<compile_context>
chip_gen: v7x
topology: tpu7x:2x2x1
jax: 0.10.0
libtpu: 0.0.40
codegen_flags: <defaults>
</compile_context>

<pallas_src>
import functools

import jax
import jax.numpy as jnp
from jax.experimental import pallas as pl
from jax.experimental.pallas import tpu as pltpu

# ----------------------------- small BERT config -----------------------------
VOCAB = 100
HIDDEN = 256                     # lane-dense stand-in for TEACHER_HIDDEN_DIM
N_LAYERS = 2
N_HEADS = 2
HEAD_DIM = HIDDEN // N_HEADS     # 128 -> head slices are 128-lane aligned
INTERMEDIATE = 4 * HIDDEN        # 1024
MAX_POS = 16
TYPE_VOCAB = 2
N_CLASSES = 2
LN_EPS = 1e-12                   # BERT default layer-norm eps


# ----------------------------- fused Pallas kernel ----------------------------
def _bert_fused_kernel(
    x_ref, mask_ref,
    emb_g_ref, emb_b_ref,
    wqkv_ref, bqkv_ref, wo_ref, bo_ref, ln1g_ref, ln1b_ref,
    wi_ref, bi_ref, wf_ref, bf_ref, ln2g_ref, ln2b_ref,
    pool_w_ref, pool_b_ref, out_w_ref, out_b_ref,
    o_ref,
    ctx_ref,                      # VMEM scratch (M, HIDDEN) for attention context
    *, batch, seq,
):
    def layernorm(y, g, b):
        mu = jnp.mean(y, axis=-1, keepdims=True)
        d = y - mu
        var = jnp.mean(d * d, axis=-1, keepdims=True)
        return d * jax.lax.rsqrt(var + LN_EPS) * g + b

    def gelu(y):
        # TODO(synk): HF BERT uses exact erf GELU; tanh approximation differs by <1e-3.
        c = jnp.float32(0.7978845608028654)  # sqrt(2/pi)
        return 0.5 * y * (1.0 + jnp.tanh(c * (y + 0.044715 * y * y * y)))

    # --- embedding LayerNorm (no zero residual streamed from HBM) ---
    x = layernorm(x_ref[...], emb_g_ref[...], emb_b_ref[...])       # (M, H)

    for l in range(N_LAYERS):
        # --- fused QKV projection: one (M,H)x(H,3H) MXU pass ---
        qkv = jnp.dot(x, wqkv_ref[l], preferred_element_type=jnp.float32) + bqkv_ref[l]
        q = qkv[:, 0 * HIDDEN:1 * HIDDEN]    # 1/sqrt(head_dim) folded into Wq at init
        k = qkv[:, 1 * HIDDEN:2 * HIDDEN]
        v = qkv[:, 2 * HIDDEN:3 * HIDDEN]

        # --- self-attention: head split via static, lane-aligned slices ---
        for b in range(batch):
            m_b = mask_ref[b]                # (1, S) additive mask over keys
            r0 = b * seq
            for h in range(N_HEADS):
                c0 = h * HEAD_DIM
                qb = q[r0:r0 + seq, c0:c0 + HEAD_DIM]
                kb = k[r0:r0 + seq, c0:c0 + HEAD_DIM]
                vb = v[r0:r0 + seq, c0:c0 + HEAD_DIM]
                s = jax.lax.dot_general(qb, kb, (((1,), (1,)), ((), ())),
                                        preferred_element_type=jnp.float32)  # (S, S)
                s = s + m_b
                s = s - jnp.max(s, axis=-1, keepdims=True)
                p = jnp.exp(s)
                p = p * pl.reciprocal(jnp.sum(p, axis=-1, keepdims=True), approx=True)
                ctx_ref[pl.ds(r0, seq), pl.ds(c0, HEAD_DIM)] = jnp.dot(
                    p, vb, preferred_element_type=jnp.float32)

        # --- attention output projection + residual + LayerNorm (fused) ---
        attn_out = (jnp.dot(ctx_ref[...], wo_ref[l],
                            preferred_element_type=jnp.float32) + bo_ref[l])
        x = layernorm(attn_out + x, ln1g_ref[l], ln1b_ref[l])

        # --- feed-forward: (wi + gelu) -> wf -> residual + LayerNorm (fused) ---
        inter = gelu(jnp.dot(x, wi_ref[l], preferred_element_type=jnp.float32) + bi_ref[l])
        ffn = jnp.dot(inter, wf_ref[l], preferred_element_type=jnp.float32) + bf_ref[l]
        x = layernorm(ffn + x, ln2g_ref[l], ln2b_ref[l])

    # --- pooler (tanh Linear on [CLS]) + classifier + softmax ---
    for b in range(batch):
        cls_b = x[b * seq:b * seq + 1, :]                              # (1, H)
        pooled = jnp.tanh(
            jnp.dot(cls_b, pool_w_ref[...], preferred_element_type=jnp.float32)
            + pool_b_ref[...])
        logits = (jnp.dot(pooled, out_w_ref[...], preferred_element_type=jnp.float32)
                  + out_b_ref[...])
        logits = logits - jnp.max(logits, axis=-1, keepdims=True)
        e = jnp.exp(logits)
        # exact division here so the softmax rows sum to 1 to tight tolerance
        o_ref[pl.ds(b, 1), :] = e / jnp.sum(e, axis=-1, keepdims=True)


def bert_teacher_pallas(x_tokens, add_mask, p):
    """x_tokens: (B*S, HIDDEN) summed embeddings (pre-LN); add_mask: (B, 1, S)."""
    M, H = x_tokens.shape
    B = add_mask.shape[0]
    S = M // B
    kernel = functools.partial(_bert_fused_kernel, batch=B, seq=S)
    return pl.pallas_call(
        kernel,
        out_shape=jax.ShapeDtypeStruct((B, N_CLASSES), jnp.float32),
        scratch_shapes=[pltpu.VMEM((M, H), jnp.float32)],
        compiler_params=pltpu.CompilerParams(vmem_limit_bytes=32 * 1024 * 1024),
    )(x_tokens, add_mask,
      p["emb_ln_g"], p["emb_ln_b"],
      p["wqkv"], p["bqkv"], p["wo"], p["bo"], p["ln1_g"], p["ln1_b"],
      p["wi"], p["bi"], p["wf"], p["bf"], p["ln2_g"], p["ln2_b"],
      p["pool_w"], p["pool_b"], p["out_w"], p["out_b"])


# ----------------------------- parameter init --------------------------------
def init_params(key):
    def nrm(k, shape, scale=0.02):
        return (scale * jax.random.normal(k, shape)).astype(jnp.float32)

    ks = jax.random.split(key, 9)
    attn_scale = 1.0 / (HEAD_DIM ** 0.5)
    wqkv = nrm(ks[3], (N_LAYERS, HIDDEN, 3 * HIDDEN))
    # Fold the 1/sqrt(head_dim) attention scale into the Q projection weights
    # (mathematically identical to scaling the scores; bq is zero here).
    wqkv = wqkv.at[:, :, :HIDDEN].multiply(attn_scale)

    return {
        "word_emb": nrm(ks[0], (VOCAB, HIDDEN)),
        "pos_emb": nrm(ks[1], (MAX_POS, HIDDEN)),
        "type_emb": nrm(ks[2], (TYPE_VOCAB, HIDDEN)),
        "emb_ln_g": jnp.ones((1, HIDDEN), jnp.float32),
        "emb_ln_b": jnp.zeros((1, HIDDEN), jnp.float32),
        "wqkv": wqkv,
        "bqkv": jnp.zeros((N_LAYERS, 1, 3 * HIDDEN), jnp.float32),
        "wo": nrm(ks[4], (N_LAYERS, HIDDEN, HIDDEN)),
        "bo": jnp.zeros((N_LAYERS, 1, HIDDEN), jnp.float32),
        "ln1_g": jnp.ones((N_LAYERS, 1, HIDDEN), jnp.float32),
        "ln1_b": jnp.zeros((N_LAYERS, 1, HIDDEN), jnp.float32),
        "wi": nrm(ks[5], (N_LAYERS, HIDDEN, INTERMEDIATE)),
        "bi": jnp.zeros((N_LAYERS, 1, INTERMEDIATE), jnp.float32),
        "wf": nrm(ks[6], (N_LAYERS, INTERMEDIATE, HIDDEN)),
        "bf": jnp.zeros((N_LAYERS, 1, HIDDEN), jnp.float32),
        "ln2_g": jnp.ones((N_LAYERS, 1, HIDDEN), jnp.float32),
        "ln2_b": jnp.zeros((N_LAYERS, 1, HIDDEN), jnp.float32),
        "pool_w": nrm(ks[7], (HIDDEN, HIDDEN)),
        "pool_b": jnp.zeros((1, HIDDEN), jnp.float32),
        "out_w": nrm(ks[8], (HIDDEN, N_CLASSES)),
        "out_b": jnp.zeros((1, N_CLASSES), jnp.float32),
    }


# ----------------------------- forward pass -----------------------------------
def teacher_forward(params, ids, mask, token_type_ids):
    B, S = ids.shape

    # embedding gathers are glue (done in plain JAX); everything after the
    # embedding sum runs inside the fused Pallas kernel.
    emb = (params["word_emb"][ids]
           + params["pos_emb"][jnp.arange(S)][None, :, :]
           + params["type_emb"][token_type_ids])
    x = emb.reshape(B * S, HIDDEN).astype(jnp.float32)

    # additive attention mask, BERT-style: (1 - mask) * -10000, shape (B, 1, S)
    add_mask = ((1.0 - mask.astype(jnp.float32)) * -10000.0).reshape(B, 1, S)

    return bert_teacher_pallas(x, add_mask, params)


# ----------------------------- main ------------------------------------------
if __name__ == "__main__":
    B, S = 2, 8
    key = jax.random.PRNGKey(0)
    k_ids, k_params = jax.random.split(key)

    ids = jax.random.randint(k_ids, (B, S), 0, VOCAB, dtype=jnp.int32)
    mask = jnp.ones((B, S), jnp.int32).at[1, 6:].set(0)        # pad last 2 tokens of batch 1
    token_type_ids = jnp.zeros((B, S), jnp.int32).at[:, 4:].set(1)

    params = init_params(k_params)

    probs = teacher_forward(params, ids, mask, token_type_ids)
    probs = jax.block_until_ready(probs)

    assert probs.shape == (B, N_CLASSES)
    # rows of a softmax must sum to 1
    assert bool(jnp.allclose(jnp.sum(probs, axis=-1), 1.0, atol=1e-5))
    assert bool(jnp.all(jnp.isfinite(probs)))
    print("KERNEL_OK")
</pallas_src>

<mosaic_0001>
module attributes {stable_mosaic.version = 11 : i64} {
  func.func @_bert_fused_kernel(%arg0: memref<16x256xf32, #tpu.memory_space<vmem>>, %arg1: memref<2x1x8xf32, #tpu.memory_space<vmem>>, %arg2: memref<1x256xf32, #tpu.memory_space<vmem>>, %arg3: memref<1x256xf32, #tpu.memory_space<vmem>>, %arg4: memref<2x256x768xf32, #tpu.memory_space<vmem>>, %arg5: memref<2x1x768xf32, #tpu.memory_space<vmem>>, %arg6: memref<2x256x256xf32, #tpu.memory_space<vmem>>, %arg7: memref<2x1x256xf32, #tpu.memory_space<vmem>>, %arg8: memref<2x1x256xf32, #tpu.memory_space<vmem>>, %arg9: memref<2x1x256xf32, #tpu.memory_space<vmem>>, %arg10: memref<2x256x1024xf32, #tpu.memory_space<vmem>>, %arg11: memref<2x1x1024xf32, #tpu.memory_space<vmem>>, %arg12: memref<2x1024x256xf32, #tpu.memory_space<vmem>>, %arg13: memref<2x1x256xf32, #tpu.memory_space<vmem>>, %arg14: memref<2x1x256xf32, #tpu.memory_space<vmem>>, %arg15: memref<2x1x256xf32, #tpu.memory_space<vmem>>, %arg16: memref<256x256xf32, #tpu.memory_space<vmem>>, %arg17: memref<1x256xf32, #tpu.memory_space<vmem>>, %arg18: memref<256x2xf32, #tpu.memory_space<vmem>>, %arg19: memref<1x2xf32, #tpu.memory_space<vmem>>, %arg20: memref<2x2xf32, #tpu.memory_space<vmem>>, %arg21: memref<16x256xf32, #tpu.memory_space<vmem>>) attributes {dimension_semantics = [], scalar_prefetch = 0 : i64, scratch_operands = 1 : i64, tpu.core_type = #tpu.core_type<tc>} {
    %c0 = arith.constant 0 : index
    %c0_0 = arith.constant 0 : index
    %0 = vector.load %arg0[%c0, %c0_0] : memref<16x256xf32, #tpu.memory_space<vmem>>, vector<16x256xf32>
    %c0_1 = arith.constant 0 : index
    %c0_2 = arith.constant 0 : index
    %1 = vector.load %arg2[%c0_1, %c0_2] : memref<1x256xf32, #tpu.memory_space<vmem>>, vector<1x256xf32>
    %c0_3 = arith.constant 0 : index
    %c0_4 = arith.constant 0 : index
    %2 = vector.load %arg3[%c0_3, %c0_4] : memref<1x256xf32, #tpu.memory_space<vmem>>, vector<1x256xf32>
    %cst = arith.constant dense<0.000000e+00> : vector<16xf32>
    %3 = vector.multi_reduction <add>, %0, %cst [1] : vector<16x256xf32> to vector<16xf32>
    %4 = vector.shape_cast %3 : vector<16xf32> to vector<16x1xf32>
    %cst_5 = arith.constant 2.560000e+02 : f32
    %5 = vector.broadcast %cst_5 : f32 to vector<16x1xf32>
    %6 = arith.divf %4, %5 : vector<16x1xf32>
    %7 = vector.broadcast %6 : vector<16x1xf32> to vector<16x256xf32>
    %8 = arith.subf %0, %7 : vector<16x256xf32>
    %9 = arith.mulf %8, %8 : vector<16x256xf32>
    %cst_6 = arith.constant dense<0.000000e+00> : vector<16xf32>
    %10 = vector.multi_reduction <add>, %9, %cst_6 [1] : vector<16x256xf32> to vector<16xf32>
    %11 = vector.shape_cast %10 : vector<16xf32> to vector<16x1xf32>
    %cst_7 = arith.constant 2.560000e+02 : f32
    %12 = vector.broadcast %cst_7 : f32 to vector<16x1xf32>
    %13 = arith.divf %11, %12 : vector<16x1xf32>
    %cst_8 = arith.constant 9.99999996E-13 : f32
    %14 = vector.broadcast %cst_8 : f32 to vector<16x1xf32>
    %15 = arith.addf %13, %14 : vector<16x1xf32>
    %16 = math.rsqrt %15 : vector<16x1xf32>
    %17 = vector.broadcast %16 : vector<16x1xf32> to vector<16x256xf32>
    %18 = arith.mulf %8, %17 : vector<16x256xf32>
    %19 = vector.broadcast %1 : vector<1x256xf32> to vector<16x256xf32>
    %20 = arith.mulf %18, %19 : vector<16x256xf32>
    %21 = vector.broadcast %2 : vector<1x256xf32> to vector<16x256xf32>
    %22 = arith.addf %20, %21 : vector<16x256xf32>
    %c0_9 = arith.constant 0 : index
    %c0_10 = arith.constant 0 : index
    %c0_11 = arith.constant 0 : index
    %23 = vector.load %arg4[%c0_9, %c0_10, %c0_11] : memref<2x256x768xf32, #tpu.memory_space<vmem>>, vector<1x256x768xf32>
    %24 = vector.shape_cast %23 : vector<1x256x768xf32> to vector<256x768xf32>
    %cst_12 = arith.constant dense<0.000000e+00> : vector<16x768xf32>
    %25 = tpu.matmul %22, %24, %cst_12 {dimension_numbers = #tpu.dot_dimension_numbers<[1], [0], [0], [1], [0, 0, 1, 1], [], []>} : vector<16x256xf32>, vector<256x768xf32>, vector<16x768xf32> -> vector<16x768xf32>
    %c0_13 = arith.constant 0 : index
    %c0_14 = arith.constant 0 : index
    %c0_15 = arith.constant 0 : index
    %26 = vector.load %arg5[%c0_13, %c0_14, %c0_15] : memref<2x1x768xf32, #tpu.memory_space<vmem>>, vector<1x1x768xf32>
    %27 = vector.shape_cast %26 : vector<1x1x768xf32> to vector<1x768xf32>
    %28 = vector.broadcast %27 : vector<1x768xf32> to vector<16x768xf32>
    %29 = arith.addf %25, %28 : vector<16x768xf32>
    %30 = vector.extract_strided_slice %29 {offsets = [0, 0], sizes = [16, 256], strides = [1, 1]} : vector<16x768xf32> to vector<16x256xf32>
    %31 = vector.extract_strided_slice %29 {offsets = [0, 256], sizes = [16, 256], strides = [1, 1]} : vector<16x768xf32> to vector<16x256xf32>
    %32 = vector.extract_strided_slice %29 {offsets = [0, 512], sizes = [16, 256], strides = [1, 1]} : vector<16x768xf32> to vector<16x256xf32>
    %c0_16 = arith.constant 0 : index
    %c0_17 = arith.constant 0 : index
    %c0_18 = arith.constant 0 : index
    %33 = vector.load %arg1[%c0_16, %c0_17, %c0_18] : memref<2x1x8xf32, #tpu.memory_space<vmem>>, vector<1x1x8xf32>
    %34 = vector.shape_cast %33 : vector<1x1x8xf32> to vector<1x8xf32>
    %35 = vector.extract_strided_slice %30 {offsets = [0, 0], sizes = [8, 128], strides = [1, 1]} : vector<16x256xf32> to vector<8x128xf32>
    %36 = vector.extract_strided_slice %31 {offsets = [0, 0], sizes = [8, 128], strides = [1, 1]} : vector<16x256xf32> to vector<8x128xf32>
    %37 = vector.extract_strided_slice %32 {offsets = [0, 0], sizes = [8, 128], strides = [1, 1]} : vector<16x256xf32> to vector<8x128xf32>
    %cst_19 = arith.constant dense<0.000000e+00> : vector<8x8xf32>
    %38 = tpu.matmul %35, %36, %cst_19 {dimension_numbers = #tpu.dot_dimension_numbers<[1], [1], [0], [0], [0, 0, 1, 0], [], []>} : vector<8x128xf32>, vector<8x128xf32>, vector<8x8xf32> -> vector<8x8xf32>
    %39 = vector.broadcast %34 : vector<1x8xf32> to vector<8x8xf32>
    %40 = arith.addf %38, %39 : vector<8x8xf32>
    %cst_20 = arith.constant dense<0xFF800000> : vector<8xf32>
    %41 = vector.multi_reduction <maximumf>, %40, %cst_20 [1] : vector<8x8xf32> to vector<8xf32>
    %42 = vector.shape_cast %41 : vector<8xf32> to vector<8x1xf32>
    %43 = vector.broadcast %42 : vector<8x1xf32> to vector<8x8xf32>
    %44 = arith.subf %40, %43 : vector<8x8xf32>
    %45 = math.exp %44 : vector<8x8xf32>
    %cst_21 = arith.constant dense<0.000000e+00> : vector<8xf32>
    %46 = vector.multi_reduction <add>, %45, %cst_21 [1] : vector<8x8xf32> to vector<8xf32>
    %47 = vector.shape_cast %46 : vector<8xf32> to vector<8x1xf32>
    %48 = tpu.reciprocal %47 {approx = true} : vector<8x1xf32> -> vector<8x1xf32>
    %49 = vector.broadcast %48 : vector<8x1xf32> to vector<8x8xf32>
    %50 = arith.mulf %45, %49 : vector<8x8xf32>
    %cst_22 = arith.constant dense<0.000000e+00> : vector<8x128xf32>
    %51 = tpu.matmul %50, %37, %cst_22 {dimension_numbers = #tpu.dot_dimension_numbers<[1], [0], [0], [1], [0, 0, 1, 1], [], []>} : vector<8x8xf32>, vector<8x128xf32>, vector<8x128xf32> -> vector<8x128xf32>
    %c0_23 = arith.constant 0 : index
    %c0_24 = arith.constant 0 : index
    %52 = vector.load %arg21[%c0_23, %c0_24] : memref<16x256xf32, #tpu.memory_space<vmem>>, vector<8x128xf32>
    tpu.vector_store %arg21[%c0_23, %c0_24], %51 {strides = array<i32>} : memref<16x256xf32, #tpu.memory_space<vmem>>, vector<8x128xf32>,
    %53 = vector.extract_strided_slice %30 {offsets = [0, 128], sizes = [8, 128], strides = [1, 1]} : vector<16x256xf32> to vector<8x128xf32>
    %54 = vector.extract_strided_slice %31 {offsets = [0, 128], sizes = [8, 128], strides = [1, 1]} : vector<16x256xf32> to vector<8x128xf32>
    %55 = vector.extract_strided_slice %32 {offsets = [0, 128], sizes = [8, 128], strides = [1, 1]} : vector<16x256xf32> to vector<8x128xf32>
    %cst_25 = arith.constant dense<0.000000e+00> : vector<8x8xf32>
    %56 = tpu.matmul %53, %54, %cst_25 {dimension_numbers = #tpu.dot_dimension_numbers<[1], [1], [0], [0], [0, 0, 1, 0], [], []>} : vector<8x128xf32>, vector<8x128xf32>, vector<8x8xf32> -> vector<8x8xf32>
    %57 = vector.broadcast %34 : vector<1x8xf32> to vector<8x8xf32>
    %58 = arith.addf %56, %57 : vector<8x8xf32>
    %cst_26 = arith.constant dense<0xFF800000> : vector<8xf32>
    %59 = vector.multi_reduction <maximumf>, %58, %cst_26 [1] : vector<8x8xf32> to vector<8xf32>
    %60 = vector.shape_cast %59 : vector<8xf32> to vector<8x1xf32>
    %61 = vector.broadcast %60 : vector<8x1xf32> to vector<8x8xf32>
    %62 = arith.subf %58, %61 : vector<8x8xf32>
    %63 = math.exp %62 : vector<8x8xf32>
    %cst_27 = arith.constant dense<0.000000e+00> : vector<8xf32>
    %64 = vector.multi_reduction <add>, %63, %cst_27 [1] : vector<8x8xf32> to vector<8xf32>
    %65 = vector.shape_cast %64 : vector<8xf32> to vector<8x1xf32>
    %66 = tpu.reciprocal %65 {approx = true} : vector<8x1xf32> -> vector<8x1xf32>
    %67 = vector.broadcast %66 : vector<8x1xf32> to vector<8x8xf32>
    %68 = arith.mulf %63, %67 : vector<8x8xf32>
    %cst_28 = arith.constant dense<0.000000e+00> : vector<8x128xf32>
    %69 = tpu.matmul %68, %55, %cst_28 {dimension_numbers = #tpu.dot_dimension_numbers<[1], [0], [0], [1], [0, 0, 1, 1], [], []>} : vector<8x8xf32>, vector<8x128xf32>, vector<8x128xf32> -> vector<8x128xf32>
    %c0_29 = arith.constant 0 : index
    %c128 = arith.constant 128 : index
    %70 = vector.load %arg21[%c0_29, %c128] : memref<16x256xf32, #tpu.memory_space<vmem>>, vector<8x128xf32>
    tpu.vector_store %arg21[%c0_29, %c128], %69 {strides = array<i32>} : memref<16x256xf32, #tpu.memory_space<vmem>>, vector<8x128xf32>,
    %c1 = arith.constant 1 : index
    %c0_30 = arith.constant 0 : index
    %c0_31 = arith.constant 0 : index
    %71 = vector.load %arg1[%c1, %c0_30, %c0_31] : memref<2x1x8xf32, #tpu.memory_space<vmem>>, vector<1x1x8xf32>
    %72 = vector.shape_cast %71 : vector<1x1x8xf32> to vector<1x8xf32>
    %73 = vector.extract_strided_slice %30 {offsets = [8, 0], sizes = [8, 128], strides = [1, 1]} : vector<16x256xf32> to vector<8x128xf32>
    %74 = vector.extract_strided_slice %31 {offsets = [8, 0], sizes = [8, 128], strides = [1, 1]} : vector<16x256xf32> to vector<8x128xf32>
    %75 = vector.extract_strided_slice %32 {offsets = [8, 0], sizes = [8, 128], strides = [1, 1]} : vector<16x256xf32> to vector<8x128xf32>
    %cst_32 = arith.constant dense<0.000000e+00> : vector<8x8xf32>
    %76 = tpu.matmul %73, %74, %cst_32 {dimension_numbers = #tpu.dot_dimension_numbers<[1], [1], [0], [0], [0, 0, 1, 0], [], []>} : vector<8x128xf32>, vector<8x128xf32>, vector<8x8xf32> -> vector<8x8xf32>
    %77 = vector.broadcast %72 : vector<1x8xf32> to vector<8x8xf32>
    %78 = arith.addf %76, %77 : vector<8x8xf32>
    %cst_33 = arith.constant dense<0xFF800000> : vector<8xf32>
    %79 = vector.multi_reduction <maximumf>, %78, %cst_33 [1] : vector<8x8xf32> to vector<8xf32>
    %80 = vector.shape_cast %79 : vector<8xf32> to vector<8x1xf32>
    %81 = vector.broadcast %80 : vector<8x1xf32> to vector<8x8xf32>
    %82 = arith.subf %78, %81 : vector<8x8xf32>
    %83 = math.exp %82 : vector<8x8xf32>
    %cst_34 = arith.constant dense<0.000000e+00> : vector<8xf32>
    %84 = vector.multi_reduction <add>, %83, %cst_34 [1] : vector<8x8xf32> to vector<8xf32>
    %85 = vector.shape_cast %84 : vector<8xf32> to vector<8x1xf32>
    %86 = tpu.reciprocal %85 {approx = true} : vector<8x1xf32> -> vector<8x1xf32>
    %87 = vector.broadcast %86 : vector<8x1xf32> to vector<8x8xf32>
    %88 = arith.mulf %83, %87 : vector<8x8xf32>
    %cst_35 = arith.constant dense<0.000000e+00> : vector<8x128xf32>
    %89 = tpu.matmul %88, %75, %cst_35 {dimension_numbers = #tpu.dot_dimension_numbers<[1], [0], [0], [1], [0, 0, 1, 1], [], []>} : vector<8x8xf32>, vector<8x128xf32>, vector<8x128xf32> -> vector<8x128xf32>
    %c8 = arith.constant 8 : index
    %c0_36 = arith.constant 0 : index
    %90 = vector.load %arg21[%c8, %c0_36] : memref<16x256xf32, #tpu.memory_space<vmem>>, vector<8x128xf32>
    tpu.vector_store %arg21[%c8, %c0_36], %89 {strides = array<i32>} : memref<16x256xf32, #tpu.memory_space<vmem>>, vector<8x128xf32>,
    %91 = vector.extract_strided_slice %30 {offsets = [8, 128], sizes = [8, 128], strides = [1, 1]} : vector<16x256xf32> to vector<8x128xf32>
    %92 = vector.extract_strided_slice %31 {offsets = [8, 128], sizes = [8, 128], strides = [1, 1]} : vector<16x256xf32> to vector<8x128xf32>
    %93 = vector.extract_strided_slice %32 {offsets = [8, 128], sizes = [8, 128], strides = [1, 1]} : vector<16x256xf32> to vector<8x128xf32>
    %cst_37 = arith.constant dense<0.000000e+00> : vector<8x8xf32>
    %94 = tpu.matmul %91, %92, %cst_37 {dimension_numbers = #tpu.dot_dimension_numbers<[1], [1], [0], [0], [0, 0, 1, 0], [], []>} : vector<8x128xf32>, vector<8x128xf32>, vector<8x8xf32> -> vector<8x8xf32>
    %95 = vector.broadcast %72 : vector<1x8xf32> to vector<8x8xf32>
    %96 = arith.addf %94, %95 : vector<8x8xf32>
    %cst_38 = arith.constant dense<0xFF800000> : vector<8xf32>
    %97 = vector.multi_reduction <maximumf>, %96, %cst_38 [1] : vector<8x8xf32> to vector<8xf32>
    %98 = vector.shape_cast %97 : vector<8xf32> to vector<8x1xf32>
    %99 = vector.broadcast %98 : vector<8x1xf32> to vector<8x8xf32>
    %100 = arith.subf %96, %99 : vector<8x8xf32>
    %101 = math.exp %100 : vector<8x8xf32>
    %cst_39 = arith.constant dense<0.000000e+00> : vector<8xf32>
    %102 = vector.multi_reduction <add>, %101, %cst_39 [1] : vector<8x8xf32> to vector<8xf32>
    %103 = vector.shape_cast %102 : vector<8xf32> to vector<8x1xf32>
    %104 = tpu.reciprocal %103 {approx = true} : vector<8x1xf32> -> vector<8x1xf32>
    %105 = vector.broadcast %104 : vector<8x1xf32> to vector<8x8xf32>
    %106 = arith.mulf %101, %105 : vector<8x8xf32>
    %cst_40 = arith.constant dense<0.000000e+00> : vector<8x128xf32>
    %107 = tpu.matmul %106, %93, %cst_40 {dimension_numbers = #tpu.dot_dimension_numbers<[1], [0], [0], [1], [0, 0, 1, 1], [], []>} : vector<8x8xf32>, vector<8x128xf32>, vector<8x128xf32> -> vector<8x128xf32>
    %c8_41 = arith.constant 8 : index
    %c128_42 = arith.constant 128 : index
    %108 = vector.load %arg21[%c8_41, %c128_42] : memref<16x256xf32, #tpu.memory_space<vmem>>, vector<8x128xf32>
    tpu.vector_store %arg21[%c8_41, %c128_42], %107 {strides = array<i32>} : memref<16x256xf32, #tpu.memory_space<vmem>>, vector<8x128xf32>,
    %c0_43 = arith.constant 0 : index
    %c0_44 = arith.constant 0 : index
    %109 = vector.load %arg21[%c0_43, %c0_44] : memref<16x256xf32, #tpu.memory_space<vmem>>, vector<16x256xf32>
    %c0_45 = arith.constant 0 : index
    %c0_46 = arith.constant 0 : index
    %c0_47 = arith.constant 0 : index
    %110 = vector.load %arg6[%c0_45, %c0_46, %c0_47] : memref<2x256x256xf32, #tpu.memory_space<vmem>>, vector<1x256x256xf32>
    %111 = vector.shape_cast %110 : vector<1x256x256xf32> to vector<256x256xf32>
    %cst_48 = arith.constant dense<0.000000e+00> : vector<16x256xf32>
    %112 = tpu.matmul %109, %111, %cst_48 {dimension_numbers = #tpu.dot_dimension_numbers<[1], [0], [0], [1], [0, 0, 1, 1], [], []>} : vector<16x256xf32>, vector<256x256xf32>, vector<16x256xf32> -> vector<16x256xf32>
    %c0_49 = arith.constant 0 : index
    %c0_50 = arith.constant 0 : index
    %c0_51 = arith.constant 0 : index
    %113 = vector.load %arg7[%c0_49, %c0_50, %c0_51] : memref<2x1x256xf32, #tpu.memory_space<vmem>>, vector<1x1x256xf32>
    %114 = vector.shape_cast %113 : vector<1x1x256xf32> to vector<1x256xf32>
    %115 = vector.broadcast %114 : vector<1x256xf32> to vector<16x256xf32>
    %116 = arith.addf %112, %115 : vector<16x256xf32>
    %117 = arith.addf %116, %22 : vector<16x256xf32>
    %c0_52 = arith.constant 0 : index
    %c0_53 = arith.constant 0 : index
    %c0_54 = arith.constant 0 : index
    %118 = vector.load %arg8[%c0_52, %c0_53, %c0_54] : memref<2x1x256xf32, #tpu.memory_space<vmem>>, vector<1x1x256xf32>
    %119 = vector.shape_cast %118 : vector<1x1x256xf32> to vector<1x256xf32>
    %c0_55 = arith.constant 0 : index
    %c0_56 = arith.constant 0 : index
    %c0_57 = arith.constant 0 : index
    %120 = vector.load %arg9[%c0_55, %c0_56, %c0_57] : memref<2x1x256xf32, #tpu.memory_space<vmem>>, vector<1x1x256xf32>
    %121 = vector.shape_cast %120 : vector<1x1x256xf32> to vector<1x256xf32>
    %cst_58 = arith.constant dense<0.000000e+00> : vector<16xf32>
    %122 = vector.multi_reduction <add>, %117, %cst_58 [1] : vector<16x256xf32> to vector<16xf32>
    %123 = vector.shape_cast %122 : vector<16xf32> to vector<16x1xf32>
    %cst_59 = arith.constant 2.560000e+02 : f32
    %124 = vector.broadcast %cst_59 : f32 to vector<16x1xf32>
    %125 = arith.divf %123, %124 : vector<16x1xf32>
    %126 = vector.broadcast %125 : vector<16x1xf32> to vector<16x256xf32>
    %127 = arith.subf %117, %126 : vector<16x256xf32>
    %128 = arith.mulf %127, %127 : vector<16x256xf32>
    %cst_60 = arith.constant dense<0.000000e+00> : vector<16xf32>
    %129 = vector.multi_reduction <add>, %128, %cst_60 [1] : vector<16x256xf32> to vector<16xf32>
    %130 = vector.shape_cast %129 : vector<16xf32> to vector<16x1xf32>
    %cst_61 = arith.constant 2.560000e+02 : f32
    %131 = vector.broadcast %cst_61 : f32 to vector<16x1xf32>
    %132 = arith.divf %130, %131 : vector<16x1xf32>
    %cst_62 = arith.constant 9.99999996E-13 : f32
    %133 = vector.broadcast %cst_62 : f32 to vector<16x1xf32>
    %134 = arith.addf %132, %133 : vector<16x1xf32>
    %135 = math.rsqrt %134 : vector<16x1xf32>
    %136 = vector.broadcast %135 : vector<16x1xf32> to vector<16x256xf32>
    %137 = arith.mulf %127, %136 : vector<16x256xf32>
    %138 = vector.broadcast %119 : vector<1x256xf32> to vector<16x256xf32>
    %139 = arith.mulf %137, %138 : vector<16x256xf32>
    %140 = vector.broadcast %121 : vector<1x256xf32> to vector<16x256xf32>
    %141 = arith.addf %139, %140 : vector<16x256xf32>
    %c0_63 = arith.constant 0 : index
    %c0_64 = arith.constant 0 : index
    %c0_65 = arith.constant 0 : index
    %142 = vector.load %arg10[%c0_63, %c0_64, %c0_65] : memref<2x256x1024xf32, #tpu.memory_space<vmem>>, vector<1x256x1024xf32>
    %143 = vector.shape_cast %142 : vector<1x256x1024xf32> to vector<256x1024xf32>
    %cst_66 = arith.constant dense<0.000000e+00> : vector<16x1024xf32>
    %144 = tpu.matmul %141, %143, %cst_66 {dimension_numbers = #tpu.dot_dimension_numbers<[1], [0], [0], [1], [0, 0, 1, 1], [], []>} : vector<16x256xf32>, vector<256x1024xf32>, vector<16x1024xf32> -> vector<16x1024xf32>
    %c0_67 = arith.constant 0 : index
    %c0_68 = arith.constant 0 : index
    %c0_69 = arith.constant 0 : index
    %145 = vector.load %arg11[%c0_67, %c0_68, %c0_69] : memref<2x1x1024xf32, #tpu.memory_space<vmem>>, vector<1x1x1024xf32>
    %146 = vector.shape_cast %145 : vector<1x1x1024xf32> to vector<1x1024xf32>
    %147 = vector.broadcast %146 : vector<1x1024xf32> to vector<16x1024xf32>
    %148 = arith.addf %144, %147 : vector<16x1024xf32>
    %cst_70 = arith.constant 5.000000e-01 : f32
    %149 = vector.broadcast %cst_70 : f32 to vector<16x1024xf32>
    %150 = arith.mulf %149, %148 : vector<16x1024xf32>
    %cst_71 = arith.constant 4.471500e-02 : f32
    %151 = vector.broadcast %cst_71 : f32 to vector<16x1024xf32>
    %152 = arith.mulf %151, %148 : vector<16x1024xf32>
    %153 = arith.mulf %152, %148 : vector<16x1024xf32>
    %154 = arith.mulf %153, %148 : vector<16x1024xf32>
    %155 = arith.addf %148, %154 : vector<16x1024xf32>
    %cst_72 = arith.constant 0.797884583 : f32
    %156 = vector.broadcast %cst_72 : f32 to vector<16x1024xf32>
    %157 = arith.mulf %156, %155 : vector<16x1024xf32>
    %158 = math.tanh %157 : vector<16x1024xf32>
    %cst_73 = arith.constant 1.000000e+00 : f32
    %159 = vector.broadcast %cst_73 : f32 to vector<16x1024xf32>
    %160 = arith.addf %159, %158 : vector<16x1024xf32>
    %161 = arith.mulf %150, %160 : vector<16x1024xf32>
    %c0_74 = arith.constant 0 : index
    %c0_75 = arith.constant 0 : index
    %c0_76 = arith.constant 0 : index
    %162 = vector.load %arg12[%c0_74, %c0_75, %c0_76] : memref<2x1024x256xf32, #tpu.memory_space<vmem>>, vector<1x1024x256xf32>
    %163 = vector.shape_cast %162 : vector<1x1024x256xf32> to vector<1024x256xf32>
    %cst_77 = arith.constant dense<0.000000e+00> : vector<16x256xf32>
    %164 = tpu.matmul %161, %163, %cst_77 {dimension_numbers = #tpu.dot_dimension_numbers<[1], [0], [0], [1], [0, 0, 1, 1], [], []>} : vector<16x1024xf32>, vector<1024x256xf32>, vector<16x256xf32> -> vector<16x256xf32>
    %c0_78 = arith.constant 0 : index
    %c0_79 = arith.constant 0 : index
    %c0_80 = arith.constant 0 : index
    %165 = vector.load %arg13[%c0_78, %c0_79, %c0_80] : memref<2x1x256xf32, #tpu.memory_space<vmem>>, vector<1x1x256xf32>
    %166 = vector.shape_cast %165 : vector<1x1x256xf32> to vector<1x256xf32>
    %167 = vector.broadcast %166 : vector<1x256xf32> to vector<16x256xf32>
    %168 = arith.addf %164, %167 : vector<16x256xf32>
    %169 = arith.addf %168, %141 : vector<16x256xf32>
    %c0_81 = arith.constant 0 : index
    %c0_82 = arith.constant 0 : index
    %c0_83 = arith.constant 0 : index
    %170 = vector.load %arg14[%c0_81, %c0_82, %c0_83] : memref<2x1x256xf32, #tpu.memory_space<vmem>>, vector<1x1x256xf32>
    %171 = vector.shape_cast %170 : vector<1x1x256xf32> to vector<1x256xf32>
    %c0_84 = arith.constant 0 : index
    %c0_85 = arith.constant 0 : index
    %c0_86 = arith.constant 0 : index
    %172 = vector.load %arg15[%c0_84, %c0_85, %c0_86] : memref<2x1x256xf32, #tpu.memory_space<vmem>>, vector<1x1x256xf32>
    %173 = vector.shape_cast %172 : vector<1x1x256xf32> to vector<1x256xf32>
    %cst_87 = arith.constant dense<0.000000e+00> : vector<16xf32>
    %174 = vector.multi_reduction <add>, %169, %cst_87 [1] : vector<16x256xf32> to vector<16xf32>
    %175 = vector.shape_cast %174 : vector<16xf32> to vector<16x1xf32>
    %cst_88 = arith.constant 2.560000e+02 : f32
    %176 = vector.broadcast %cst_88 : f32 to vector<16x1xf32>
    %177 = arith.divf %175, %176 : vector<16x1xf32>
    %178 = vector.broadcast %177 : vector<16x1xf32> to vector<16x256xf32>
    %179 = arith.subf %169, %178 : vector<16x256xf32>
    %180 = arith.mulf %179, %179 : vector<16x256xf32>
    %cst_89 = arith.constant dense<0.000000e+00> : vector<16xf32>
    %181 = vector.multi_reduction <add>, %180, %cst_89 [1] : vector<16x256xf32> to vector<16xf32>
    %182 = vector.shape_cast %181 : vector<16xf32> to vector<16x1xf32>
    %cst_90 = arith.constant 2.560000e+02 : f32
    %183 = vector.broadcast %cst_90 : f32 to vector<16x1xf32>
    %184 = arith.divf %182, %183 : vector<16x1xf32>
    %cst_91 = arith.constant 9.99999996E-13 : f32
    %185 = vector.broadcast %cst_91 : f32 to vector<16x1xf32>
    %186 = arith.addf %184, %185 : vector<16x1xf32>
    %187 = math.rsqrt %186 : vector<16x1xf32>
    %188 = vector.broadcast %187 : vector<16x1xf32> to vector<16x256xf32>
    %189 = arith.mulf %179, %188 : vector<16x256xf32>
    %190 = vector.broadcast %171 : vector<1x256xf32> to vector<16x256xf32>
    %191 = arith.mulf %189, %190 : vector<16x256xf32>
    %192 = vector.broadcast %173 : vector<1x256xf32> to vector<16x256xf32>
    %193 = arith.addf %191, %192 : vector<16x256xf32>
    %c1_92 = arith.constant 1 : index
    %c0_93 = arith.constant 0 : index
    %c0_94 = arith.constant 0 : index
    %194 = vector.load %arg4[%c1_92, %c0_93, %c0_94] : memref<2x256x768xf32, #tpu.memory_space<vmem>>, vector<1x256x768xf32>
    %195 = vector.shape_cast %194 : vector<1x256x768xf32> to vector<256x768xf32>
    %cst_95 = arith.constant dense<0.000000e+00> : vector<16x768xf32>
    %196 = tpu.matmul %193, %195, %cst_95 {dimension_numbers = #tpu.dot_dimension_numbers<[1], [0], [0], [1], [0, 0, 1, 1], [], []>} : vector<16x256xf32>, vector<256x768xf32>, vector<16x768xf32> -> vector<16x768xf32>
    %c1_96 = arith.constant 1 : index
    %c0_97 = arith.constant 0 : index
    %c0_98 = arith.constant 0 : index
    %197 = vector.load %arg5[%c1_96, %c0_97, %c0_98] : memref<2x1x768xf32, #tpu.memory_space<vmem>>, vector<1x1x768xf32>
    %198 = vector.shape_cast %197 : vector<1x1x768xf32> to vector<1x768xf32>
    %199 = vector.broadcast %198 : vector<1x768xf32> to vector<16x768xf32>
    %200 = arith.addf %196, %199 : vector<16x768xf32>
    %201 = vector.extract_strided_slice %200 {offsets = [0, 0], sizes = [16, 256], strides = [1, 1]} : vector<16x768xf32> to vector<16x256xf32>
    %202 = vector.extract_strided_slice %200 {offsets = [0, 256], sizes = [16, 256], strides = [1, 1]} : vector<16x768xf32> to vector<16x256xf32>
    %203 = vector.extract_strided_slice %200 {offsets = [0, 512], sizes = [16, 256], strides = [1, 1]} : vector<16x768xf32> to vector<16x256xf32>
    %c0_99 = arith.constant 0 : index
    %c0_100 = arith.constant 0 : index
    %c0_101 = arith.constant 0 : index
    %204 = vector.load %arg1[%c0_99, %c0_100, %c0_101] : memref<2x1x8xf32, #tpu.memory_space<vmem>>, vector<1x1x8xf32>
    %205 = vector.shape_cast %204 : vector<1x1x8xf32> to vector<1x8xf32>
    %206 = vector.extract_strided_slice %201 {offsets = [0, 0], sizes = [8, 128], strides = [1, 1]} : vector<16x256xf32> to vector<8x128xf32>
    %207 = vector.extract_strided_slice %202 {offsets = [0, 0], sizes = [8, 128], strides = [1, 1]} : vector<16x256xf32> to vector<8x128xf32>
    %208 = vector.extract_strided_slice %203 {offsets = [0, 0], sizes = [8, 128], strides = [1, 1]} : vector<16x256xf32> to vector<8x128xf32>
    %cst_102 = arith.constant dense<0.000000e+00> : vector<8x8xf32>
    %209 = tpu.matmul %206, %207, %cst_102 {dimension_numbers = #tpu.dot_dimension_numbers<[1], [1], [0], [0], [0, 0, 1, 0], [], []>} : vector<8x128xf32>, vector<8x128xf32>, vector<8x8xf32> -> vector<8x8xf32>
    %210 = vector.broadcast %205 : vector<1x8xf32> to vector<8x8xf32>
    %211 = arith.addf %209, %210 : vector<8x8xf32>
    %cst_103 = arith.constant dense<0xFF800000> : vector<8xf32>
    %212 = vector.multi_reduction <maximumf>, %211, %cst_103 [1] : vector<8x8xf32> to vector<8xf32>
    %213 = vector.shape_cast %212 : vector<8xf32> to vector<8x1xf32>
    %214 = vector.broadcast %213 : vector<8x1xf32> to vector<8x8xf32>
    %215 = arith.subf %211, %214 : vector<8x8xf32>
    %216 = math.exp %215 : vector<8x8xf32>
    %cst_104 = arith.constant dense<0.000000e+00> : vector<8xf32>
    %217 = vector.multi_reduction <add>, %216, %cst_104 [1] : vector<8x8xf32> to vector<8xf32>
    %218 = vector.shape_cast %217 : vector<8xf32> to vector<8x1xf32>
    %219 = tpu.reciprocal %218 {approx = true} : vector<8x1xf32> -> vector<8x1xf32>
    %220 = vector.broadcast %219 : vector<8x1xf32> to vector<8x8xf32>
    %221 = arith.mulf %216, %220 : vector<8x8xf32>
    %cst_105 = arith.constant dense<0.000000e+00> : vector<8x128xf32>
    %222 = tpu.matmul %221, %208, %cst_105 {dimension_numbers = #tpu.dot_dimension_numbers<[1], [0], [0], [1], [0, 0, 1, 1], [], []>} : vector<8x8xf32>, vector<8x128xf32>, vector<8x128xf32> -> vector<8x128xf32>
    %c0_106 = arith.constant 0 : index
    %c0_107 = arith.constant 0 : index
    %223 = vector.load %arg21[%c0_106, %c0_107] : memref<16x256xf32, #tpu.memory_space<vmem>>, vector<8x128xf32>
    tpu.vector_store %arg21[%c0_106, %c0_107], %222 {strides = array<i32>} : memref<16x256xf32, #tpu.memory_space<vmem>>, vector<8x128xf32>,
    %224 = vector.extract_strided_slice %201 {offsets = [0, 128], sizes = [8, 128], strides = [1, 1]} : vector<16x256xf32> to vector<8x128xf32>
    %225 = vector.extract_strided_slice %202 {offsets = [0, 128], sizes = [8, 128], strides = [1, 1]} : vector<16x256xf32> to vector<8x128xf32>
    %226 = vector.extract_strided_slice %203 {offsets = [0, 128], sizes = [8, 128], strides = [1, 1]} : vector<16x256xf32> to vector<8x128xf32>
    %cst_108 = arith.constant dense<0.000000e+00> : vector<8x8xf32>
    %227 = tpu.matmul %224, %225, %cst_108 {dimension_numbers = #tpu.dot_dimension_numbers<[1], [1], [0], [0], [0, 0, 1, 0], [], []>} : vector<8x128xf32>, vector<8x128xf32>, vector<8x8xf32> -> vector<8x8xf32>
    %228 = vector.broadcast %205 : vector<1x8xf32> to vector<8x8xf32>
    %229 = arith.addf %227, %228 : vector<8x8xf32>
    %cst_109 = arith.constant dense<0xFF800000> : vector<8xf32>
    %230 = vector.multi_reduction <maximumf>, %229, %cst_109 [1] : vector<8x8xf32> to vector<8xf32>
    %231 = vector.shape_cast %230 : vector<8xf32> to vector<8x1xf32>
    %232 = vector.broadcast %231 : vector<8x1xf32> to vector<8x8xf32>
    %233 = arith.subf %229, %232 : vector<8x8xf32>
    %234 = math.exp %233 : vector<8x8xf32>
    %cst_110 = arith.constant dense<0.000000e+00> : vector<8xf32>
    %235 = vector.multi_reduction <add>, %234, %cst_110 [1] : vector<8x8xf32> to vector<8xf32>
    %236 = vector.shape_cast %235 : vector<8xf32> to vector<8x1xf32>
    %237 = tpu.reciprocal %236 {approx = true} : vector<8x1xf32> -> vector<8x1xf32>
    %238 = vector.broadcast %237 : vector<8x1xf32> to vector<8x8xf32>
    %239 = arith.mulf %234, %238 : vector<8x8xf32>
    %cst_111 = arith.constant dense<0.000000e+00> : vector<8x128xf32>
    %240 = tpu.matmul %239, %226, %cst_111 {dimension_numbers = #tpu.dot_dimension_numbers<[1], [0], [0], [1], [0, 0, 1, 1], [], []>} : vector<8x8xf32>, vector<8x128xf32>, vector<8x128xf32> -> vector<8x128xf32>
    %c0_112 = arith.constant 0 : index
    %c128_113 = arith.constant 128 : index
    %241 = vector.load %arg21[%c0_112, %c128_113] : memref<16x256xf32, #tpu.memory_space<vmem>>, vector<8x128xf32>
    tpu.vector_store %arg21[%c0_112, %c128_113], %240 {strides = array<i32>} : memref<16x256xf32, #tpu.memory_space<vmem>>, vector<8x128xf32>,
    %c1_114 = arith.constant 1 : index
    %c0_115 = arith.constant 0 : index
    %c0_116 = arith.constant 0 : index
    %242 = vector.load %arg1[%c1_114, %c0_115, %c0_116] : memref<2x1x8xf32, #tpu.memory_space<vmem>>, vector<1x1x8xf32>
    %243 = vector.shape_cast %242 : vector<1x1x8xf32> to vector<1x8xf32>
    %244 = vector.extract_strided_slice %201 {offsets = [8, 0], sizes = [8, 128], strides = [1, 1]} : vector<16x256xf32> to vector<8x128xf32>
    %245 = vector.extract_strided_slice %202 {offsets = [8, 0], sizes = [8, 128], strides = [1, 1]} : vector<16x256xf32> to vector<8x128xf32>
    %246 = vector.extract_strided_slice %203 {offsets = [8, 0], sizes = [8, 128], strides = [1, 1]} : vector<16x256xf32> to vector<8x128xf32>
    %cst_117 = arith.constant dense<0.000000e+00> : vector<8x8xf32>
    %247 = tpu.matmul %244, %245, %cst_117 {dimension_numbers = #tpu.dot_dimension_numbers<[1], [1], [0], [0], [0, 0, 1, 0], [], []>} : vector<8x128xf32>, vector<8x128xf32>, vector<8x8xf32> -> vector<8x8xf32>
    %248 = vector.broadcast %243 : vector<1x8xf32> to vector<8x8xf32>
    %249 = arith.addf %247, %248 : vector<8x8xf32>
    %cst_118 = arith.constant dense<0xFF800000> : vector<8xf32>
    %250 = vector.multi_reduction <maximumf>, %249, %cst_118 [1] : vector<8x8xf32> to vector<8xf32>
    %251 = vector.shape_cast %250 : vector<8xf32> to vector<8x1xf32>
    %252 = vector.broadcast %251 : vector<8x1xf32> to vector<8x8xf32>
    %253 = arith.subf %249, %252 : vector<8x8xf32>
    %254 = math.exp %253 : vector<8x8xf32>
    %cst_119 = arith.constant dense<0.000000e+00> : vector<8xf32>
    %255 = vector.multi_reduction <add>, %254, %cst_119 [1] : vector<8x8xf32> to vector<8xf32>
    %256 = vector.shape_cast %255 : vector<8xf32> to vector<8x1xf32>
    %257 = tpu.reciprocal %256 {approx = true} : vector<8x1xf32> -> vector<8x1xf32>
    %258 = vector.broadcast %257 : vector<8x1xf32> to vector<8x8xf32>
    %259 = arith.mulf %254, %258 : vector<8x8xf32>
    %cst_120 = arith.constant dense<0.000000e+00> : vector<8x128xf32>
    %260 = tpu.matmul %259, %246, %cst_120 {dimension_numbers = #tpu.dot_dimension_numbers<[1], [0], [0], [1], [0, 0, 1, 1], [], []>} : vector<8x8xf32>, vector<8x128xf32>, vector<8x128xf32> -> vector<8x128xf32>
    %c8_121 = arith.constant 8 : index
    %c0_122 = arith.constant 0 : index
    %261 = vector.load %arg21[%c8_121, %c0_122] : memref<16x256xf32, #tpu.memory_space<vmem>>, vector<8x128xf32>
    tpu.vector_store %arg21[%c8_121, %c0_122], %260 {strides = array<i32>} : memref<16x256xf32, #tpu.memory_space<vmem>>, vector<8x128xf32>,
    %262 = vector.extract_strided_slice %201 {offsets = [8, 128], sizes = [8, 128], strides = [1, 1]} : vector<16x256xf32> to vector<8x128xf32>
    %263 = vector.extract_strided_slice %202 {offsets = [8, 128], sizes = [8, 128], strides = [1, 1]} : vector<16x256xf32> to vector<8x128xf32>
    %264 = vector.extract_strided_slice %203 {offsets = [8, 128], sizes = [8, 128], strides = [1, 1]} : vector<16x256xf32> to vector<8x128xf32>
    %cst_123 = arith.constant dense<0.000000e+00> : vector<8x8xf32>
    %265 = tpu.matmul %262, %263, %cst_123 {dimension_numbers = #tpu.dot_dimension_numbers<[1], [1], [0], [0], [0, 0, 1, 0], [], []>} : vector<8x128xf32>, vector<8x128xf32>, vector<8x8xf32> -> vector<8x8xf32>
    %266 = vector.broadcast %243 : vector<1x8xf32> to vector<8x8xf32>
    %267 = arith.addf %265, %266 : vector<8x8xf32>
    %cst_124 = arith.constant dense<0xFF800000> : vector<8xf32>
    %268 = vector.multi_reduction <maximumf>, %267, %cst_124 [1] : vector<8x8xf32> to vector<8xf32>
    %269 = vector.shape_cast %268 : vector<8xf32> to vector<8x1xf32>
    %270 = vector.broadcast %269 : vector<8x1xf32> to vector<8x8xf32>
    %271 = arith.subf %267, %270 : vector<8x8xf32>
    %272 = math.exp %271 : vector<8x8xf32>
    %cst_125 = arith.constant dense<0.000000e+00> : vector<8xf32>
    %273 = vector.multi_reduction <add>, %272, %cst_125 [1] : vector<8x8xf32> to vector<8xf32>
    %274 = vector.shape_cast %273 : vector<8xf32> to vector<8x1xf32>
    %275 = tpu.reciprocal %274 {approx = true} : vector<8x1xf32> -> vector<8x1xf32>
    %276 = vector.broadcast %275 : vector<8x1xf32> to vector<8x8xf32>
    %277 = arith.mulf %272, %276 : vector<8x8xf32>
    %cst_126 = arith.constant dense<0.000000e+00> : vector<8x128xf32>
    %278 = tpu.matmul %277, %264, %cst_126 {dimension_numbers = #tpu.dot_dimension_numbers<[1], [0], [0], [1], [0, 0, 1, 1], [], []>} : vector<8x8xf32>, vector<8x128xf32>, vector<8x128xf32> -> vector<8x128xf32>
    %c8_127 = arith.constant 8 : index
    %c128_128 = arith.constant 128 : index
    %279 = vector.load %arg21[%c8_127, %c128_128] : memref<16x256xf32, #tpu.memory_space<vmem>>, vector<8x128xf32>
    tpu.vector_store %arg21[%c8_127, %c128_128], %278 {strides = array<i32>} : memref<16x256xf32, #tpu.memory_space<vmem>>, vector<8x128xf32>,
    %c0_129 = arith.constant 0 : index
    %c0_130 = arith.constant 0 : index
    %280 = vector.load %arg21[%c0_129, %c0_130] : memref<16x256xf32, #tpu.memory_space<vmem>>, vector<16x256xf32>
    %c1_131 = arith.constant 1 : index
    %c0_132 = arith.constant 0 : index
    %c0_133 = arith.constant 0 : index
    %281 = vector.load %arg6[%c1_131, %c0_132, %c0_133] : memref<2x256x256xf32, #tpu.memory_space<vmem>>, vector<1x256x256xf32>
    %282 = vector.shape_cast %281 : vector<1x256x256xf32> to vector<256x256xf32>
    %cst_134 = arith.constant dense<0.000000e+00> : vector<16x256xf32>
    %283 = tpu.matmul %280, %282, %cst_134 {dimension_numbers = #tpu.dot_dimension_numbers<[1], [0], [0], [1], [0, 0, 1, 1], [], []>} : vector<16x256xf32>, vector<256x256xf32>, vector<16x256xf32> -> vector<16x256xf32>
    %c1_135 = arith.constant 1 : index
    %c0_136 = arith.constant 0 : index
    %c0_137 = arith.constant 0 : index
    %284 = vector.load %arg7[%c1_135, %c0_136, %c0_137] : memref<2x1x256xf32, #tpu.memory_space<vmem>>, vector<1x1x256xf32>
    %285 = vector.shape_cast %284 : vector<1x1x256xf32> to vector<1x256xf32>
    %286 = vector.broadcast %285 : vector<1x256xf32> to vector<16x256xf32>
    %287 = arith.addf %283, %286 : vector<16x256xf32>
    %288 = arith.addf %287, %193 : vector<16x256xf32>
    %c1_138 = arith.constant 1 : index
    %c0_139 = arith.constant 0 : index
    %c0_140 = arith.constant 0 : index
    %289 = vector.load %arg8[%c1_138, %c0_139, %c0_140] : memref<2x1x256xf32, #tpu.memory_space<vmem>>, vector<1x1x256xf32>
    %290 = vector.shape_cast %289 : vector<1x1x256xf32> to vector<1x256xf32>
    %c1_141 = arith.constant 1 : index
    %c0_142 = arith.constant 0 : index
    %c0_143 = arith.constant 0 : index
    %291 = vector.load %arg9[%c1_141, %c0_142, %c0_143] : memref<2x1x256xf32, #tpu.memory_space<vmem>>, vector<1x1x256xf32>
    %292 = vector.shape_cast %291 : vector<1x1x256xf32> to vector<1x256xf32>
    %cst_144 = arith.constant dense<0.000000e+00> : vector<16xf32>
    %293 = vector.multi_reduction <add>, %288, %cst_144 [1] : vector<16x256xf32> to vector<16xf32>
    %294 = vector.shape_cast %293 : vector<16xf32> to vector<16x1xf32>
    %cst_145 = arith.constant 2.560000e+02 : f32
    %295 = vector.broadcast %cst_145 : f32 to vector<16x1xf32>
    %296 = arith.divf %294, %295 : vector<16x1xf32>
    %297 = vector.broadcast %296 : vector<16x1xf32> to vector<16x256xf32>
    %298 = arith.subf %288, %297 : vector<16x256xf32>
    %299 = arith.mulf %298, %298 : vector<16x256xf32>
    %cst_146 = arith.constant dense<0.000000e+00> : vector<16xf32>
    %300 = vector.multi_reduction <add>, %299, %cst_146 [1] : vector<16x256xf32> to vector<16xf32>
    %301 = vector.shape_cast %300 : vector<16xf32> to vector<16x1xf32>
    %cst_147 = arith.constant 2.560000e+02 : f32
    %302 = vector.broadcast %cst_147 : f32 to vector<16x1xf32>
    %303 = arith.divf %301, %302 : vector<16x1xf32>
    %cst_148 = arith.constant 9.99999996E-13 : f32
    %304 = vector.broadcast %cst_148 : f32 to vector<16x1xf32>
    %305 = arith.addf %303, %304 : vector<16x1xf32>
    %306 = math.rsqrt %305 : vector<16x1xf32>
    %307 = vector.broadcast %306 : vector<16x1xf32> to vector<16x256xf32>
    %308 = arith.mulf %298, %307 : vector<16x256xf32>
    %309 = vector.broadcast %290 : vector<1x256xf32> to vector<16x256xf32>
    %310 = arith.mulf %308, %309 : vector<16x256xf32>
    %311 = vector.broadcast %292 : vector<1x256xf32> to vector<16x256xf32>
    %312 = arith.addf %310, %311 : vector<16x256xf32>
    %c1_149 = arith.constant 1 : index
    %c0_150 = arith.constant 0 : index
    %c0_151 = arith.constant 0 : index
    %313 = vector.load %arg10[%c1_149, %c0_150, %c0_151] : memref<2x256x1024xf32, #tpu.memory_space<vmem>>, vector<1x256x1024xf32>
    %314 = vector.shape_cast %313 : vector<1x256x1024xf32> to vector<256x1024xf32>
    %cst_152 = arith.constant dense<0.000000e+00> : vector<16x1024xf32>
    %315 = tpu.matmul %312, %314, %cst_152 {dimension_numbers = #tpu.dot_dimension_numbers<[1], [0], [0], [1], [0, 0, 1, 1], [], []>} : vector<16x256xf32>, vector<256x1024xf32>, vector<16x1024xf32> -> vector<16x1024xf32>
    %c1_153 = arith.constant 1 : index
    %c0_154 = arith.constant 0 : index
    %c0_155 = arith.constant 0 : index
    %316 = vector.load %arg11[%c1_153, %c0_154, %c0_155] : memref<2x1x1024xf32, #tpu.memory_space<vmem>>, vector<1x1x1024xf32>
    %317 = vector.shape_cast %316 : vector<1x1x1024xf32> to vector<1x1024xf32>
    %318 = vector.broadcast %317 : vector<1x1024xf32> to vector<16x1024xf32>
    %319 = arith.addf %315, %318 : vector<16x1024xf32>
    %cst_156 = arith.constant 5.000000e-01 : f32
    %320 = vector.broadcast %cst_156 : f32 to vector<16x1024xf32>
    %321 = arith.mulf %320, %319 : vector<16x1024xf32>
    %cst_157 = arith.constant 4.471500e-02 : f32
    %322 = vector.broadcast %cst_157 : f32 to vector<16x1024xf32>
    %323 = arith.mulf %322, %319 : vector<16x1024xf32>
    %324 = arith.mulf %323, %319 : vector<16x1024xf32>
    %325 = arith.mulf %324, %319 : vector<16x1024xf32>
    %326 = arith.addf %319, %325 : vector<16x1024xf32>
    %cst_158 = arith.constant 0.797884583 : f32
    %327 = vector.broadcast %cst_158 : f32 to vector<16x1024xf32>
    %328 = arith.mulf %327, %326 : vector<16x1024xf32>
    %329 = math.tanh %328 : vector<16x1024xf32>
    %cst_159 = arith.constant 1.000000e+00 : f32
    %330 = vector.broadcast %cst_159 : f32 to vector<16x1024xf32>
    %331 = arith.addf %330, %329 : vector<16x1024xf32>
    %332 = arith.mulf %321, %331 : vector<16x1024xf32>
    %c1_160 = arith.constant 1 : index
    %c0_161 = arith.constant 0 : index
    %c0_162 = arith.constant 0 : index
    %333 = vector.load %arg12[%c1_160, %c0_161, %c0_162] : memref<2x1024x256xf32, #tpu.memory_space<vmem>>, vector<1x1024x256xf32>
    %334 = vector.shape_cast %333 : vector<1x1024x256xf32> to vector<1024x256xf32>
    %cst_163 = arith.constant dense<0.000000e+00> : vector<16x256xf32>
    %335 = tpu.matmul %332, %334, %cst_163 {dimension_numbers = #tpu.dot_dimension_numbers<[1], [0], [0], [1], [0, 0, 1, 1], [], []>} : vector<16x1024xf32>, vector<1024x256xf32>, vector<16x256xf32> -> vector<16x256xf32>
    %c1_164 = arith.constant 1 : index
    %c0_165 = arith.constant 0 : index
    %c0_166 = arith.constant 0 : index
    %336 = vector.load %arg13[%c1_164, %c0_165, %c0_166] : memref<2x1x256xf32, #tpu.memory_space<vmem>>, vector<1x1x256xf32>
    %337 = vector.shape_cast %336 : vector<1x1x256xf32> to vector<1x256xf32>
    %338 = vector.broadcast %337 : vector<1x256xf32> to vector<16x256xf32>
    %339 = arith.addf %335, %338 : vector<16x256xf32>
    %340 = arith.addf %339, %312 : vector<16x256xf32>
    %c1_167 = arith.constant 1 : index
    %c0_168 = arith.constant 0 : index
    %c0_169 = arith.constant 0 : index
    %341 = vector.load %arg14[%c1_167, %c0_168, %c0_169] : memref<2x1x256xf32, #tpu.memory_space<vmem>>, vector<1x1x256xf32>
    %342 = vector.shape_cast %341 : vector<1x1x256xf32> to vector<1x256xf32>
    %c1_170 = arith.constant 1 : index
    %c0_171 = arith.constant 0 : index
    %c0_172 = arith.constant 0 : index
    %343 = vector.load %arg15[%c1_170, %c0_171, %c0_172] : memref<2x1x256xf32, #tpu.memory_space<vmem>>, vector<1x1x256xf32>
    %344 = vector.shape_cast %343 : vector<1x1x256xf32> to vector<1x256xf32>
    %cst_173 = arith.constant dense<0.000000e+00> : vector<16xf32>
    %345 = vector.multi_reduction <add>, %340, %cst_173 [1] : vector<16x256xf32> to vector<16xf32>
    %346 = vector.shape_cast %345 : vector<16xf32> to vector<16x1xf32>
    %cst_174 = arith.constant 2.560000e+02 : f32
    %347 = vector.broadcast %cst_174 : f32 to vector<16x1xf32>
    %348 = arith.divf %346, %347 : vector<16x1xf32>
    %349 = vector.broadcast %348 : vector<16x1xf32> to vector<16x256xf32>
    %350 = arith.subf %340, %349 : vector<16x256xf32>
    %351 = arith.mulf %350, %350 : vector<16x256xf32>
    %cst_175 = arith.constant dense<0.000000e+00> : vector<16xf32>
    %352 = vector.multi_reduction <add>, %351, %cst_175 [1] : vector<16x256xf32> to vector<16xf32>
    %353 = vector.shape_cast %352 : vector<16xf32> to vector<16x1xf32>
    %cst_176 = arith.constant 2.560000e+02 : f32
    %354 = vector.broadcast %cst_176 : f32 to vector<16x1xf32>
    %355 = arith.divf %353, %354 : vector<16x1xf32>
    %cst_177 = arith.constant 9.99999996E-13 : f32
    %356 = vector.broadcast %cst_177 : f32 to vector<16x1xf32>
    %357 = arith.addf %355, %356 : vector<16x1xf32>
    %358 = math.rsqrt %357 : vector<16x1xf32>
    %359 = vector.broadcast %358 : vector<16x1xf32> to vector<16x256xf32>
    %360 = arith.mulf %350, %359 : vector<16x256xf32>
    %361 = vector.broadcast %342 : vector<1x256xf32> to vector<16x256xf32>
    %362 = arith.mulf %360, %361 : vector<16x256xf32>
    %363 = vector.broadcast %344 : vector<1x256xf32> to vector<16x256xf32>
    %364 = arith.addf %362, %363 : vector<16x256xf32>
    %365 = vector.extract_strided_slice %364 {offsets = [0, 0], sizes = [1, 256], strides = [1, 1]} : vector<16x256xf32> to vector<1x256xf32>
    %c0_178 = arith.constant 0 : index
    %c0_179 = arith.constant 0 : index
    %366 = vector.load %arg16[%c0_178, %c0_179] : memref<256x256xf32, #tpu.memory_space<vmem>>, vector<256x256xf32>
    %cst_180 = arith.constant dense<0.000000e+00> : vector<1x256xf32>
    %367 = tpu.matmul %365, %366, %cst_180 {dimension_numbers = #tpu.dot_dimension_numbers<[1], [0], [0], [1], [0, 0, 1, 1], [], []>} : vector<1x256xf32>, vector<256x256xf32>, vector<1x256xf32> -> vector<1x256xf32>
    %c0_181 = arith.constant 0 : index
    %c0_182 = arith.constant 0 : index
    %368 = vector.load %arg17[%c0_181, %c0_182] : memref<1x256xf32, #tpu.memory_space<vmem>>, vector<1x256xf32>
    %369 = arith.addf %367, %368 : vector<1x256xf32>
    %370 = math.tanh %369 : vector<1x256xf32>
    %c0_183 = arith.constant 0 : index
    %c0_184 = arith.constant 0 : index
    %371 = vector.load %arg18[%c0_183, %c0_184] : memref<256x2xf32, #tpu.memory_space<vmem>>, vector<256x2xf32>
    %cst_185 = arith.constant dense<0.000000e+00> : vector<1x2xf32>
    %372 = tpu.matmul %370, %371, %cst_185 {dimension_numbers = #tpu.dot_dimension_numbers<[1], [0], [0], [1], [0, 0, 1, 1], [], []>} : vector<1x256xf32>, vector<256x2xf32>, vector<1x2xf32> -> vector<1x2xf32>
    %c0_186 = arith.constant 0 : index
    %c0_187 = arith.constant 0 : index
    %373 = vector.load %arg19[%c0_186, %c0_187] : memref<1x2xf32, #tpu.memory_space<vmem>>, vector<1x2xf32>
    %374 = arith.addf %372, %373 : vector<1x2xf32>
    %cst_188 = arith.constant dense<0xFF800000> : vector<1xf32>
    %375 = vector.multi_reduction <maximumf>, %374, %cst_188 [1] : vector<1x2xf32> to vector<1xf32>
    %376 = vector.shape_cast %375 : vector<1xf32> to vector<1x1xf32>
    %377 = vector.broadcast %376 : vector<1x1xf32> to vector<1x2xf32>
    %378 = arith.subf %374, %377 : vector<1x2xf32>
    %379 = math.exp %378 : vector<1x2xf32>
    %cst_189 = arith.constant dense<0.000000e+00> : vector<1xf32>
    %380 = vector.multi_reduction <add>, %379, %cst_189 [1] : vector<1x2xf32> to vector<1xf32>
    %381 = vector.shape_cast %380 : vector<1xf32> to vector<1x1xf32>
    %382 = vector.broadcast %381 : vector<1x1xf32> to vector<1x2xf32>
    %383 = arith.divf %379, %382 : vector<1x2xf32>
    %c0_190 = arith.constant 0 : index
    %c0_191 = arith.constant 0 : index
    %384 = vector.load %arg20[%c0_190, %c0_191] : memref<2x2xf32, #tpu.memory_space<vmem>>, vector<1x2xf32>
    tpu.vector_store %arg20[%c0_190, %c0_191], %383 {strides = array<i32>} : memref<2x2xf32, #tpu.memory_space<vmem>>, vector<1x2xf32>,
    %385 = vector.extract_strided_slice %364 {offsets = [8, 0], sizes = [1, 256], strides = [1, 1]} : vector<16x256xf32> to vector<1x256xf32>
    %c0_192 = arith.constant 0 : index
    %c0_193 = arith.constant 0 : index
    %386 = vector.load %arg16[%c0_192, %c0_193] : memref<256x256xf32, #tpu.memory_space<vmem>>, vector<256x256xf32>
    %cst_194 = arith.constant dense<0.000000e+00> : vector<1x256xf32>
    %387 = tpu.matmul %385, %386, %cst_194 {dimension_numbers = #tpu.dot_dimension_numbers<[1], [0], [0], [1], [0, 0, 1, 1], [], []>} : vector<1x256xf32>, vector<256x256xf32>, vector<1x256xf32> -> vector<1x256xf32>
    %c0_195 = arith.constant 0 : index
    %c0_196 = arith.constant 0 : index
    %388 = vector.load %arg17[%c0_195, %c0_196] : memref<1x256xf32, #tpu.memory_space<vmem>>, vector<1x256xf32>
    %389 = arith.addf %387, %388 : vector<1x256xf32>
    %390 = math.tanh %389 : vector<1x256xf32>
    %c0_197 = arith.constant 0 : index
    %c0_198 = arith.constant 0 : index
    %391 = vector.load %arg18[%c0_197, %c0_198] : memref<256x2xf32, #tpu.memory_space<vmem>>, vector<256x2xf32>
    %cst_199 = arith.constant dense<0.000000e+00> : vector<1x2xf32>
    %392 = tpu.matmul %390, %391, %cst_199 {dimension_numbers = #tpu.dot_dimension_numbers<[1], [0], [0], [1], [0, 0, 1, 1], [], []>} : vector<1x256xf32>, vector<256x2xf32>, vector<1x2xf32> -> vector<1x2xf32>
    %c0_200 = arith.constant 0 : index
    %c0_201 = arith.constant 0 : index
    %393 = vector.load %arg19[%c0_200, %c0_201] : memref<1x2xf32, #tpu.memory_space<vmem>>, vector<1x2xf32>
    %394 = arith.addf %392, %393 : vector<1x2xf32>
    %cst_202 = arith.constant dense<0xFF800000> : vector<1xf32>
    %395 = vector.multi_reduction <maximumf>, %394, %cst_202 [1] : vector<1x2xf32> to vector<1xf32>
    %396 = vector.shape_cast %395 : vector<1xf32> to vector<1x1xf32>
    %397 = vector.broadcast %396 : vector<1x1xf32> to vector<1x2xf32>
    %398 = arith.subf %394, %397 : vector<1x2xf32>
    %399 = math.exp %398 : vector<1x2xf32>
    %cst_203 = arith.constant dense<0.000000e+00> : vector<1xf32>
    %400 = vector.multi_reduction <add>, %399, %cst_203 [1] : vector<1x2xf32> to vector<1xf32>
    %401 = vector.shape_cast %400 : vector<1xf32> to vector<1x1xf32>
    %402 = vector.broadcast %401 : vector<1x1xf32> to vector<1x2xf32>
    %403 = arith.divf %399, %402 : vector<1x2xf32>
    %c1_204 = arith.constant 1 : index
    %c0_205 = arith.constant 0 : index
    %404 = vector.load %arg20[%c1_204, %c0_205] : memref<2x2xf32, #tpu.memory_space<vmem>>, vector<1x2xf32>
    tpu.vector_store %arg20[%c1_204, %c0_205], %403 {strides = array<i32>} : memref<2x2xf32, #tpu.memory_space<vmem>>, vector<1x2xf32>,
    return
  }
}

</mosaic_0001>

<bundles_post_ra>
// kernel: tpu_custom_call.1
= control target key start
LH: loop header
LB: loop body
LE: loop exit
PB: predicated region body
PF: predicated region fallthrough
CT: control target
= control target key end

     0   :  { %s10496_s0 = inlined_call_operand.hbm [shape: f32[16,256], index: 0, kind: input, shape index: {}]   ;;  %s10497_s1 = inlined_call_operand.hbm [shape: f32[2,1,8], index: 1, kind: input, shape index: {}]   ;;  %s10498_s2 = inlined_call_operand.hbm [shape: f32[1,256], index: 2, kind: input, shape index: {}]   ;;  %s10499_s3 = inlined_call_operand.hbm [shape: f32[1,256], index: 3, kind: input, shape index: {}]   ;;  %s10500_s4 = inlined_call_operand.hbm [shape: f32[2,256,768], index: 4, kind: input, shape index: {}]   ;;  %s10501_s5 = inlined_call_operand.hbm [shape: f32[2,1,768], index: 5, kind: input, shape index: {}]   ;;  %s10502_s6 = inlined_call_operand.hbm [shape: f32[2,256,256], index: 6, kind: input, shape index: {}]   ;;  %s10503_s7 = inlined_call_operand.hbm [shape: f32[2,1,256], index: 7, kind: input, shape index: {}]   ;;  %s10504_s8 = inlined_call_operand.hbm [shape: f32[2,1,256], index: 8, kind: input, shape index: {}]   ;;  %s10505_s9 = inlined_call_operand.hbm [shape: f32[2,1,256], index: 9, kind: input, shape index: {}]   ;;  %s10506_s10 = inlined_call_operand.hbm [shape: f32[2,256,1024], index: 10, kind: input, shape index: {}]   ;;  %s10507_s11 = inlined_call_operand.hbm [shape: f32[2,1,1024], index: 11, kind: input, shape index: {}]   ;;  %s10508_s12 = inlined_call_operand.hbm [shape: f32[2,1024,256], index: 12, kind: input, shape index: {}]   ;;  %s10509_s13 = inlined_call_operand.hbm [shape: f32[2,1,256], index: 13, kind: input, shape index: {}]   ;;  %s10510_s14 = inlined_call_operand.hbm [shape: f32[2,1,256], index: 14, kind: input, shape index: {}]   ;;  %s10511_s15 = inlined_call_operand.hbm [shape: f32[2,1,256], index: 15, kind: input, shape index: {}]   ;;  %s10512_s16 = inlined_call_operand.hbm [shape: f32[256,256], index: 16, kind: input, shape index: {}]   ;;  %s10513_s17 = inlined_call_operand.hbm [shape: f32[1,256], index: 17, kind: input, shape index: {}]   ;;  %s10514_s18 = inlined_call_operand.vmem [shape: f32[256,2], index: 18, kind: input, shape index: {}]   ;;  %s10515_s19 = inlined_call_operand.hbm [shape: f32[1,2], index: 19, kind: input, shape index: {}]   ;;  %s10516_s20 = inlined_call_operand.hbm [shape: f32[2,2], index: 20, kind: output, shape index: {}]  }
   0x1   :  { %10525 = sst [smem:[#allocation45_spill]] %s10496_s0 }
   0x2   :  { %10526 = sst [smem:[#allocation46_spill]] %s10497_s1 }
   0x3   :  { %10527 = sst [smem:[#allocation47_spill]] %s10498_s2 }
   0x4   :  { %10528 = sst [smem:[#allocation48_spill]] %s10499_s3 }
   0x5   :  { %10529 = sst [smem:[#allocation49_spill]] %s10500_s4 }
   0x6   :  { %10530 = sst [smem:[#allocation50_spill]] %s10514_s18 }
   0x7   :  { %10531 = sst [smem:[#allocation51_spill]] %s10515_s19 }
   0x8   :  { %10532 = sst [smem:[#allocation52_spill]] %s10516_s20 }
   0x9   :  { %25 = vsyncpa [#allocation4], 0 }
   0xa   :  { %26 = vsyncpa [#allocation7], 0 }
   0xb   :  { %27 = vsyncpa [#allocation10], 0 }
   0xc   :  { %28 = vsyncpa [#allocation13], 0 }
   0xd   :  { %29 = vsyncpa [#allocation16], 0 }
   0xe   :  { %30 = vsyncpa [#allocation19], 0 }
   0xf   :  { %31 = vsyncpa [#allocation22], 0 }
  0x10   :  { %32 = vsyncpa [#allocation25], 0 }
  0x11   :  { %33 = vsyncpa [#allocation28], 0 }
  0x12   :  { %34 = vsyncpa [#allocation31], 0 }
  0x13   :  { %35 = vsyncpa [#allocation5], 0  ;;  %s8950_s1 = smov [#allocation6]   ;;  %s10533_s2 = sld [smem:[#allocation46_spill]] }
  0x14   :  { %s53_s22 = sshll.u32 %s8950_s1, 4  ;;  %s54_s22 = int_to_ptr.vmem [resolvable:$true] %s53_s22 }
  0x19   :  { %s8488_s25 = scalar_lea.hbm %s10533_s2, 32 }
  0x1a   :  { %p8489_p0 = scmp.ne.s32.totalorder %s10533_s2, %s8488_s25  ;;  %p8492_p1 = scmp.lt.u32.totalorder %s8488_s25, %s10533_s2 }
  0x1c   :  { %p8494_p2 = pnand %p8492_p1, %p8489_p0 }
  0x1e   :  { %8497 = shalt.err (!%p8494_p2)
}
  0x1f   :  { %s8498_s4 = scalar_lea.vmem %s54_s22, 32  ;;  %p8503_p4 = scmp.lt.s32.totalorder %s54_s22, %s54_s22 }
  0x20   :  { %p8499_p3 = scmp.ne.s32.totalorder %s54_s22, %s8498_s4  ;;  %p8504_p5 = scmp.lt.s32.totalorder %s8498_s4, %s8498_s4 }
  0x22   :  { %p8505_p6 = por %p8504_p5, %p8503_p4 }
  0x24   :  { %p8506_p7 = pnand %p8505_p6, %p8499_p3 }
  0x26   :  { %8509 = shalt.err (!%p8506_p7)
}
  0x27   :  { %s8951_s29 = smov 16   ;;  %s8952_s30 = smov 1  }
  0x28   :  { %59 = dma.hbm_to_vmem [thread:$0]  %s10533_s2, 32, %s54_s22, [#allocation7], %s8951_s29, %s8951_s29, %s8952_s30  }
  0x29   :  { %s8953_s1 = smov [#allocation9]   ;;  %s8954_s24 = smov [#allocation12]  }
  0x2a   :  { %s76_s23 = sshll.u32 %s8953_s1, 4  ;;  %s97_s25 = sshll.u32 %s8954_s24, 4  ;;  %s77_s23 = int_to_ptr.vmem [resolvable:$true] %s76_s23  ;;  %s98_s25 = int_to_ptr.vmem [resolvable:$true] %s97_s25 }
  0x2b   :  { %s10534_s27 = sld [smem:[#allocation48_spill]] }
  0x31   :  { %s8510_s28 = scalar_lea.hbm %s10534_s27, 32 }
  0x32   :  { %p8511_p8 = scmp.ne.s32.totalorder %s10534_s27, %s8510_s28  ;;  %p8514_p9 = scmp.lt.u32.totalorder %s8510_s28, %s10534_s27 }
  0x34   :  { %p8516_p10 = pnand %p8514_p9, %p8511_p8 }
  0x36   :  { %8519 = shalt.err (!%p8516_p10)
}
  0x37   :  { %s8520_s22 = scalar_lea.vmem %s77_s23, 32  ;;  %p8525_p12 = scmp.lt.s32.totalorder %s77_s23, %s77_s23 }
  0x38   :  { %p8521_p11 = scmp.ne.s32.totalorder %s77_s23, %s8520_s22  ;;  %p8526_p13 = scmp.lt.s32.totalorder %s8520_s22, %s8520_s22 }
  0x3a   :  { %p8527_p0 = por %p8526_p13, %p8525_p12 }
  0x3c   :  { %p8528_p1 = pnand %p8527_p0, %p8521_p11 }
  0x3e   :  { %8531 = shalt.err (!%p8528_p1)
}
  0x3f   :  { %79 = dma.hbm_to_vmem [thread:$0]  %s10534_s27, 32, %s77_s23, [#allocation10]  }
  0x40   :  { %s8532_s21 = scalar_lea.hbm %s10501_s5, 192 }
  0x41   :  { %p8533_p2 = scmp.ne.s32.totalorder %s10501_s5, %s8532_s21  ;;  %p8536_p3 = scmp.lt.u32.totalorder %s8532_s21, %s10501_s5 }
  0x43   :  { %p8538_p4 = pnand %p8536_p3, %p8533_p2 }
  0x45   :  { %8541 = shalt.err (!%p8538_p4)
}
  0x46   :  { %s8542_s3 = scalar_lea.vmem %s98_s25, 192  ;;  %p8547_p6 = scmp.lt.s32.totalorder %s98_s25, %s98_s25 }
  0x47   :  { %p8543_p5 = scmp.ne.s32.totalorder %s98_s25, %s8542_s3  ;;  %p8548_p7 = scmp.lt.s32.totalorder %s8542_s3, %s8542_s3 }
  0x49   :  { %p8549_p8 = por %p8548_p7, %p8547_p6 }
  0x4b   :  { %p8550_p9 = pnand %p8549_p8, %p8543_p5 }
  0x4d   :  { %8553 = shalt.err (!%p8550_p9)
}
  0x4e   :  { %s8955_s23 = smov 96   ;;  %s8956_s26 = smov 6  }
  0x4f   :  { %103 = dma.hbm_to_vmem [thread:$0]  %s10501_s5, 192, %s98_s25, [#allocation13], %s8955_s23, %s8955_s23, %s8956_s26  }
  0x50   :  { %s8957_s4 = smov [#allocation15]   ;;  %s8554_s20 = scalar_lea.hbm %s10503_s7, 64 }
  0x51   :  { %s121_s22 = sshll.u32 %s8957_s4, 4  ;;  %p8555_p10 = scmp.ne.s32.totalorder %s10503_s7, %s8554_s20  ;;  %s122_s22 = int_to_ptr.vmem [resolvable:$true] %s121_s22 }
  0x52   :  { %p8558_p11 = scmp.lt.u32.totalorder %s8554_s20, %s10503_s7 }
  0x54   :  { %p8560_p12 = pnand %p8558_p11, %p8555_p10 }
  0x56   :  { %8563 = shalt.err (!%p8560_p12)
}
  0x57   :  { %s8564_s1 = scalar_lea.vmem %s122_s22, 64  ;;  %p8569_p0 = scmp.lt.s32.totalorder %s122_s22, %s122_s22 }
  0x58   :  { %p8565_p13 = scmp.ne.s32.totalorder %s122_s22, %s8564_s1  ;;  %p8570_p1 = scmp.lt.s32.totalorder %s8564_s1, %s8564_s1 }
  0x5a   :  { %p8571_p2 = por %p8570_p1, %p8569_p0 }
  0x5c   :  { %p8572_p3 = pnand %p8571_p2, %p8565_p13 }
  0x5e   :  { %8575 = shalt.err (!%p8572_p3)
}
  0x5f   :  { %s8958_s5 = smov 32   ;;  %s8959_s25 = smov 2  }
  0x60   :  { %127 = dma.hbm_to_vmem [thread:$0]  %s10503_s7, 64, %s122_s22, [#allocation16], %s8958_s5, %s8958_s5, %s8959_s25  }
  0x61   :  { %s8960_s23 = smov [#allocation18]   ;;  %s8961_s27 = smov [#allocation21]  }
  0x62   :  { %s145_s26 = sshll.u32 %s8960_s23, 4  ;;  %s169_s28 = sshll.u32 %s8961_s27, 4  ;;  %s146_s26 = int_to_ptr.vmem [resolvable:$true] %s145_s26  ;;  %s9143_s28 = int_to_ptr.vmem [resolvable:$true] %s169_s28 }
  0x63   :  { %s8576_s30 = scalar_lea.hbm %s10505_s9, 64 }
  0x64   :  { %p8577_p4 = scmp.ne.s32.totalorder %s10505_s9, %s8576_s30  ;;  %p8580_p5 = scmp.lt.u32.totalorder %s8576_s30, %s10505_s9 }
  0x66   :  { %p8582_p6 = pnand %p8580_p5, %p8577_p4 }
  0x68   :  { %8585 = shalt.err (!%p8582_p6)
}
  0x69   :  { %s8586_s7 = scalar_lea.vmem %s146_s26, 64  ;;  %p8591_p8 = scmp.lt.s32.totalorder %s146_s26, %s146_s26 }
  0x6a   :  { %p8587_p7 = scmp.ne.s32.totalorder %s146_s26, %s8586_s7  ;;  %p8592_p9 = scmp.lt.s32.totalorder %s8586_s7, %s8586_s7 }
  0x6c   :  { %p8593_p10 = por %p8592_p9, %p8591_p8 }
  0x6e   :  { %p8594_p11 = pnand %p8593_p10, %p8587_p7 }
  0x70   :  { %8597 = shalt.err (!%p8594_p11)
}
  0x71   :  { %151 = dma.hbm_to_vmem [thread:$0]  %s10505_s9, 64, %s146_s26, [#allocation19], %s8958_s5, %s8958_s5, %s8959_s25  }
  0x72   :  { %s8598_s3 = scalar_lea.hbm %s10507_s11, 256 }
  0x73   :  { %p8599_p12 = scmp.ne.s32.totalorder %s10507_s11, %s8598_s3  ;;  %p8602_p13 = scmp.lt.u32.totalorder %s8598_s3, %s10507_s11 }
  0x75   :  { %p8604_p0 = pnand %p8602_p13, %p8599_p12 }
  0x77   :  { %8607 = shalt.err (!%p8604_p0)
}
  0x78   :  { %s8608_s30 = scalar_lea.vmem %s9143_s28, 256  ;;  %p8613_p2 = scmp.lt.s32.totalorder %s9143_s28, %s9143_s28 }
  0x79   :  { %p8609_p1 = scmp.ne.s32.totalorder %s9143_s28, %s8608_s30  ;;  %p8614_p3 = scmp.lt.s32.totalorder %s8608_s30, %s8608_s30 }
  0x7b   :  { %p8615_p4 = por %p8614_p3, %p8613_p2 }
  0x7d   :  { %p8616_p5 = pnand %p8615_p4, %p8609_p1 }
  0x7f   :  { %8619 = shalt.err (!%p8616_p5)
}
  0x80   :  { %s8962_s9 = smov 128   ;;  %s8963_s26 = smov 8  }
  0x81   :  { %175 = dma.hbm_to_vmem [thread:$0]  %s10507_s11, 256, %s9143_s28, [#allocation22], %s8962_s9, %s8962_s9, %s8963_s26  }
  0x82   :  { %s8964_s21 = smov [#allocation24]   ;;  %s8965_s7 = smov [#allocation27]  }
  0x83   :  { %s193_s18 = sshll.u32 %s8964_s21, 4  ;;  %s217_s22 = sshll.u32 %s8965_s7, 4  ;;  %s194_s18 = int_to_ptr.vmem [resolvable:$true] %s193_s18  ;;  %s9177_s22 = int_to_ptr.vmem [resolvable:$true] %s217_s22 }
  0x84   :  { %s8620_s24 = scalar_lea.hbm %s10509_s13, 64 }
  0x85   :  { %p8621_p6 = scmp.ne.s32.totalorder %s10509_s13, %s8620_s24  ;;  %p8624_p7 = scmp.lt.u32.totalorder %s8620_s24, %s10509_s13 }
  0x87   :  { %p8626_p8 = pnand %p8624_p7, %p8621_p6 }
  0x89   :  { %8629 = shalt.err (!%p8626_p8)
}
  0x8a   :  { %s8630_s11 = scalar_lea.vmem %s194_s18, 64  ;;  %p8635_p10 = scmp.lt.s32.totalorder %s194_s18, %s194_s18 }
  0x8b   :  { %p8631_p9 = scmp.ne.s32.totalorder %s194_s18, %s8630_s11  ;;  %p8636_p11 = scmp.lt.s32.totalorder %s8630_s11, %s8630_s11 }
  0x8d   :  { %p8637_p12 = por %p8636_p11, %p8635_p10 }
  0x8f   :  { %p8638_p13 = pnand %p8637_p12, %p8631_p9 }
  0x91   :  { %8641 = shalt.err (!%p8638_p13)
}
  0x92   :  { %199 = dma.hbm_to_vmem [thread:$0]  %s10509_s13, 64, %s194_s18, [#allocation25], %s8958_s5, %s8958_s5, %s8959_s25  }
  0x93   :  { %s8642_s26 = scalar_lea.hbm %s10511_s15, 64 }
  0x94   :  { %p8643_p0 = scmp.ne.s32.totalorder %s10511_s15, %s8642_s26  ;;  %p8646_p1 = scmp.lt.u32.totalorder %s8642_s26, %s10511_s15 }
  0x96   :  { %p8648_p2 = pnand %p8646_p1, %p8643_p0 }
  0x98   :  { %8651 = shalt.err (!%p8648_p2)
}
  0x99   :  { %s8652_s19 = scalar_lea.vmem %s9177_s22, 64  ;;  %p8657_p4 = scmp.lt.s32.totalorder %s9177_s22, %s9177_s22 }
  0x9a   :  { %p8653_p3 = scmp.ne.s32.totalorder %s9177_s22, %s8652_s19  ;;  %p8658_p5 = scmp.lt.s32.totalorder %s8652_s19, %s8652_s19 }
  0x9c   :  { %p8659_p6 = por %p8658_p5, %p8657_p4 }
  0x9e   :  { %p8660_p7 = pnand %p8659_p6, %p8653_p3 }
  0xa0   :  { %8663 = shalt.err (!%p8660_p7)
}
  0xa1   :  { %223 = dma.hbm_to_vmem [thread:$0]  %s10511_s15, 64, %s9177_s22, [#allocation28], %s8958_s5, %s8958_s5, %s8959_s25  }
  0xa2   :  { %s8966_s1 = smov [#allocation30]   ;;  %s8967_s3 = smov [#allocation3]  }
  0xa3   :  { %s242_s24 = sshll.u32 %s8966_s1, 4  ;;  %s41_s23 = sshll.u32 %s8967_s3, 4  ;;  %s243_s24 = int_to_ptr.vmem [resolvable:$true] %s242_s24  ;;  %s9214_s23 = int_to_ptr.vmem [resolvable:$true] %s41_s23 }
  0xa4   :  { %s8664_s11 = scalar_lea.hbm %s10513_s17, 32 }
  0xa5   :  { %p8665_p8 = scmp.ne.s32.totalorder %s10513_s17, %s8664_s11  ;;  %p8668_p9 = scmp.lt.u32.totalorder %s8664_s11, %s10513_s17 }
  0xa7   :  { %p8670_p10 = pnand %p8668_p9, %p8665_p8 }
  0xa9   :  { %8673 = shalt.err (!%p8670_p10)
}
  0xaa   :  { %s8674_s15 = scalar_lea.vmem %s243_s24, 32  ;;  %p8679_p12 = scmp.lt.s32.totalorder %s243_s24, %s243_s24 }
  0xab   :  { %p8675_p11 = scmp.ne.s32.totalorder %s243_s24, %s8674_s15  ;;  %p8680_p13 = scmp.lt.s32.totalorder %s8674_s15, %s8674_s15 }
  0xad   :  { %p8681_p0 = por %p8680_p13, %p8679_p12 }
  0xaf   :  { %p8682_p1 = pnand %p8681_p0, %p8675_p11 }
  0xb1   :  { %8685 = shalt.err (!%p8682_p1)
}
  0xb2   :  { %245 = dma.hbm_to_vmem [thread:$0]  %s10513_s17, 32, %s243_s24, [#allocation31]  }
  0xb3   :  { %s10535_s21 = sld [smem:[#allocation45_spill]] }
  0xb9   :  { %s8686_s7 = scalar_lea.hbm %s10535_s21, 512 }
  0xba   :  { %p8687_p2 = scmp.ne.s32.totalorder %s10535_s21, %s8686_s7  ;;  %p8690_p3 = scmp.lt.u32.totalorder %s8686_s7, %s10535_s21 }
  0xbc   :  { %p8692_p4 = pnand %p8690_p3, %p8687_p2 }
  0xbe   :  { %8695 = shalt.err (!%p8692_p4)
}
  0xbf   :  { %s8696_s3 = scalar_lea.vmem %s9214_s23, 512  ;;  %p8701_p6 = scmp.lt.s32.totalorder %s9214_s23, %s9214_s23 }
  0xc0   :  { %p8697_p5 = scmp.ne.s32.totalorder %s9214_s23, %s8696_s3  ;;  %p8702_p7 = scmp.lt.s32.totalorder %s8696_s3, %s8696_s3 }
  0xc2   :  { %p8703_p8 = por %p8702_p7, %p8701_p6 }
  0xc4   :  { %p8704_p9 = pnand %p8703_p8, %p8697_p5 }
  0xc6   :  { %8707 = shalt.err (!%p8704_p9)
}
  0xc7   :  { %s8968_s17 = smov 256   ;;  %s8969_s4 = smov [#allocation8]  }
  0xc8   :  { %47 = dma.hbm_to_vmem [thread:$0]  %s10535_s21, 512, %s9214_s23, [#allocation4], %s8968_s17, %s8968_s17, %s8951_s29  }
  0xc9   :  { %s66_s11 = sshll.u32 %s8969_s4, 4  ;;  %s8970_s28 = smov [#allocation11]   ;;  %s67_s11 = int_to_ptr.vmem [resolvable:$true] %s66_s11 }
  0xca   :  { %s85_s2 = sshll.u32 %s8970_s28, 4  ;;  %s10536_s15 = sld [smem:[#allocation47_spill]]  ;;  %s86_s2 = int_to_ptr.vmem [resolvable:$true] %s85_s2 }
  0xd0   :  { %s8708_s22 = scalar_lea.hbm %s10536_s15, 32 }
  0xd1   :  { %p8709_p10 = scmp.ne.s32.totalorder %s10536_s15, %s8708_s22  ;;  %p8712_p11 = scmp.lt.u32.totalorder %s8708_s22, %s10536_s15 }
  0xd3   :  { %p8714_p12 = pnand %p8712_p11, %p8709_p10 }
  0xd5   :  { %8717 = shalt.err (!%p8714_p12)
}
  0xd6   :  { %s8718_s23 = scalar_lea.vmem %s67_s11, 32  ;;  %p8723_p0 = scmp.lt.s32.totalorder %s67_s11, %s67_s11 }
  0xd7   :  { %p8719_p13 = scmp.ne.s32.totalorder %s67_s11, %s8718_s23  ;;  %p8724_p1 = scmp.lt.s32.totalorder %s8718_s23, %s8718_s23 }
  0xd9   :  { %p8725_p2 = por %p8724_p1, %p8723_p0 }
  0xdb   :  { %p8726_p3 = pnand %p8725_p2, %p8719_p13 }
  0xdd   :  { %8729 = shalt.err (!%p8726_p3)
}
  0xde   :  { %69 = dma.hbm_to_vmem [thread:$0]  %s10536_s15, 32, %s67_s11, [#allocation7]  }
  0xdf   :  { %s10537_s1 = sld [smem:[#allocation49_spill]] }
  0xe5   :  { %s8730_s3 = scalar_lea.hbm %s10537_s1, 49152 }
  0xe6   :  { %p8731_p4 = scmp.ne.s32.totalorder %s10537_s1, %s8730_s3  ;;  %p8734_p5 = scmp.lt.u32.totalorder %s8730_s3, %s10537_s1 }
  0xe8   :  { %p8736_p6 = pnand %p8734_p5, %p8731_p4 }
  0xea   :  { %8739 = shalt.err (!%p8736_p6)
}
  0xeb   :  { %s8740_s30 = scalar_lea.vmem %s86_s2, 49152  ;;  %p8745_p8 = scmp.lt.s32.totalorder %s86_s2, %s86_s2 }
  0xec   :  { %p8741_p7 = scmp.ne.s32.totalorder %s86_s2, %s8740_s30  ;;  %p8746_p9 = scmp.lt.s32.totalorder %s8740_s30, %s8740_s30 }
  0xee   :  { %p8747_p10 = por %p8746_p9, %p8745_p8 }
  0xf0   :  { %p8748_p11 = pnand %p8747_p10, %p8741_p7 }
  0xf2   :  { %8751 = shalt.err (!%p8748_p11)
}
  0xf3   :  { %s8971_s11 = smov 768   ;;  %s8972_s9 = smov 48  }
  0xf4   :  { %91 = dma.hbm_to_vmem [thread:$0]  %s10537_s1, 49152, %s86_s2, [#allocation10], %s8971_s11, %s8971_s11, %s8972_s9  }
  0xf5   :  { %s8973_s26 = smov [#allocation14]   ;;  %s8974_s0 = smov [#allocation17]  }
  0xf6   :  { %s109_s20 = sshll.u32 %s8973_s26, 4  ;;  %s133_s7 = sshll.u32 %s8974_s0, 4  ;;  %s110_s20 = int_to_ptr.vmem [resolvable:$true] %s109_s20  ;;  %s134_s7 = int_to_ptr.vmem [resolvable:$true] %s133_s7 }
  0xf7   :  { %s8752_s19 = scalar_lea.hbm %s10502_s6, 16384 }
  0xf8   :  { %p8753_p12 = scmp.ne.s32.totalorder %s10502_s6, %s8752_s19  ;;  %p8756_p13 = scmp.lt.u32.totalorder %s8752_s19, %s10502_s6 }
  0xfa   :  { %p8758_p0 = pnand %p8756_p13, %p8753_p12 }
  0xfc   :  { %8761 = shalt.err (!%p8758_p0)
}
  0xfd   :  { %s8762_s2 = scalar_lea.vmem %s110_s20, 16384  ;;  %p8767_p2 = scmp.lt.s32.totalorder %s110_s20, %s110_s20 }
  0xfe   :  { %p8763_p1 = scmp.ne.s32.totalorder %s110_s20, %s8762_s2  ;;  %p8768_p3 = scmp.lt.s32.totalorder %s8762_s2, %s8762_s2 }
 0x100   :  { %p8769_p4 = por %p8768_p3, %p8767_p2 }
 0x102   :  { %p8770_p5 = pnand %p8769_p4, %p8763_p1 }
 0x104   :  { %8773 = shalt.err (!%p8770_p5)
}
 0x105   :  { %115 = dma.hbm_to_vmem [thread:$0]  %s10502_s6, 16384, %s110_s20, [#allocation13], %s8968_s17, %s8968_s17, %s8951_s29  }
 0x106   :  { %s8774_s30 = scalar_lea.hbm %s10504_s8, 64 }
 0x107   :  { %p8775_p6 = scmp.ne.s32.totalorder %s10504_s8, %s8774_s30  ;;  %p8778_p7 = scmp.lt.u32.totalorder %s8774_s30, %s10504_s8 }
 0x109   :  { %p8780_p8 = pnand %p8778_p7, %p8775_p6 }
 0x10b   :  { %8783 = shalt.err (!%p8780_p8)
}
 0x10c   :  { %s8784_s26 = scalar_lea.vmem %s134_s7, 64  ;;  %p8789_p10 = scmp.lt.s32.totalorder %s134_s7, %s134_s7 }
 0x10d   :  { %p8785_p9 = scmp.ne.s32.totalorder %s134_s7, %s8784_s26  ;;  %p8790_p11 = scmp.lt.s32.totalorder %s8784_s26, %s8784_s26 }
 0x10f   :  { %p8791_p12 = por %p8790_p11, %p8789_p10 }
 0x111   :  { %p8792_p13 = pnand %p8791_p12, %p8785_p9 }
 0x113   :  { %8795 = shalt.err (!%p8792_p13)
}
 0x114   :  { %139 = dma.hbm_to_vmem [thread:$0]  %s10504_s8, 64, %s134_s7, [#allocation16], %s8958_s5, %s8958_s5, %s8959_s25  }
 0x115   :  { %s8975_s0 = smov [#allocation20]   ;;  %s8796_s13 = scalar_lea.hbm %s10506_s10, 65536 }
 0x116   :  { %s157_s23 = sshll.u32 %s8975_s0, 4  ;;  %p8797_p0 = scmp.ne.s32.totalorder %s10506_s10, %s8796_s13  ;;  %s158_s23 = int_to_ptr.vmem [resolvable:$true] %s157_s23 }
 0x117   :  { %p8800_p1 = scmp.lt.u32.totalorder %s8796_s13, %s10506_s10 }
 0x119   :  { %p8802_p2 = pnand %p8800_p1, %p8797_p0 }
 0x11b   :  { %8805 = shalt.err (!%p8802_p2)
}
 0x11c   :  { %s8806_s1 = scalar_lea.vmem %s158_s23, 65536  ;;  %p8811_p4 = scmp.lt.s32.totalorder %s158_s23, %s158_s23 }
 0x11d   :  { %p8807_p3 = scmp.ne.s32.totalorder %s158_s23, %s8806_s1  ;;  %p8812_p5 = scmp.lt.s32.totalorder %s8806_s1, %s8806_s1 }
 0x11f   :  { %p8813_p6 = por %p8812_p5, %p8811_p4 }
 0x121   :  { %p8814_p7 = pnand %p8813_p6, %p8807_p3 }
 0x123   :  { %8817 = shalt.err (!%p8814_p7)
}
 0x124   :  { %s8976_s8 = smov 1024   ;;  %s8977_s7 = smov 64  }
 0x125   :  { %163 = dma.hbm_to_vmem [thread:$0]  %s10506_s10, 65536, %s158_s23, [#allocation19], %s8976_s8, %s8976_s8, %s8977_s7  }
 0x126   :  { %s8978_s28 = smov [#allocation23]   ;;  %s8979_s11 = smov [#allocation26]  }
 0x127   :  { %s181_s30 = sshll.u32 %s8978_s28, 4  ;;  %s205_s9 = sshll.u32 %s8979_s11, 4  ;;  %s182_s30 = int_to_ptr.vmem [resolvable:$true] %s181_s30  ;;  %s9314_s9 = int_to_ptr.vmem [resolvable:$true] %s205_s9 }
 0x128   :  { %s8818_s26 = scalar_lea.hbm %s10508_s12, 65536 }
 0x129   :  { %p8819_p8 = scmp.ne.s32.totalorder %s10508_s12, %s8818_s26  ;;  %p8822_p9 = scmp.lt.u32.totalorder %s8818_s26, %s10508_s12 }
 0x12b   :  { %p8824_p10 = pnand %p8822_p9, %p8819_p8 }
 0x12d   :  { %8827 = shalt.err (!%p8824_p10)
}
 0x12e   :  { %s8828_s10 = scalar_lea.vmem %s182_s30, 65536  ;;  %p8833_p12 = scmp.lt.s32.totalorder %s182_s30, %s182_s30 }
 0x12f   :  { %p8829_p11 = scmp.ne.s32.totalorder %s182_s30, %s8828_s10  ;;  %p8834_p13 = scmp.lt.s32.totalorder %s8828_s10, %s8828_s10 }
 0x131   :  { %p8835_p0 = por %p8834_p13, %p8833_p12 }
 0x133   :  { %p8836_p1 = pnand %p8835_p0, %p8829_p11 }
 0x135   :  { %8839 = shalt.err (!%p8836_p1)
}
 0x136   :  { %187 = dma.hbm_to_vmem [thread:$0]  %s10508_s12, 65536, %s182_s30, [#allocation22], %s8968_s17, %s8968_s17, %s8951_s29  }
 0x137   :  { %s8840_s3 = scalar_lea.hbm %s10510_s14, 64 }
 0x138   :  { %p8841_p2 = scmp.ne.s32.totalorder %s10510_s14, %s8840_s3  ;;  %p8844_p3 = scmp.lt.u32.totalorder %s8840_s3, %s10510_s14 }
 0x13a   :  { %p8846_p4 = pnand %p8844_p3, %p8841_p2 }
 0x13c   :  { %8849 = shalt.err (!%p8846_p4)
}
 0x13d   :  { %s8850_s7 = scalar_lea.vmem %s9314_s9, 64  ;;  %p8855_p6 = scmp.lt.s32.totalorder %s9314_s9, %s9314_s9 }
 0x13e   :  { %p8851_p5 = scmp.ne.s32.totalorder %s9314_s9, %s8850_s7  ;;  %p8856_p7 = scmp.lt.s32.totalorder %s8850_s7, %s8850_s7 }
 0x140   :  { %p8857_p8 = por %p8856_p7, %p8855_p6 }
 0x142   :  { %p8858_p9 = pnand %p8857_p8, %p8851_p5 }
 0x144   :  { %8861 = shalt.err (!%p8858_p9)
}
 0x145   :  { %211 = dma.hbm_to_vmem [thread:$0]  %s10510_s14, 64, %s9314_s9, [#allocation25], %s8958_s5, %s8958_s5, %s8959_s25  }
 0x146   :  { %s8980_s4 = smov [#allocation29]   ;;  %s8981_s30 = smov [#allocation32]  }
 0x147   :  { %s229_s28 = sshll.u32 %s8980_s4, 4  ;;  %s254_s11 = sshll.u32 %s8981_s30, 4  ;;  %s230_s28 = int_to_ptr.vmem [resolvable:$true] %s229_s28  ;;  %s255_s11 = int_to_ptr.vmem [resolvable:$true] %s254_s11 }
 0x148   :  { %s8862_s26 = scalar_lea.hbm %s10512_s16, 8192 }
 0x149   :  { %p8863_p10 = scmp.ne.s32.totalorder %s10512_s16, %s8862_s26  ;;  %p8866_p11 = scmp.lt.u32.totalorder %s8862_s26, %s10512_s16 }
 0x14b   :  { %p8868_p12 = pnand %p8866_p11, %p8863_p10 }
 0x14d   :  { %8871 = shalt.err (!%p8868_p12)
}
 0x14e   :  { %s8872_s14 = scalar_lea.vmem %s230_s28, 8192  ;;  %p8877_p0 = scmp.lt.s32.totalorder %s230_s28, %s230_s28 }
 0x14f   :  { %p8873_p13 = scmp.ne.s32.totalorder %s230_s28, %s8872_s14  ;;  %p8878_p1 = scmp.lt.s32.totalorder %s8872_s14, %s8872_s14 }
 0x151   :  { %p8879_p2 = por %p8878_p1, %p8877_p0 }
 0x153   :  { %p8880_p3 = pnand %p8879_p2, %p8873_p13 }
 0x155   :  { %8883 = shalt.err (!%p8880_p3)
}
 0x156   :  { %235 = dma.hbm_to_vmem [thread:$0]  %s10512_s16, 8192, %s230_s28, [#allocation28], %s8968_s17, %s8968_s17, %s8951_s29  }
 0x157   :  { %s10538_s23 = sld [smem:[#allocation51_spill]] }
 0x15d   :  { %s8884_s19 = scalar_lea.hbm %s10538_s23, 16 }
 0x15e   :  { %p8885_p4 = scmp.ne.s32.totalorder %s10538_s23, %s8884_s19  ;;  %p8888_p5 = scmp.lt.u32.totalorder %s8884_s19, %s10538_s23 }
 0x160   :  { %p8890_p6 = pnand %p8888_p5, %p8885_p4 }
 0x162   :  { %8893 = shalt.err (!%p8890_p6)
}
 0x163   :  { %s8894_s2 = scalar_lea.vmem %s255_s11, 16  ;;  %s8898_s1 = scalar_lea.vmem %s255_s11, 32 }
 0x164   :  { %p8895_p7 = scmp.ne.s32.totalorder %s255_s11, %s8894_s2  ;;  %p8899_p8 = scmp.lt.s32.totalorder %s255_s11, %s255_s11 }
 0x165   :  { %p8900_p9 = scmp.lt.s32.totalorder %s8898_s1, %s8894_s2 }
 0x167   :  { %p8901_p10 = por %p8900_p9, %p8899_p8 }
 0x169   :  { %p8902_p11 = pnand %p8901_p10, %p8895_p7 }
 0x16b   :  { %8905 = shalt.err (!%p8902_p11)
}
 0x16c   :  { %257 = dma.hbm_to_vmem [thread:$0]  %s10538_s23, 16, %s255_s11, [#allocation31]  }
 0x16d   :  { %8928 = dma.done.wait [#allocation4], 512  }
 0x16e   :  { %8929 = vsyncadd [#allocation4], 4294966784 }
 0x16f   :  { %8930 = dma.done.wait [#allocation7], 64  }
 0x170   :  { %8931 = vsyncadd [#allocation7], 4294967232 }
 0x171   :  { %8932 = dma.done.wait [#allocation10], 49184  }
 0x172   :  { %8933 = vsyncadd [#allocation10], 4294918112 }
 0x173   :  { %8934 = dma.done.wait [#allocation13], 16576  }
 0x174   :  { %8935 = vsyncadd [#allocation13], 4294950720 }
 0x175   :  { %8936 = dma.done.wait [#allocation16], 128  }
 0x176   :  { %8937 = vsyncadd [#allocation16], 4294967168 }
 0x177   :  { %8938 = dma.done.wait [#allocation19], 65600  }
 0x178   :  { %8939 = vsyncadd [#allocation19], 4294901696 }
 0x179   :  { %8940 = dma.done.wait [#allocation22], 65792  }
 0x17a   :  { %8941 = vsyncadd [#allocation22], 4294901504 }
 0x17b   :  { %8942 = dma.done.wait [#allocation25], 128  }
 0x17c   :  { %8943 = vsyncadd [#allocation25], 4294967168 }
 0x17d   :  { %8944 = dma.done.wait [#allocation28], 8256  }
 0x17e   :  { %8945 = vsyncadd [#allocation28], 4294959040 }
 0x17f   :  { %8946 = dma.done.wait [#allocation31], 48  }
 0x180   :  { %8947 = vsyncadd [#allocation31], 4294967248  ;;  %v9378_v0 = vld [vmem:[#allocation3] sm:$0xff]  ;;  %v9380_v1 = vld [vmem:[#allocation3 + $0x8] sm:$0xff]  ;;  %vm8983_vm0 = vmmov 0   ;;  %vm916_vm1 = vcmask 64512  }
 0x181   :  { %v9382_v2 = vld [vmem:[#allocation3 + $0x10] sm:$0xff]  ;;  %v321_v3 = vadd.f32 %v9380_v1, %v9378_v0  ;;  %v9386_v4 = vld [vmem:[#allocation3 + $0x18] sm:$0xff]  ;;  %v384_v8 = vld [vmem:[#allocation11] sm:$0xff]  ;;  %s10539_s7 = sld [smem:[#allocation50_spill]]  ;;  %vm6066_vm2 = vcmask 8192  }
 0x182   :  { %v324_v5 = vadd.f32 %v9386_v4, %v9382_v2  ;;  %v385_v6 = vld [vmem:[#allocation11 + $0x8] sm:$0xff]  ;;  %v391_v7 = vld [vmem:[#allocation11 + $0x38] sm:$0xff]  ;;  %v390_v10 = vld [vmem:[#allocation11 + $0x30] sm:$0xff] }
 0x183   :  { %322 = vadd.xlane.f32.xlu0 %v321_v3  ;;  %v6561_v9 = vpack.c.bf16 %v391_v7, %v385_v6  ;;  %v387_v11 = vld [vmem:[#allocation11 + $0x18] sm:$0xff]  ;;  %v393_v12 = vld [vmem:[#allocation11 + $0x48] sm:$0xff]  ;;  %v6563_v13 = vpack.c.bf16 %v390_v10, %v384_v8  ;;  %v386_v15 = vld [vmem:[#allocation11 + $0x10] sm:$0xff] }
 0x184   :  { %325 = vadd.xlane.f32.xlu1 %v324_v5  ;;  %v6625_v14 = vpack.c.bf16 %v393_v12, %v387_v11  ;;  %v392_v16 = vld [vmem:[#allocation11 + $0x40] sm:$0xff]  ;;  %v397_v17 = vld [vmem:[#allocation11 + $0x68] sm:$0xff]  ;;  %v403_v19 = vld [vmem:[#allocation11 + $0x98] sm:$0xff] }
 0x185   :  { %6562 = vmatprep.subr.bf16.mxu0 %v6561_v9  ;;  %v6627_v18 = vpack.c.bf16 %v392_v16, %v386_v15  ;;  %v396_v20 = vld [vmem:[#allocation11 + $0x60] sm:$0xff]  ;;  %v402_v21 = vld [vmem:[#allocation11 + $0x90] sm:$0xff]  ;;  %v6565_v22 = vpack.c.bf16 %v403_v19, %v397_v17  ;;  %v399_v24 = vld [vmem:[#allocation11 + $0x78] sm:$0xff] }
 0x186   :  { %6564 = vmatpush1.bf16.msra.mxu0 %v6563_v13  ;;  %6626 = vmatprep.subr.bf16.mxu1 %v6625_v14  ;;  %v6567_v23 = vpack.c.bf16 %v402_v21, %v396_v20  ;;  %v405_v25 = vld [vmem:[#allocation11 + $0xa8] sm:$0xff]  ;;  %v398_v26 = vld [vmem:[#allocation11 + $0x70] sm:$0xff]  ;;  %v404_v28 = vld [vmem:[#allocation11 + $0xa0] sm:$0xff] }
 0x187   :  { %6628 = vmatpush1.bf16.msra.mxu1 %v6627_v18  ;;  %v6629_v27 = vpack.c.bf16 %v405_v25, %v399_v24  ;;  %v409_v29 = vld [vmem:[#allocation11 + $0xc8] sm:$0xff]  ;;  %v415_v30 = vld [vmem:[#allocation11 + $0xf8] sm:$0xff]  ;;  %6566 = vmatprep.subr.bf16.mxu0 %v6565_v22  ;;  %v6631_v31 = vpack.c.bf16 %v404_v28, %v398_v26  ;;  %v408_v33 = vld [vmem:[#allocation11 + $0xc0] sm:$0xff] }
 0x188   :  { %v6569_v32 = vpack.c.bf16 %v415_v30, %v409_v29  ;;  %v414_v34 = vld [vmem:[#allocation11 + $0xf0] sm:$0xff]  ;;  %v411_v35 = vld [vmem:[#allocation11 + $0xd8] sm:$0xff]  ;;  %v417_v36 = vld [vmem:[#allocation11 + $0x108] sm:$0xff] }
 0x189   :  { %6630 = vmatprep.subr.bf16.mxu1 %v6629_v27  ;;  %v410_v37 = vld [vmem:[#allocation11 + $0xd0] sm:$0xff]  ;;  %v416_v38 = vld [vmem:[#allocation11 + $0x100] sm:$0xff]  ;;  %v6571_v39 = vpack.c.bf16 %v414_v34, %v408_v33  ;;  %v6633_v40 = vpack.c.bf16 %v417_v36, %v411_v35  ;;  %v421_v41 = vld [vmem:[#allocation11 + $0x128] sm:$0xff] }
 0x18a   :  { %6568 = vmatpush1.bf16.msra.mxu0 %v6567_v23  ;;  %v427_v42 = vld [vmem:[#allocation11 + $0x158] sm:$0xff]  ;;  %v420_v43 = vld [vmem:[#allocation11 + $0x120] sm:$0xff]  ;;  %v6635_v44 = vpack.c.bf16 %v416_v38, %v410_v37  ;;  %v426_v46 = vld [vmem:[#allocation11 + $0x150] sm:$0xff] }
 0x18b   :  { %6632 = vmatpush1.bf16.msra.mxu1 %v6631_v31  ;;  %6570 = vmatprep.subr.bf16.mxu0 %v6569_v32  ;;  %v6573_v45 = vpack.c.bf16 %v427_v42, %v421_v41  ;;  %v423_v47 = vld [vmem:[#allocation11 + $0x138] sm:$0xff]  ;;  %v429_v48 = vld [vmem:[#allocation11 + $0x168] sm:$0xff]  ;;  %v422_v50 = vld [vmem:[#allocation11 + $0x130] sm:$0xff]  ;;  %v6575_v54 = vpack.c.bf16 %v426_v46, %v420_v43 }
 0x18c   :  { %6634 = vmatprep.subr.bf16.mxu1 %v6633_v40  ;;  %v6637_v49 = vpack.c.bf16 %v429_v48, %v423_v47  ;;  %v428_v51 = vld [vmem:[#allocation11 + $0x160] sm:$0xff]  ;;  %v433_v52 = vld [vmem:[#allocation11 + $0x188] sm:$0xff]  ;;  %v439_v53 = vld [vmem:[#allocation11 + $0x1b8] sm:$0xff] }
 0x18d   :  { %v435_v55 = vld [vmem:[#allocation11 + $0x198] sm:$0xff]  ;;  %v441_v56 = vld [vmem:[#allocation11 + $0x1c8] sm:$0xff]  ;;  %v6639_v57 = vpack.c.bf16 %v428_v51, %v422_v50  ;;  %v6577_v58 = vpack.c.bf16 %v439_v53, %v433_v52  ;;  %v432_v59 = vld [vmem:[#allocation11 + $0x180] sm:$0xff] }
 0x18e   :  { %6572 = vmatpush1.bf16.msra.mxu0 %v6571_v39  ;;  %v438_v60 = vld [vmem:[#allocation11 + $0x1b0] sm:$0xff]  ;;  %v6641_v62 = vpack.c.bf16 %v441_v56, %v435_v55  ;;  %v440_v63 = vld [vmem:[#allocation11 + $0x1c0] sm:$0xff]  ;;  %v445_v3 = vld [vmem:[#allocation11 + $0x1e8] sm:$0xff] }
 0x18f   :  { %6636 = vmatpush1.bf16.msra.mxu1 %v6635_v44  ;;  %6574 = vmatprep.subr.bf16.mxu0 %v6573_v45  ;;  %v434_v61 = vld [vmem:[#allocation11 + $0x190] sm:$0xff]  ;;  %v451_v5 = vld [vmem:[#allocation11 + $0x218] sm:$0xff]  ;;  %v453_v7 = vld [vmem:[#allocation11 + $0x228] sm:$0xff]  ;;  %v6579_v8 = vpack.c.bf16 %v438_v60, %v432_v59 }
 0x190   :  { %6638 = vmatprep.subr.bf16.mxu1 %v6637_v49  ;;  %v447_v6 = vld [vmem:[#allocation11 + $0x1f8] sm:$0xff]  ;;  %v6643_v9 = vpack.c.bf16 %v440_v63, %v434_v61  ;;  %v6581_v10 = vpack.c.bf16 %v451_v5, %v445_v3  ;;  %v444_v11 = vld [vmem:[#allocation11 + $0x1e0] sm:$0xff]  ;;  %v450_v12 = vld [vmem:[#allocation11 + $0x210] sm:$0xff] }
 0x191   :  { %v446_v13 = vld [vmem:[#allocation11 + $0x1f0] sm:$0xff]  ;;  %v6645_v14 = vpack.c.bf16 %v453_v7, %v447_v6  ;;  %v452_v15 = vld [vmem:[#allocation11 + $0x220] sm:$0xff]  ;;  %v457_v16 = vld [vmem:[#allocation11 + $0x248] sm:$0xff]  ;;  %v6583_v20 = vpack.c.bf16 %v450_v12, %v444_v11 }
 0x192   :  { %6576 = vmatpush1.bf16.msra.mxu0 %v6575_v54  ;;  %v463_v17 = vld [vmem:[#allocation11 + $0x278] sm:$0xff]  ;;  %v465_v19 = vld [vmem:[#allocation11 + $0x288] sm:$0xff]  ;;  %v6647_v21 = vpack.c.bf16 %v452_v15, %v446_v13  ;;  %v456_v23 = vld [vmem:[#allocation11 + $0x240] sm:$0xff] }
 0x193   :  { %6640 = vmatpush1.bf16.msra.mxu1 %v6639_v57  ;;  %6578 = vmatprep.subr.bf16.mxu0 %v6577_v58  ;;  %v459_v18 = vld [vmem:[#allocation11 + $0x258] sm:$0xff]  ;;  %v6585_v22 = vpack.c.bf16 %v463_v17, %v457_v16  ;;  %v462_v24 = vld [vmem:[#allocation11 + $0x270] sm:$0xff]  ;;  %v464_v27 = vld [vmem:[#allocation11 + $0x280] sm:$0xff] }
 0x194   :  { %6642 = vmatprep.subr.bf16.mxu1 %v6641_v62  ;;  %v458_v25 = vld [vmem:[#allocation11 + $0x250] sm:$0xff]  ;;  %v6649_v26 = vpack.c.bf16 %v465_v19, %v459_v18  ;;  %v469_v28 = vld [vmem:[#allocation11 + $0x2a8] sm:$0xff]  ;;  %v475_v29 = vld [vmem:[#allocation11 + $0x2d8] sm:$0xff]  ;;  %v6587_v32 = vpack.c.bf16 %v462_v24, %v456_v23 }
 0x195   :  { %v471_v30 = vld [vmem:[#allocation11 + $0x2b8] sm:$0xff]  ;;  %v477_v31 = vld [vmem:[#allocation11 + $0x2e8] sm:$0xff]  ;;  %v6651_v33 = vpack.c.bf16 %v464_v27, %v458_v25  ;;  %v6589_v34 = vpack.c.bf16 %v475_v29, %v469_v28  ;;  %v468_v35 = vld [vmem:[#allocation11 + $0x2a0] sm:$0xff] }
 0x196   :  { %6580 = vmatpush1.bf16.msra.mxu0 %v6579_v8  ;;  %v474_v36 = vld [vmem:[#allocation11 + $0x2d0] sm:$0xff]  ;;  %v6653_v38 = vpack.c.bf16 %v477_v31, %v471_v30  ;;  %v476_v39 = vld [vmem:[#allocation11 + $0x2e0] sm:$0xff]  ;;  %v481_v40 = vld [vmem:[#allocation11 + $0x308] sm:$0xff] }
 0x197   :  { %6644 = vmatpush1.bf16.msra.mxu1 %v6643_v9  ;;  %6582 = vmatprep.subr.bf16.mxu0 %v6581_v10  ;;  %v470_v37 = vld [vmem:[#allocation11 + $0x2b0] sm:$0xff]  ;;  %v487_v41 = vld [vmem:[#allocation11 + $0x338] sm:$0xff]  ;;  %v489_v43 = vld [vmem:[#allocation11 + $0x348] sm:$0xff]  ;;  %v6591_v44 = vpack.c.bf16 %v474_v36, %v468_v35 }
 0x198   :  { %6646 = vmatprep.subr.bf16.mxu1 %v6645_v14  ;;  %v483_v42 = vld [vmem:[#allocation11 + $0x318] sm:$0xff]  ;;  %v6655_v45 = vpack.c.bf16 %v476_v39, %v470_v37  ;;  %v6593_v46 = vpack.c.bf16 %v487_v41, %v481_v40  ;;  %v480_v47 = vld [vmem:[#allocation11 + $0x300] sm:$0xff]  ;;  %v486_v48 = vld [vmem:[#allocation11 + $0x330] sm:$0xff] }
 0x199   :  { %v482_v49 = vld [vmem:[#allocation11 + $0x310] sm:$0xff]  ;;  %v6657_v50 = vpack.c.bf16 %v489_v43, %v483_v42  ;;  %v488_v51 = vld [vmem:[#allocation11 + $0x340] sm:$0xff]  ;;  %v493_v52 = vld [vmem:[#allocation11 + $0x368] sm:$0xff]  ;;  %v6595_v56 = vpack.c.bf16 %v486_v48, %v480_v47 }
 0x19a   :  { %6584 = vmatpush1.bf16.msra.mxu0 %v6583_v20  ;;  %v499_v53 = vld [vmem:[#allocation11 + $0x398] sm:$0xff]  ;;  %v501_v55 = vld [vmem:[#allocation11 + $0x3a8] sm:$0xff]  ;;  %v6659_v57 = vpack.c.bf16 %v488_v51, %v482_v49  ;;  %v492_v59 = vld [vmem:[#allocation11 + $0x360] sm:$0xff] }
 0x19b   :  { %6648 = vmatpush1.bf16.msra.mxu1 %v6647_v21  ;;  %6586 = vmatprep.subr.bf16.mxu0 %v6585_v22  ;;  %v495_v54 = vld [vmem:[#allocation11 + $0x378] sm:$0xff]  ;;  %v6597_v58 = vpack.c.bf16 %v499_v53, %v493_v52  ;;  %v498_v60 = vld [vmem:[#allocation11 + $0x390] sm:$0xff]  ;;  %v500_v63 = vld [vmem:[#allocation11 + $0x3a0] sm:$0xff] }
 0x19c   :  { %6650 = vmatprep.subr.bf16.mxu1 %v6649_v26  ;;  %v494_v61 = vld [vmem:[#allocation11 + $0x370] sm:$0xff]  ;;  %v6661_v62 = vpack.c.bf16 %v501_v55, %v495_v54  ;;  %v505_v3 = vld [vmem:[#allocation11 + $0x3c8] sm:$0xff]  ;;  %v511_v5 = vld [vmem:[#allocation11 + $0x3f8] sm:$0xff]  ;;  %v6599_v8 = vpack.c.bf16 %v498_v60, %v492_v59 }
 0x19d   :  { %v507_v6 = vld [vmem:[#allocation11 + $0x3d8] sm:$0xff]  ;;  %v513_v7 = vld [vmem:[#allocation11 + $0x408] sm:$0xff]  ;;  %v6663_v9 = vpack.c.bf16 %v500_v63, %v494_v61  ;;  %v6601_v10 = vpack.c.bf16 %v511_v5, %v505_v3  ;;  %v504_v11 = vld [vmem:[#allocation11 + $0x3c0] sm:$0xff] }
 0x19e   :  { %6588 = vmatpush1.bf16.msra.mxu0 %v6587_v32  ;;  %v510_v12 = vld [vmem:[#allocation11 + $0x3f0] sm:$0xff]  ;;  %v6665_v13 = vpack.c.bf16 %v513_v7, %v507_v6  ;;  %v512_v15 = vld [vmem:[#allocation11 + $0x400] sm:$0xff]  ;;  %v523_v30 = vld [vmem:[#allocation11 + $0x458] sm:$0xff] }
 0x19f   :  { %6652 = vmatpush1.bf16.msra.mxu1 %v6651_v33  ;;  %6590 = vmatprep.subr.bf16.mxu0 %v6589_v34  ;;  %v506_v14 = vld [vmem:[#allocation11 + $0x3d0] sm:$0xff]  ;;  %v6603_v16 = vpack.c.bf16 %v510_v12, %v504_v11  ;;  %v516_v31 = vld [vmem:[#allocation11 + $0x420] sm:$0xff]  ;;  %v519_v33 = vld [vmem:[#allocation11 + $0x438] sm:$0xff] }
 0x1a0   :  { %6654 = vmatprep.subr.bf16.mxu1 %v6653_v38  ;;  %v6667_v17 = vpack.c.bf16 %v512_v15, %v506_v14  ;;  %v522_v32 = vld [vmem:[#allocation11 + $0x450] sm:$0xff]  ;;  %v525_v35 = vld [vmem:[#allocation11 + $0x468] sm:$0xff]  ;;  %v524_v37 = vld [vmem:[#allocation11 + $0x460] sm:$0xff] }
 0x1a1   :  { %v6607_v34 = vpack.c.bf16 %v522_v32, %v516_v31  ;;  %v518_v36 = vld [vmem:[#allocation11 + $0x430] sm:$0xff]  ;;  %v6669_v38 = vpack.c.bf16 %v525_v35, %v519_v33  ;;  %v529_v40 = vld [vmem:[#allocation11 + $0x488] sm:$0xff]  ;;  %v535_v41 = vld [vmem:[#allocation11 + $0x4b8] sm:$0xff]  ;;  %v355_v35 = vlaneseq }
 0x1a2   :  { %6592 = vmatpush1.bf16.msra.mxu0 %v6591_v44  ;;  %v6671_v39 = vpack.c.bf16 %v524_v37, %v518_v36  ;;  %v6609_v42 = vpack.c.bf16 %v535_v41, %v529_v40  ;;  %v528_v43 = vld [vmem:[#allocation11 + $0x480] sm:$0xff]  ;;  %v534_v44 = vld [vmem:[#allocation11 + $0x4b0] sm:$0xff]  ;;  %v537_v47 = vld [vmem:[#allocation11 + $0x4c8] sm:$0xff] }
 0x1a3   :  { %6656 = vmatpush1.bf16.msra.mxu1 %v6655_v45  ;;  %6594 = vmatprep.subr.bf16.mxu0 %v6593_v46  ;;  %v531_v45 = vld [vmem:[#allocation11 + $0x498] sm:$0xff]  ;;  %v6611_v46 = vpack.c.bf16 %v534_v44, %v528_v43  ;;  %v530_v48 = vld [vmem:[#allocation11 + $0x490] sm:$0xff]  ;;  %v536_v49 = vld [vmem:[#allocation11 + $0x4c0] sm:$0xff] }
 0x1a4   :  { %6658 = vmatprep.subr.bf16.mxu1 %v6657_v50  ;;  %v6673_v50 = vpack.c.bf16 %v537_v47, %v531_v45  ;;  %v6675_v51 = vpack.c.bf16 %v536_v49, %v530_v48  ;;  %v541_v52 = vld [vmem:[#allocation11 + $0x4e8] sm:$0xff]  ;;  %v547_v53 = vld [vmem:[#allocation11 + $0x518] sm:$0xff]  ;;  %v540_v54 = vld [vmem:[#allocation11 + $0x4e0] sm:$0xff] }
 0x1a5   :  { %v6613_v55 = vpack.c.bf16 %v547_v53, %v541_v52  ;;  %v542_v61 = vld [vmem:[#allocation11 + $0x4f0] sm:$0xff]  ;;  %v553_v63 = vld [vmem:[#allocation11 + $0x548] sm:$0xff]  ;;  %v559_v5 = vld [vmem:[#allocation11 + $0x578] sm:$0xff] }
 0x1a6   :  { %6596 = vmatpush1.bf16.msra.mxu0 %v6595_v56  ;;  %v546_v56 = vld [vmem:[#allocation11 + $0x510] sm:$0xff]  ;;  %v552_v6 = vld [vmem:[#allocation11 + $0x540] sm:$0xff]  ;;  %v565_v15 = vld [vmem:[#allocation11 + $0x5a8] sm:$0xff] }
 0x1a7   :  { %6660 = vmatpush1.bf16.msra.mxu1 %v6659_v57  ;;  %6598 = vmatprep.subr.bf16.mxu0 %v6597_v58  ;;  %v543_v57 = vld [vmem:[#allocation11 + $0x4f8] sm:$0xff]  ;;  %v549_v58 = vld [vmem:[#allocation11 + $0x528] sm:$0xff]  ;;  %v6615_v59 = vpack.c.bf16 %v546_v56, %v540_v54  ;;  %v558_v7 = vld [vmem:[#allocation11 + $0x570] sm:$0xff] }
 0x1a8   :  { %6662 = vmatprep.subr.bf16.mxu1 %v6661_v62  ;;  %v6677_v60 = vpack.c.bf16 %v549_v58, %v543_v57  ;;  %v548_v62 = vld [vmem:[#allocation11 + $0x520] sm:$0xff]  ;;  %v554_v11 = vld [vmem:[#allocation11 + $0x550] sm:$0xff]  ;;  %v6619_v12 = vpack.c.bf16 %v558_v7, %v552_v6  ;;  %v319_v41 = vld [vmem:[#allocation8] sm:$0x3] }
 0x1a9   :  { %v6679_v3 = vpack.c.bf16 %v548_v62, %v542_v61  ;;  %v560_v14 = vld [vmem:[#allocation11 + $0x580] sm:$0xff]  ;;  %v394_v52 = vld [vmem:[#allocation11 + $0x50] sm:$0xff]  ;;  %v401_v57 = vld [vmem:[#allocation11 + $0x88] sm:$0xff] }
 0x1aa   :  { %6600 = vmatpush1.bf16.msra.mxu0 %v6599_v8  ;;  %v6617_v8 = vpack.c.bf16 %v559_v5, %v553_v63  ;;  %v407_v58 = vld [vmem:[#allocation11 + $0xb8] sm:$0xff]  ;;  %v406_v5 = vld [vmem:[#allocation11 + $0xb0] sm:$0xff] }
 0x1ab   :  { %6664 = vmatpush1.bf16.msra.mxu1 %v6663_v9  ;;  %6602 = vmatprep.subr.bf16.mxu0 %v6601_v10  ;;  %v555_v9 = vld [vmem:[#allocation11 + $0x558] sm:$0xff]  ;;  %v561_v10 = vld [vmem:[#allocation11 + $0x588] sm:$0xff]  ;;  %v6693_v63 = vpack.c.bf16 %v407_v58, %v401_v57 }
 0x1ac   :  { %6666 = vmatprep.subr.bf16.mxu1 %v6665_v13  ;;  %v6681_v13 = vpack.c.bf16 %v561_v10, %v555_v9  ;;  %v412_v9 = vld [vmem:[#allocation11 + $0xe0] sm:$0xff]  ;;  %v418_v10 = vld [vmem:[#allocation11 + $0x110] sm:$0xff]  ;;  %v515_v57 = vld [vmem:[#allocation11 + $0x418] sm:$0xff] }
 0x1ae   :  { %6604 = vmatpush1.bf16.msra.mxu0 %v6603_v16  ;;  %v571_v16 = vld [vmem:[#allocation11 + $0x5d8] sm:$0xff] }
 0x1af   :  { %6668 = vmatpush1.bf16.msra.mxu1 %v6667_v17  ;;  %v6621_v17 = vpack.c.bf16 %v571_v16, %v565_v15  ;;  %v424_v15 = vld [vmem:[#allocation11 + $0x140] sm:$0xff]  ;;  %v430_v16 = vld [vmem:[#allocation11 + $0x170] sm:$0xff] }
 0x1b0   :  { %6670 = vmatprep.subr.bf16.mxu1 %v6669_v38  ;;  %v9410_v38 = vshrl.u32 %v355_v35, 7  ;;  %v473_v35 = vld [vmem:[#allocation11 + $0x2c8] sm:$0xff] }
 0x1b2   :  { %v9416_v40 = vsub.s32 0, %v9410_v38 }
 0x1b3   :  { %6672 = vmatpush1.bf16.msra.mxu1 %v6671_v39  ;;  %v9413_v39 = vsub.s32 1, %v9410_v38 }
 0x1b4   :  { %6674 = vmatprep.subr.bf16.mxu1 %v6673_v50  ;;  %v358_v44 = vrot.slane %v319_v41, %v9416_v40 }
 0x1b5   :  { %v362_v43 = vrot.slane %v319_v41, %v9413_v39 }
 0x1b7   :  { %6676 = vmatpush1.bf16.msra.mxu1 %v6675_v51  ;;  %v388_v51 = vld [vmem:[#allocation11 + $0x20] sm:$0xff] }
 0x1b8   :  { %6678 = vmatprep.subr.bf16.mxu1 %v6677_v60  ;;  %v6691_v62 = vpack.c.bf16 %v394_v52, %v388_v51  ;;  %v503_v51 = vld [vmem:[#allocation11 + $0x3b8] sm:$0xff] }
 0x1bb   :  { %6680 = vmatpush1.bf16.msra.mxu1 %v6679_v3  ;;  %v400_v3 = vld [vmem:[#allocation11 + $0x80] sm:$0xff] }
 0x1bc   :  { %6682 = vmatprep.subr.bf16.mxu1 %v6681_v13  ;;  %v6695_v7 = vpack.c.bf16 %v406_v5, %v400_v3  ;;  %v6699_v13 = vpack.c.bf16 %v418_v10, %v412_v9  ;;  %v527_v3 = vld [vmem:[#allocation11 + $0x478] sm:$0xff] }
 0x1bd   :  { %v539_v9 = vld [vmem:[#allocation11 + $0x4d8] sm:$0xff] }
 0x210   :  { %v323_v18 = vpop.xlane.xlu0 %322 }
 0x211   :  { %v328_v19 = vmul.f32 0.00390625, %v323_v18  ;;  %v326_v20 = vpop.xlane.xlu1 %325  ;;  %v564_v18 = vld [vmem:[#allocation11 + $0x5a0] sm:$0xff] }
 0x212   :  { %v329_v21 = vmul.f32 0.00390625, %v326_v20  ;;  %v567_v20 = vld [vmem:[#allocation11 + $0x5b8] sm:$0xff] }
 0x213   :  { %v9391_v22 = vsub.f32 %v9378_v0, %v328_v19  ;;  %v9394_v23 = vsub.f32 %v9380_v1, %v328_v19  ;;  %v570_v19 = vld [vmem:[#allocation11 + $0x5d0] sm:$0xff] }
 0x214   :  { %v9397_v24 = vsub.f32 %v9382_v2, %v329_v21  ;;  %v9400_v25 = vsub.f32 %v9386_v4, %v329_v21  ;;  %v517_v2 = vld [vmem:[#allocation11 + $0x428] sm:$0xff]  ;;  %v6683_v21 = vpack.c.bf16 %v560_v14, %v554_v11 }
 0x215   :  { %v334_v26 = vmul.f32 %v9391_v22, %v9391_v22  ;;  %v335_v27 = vmul.f32 %v9394_v23, %v9394_v23  ;;  %v6605_v4 = vpack.c.bf16 %v523_v30, %v517_v2  ;;  %v389_v2 = vld [vmem:[#allocation11 + $0x28] sm:$0xff]  ;;  %v395_v30 = vld [vmem:[#allocation11 + $0x58] sm:$0xff] }
 0x216   :  { %v336_v28 = vmul.f32 %v9397_v24, %v9397_v24  ;;  %v337_v0 = vmul.f32 %v9400_v25, %v9400_v25  ;;  %6684 = vmatpush1.bf16.msra.mxu1 %v6683_v21  ;;  %v425_v11 = vld [vmem:[#allocation11 + $0x148] sm:$0xff]  ;;  %v436_v21 = vld [vmem:[#allocation11 + $0x1a0] sm:$0xff] }
 0x217   :  { %v338_v1 = vadd.f32 %v335_v27, %v334_v26  ;;  %6606 = vmatprep.subr.bf16.mxu0 %v6605_v4  ;;  %v573_v26 = vld [vmem:[#allocation11 + $0x5e8] sm:$0xff]  ;;  %v6689_v4 = vpack.c.bf16 %v395_v30, %v389_v2  ;;  %v454_v2 = vld [vmem:[#allocation11 + $0x230] sm:$0xff] }
 0x218   :  { %v341_v29 = vadd.f32 %v337_v0, %v336_v28  ;;  %6608 = vmatpush1.bf16.msra.mxu0 %v6607_v34  ;;  %v6685_v27 = vpack.c.bf16 %v573_v26, %v567_v20  ;;  %v566_v28 = vld [vmem:[#allocation11 + $0x5b0] sm:$0xff]  ;;  %v572_v0 = vld [vmem:[#allocation11 + $0x5e0] sm:$0xff]  ;;  %v461_v30 = vld [vmem:[#allocation11 + $0x268] sm:$0xff] }
 0x219   :  { %339 = vadd.xlane.f32.xlu0 %v338_v1  ;;  %6610 = vmatprep.subr.bf16.mxu0 %v6609_v42  ;;  %v6623_v1 = vpack.c.bf16 %v570_v19, %v564_v18  ;;  %v320_v42 = vld [vmem:[#allocation9] sm:$0x3]  ;;  %v6703_v19 = vpack.c.bf16 %v430_v16, %v424_v15  ;;  %v442_v26 = vld [vmem:[#allocation11 + $0x1d0] sm:$0xff] }
 0x21a   :  { %342 = vadd.xlane.f32.xlu1 %v341_v29  ;;  %v6687_v29 = vpack.c.bf16 %v572_v0, %v566_v28  ;;  %6686 = vmatprep.subr.bf16.mxu1 %v6685_v27  ;;  %v377_v48 = vrot.slane %v320_v42, %v9413_v39  ;;  %v373_v50 = vrot.slane %v320_v42, %v9416_v40  ;;  %v443_v18 = vld [vmem:[#allocation11 + $0x1d8] sm:$0xff]  ;;  %v449_v27 = vld [vmem:[#allocation11 + $0x208] sm:$0xff]  ;;  %v472_v42 = vld [vmem:[#allocation11 + $0x2c0] sm:$0xff] }
 0x21b   :  { %v455_v28 = vld [vmem:[#allocation11 + $0x238] sm:$0xff]  ;;  %v6707_v0 = vpack.c.bf16 %v442_v26, %v436_v21 }
 0x21c   :  { %6612 = vmatpush1.bf16.msra.mxu0 %v6611_v46  ;;  %6688 = vmatpush1.bf16.msra.mxu1 %v6687_v29  ;;  %v448_v29 = vld [vmem:[#allocation11 + $0x200] sm:$0xff]  ;;  %v551_v15 = vld [vmem:[#allocation11 + $0x538] sm:$0xff] }
 0x21d   :  { %6614 = vmatprep.subr.bf16.mxu0 %v6613_v55  ;;  %v563_v21 = vld [vmem:[#allocation11 + $0x598] sm:$0xff] }
 0x220   :  { %6616 = vmatpush1.bf16.msra.mxu0 %v6615_v59 }
 0x221   :  { %6618 = vmatprep.subr.bf16.mxu0 %v6617_v8 }
 0x224   :  { %6620 = vmatpush1.bf16.msra.mxu0 %v6619_v12  ;;  %v431_v12 = vld [vmem:[#allocation11 + $0x178] sm:$0xff] }
 0x225   :  { %6622 = vmatprep.subr.bf16.mxu0 %v6621_v17  ;;  %v6701_v14 = vpack.c.bf16 %v431_v12, %v425_v11  ;;  %v437_v17 = vld [vmem:[#allocation11 + $0x1a8] sm:$0xff]  ;;  %v532_v12 = vld [vmem:[#allocation11 + $0x4a0] sm:$0xff] }
 0x226   :  { %v6705_v20 = vpack.c.bf16 %v443_v18, %v437_v17  ;;  %v544_v18 = vld [vmem:[#allocation11 + $0x500] sm:$0xff] }
 0x228   :  { %6624 = vmatpush1.bf16.msra.mxu0 %v6623_v1  ;;  %v6709_v1 = vpack.c.bf16 %v455_v28, %v449_v27  ;;  %v556_v28 = vld [vmem:[#allocation11 + $0x560] sm:$0xff] }
 0x229   :  { %6690 = vmatprep.subr.bf16.mxu0 %v6689_v4  ;;  %v467_v4 = vld [vmem:[#allocation11 + $0x298] sm:$0xff] }
 0x2a6   :  { %v340_v31 = vpop.xlane.xlu0 %339 }
 0x2a7   :  { %v344_v32 = vmul.f32 0.00390625, %v340_v31  ;;  %v343_v33 = vpop.xlane.xlu1 %342  ;;  %v6711_v31 = vpack.c.bf16 %v454_v2, %v448_v29  ;;  %v575_v29 = vld [vmem:[#allocation11 + $0x5f8] sm:$0xff] }
 0x2a8   :  { %v345_v34 = vmul.f32 0.00390625, %v343_v33  ;;  %v460_v33 = vld [vmem:[#allocation11 + $0x260] sm:$0xff] }
 0x2a9   :  { %v346_v36 = vadd.f32 1e-12, %v344_v32  ;;  %v6713_v32 = vpack.c.bf16 %v467_v4, %v461_v30  ;;  %v568_v4 = vld [vmem:[#allocation11 + $0x5c0] sm:$0xff] }
 0x2aa   :  { %v347_v37 = vadd.f32 1e-12, %v345_v34  ;;  %v466_v34 = vld [vmem:[#allocation11 + $0x290] sm:$0xff] }
 0x2ab   :  { %8356 = vrsqrt.f32 %v346_v36  ;;  %v479_v36 = vld [vmem:[#allocation11 + $0x2f8] sm:$0xff] }
 0x2ac   :  { %8358 = vrsqrt.f32 %v347_v37  ;;  %v6715_v37 = vpack.c.bf16 %v466_v34, %v460_v33  ;;  %v6717_v41 = vpack.c.bf16 %v479_v36, %v473_v35  ;;  %v8982_v33 = vmov 0.0   ;;  %v576_v35 = vld [vmem:[#allocation12] sm:$0x3f] }
 0x2ad   :  { %6481 = vmatprep.subr.mxu1 %v8982_v33  ;;  %v9450_v34 = vsub.s32 2, %v9410_v38 }
 0x2af   :  { %v589_v36 = vrot.slane %v576_v35, %v9450_v34 }
 0x2b5   :  { %v8357_v45 = vpop.eup %8356 }
 0x2b6   :  { %v8359_v46 = vpop.eup %8358  ;;  %v351_v47 = vmul.f32 %v8357_v45, %v9394_v23  ;;  %v350_v49 = vmul.f32 %v8357_v45, %v9391_v22  ;;  %v491_v45 = vld [vmem:[#allocation11 + $0x358] sm:$0xff] }
 0x2b7   :  { %v353_v53 = vmul.f32 %v8359_v46, %v9400_v25  ;;  %v352_v54 = vmul.f32 %v8359_v46, %v9397_v24  ;;  %v413_v24 = vld [vmem:[#allocation11 + $0xe8] sm:$0xff]  ;;  %v419_v25 = vld [vmem:[#allocation11 + $0x118] sm:$0xff] }
 0x2b8   :  { %v366_v55 = vmul.f32 %v362_v43, %v351_v47  ;;  %v365_v56 = vmul.f32 %v358_v44, %v350_v49  ;;  %v6697_v8 = vpack.c.bf16 %v419_v25, %v413_v24  ;;  %v490_v49 = vld [vmem:[#allocation11 + $0x350] sm:$0xff]  ;;  %v520_v25 = vld [vmem:[#allocation11 + $0x440] sm:$0xff] }
 0x2b9   :  { %v368_v59 = vmul.f32 %v362_v43, %v353_v53  ;;  %v367_v60 = vmul.f32 %v358_v44, %v352_v54  ;;  %v478_v43 = vld [vmem:[#allocation11 + $0x2f0] sm:$0xff]  ;;  %v485_v44 = vld [vmem:[#allocation11 + $0x328] sm:$0xff]  ;;  %v496_v54 = vld [vmem:[#allocation11 + $0x380] sm:$0xff] }
 0x2ba   :  { %v9426_v61 = vadd.f32 %v377_v48, %v366_v55  ;;  %v9428_v23 = vadd.f32 %v373_v50, %v365_v56  ;;  %v6719_v46 = vpack.c.bf16 %v478_v43, %v472_v42  ;;  %v6721_v47 = vpack.c.bf16 %v491_v45, %v485_v44  ;;  %v502_v55 = vld [vmem:[#allocation11 + $0x3b0] sm:$0xff]  ;;  %v509_v56 = vld [vmem:[#allocation11 + $0x3e8] sm:$0xff] }
 0x2bb   :  { %v9430_v22 = vadd.f32 %v377_v48, %v368_v59  ;;  %v9436_v6 = vadd.f32 %v373_v50, %v367_v60  ;;  %v484_v48 = vld [vmem:[#allocation11 + $0x320] sm:$0xff]  ;;  %v497_v50 = vld [vmem:[#allocation11 + $0x388] sm:$0xff]  ;;  %v6727_v58 = vpack.c.bf16 %v502_v55, %v496_v54  ;;  %v6729_v59 = vpack.c.bf16 %v515_v57, %v509_v56 }
 0x2bc   :  { %672 = vmatprep.mubr.f32.mxu0 %v9426_v61  ;;  %749 = vmatprep.mubr.f32.mxu1 %v9426_v61  ;;  %v6723_v52 = vpack.c.bf16 %v490_v49, %v484_v48  ;;  %v6725_v53 = vpack.c.bf16 %v503_v51, %v497_v50  ;;  %v508_v60 = vld [vmem:[#allocation11 + $0x3e0] sm:$0xff]  ;;  %v9455_v43 = vsub.s32 3, %v9410_v38  ;;  %v585_v48 = vrot.slane %v576_v35, %v9413_v39 }
 0x2bd   :  { %673 = vmatmul.mubr.f32.vlgmr.msra.gmra.mrb[0].mxu0 %v9428_v23  ;;  %750 = vmatmul.mubr.f32.vlgmr.msra.gmra.mrb[0].mxu1 %v9428_v23 }
 0x2be   :  { %6692 = vmatpush1.bf16.msra.mxu0 %v6691_v62  ;;  %678 = vmatprep.mubr.f32.mxu0 %v9430_v22  ;;  %v514_v62 = vld [vmem:[#allocation11 + $0x410] sm:$0xff]  ;;  %v593_v49 = vrot.slane %v576_v35, %v9455_v43 }
 0x2bf   :  { %6694 = vmatprep.subr.bf16.mxu0 %v6693_v63  ;;  %755 = vmatprep.mubr.f32.mxu1 %v9430_v22  ;;  %v521_v63 = vld [vmem:[#allocation11 + $0x448] sm:$0xff]  ;;  %v6731_v5 = vpack.c.bf16 %v514_v62, %v508_v60  ;;  %v9475_v62 = vsub.s32 5, %v9410_v38 }
 0x2c0   :  { %v6733_v24 = vpack.c.bf16 %v527_v3, %v521_v63 }
 0x2c1   :  { %679 = vmatmul.mubr.f32.gmra.mrb[2].mxu0 %v9436_v6  ;;  %756 = vmatmul.mubr.f32.gmra.mrb[2].mxu1 %v9436_v6 }
 0x2c2   :  { %6696 = vmatpush1.bf16.msra.mxu0 %v6695_v7  ;;  %826 = vmatprep.mubr.f32.mxu0 %v9426_v61  ;;  %v526_v7 = vld [vmem:[#allocation11 + $0x470] sm:$0xff] }
 0x2c3   :  { %6698 = vmatprep.subr.bf16.mxu0 %v6697_v8  ;;  %v533_v8 = vld [vmem:[#allocation11 + $0x4a8] sm:$0xff]  ;;  %v6735_v10 = vpack.c.bf16 %v526_v7, %v520_v25  ;;  %6483 = vmatprep.mubr.msk.f32.mxu1 %vm8983_vm0, %v8982_v33 }
 0x2c4   :  { %v6737_v11 = vpack.c.bf16 %v539_v9, %v533_v8  ;;  %v6367_v9 = vld [vmem:[#allocation6] ss:$0 sm:$0xff] }
 0x2c6   :  { %6700 = vmatpush1.bf16.msra.mxu0 %v6699_v13  ;;  %v538_v13 = vld [vmem:[#allocation11 + $0x4d0] sm:$0xff] }
 0x2c7   :  { %6702 = vmatprep.subr.bf16.mxu0 %v6701_v14  ;;  %v545_v14 = vld [vmem:[#allocation11 + $0x508] sm:$0xff]  ;;  %v6739_v16 = vpack.c.bf16 %v538_v13, %v532_v12 }
 0x2c8   :  { %v6741_v17 = vpack.c.bf16 %v551_v15, %v545_v14 }
 0x2ca   :  { %6704 = vmatpush1.bf16.msra.mxu0 %v6703_v19  ;;  %v550_v19 = vld [vmem:[#allocation11 + $0x530] sm:$0xff] }
 0x2cb   :  { %6706 = vmatprep.subr.bf16.mxu0 %v6705_v20  ;;  %v557_v20 = vld [vmem:[#allocation11 + $0x568] sm:$0xff]  ;;  %v6743_v26 = vpack.c.bf16 %v550_v19, %v544_v18 }
 0x2cc   :  { %v6745_v27 = vpack.c.bf16 %v563_v21, %v557_v20 }
 0x2ce   :  { %6708 = vmatpush1.bf16.msra.mxu0 %v6707_v0  ;;  %v562_v0 = vld [vmem:[#allocation11 + $0x590] sm:$0xff] }
 0x2cf   :  { %6710 = vmatprep.subr.bf16.mxu0 %v6709_v1  ;;  %v569_v1 = vld [vmem:[#allocation11 + $0x5c8] sm:$0xff]  ;;  %v6747_v2 = vpack.c.bf16 %v562_v0, %v556_v28 }
 0x2d0   :  { %v6749_v30 = vpack.c.bf16 %v575_v29, %v569_v1 }
 0x2d2   :  { %6712 = vmatpush1.bf16.msra.mxu0 %v6711_v31  ;;  %v574_v31 = vld [vmem:[#allocation11 + $0x5f0] sm:$0xff] }
 0x2d3   :  { %6714 = vmatprep.subr.bf16.mxu0 %v6713_v32  ;;  %v6751_v32 = vpack.c.bf16 %v574_v31, %v568_v4 }
 0x2d6   :  { %6716 = vmatpush1.bf16.msra.mxu0 %v6715_v37  ;;  %v581_v37 = vrot.slane %v576_v35, %v9416_v40 }
 0x2d7   :  { %6718 = vmatprep.subr.bf16.mxu0 %v6717_v41 }
 0x2da   :  { %6720 = vmatpush1.bf16.msra.mxu0 %v6719_v46 }
 0x2db   :  { %6722 = vmatprep.subr.bf16.mxu0 %v6721_v47 }
 0x2de   :  { %6724 = vmatpush1.bf16.msra.mxu0 %v6723_v52 }
 0x2df   :  { %6726 = vmatprep.subr.bf16.mxu0 %v6725_v53 }
 0x2e2   :  { %6728 = vmatpush1.bf16.msra.mxu0 %v6727_v58  ;;  %v9471_v58 = vsub.s32 4, %v9410_v38 }
 0x2e3   :  { %6730 = vmatprep.subr.bf16.mxu0 %v6729_v59 }
 0x2e4   :  { %v597_v59 = vrot.slane %v576_v35, %v9471_v58 }
 0x2e6   :  { %6732 = vmatpush1.bf16.msra.mxu0 %v6731_v5  ;;  %v601_v5 = vrot.slane %v576_v35, %v9475_v62 }
 0x2e7   :  { %6734 = vmatprep.subr.bf16.mxu0 %v6733_v24 }
 0x2ea   :  { %6736 = vmatpush1.bf16.msra.mxu0 %v6735_v10 }
 0x2eb   :  { %6738 = vmatprep.subr.bf16.mxu0 %v6737_v11 }
 0x2ee   :  { %6740 = vmatpush1.bf16.msra.mxu0 %v6739_v16 }
 0x2ef   :  { %6742 = vmatprep.subr.bf16.mxu0 %v6741_v17 }
 0x2f2   :  { %6744 = vmatpush1.bf16.msra.mxu0 %v6743_v26 }
 0x2f3   :  { %6746 = vmatprep.subr.bf16.mxu0 %v6745_v27 }
 0x2f6   :  { %6748 = vmatpush1.bf16.msra.mxu0 %v6747_v2 }
 0x2f7   :  { %6750 = vmatprep.subr.bf16.mxu0 %v6749_v30 }
 0x2fa   :  { %6752 = vmatpush1.bf16.msra.mxu0 %v6751_v32 }
 0x2fd   :  { %827 = vmatmul.mubr.f32.vlgmr.msra.gmra.mrb[4].mxu0 %v9428_v23 }
 0x2fe   :  { %832 = vmatprep.mubr.f32.mxu0 %v9430_v22 }
 0x301   :  { %833 = vmatmul.mubr.f32.gmra.mrb[6].mxu0 %v9436_v6 }
 0x390   :  { %v674_v41 = vpop.f32.mrb[0].mxu0  ;;  %v751_v42 = vpop.f32.mrb[0].mxu1 }
 0x391   :  { %v752_v44 = vadd.f32 %v751_v42, %v589_v36  ;;  %v676_v45 = vpop.f32.mrb[1].mxu0  ;;  %v753_v46 = vpop.f32.mrb[1].mxu1  ;;  %v675_v47 = vadd.f32 %v674_v41, %v581_v37 }
 0x392   :  { %v754_v26 = vadd.f32 %v753_v46, %v593_v49  ;;  %v677_v27 = vadd.f32 %v676_v45, %v585_v48 }
 0x393   :  { %6482 = vmatpush3.xpose.msra.mxu1 %v752_v44 }
 0x394   :  { %v680_v50 = vpop.f32.mrb[2].mxu0  ;;  %v757_v51 = vpop.f32.mrb[2].mxu1  ;;  %6486 = vmatprep.subr.mxu1 %v8982_v33 }
 0x395   :  { %v9460_v52 = vadd.f32 %v680_v50, %v581_v37  ;;  %v9462_v53 = vadd.f32 %v757_v51, %v589_v36  ;;  %v682_v54 = vpop.f32.mrb[3].mxu0  ;;  %v759_v55 = vpop.f32.mrb[3].mxu1 }
 0x396   :  { %6484 = vmatmul.mubr.f32.vlgmr.msra.gmra.mrb[4].mxu1 %v675_v47  ;;  %v9464_v56 = vadd.f32 %v682_v54, %v585_v48  ;;  %v9466_v57 = vadd.f32 %v759_v55, %v593_v49  ;;  %v6370_v47 = vld [vmem:[#allocation6 + $0x1] ss:$0 sm:$0xff] }
 0x397   :  { %6488 = vmatprep.mubr.msk.f32.mxu1 %vm8983_vm0, %v8982_v33 }
 0x3d0   :  { %v828_v60 = vpop.f32.mrb[4].mxu0 }
 0x3d1   :  { %v829_v63 = vadd.f32 %v828_v60, %v597_v59  ;;  %v830_v3 = vpop.f32.mrb[5].mxu0 }
 0x3d2   :  { %v831_v28 = vadd.f32 %v830_v3, %v601_v5 }
 0x3d3   :  { %6487 = vmatpush3.msra.mxu1 %v829_v63 }
 0x3d4   :  { %v834_v24 = vpop.f32.mrb[6].mxu0  ;;  %6491 = vmatprep.subr.mxu1 %v8982_v33 }
 0x3d5   :  { %v835_v25 = vadd.f32 %v834_v24, %v597_v59  ;;  %v836_v7 = vpop.f32.mrb[7].mxu0 }
 0x3d6   :  { %v9479_v8 = vadd.f32 %v836_v7, %v601_v5 }
 0x469   :  { %v912_v10 = vpop.f32.mrb[4].mxu1 }
 0x46a   :  { %v913_v11 = vadd.f32 %v6367_v9, %v912_v10  ;;  %v6485_v12 = vpop.f32.mrb[5].mxu1 }
 0x46c   :  { %v917_v13 = vsel %vm916_vm1, %v913_v11, -inf }
 0x46d   :  { %918 = vmax.xlane.f32.xlu0 %v917_v13 }
 0x4fa   :  { %v919_v14 = vpop.xlane.xlu0 %918 }
 0x4fb   :  { %v920_v15 = vsub.f32 %v913_v11, %v919_v14  ;;  %v1482_v14 = vld [vmem:[#allocation14 + $0x18] sm:$0xff] }
 0x4fd   :  { %v921_v16 = vmul.f32 1.442695, %v920_v15 }
 0x4ff   :  { %8360 = vpow2.f32 %v921_v16 }
 0x509   :  { %v8361_v17 = vpop.eup %8360 }
 0x50a   :  { %v923_v18 = vsel %vm916_vm1, %v8361_v17, 0.0 }
 0x50b   :  { %924 = vadd.xlane.f32.xlu1 %v923_v18  ;;  %v1481_v18 = vld [vmem:[#allocation14 + $0x10] sm:$0xff] }
 0x598   :  { %v925_v19 = vpop.xlane.xlu1 %924 }
 0x599   :  { %8362 = vrcp.f32 %v925_v19  ;;  %v1484_v19 = vld [vmem:[#allocation14 + $0x28] sm:$0xff] }
 0x5a3   :  { %v8363_v20 = vpop.eup %8362 }
 0x5a4   :  { %v927_v21 = vmul.f32 %v8363_v20, %v8361_v17  ;;  %v1479_v17 = vld [vmem:[#allocation14] sm:$0xff]  ;;  %v1486_v20 = vld [vmem:[#allocation14 + $0x38] sm:$0xff] }
 0x5a6   :  { %6489 = vmatmul.mubr.msk.f32.vlgmr.msra.gmra.mrb[6].mxu1 %vm916_vm1, %v927_v21 }
 0x5a7   :  { %6492 = vmatpush3.xpose.msra.mxu1 %v754_v26  ;;  %6493 = vmatprep.mubr.msk.f32.mxu1 %vm8983_vm0, %v8982_v33  ;;  %v6755_v26 = vpack.c.bf16 %v1481_v18, %v1479_v17  ;;  %v1511_v17 = vld [vmem:[#allocation14 + $0x100] sm:$0xff]  ;;  %v1513_v18 = vld [vmem:[#allocation14 + $0x110] sm:$0xff] }
 0x5a8   :  { %6496 = vmatprep.subr.mxu1 %v8982_v33 }
 0x5aa   :  { %6494 = vmatmul.mubr.f32.vlgmr.msra.gmra.mrb[8].mxu1 %v677_v27 }
 0x5ab   :  { %6497 = vmatpush3.msra.mxu1 %v831_v28  ;;  %6498 = vmatprep.mubr.msk.f32.mxu1 %vm8983_vm0, %v8982_v33  ;;  %v6757_v28 = vpack.c.bf16 %v1486_v20, %v1484_v19  ;;  %v1516_v19 = vld [vmem:[#allocation14 + $0x128] sm:$0xff]  ;;  %v1518_v20 = vld [vmem:[#allocation14 + $0x138] sm:$0xff] }
 0x5ac   :  { %6501 = vmatprep.subr.mxu1 %v8982_v33 }
 0x679   :  { %v9490_v0 = vpop.f32.mrb[6].mxu1 }
 0x67a   :  { %v6490_v1 = vpop.f32.mrb[7].mxu1 }
 0x67b   :  { %v1483_v1 = vld [vmem:[#allocation14 + $0x20] sm:$0xff] }
 0x67d   :  { %v1068_v29 = vpop.f32.mrb[8].mxu1 }
 0x67e   :  { %v1069_v2 = vadd.f32 %v6367_v9, %v1068_v29  ;;  %v6495_v30 = vpop.f32.mrb[9].mxu1  ;;  %v1485_v29 = vld [vmem:[#allocation14 + $0x30] sm:$0xff] }
 0x67f   :  { %v1490_v30 = vld [vmem:[#allocation14 + $0x58] sm:$0xff] }
 0x680   :  { %v1072_v4 = vsel %vm916_vm1, %v1069_v2, -inf }
 0x681   :  { %1073 = vmax.xlane.f32.xlu0 %v1072_v4  ;;  %v6759_v4 = vpack.c.bf16 %v1485_v29, %v1483_v1  ;;  %v1520_v1 = vld [vmem:[#allocation14 + $0x148] sm:$0xff]  ;;  %v1522_v29 = vld [vmem:[#allocation14 + $0x158] sm:$0xff] }
 0x70e   :  { %v1074_v31 = vpop.xlane.xlu0 %1073 }
 0x70f   :  { %v1075_v32 = vsub.f32 %v1069_v2, %v1074_v31  ;;  %v1488_v2 = vld [vmem:[#allocation14 + $0x48] sm:$0xff] }
 0x710   :  { %v6761_v31 = vpack.c.bf16 %v1490_v30, %v1488_v2  ;;  %v6793_v30 = vpack.c.bf16 %v1522_v29, %v1520_v1  ;;  %v1711_v29 = vld [vmem:[#allocation20 + $0x58] sm:$0xff] }
 0x711   :  { %v1076_v35 = vmul.f32 1.442695, %v1075_v32  ;;  %v1487_v32 = vld [vmem:[#allocation14 + $0x40] sm:$0xff] }
 0x713   :  { %8364 = vpow2.f32 %v1076_v35  ;;  %v1489_v35 = vld [vmem:[#allocation14 + $0x50] sm:$0xff] }
 0x71d   :  { %v8365_v36 = vpop.eup %8364 }
 0x71e   :  { %v1078_v37 = vsel %vm916_vm1, %v8365_v36, 0.0 }
 0x71f   :  { %1079 = vadd.xlane.f32.xlu1 %v1078_v37  ;;  %v1494_v37 = vld [vmem:[#allocation14 + $0x78] sm:$0xff] }
 0x7ac   :  { %v1080_v41 = vpop.xlane.xlu1 %1079 }
 0x7ad   :  { %8366 = vrcp.f32 %v1080_v41  ;;  %v6763_v41 = vpack.c.bf16 %v1489_v35, %v1487_v32  ;;  %v1524_v32 = vld [vmem:[#allocation14 + $0x168] sm:$0xff]  ;;  %v1526_v35 = vld [vmem:[#allocation14 + $0x178] sm:$0xff] }
 0x7b7   :  { %v8367_v42 = vpop.eup %8366 }
 0x7b8   :  { %v1082_v44 = vmul.f32 %v8367_v42, %v8365_v36  ;;  %v1492_v36 = vld [vmem:[#allocation14 + $0x68] sm:$0xff] }
 0x7b9   :  { %v6765_v42 = vpack.c.bf16 %v1494_v37, %v1492_v36  ;;  %v6797_v37 = vpack.c.bf16 %v1526_v35, %v1524_v32  ;;  %v1702_v32 = vld [vmem:[#allocation20 + $0x10] sm:$0xff] }
 0x7ba   :  { %6499 = vmatmul.mubr.msk.f32.vlgmr.msra.gmra.mrb[10].mxu1 %vm916_vm1, %v1082_v44  ;;  %v1491_v44 = vld [vmem:[#allocation14 + $0x60] sm:$0xff] }
 0x7bb   :  { %6502 = vmatpush3.xpose.msra.mxu1 %v9462_v53  ;;  %6503 = vmatprep.mubr.msk.f32.mxu1 %vm8983_vm0, %v8982_v33  ;;  %v1710_v35 = vld [vmem:[#allocation20 + $0x50] sm:$0xff] }
 0x7bc   :  { %6506 = vmatprep.subr.mxu1 %v8982_v33 }
 0x7be   :  { %6504 = vmatmul.mubr.f32.vlgmr.msra.gmra.mrb[12].mxu1 %v9460_v52 }
 0x7bf   :  { %6507 = vmatpush3.msra.mxu1 %v835_v25  ;;  %6508 = vmatprep.mubr.msk.f32.mxu1 %vm8983_vm0, %v8982_v33 }
 0x7c0   :  { %6511 = vmatprep.subr.mxu1 %v8982_v33 }
 0x88d   :  { %v1152_v45 = vpop.f32.mrb[10].mxu1 }
 0x88e   :  { %v6500_v46 = vpop.f32.mrb[11].mxu1 }
 0x88f   :  { %v1493_v46 = vld [vmem:[#allocation14 + $0x70] sm:$0xff] }
 0x891   :  { %v1231_v48 = vpop.f32.mrb[12].mxu1 }
 0x892   :  { %v1232_v49 = vadd.f32 %v6370_v47, %v1231_v48  ;;  %v6505_v50 = vpop.f32.mrb[13].mxu1  ;;  %v1498_v48 = vld [vmem:[#allocation14 + $0x98] sm:$0xff] }
 0x894   :  { %v1235_v51 = vsel %vm916_vm1, %v1232_v49, -inf }
 0x895   :  { %1236 = vmax.xlane.f32.xlu0 %v1235_v51  ;;  %v1497_v51 = vld [vmem:[#allocation14 + $0x90] sm:$0xff] }
 0x922   :  { %v1237_v53 = vpop.xlane.xlu0 %1236 }
 0x923   :  { %v1238_v54 = vsub.f32 %v1232_v49, %v1237_v53  ;;  %v6767_v49 = vpack.c.bf16 %v1493_v46, %v1491_v44  ;;  %v1500_v53 = vld [vmem:[#allocation14 + $0xa8] sm:$0xff]  ;;  %v1530_v46 = vld [vmem:[#allocation14 + $0x198] sm:$0xff] }
 0x924   :  { %v1528_v44 = vld [vmem:[#allocation14 + $0x188] sm:$0xff] }
 0x925   :  { %v1239_v55 = vmul.f32 1.442695, %v1238_v54  ;;  %v1502_v54 = vld [vmem:[#allocation14 + $0xb8] sm:$0xff] }
 0x927   :  { %8368 = vpow2.f32 %v1239_v55 }
 0x931   :  { %v8369_v52 = vpop.eup %8368 }
 0x932   :  { %v1241_v59 = vsel %vm916_vm1, %v8369_v52, 0.0 }
 0x933   :  { %1242 = vadd.xlane.f32.xlu1 %v1241_v59  ;;  %v1499_v59 = vld [vmem:[#allocation14 + $0xa0] sm:$0xff] }
 0x9c0   :  { %v1243_v60 = vpop.xlane.xlu1 %1242 }
 0x9c1   :  { %8370 = vrcp.f32 %v1243_v60  ;;  %v1501_v60 = vld [vmem:[#allocation14 + $0xb0] sm:$0xff] }
 0x9cb   :  { %v8371_v63 = vpop.eup %8370 }
 0x9cc   :  { %v1245_v3 = vmul.f32 %v8371_v63, %v8369_v52  ;;  %v6773_v52 = vpack.c.bf16 %v1502_v54, %v1500_v53  ;;  %v1504_v63 = vld [vmem:[#allocation14 + $0xc8] sm:$0xff] }
 0x9ce   :  { %6509 = vmatmul.mubr.msk.f32.vlgmr.msra.gmra.mrb[14].mxu1 %vm916_vm1, %v1245_v3  ;;  %v1506_v3 = vld [vmem:[#allocation14 + $0xd8] sm:$0xff] }
 0x9cf   :  { %6512 = vmatpush3.xpose.msra.mxu1 %v9466_v57  ;;  %6513 = vmatprep.mubr.msk.f32.mxu1 %vm8983_vm0, %v8982_v33 }
 0x9d0   :  { %6516 = vmatprep.subr.mxu1 %v8982_v33 }
 0x9d2   :  { %6514 = vmatmul.mubr.f32.vlgmr.msra.gmra.mrb[16].mxu1 %v9464_v56 }
 0x9d3   :  { %6517 = vmatpush3.msra.mxu1 %v9479_v8  ;;  %6518 = vmatprep.mubr.msk.f32.mxu1 %vm8983_vm0, %v8982_v33  ;;  %v1480_v8 = vld [vmem:[#allocation14 + $0x8] sm:$0xff] }
 0x9d4   :  { %v6753_v15 = vpack.c.bf16 %v1482_v14, %v1480_v8  ;;  %v1512_v8 = vld [vmem:[#allocation14 + $0x108] sm:$0xff]  ;;  %v1514_v14 = vld [vmem:[#allocation14 + $0x118] sm:$0xff] }
 0x9d6   :  { %6754 = vmatprep.subr.bf16.mxu1 %v6753_v15 }
 0xaa1   :  { %v9514_v5 = vpop.f32.mrb[14].mxu1 }
 0xaa2   :  { %v6510_v24 = vpop.f32.mrb[15].mxu1 }
 0xaa3   :  { %v6775_v24 = vpack.c.bf16 %v1501_v60, %v1499_v59  ;;  %v1536_v59 = vld [vmem:[#allocation14 + $0x1c8] sm:$0xff]  ;;  %v1538_v60 = vld [vmem:[#allocation14 + $0x1d8] sm:$0xff] }
 0xaa5   :  { %v1386_v25 = vpop.f32.mrb[16].mxu1 }
 0xaa6   :  { %v1387_v7 = vadd.f32 %v6370_v47, %v1386_v25  ;;  %v6515_v9 = vpop.f32.mrb[17].mxu1  ;;  %v1496_v47 = vld [vmem:[#allocation14 + $0x88] sm:$0xff]  ;;  %v6777_v25 = vpack.c.bf16 %v1506_v3, %v1504_v63  ;;  %v6809_v3 = vpack.c.bf16 %v1538_v60, %v1536_v59 }
 0xaa7   :  { %v6769_v50 = vpack.c.bf16 %v1498_v48, %v1496_v47  ;;  %v1505_v9 = vld [vmem:[#allocation14 + $0xd0] sm:$0xff]  ;;  %v6801_v48 = vpack.c.bf16 %v1530_v46, %v1528_v44 }
 0xaa8   :  { %v1390_v57 = vsel %vm916_vm1, %v1387_v7, -inf  ;;  %v1716_v46 = vld [vmem:[#allocation20 + $0x80] sm:$0xff] }
 0xaa9   :  { %1391 = vmax.xlane.f32.xlu0 %v1390_v57  ;;  %v1508_v57 = vld [vmem:[#allocation14 + $0xe8] sm:$0xff] }
 0xaaa   :  { %v1732_v59 = vld [vmem:[#allocation20 + $0x100] sm:$0xff] }
 0xb36   :  { %v1392_v10 = vpop.xlane.xlu0 %1391 }
 0xb37   :  { %v1393_v11 = vsub.f32 %v1387_v7, %v1392_v10  ;;  %v1503_v7 = vld [vmem:[#allocation14 + $0xc0] sm:$0xff]  ;;  %v1510_v10 = vld [vmem:[#allocation14 + $0xf8] sm:$0xff] }
 0xb39   :  { %v1394_v12 = vmul.f32 1.442695, %v1393_v11  ;;  %v6779_v11 = vpack.c.bf16 %v1505_v9, %v1503_v7  ;;  %v1540_v7 = vld [vmem:[#allocation14 + $0x1e8] sm:$0xff]  ;;  %v1542_v9 = vld [vmem:[#allocation14 + $0x1f8] sm:$0xff] }
 0xb3b   :  { %8372 = vpow2.f32 %v1394_v12  ;;  %v6781_v12 = vpack.c.bf16 %v1510_v10, %v1508_v57  ;;  %v6813_v10 = vpack.c.bf16 %v1542_v9, %v1540_v7  ;;  %v1749_v7 = vld [vmem:[#allocation20 + $0x188] sm:$0xff] }
 0xb3c   :  { %v1757_v9 = vld [vmem:[#allocation20 + $0x1c8] sm:$0xff] }
 0xb45   :  { %v8373_v13 = vpop.eup %8372 }
 0xb46   :  { %v1396_v56 = vsel %vm916_vm1, %v8373_v13, 0.0 }
 0xb47   :  { %1397 = vadd.xlane.f32.xlu1 %v1396_v56  ;;  %v1509_v56 = vld [vmem:[#allocation14 + $0xf0] sm:$0xff] }
 0xbd4   :  { %v1398_v16 = vpop.xlane.xlu1 %1397 }
 0xbd5   :  { %8374 = vrcp.f32 %v1398_v16  ;;  %v6785_v16 = vpack.c.bf16 %v1514_v14, %v1512_v8  ;;  %v1543_v14 = vld [vmem:[#allocation15] sm:$0x3] }
 0xbdf   :  { %v8375_v21 = vpop.eup %8374 }
 0xbe0   :  { %v1400_v27 = vmul.f32 %v8375_v21, %v8373_v13  ;;  %v1507_v13 = vld [vmem:[#allocation14 + $0xe0] sm:$0xff]  ;;  %v6787_v21 = vpack.c.bf16 %v1513_v18, %v1511_v17 }
 0xbe1   :  { %v6783_v15 = vpack.c.bf16 %v1509_v56, %v1507_v13 }
 0xbe2   :  { %6519 = vmatmul.mubr.msk.f32.vlgmr.msra.gmra.mrb[18].mxu1 %vm916_vm1, %v1400_v27  ;;  %v1515_v27 = vld [vmem:[#allocation14 + $0x120] sm:$0xff] }
 0xbe3   :  { %6756 = vmatpush1.bf16.msra.mxu1 %v6755_v26  ;;  %1619 = vmatprep.mubr.f32.mxu1 %v1152_v45  ;;  %v1495_v45 = vld [vmem:[#allocation14 + $0x80] sm:$0xff]  ;;  %v6789_v26 = vpack.c.bf16 %v1518_v20, %v1516_v19 }
 0xbe4   :  { %6758 = vmatprep.subr.bf16.mxu1 %v6757_v28  ;;  %v6771_v55 = vpack.c.bf16 %v1497_v51, %v1495_v45  ;;  %v1517_v28 = vld [vmem:[#allocation14 + $0x130] sm:$0xff]  ;;  %v1532_v45 = vld [vmem:[#allocation14 + $0x1a8] sm:$0xff]  ;;  %v1534_v51 = vld [vmem:[#allocation14 + $0x1b8] sm:$0xff] }
 0xbe5   :  { %v6791_v2 = vpack.c.bf16 %v1517_v28, %v1515_v27  ;;  %v6805_v54 = vpack.c.bf16 %v1534_v51, %v1532_v45  ;;  %v1709_v27 = vld [vmem:[#allocation20 + $0x48] sm:$0xff]  ;;  %v1703_v28 = vld [vmem:[#allocation20 + $0x18] sm:$0xff] }
 0xbe6   :  { %v1733_v45 = vld [vmem:[#allocation20 + $0x108] sm:$0xff] }
 0xbe7   :  { %6760 = vmatpush1.bf16.msra.mxu1 %v6759_v4  ;;  %v1519_v4 = vld [vmem:[#allocation14 + $0x140] sm:$0xff]  ;;  %v1741_v51 = vld [vmem:[#allocation20 + $0x148] sm:$0xff] }
 0xbe8   :  { %6762 = vmatprep.subr.bf16.mxu1 %v6761_v31  ;;  %v1521_v31 = vld [vmem:[#allocation14 + $0x150] sm:$0xff] }
 0xbe9   :  { %v6795_v36 = vpack.c.bf16 %v1521_v31, %v1519_v4  ;;  %v6881_v4 = vpack.c.bf16 %v1711_v29, %v1703_v28  ;;  %v1772_v29 = vld [vmem:[#allocation20 + $0x240] sm:$0xff] }
 0xbeb   :  { %6764 = vmatpush1.bf16.msra.mxu1 %v6763_v41  ;;  %v1523_v41 = vld [vmem:[#allocation14 + $0x160] sm:$0xff] }
 0xbec   :  { %6766 = vmatprep.subr.bf16.mxu1 %v6765_v42  ;;  %v1525_v42 = vld [vmem:[#allocation14 + $0x170] sm:$0xff] }
 0xbed   :  { %v6799_v47 = vpack.c.bf16 %v1525_v42, %v1523_v41  ;;  %v1727_v41 = vld [vmem:[#allocation20 + $0xd8] sm:$0xff] }
 0xbef   :  { %6768 = vmatpush1.bf16.msra.mxu1 %v6767_v49  ;;  %v1527_v49 = vld [vmem:[#allocation14 + $0x180] sm:$0xff] }
 0xbf0   :  { %6770 = vmatprep.subr.bf16.mxu1 %v6769_v50  ;;  %v1529_v50 = vld [vmem:[#allocation14 + $0x190] sm:$0xff] }
 0xbf1   :  { %v6803_v53 = vpack.c.bf16 %v1529_v50, %v1527_v49  ;;  %v1726_v50 = vld [vmem:[#allocation20 + $0xd0] sm:$0xff] }
 0xbf3   :  { %6772 = vmatpush1.bf16.msra.mxu1 %v6771_v55  ;;  %v1531_v55 = vld [vmem:[#allocation14 + $0x1a0] sm:$0xff] }
 0xbf4   :  { %6774 = vmatprep.subr.bf16.mxu1 %v6773_v52  ;;  %v1533_v52 = vld [vmem:[#allocation14 + $0x1b0] sm:$0xff] }
 0xbf5   :  { %v6807_v63 = vpack.c.bf16 %v1533_v52, %v1531_v55  ;;  %v1735_v55 = vld [vmem:[#allocation20 + $0x118] sm:$0xff] }
 0xbf6   :  { %v1743_v52 = vld [vmem:[#allocation20 + $0x158] sm:$0xff] }
 0xbf7   :  { %6776 = vmatpush1.bf16.msra.mxu1 %v6775_v24  ;;  %v1535_v24 = vld [vmem:[#allocation14 + $0x1c0] sm:$0xff]  ;;  %v6889_v60 = vpack.c.bf16 %v1743_v52, %v1735_v55  ;;  %v1796_v55 = vld [vmem:[#allocation20 + $0x300] sm:$0xff] }
 0xbf8   :  { %6778 = vmatprep.subr.bf16.mxu1 %v6777_v25  ;;  %v1537_v25 = vld [vmem:[#allocation14 + $0x1d0] sm:$0xff] }
 0xbf9   :  { %v6811_v57 = vpack.c.bf16 %v1537_v25, %v1535_v24  ;;  %v1742_v24 = vld [vmem:[#allocation20 + $0x150] sm:$0xff]  ;;  %v1804_v52 = vld [vmem:[#allocation20 + $0x340] sm:$0xff] }
 0xbfb   :  { %6780 = vmatpush1.bf16.msra.mxu1 %v6779_v11  ;;  %v1539_v11 = vld [vmem:[#allocation14 + $0x1e0] sm:$0xff] }
 0xbfc   :  { %6782 = vmatprep.subr.bf16.mxu1 %v6781_v12  ;;  %v1541_v12 = vld [vmem:[#allocation14 + $0x1f0] sm:$0xff] }
 0xbfd   :  { %v6815_v13 = vpack.c.bf16 %v1541_v12, %v1539_v11  ;;  %v6829_v11 = vpack.c.bf16 %v1757_v9, %v1749_v7  ;;  %v1759_v12 = vld [vmem:[#allocation20 + $0x1d8] sm:$0xff]  ;;  %v6843_v9 = vpack.c.bf16 %v1804_v52, %v1796_v55  ;;  %v1862_v52 = vld [vmem:[#allocation20 + $0x510] sm:$0xff] }
 0xbfe   :  { %v1823_v7 = vld [vmem:[#allocation20 + $0x3d8] sm:$0xff] }
 0xbff   :  { %6784 = vmatpush1.bf16.msra.mxu1 %v6783_v15  ;;  %v9522_v15 = vrot.slane %v1543_v14, %v9416_v40 }
 0xc00   :  { %6786 = vmatprep.subr.bf16.mxu1 %v6785_v16  ;;  %v9525_v16 = vrot.slane %v1543_v14, %v9413_v39  ;;  %v1750_v14 = vld [vmem:[#allocation20 + $0x190] sm:$0xff] }
 0xc03   :  { %6788 = vmatpush1.bf16.msra.mxu1 %v6787_v21 }
 0xc04   :  { %6790 = vmatprep.subr.bf16.mxu1 %v6789_v26  ;;  %v1701_v26 = vld [vmem:[#allocation20 + $0x8] sm:$0xff] }
 0xc05   :  { %v6817_v1 = vpack.c.bf16 %v1709_v27, %v1701_v26 }
 0xc07   :  { %6792 = vmatpush1.bf16.msra.mxu1 %v6791_v2  ;;  %v1700_v2 = vld [vmem:[#allocation20] sm:$0xff]  ;;  %6818 = vmatprep.subr.bf16.mxu0 %v6817_v1 }
 0xc08   :  { %6794 = vmatprep.subr.bf16.mxu1 %v6793_v30  ;;  %v1708_v30 = vld [vmem:[#allocation20 + $0x40] sm:$0xff] }
 0xc09   :  { %v6819_v31 = vpack.c.bf16 %v1708_v30, %v1700_v2  ;;  %v1764_v1 = vld [vmem:[#allocation20 + $0x200] sm:$0xff]  ;;  %v1766_v2 = vld [vmem:[#allocation20 + $0x210] sm:$0xff] }
 0xc0b   :  { %6796 = vmatpush1.bf16.msra.mxu1 %v6795_v36  ;;  %v6883_v36 = vpack.c.bf16 %v1710_v35, %v1702_v32  ;;  %6820 = vmatpush1.bf16.msra.mxu0 %v6819_v31  ;;  %v1781_v31 = vld [vmem:[#allocation20 + $0x288] sm:$0xff]  ;;  %v1783_v35 = vld [vmem:[#allocation20 + $0x298] sm:$0xff] }
 0xc0c   :  { %6798 = vmatprep.subr.bf16.mxu1 %v6797_v37  ;;  %v1719_v37 = vld [vmem:[#allocation20 + $0x98] sm:$0xff]  ;;  %v1789_v32 = vld [vmem:[#allocation20 + $0x2c8] sm:$0xff] }
 0xc0d   :  { %v6885_v44 = vpack.c.bf16 %v1727_v41, %v1719_v37  ;;  %v6837_v37 = vpack.c.bf16 %v1789_v32, %v1781_v31  ;;  %v1780_v41 = vld [vmem:[#allocation20 + $0x280] sm:$0xff]  ;;  %v1847_v31 = vld [vmem:[#allocation20 + $0x498] sm:$0xff] }
 0xc0e   :  { %v1855_v32 = vld [vmem:[#allocation20 + $0x4d8] sm:$0xff] }
 0xc0f   :  { %6800 = vmatpush1.bf16.msra.mxu1 %v6799_v47  ;;  %v1724_v47 = vld [vmem:[#allocation20 + $0xc0] sm:$0xff] }
 0xc10   :  { %6802 = vmatprep.subr.bf16.mxu1 %v6801_v48  ;;  %v1718_v48 = vld [vmem:[#allocation20 + $0x90] sm:$0xff]  ;;  %v6823_v49 = vpack.c.bf16 %v1724_v47, %v1716_v46 }
 0xc11   :  { %v1790_v47 = vld [vmem:[#allocation20 + $0x2d0] sm:$0xff] }
 0xc13   :  { %6804 = vmatpush1.bf16.msra.mxu1 %v6803_v53  ;;  %v6887_v53 = vpack.c.bf16 %v1726_v50, %v1718_v48  ;;  %v1797_v48 = vld [vmem:[#allocation20 + $0x308] sm:$0xff]  ;;  %v1799_v50 = vld [vmem:[#allocation20 + $0x318] sm:$0xff] }
 0xc14   :  { %6806 = vmatprep.subr.bf16.mxu1 %v6805_v54  ;;  %v6825_v54 = vpack.c.bf16 %v1741_v51, %v1733_v45  ;;  %v1807_v45 = vld [vmem:[#allocation20 + $0x358] sm:$0xff] }
 0xc17   :  { %6808 = vmatpush1.bf16.msra.mxu1 %v6807_v63  ;;  %v1740_v63 = vld [vmem:[#allocation20 + $0x140] sm:$0xff] }
 0xc18   :  { %6810 = vmatprep.subr.bf16.mxu1 %v6809_v3  ;;  %v1734_v3 = vld [vmem:[#allocation20 + $0x110] sm:$0xff]  ;;  %v6827_v25 = vpack.c.bf16 %v1740_v63, %v1732_v59 }
 0xc19   :  { %v1798_v59 = vld [vmem:[#allocation20 + $0x310] sm:$0xff] }
 0xc1a   :  { %v1806_v63 = vld [vmem:[#allocation20 + $0x350] sm:$0xff] }
 0xc1b   :  { %6812 = vmatpush1.bf16.msra.mxu1 %v6811_v57  ;;  %v1751_v57 = vld [vmem:[#allocation20 + $0x198] sm:$0xff] }
 0xc1c   :  { %6814 = vmatprep.subr.bf16.mxu1 %v6813_v10  ;;  %v6891_v10 = vpack.c.bf16 %v1742_v24, %v1734_v3  ;;  %v1813_v3 = vld [vmem:[#allocation20 + $0x388] sm:$0xff] }
 0xc1d   :  { %v1821_v24 = vld [vmem:[#allocation20 + $0x3c8] sm:$0xff] }
 0xc1f   :  { %6816 = vmatpush1.bf16.msra.mxu1 %v6815_v13  ;;  %v1748_v13 = vld [vmem:[#allocation20 + $0x180] sm:$0xff] }
 0xc20   :  { %6882 = vmatprep.subr.bf16.mxu1 %v6881_v4  ;;  %v1774_v4 = vld [vmem:[#allocation20 + $0x250] sm:$0xff] }
 0xc22   :  { %1620 = vmatmul.mubr.f32.vlgmr.msra.gmra.mrb[20].mxu1 %v9490_v0 }
 0xc23   :  { %6884 = vmatpush1.bf16.msra.mxu1 %v6883_v36  ;;  %v6835_v36 = vpack.c.bf16 %v1772_v29, %v1764_v1  ;;  %v1830_v1 = vld [vmem:[#allocation20 + $0x410] sm:$0xff] }
 0xc24   :  { %6886 = vmatprep.subr.bf16.mxu1 %v6885_v44  ;;  %v1782_v44 = vld [vmem:[#allocation20 + $0x290] sm:$0xff] }
 0xc27   :  { %6888 = vmatpush1.bf16.msra.mxu1 %v6887_v53  ;;  %v6903_v53 = vpack.c.bf16 %v1790_v47, %v1782_v44  ;;  %v1854_v44 = vld [vmem:[#allocation20 + $0x4d0] sm:$0xff]  ;;  %v1869_v47 = vld [vmem:[#allocation20 + $0x548] sm:$0xff] }
 0xc28   :  { %6890 = vmatprep.subr.bf16.mxu1 %v6889_v60  ;;  %v6905_v60 = vpack.c.bf16 %v1807_v45, %v1799_v50 }
 0xc2b   :  { %6892 = vmatpush1.bf16.msra.mxu1 %v6891_v10  ;;  %v6845_v10 = vpack.c.bf16 %v1821_v24, %v1813_v3 }
 0xcb5   :  { %v1470_v56 = vpop.f32.mrb[18].mxu1 }
 0xcb6   :  { %v6520_v8 = vpop.f32.mrb[19].mxu1  ;;  %1625 = vmatprep.mubr.f32.mxu1 %v1470_v56  ;;  %v1756_v56 = vld [vmem:[#allocation20 + $0x1c0] sm:$0xff] }
 0xcb7   :  { %1626 = vmatmul.mubr.f32.gmra.mrb[22].mxu1 %v9514_v5  ;;  %v6893_v8 = vpack.c.bf16 %v1759_v12, %v1751_v57  ;;  %v6831_v26 = vpack.c.bf16 %v1756_v56, %v1748_v13  ;;  %v6907_v57 = vpack.c.bf16 %v1806_v63, %v1798_v59  ;;  %v1820_v12 = vld [vmem:[#allocation20 + $0x3c0] sm:$0xff]  ;;  %v1814_v13 = vld [vmem:[#allocation20 + $0x390] sm:$0xff] }
 0xcb8   :  { %v1870_v59 = vld [vmem:[#allocation20 + $0x550] sm:$0xff] }
 0xcb9   :  { %6894 = vmatprep.subr.bf16.mxu1 %v6893_v8  ;;  %v1822_v8 = vld [vmem:[#allocation20 + $0x3d0] sm:$0xff]  ;;  %v6923_v63 = vpack.c.bf16 %v1870_v59, %v1862_v52  ;;  %v1927_v52 = vld [vmem:[#allocation20 + $0x718] sm:$0xff] }
 0xcf5   :  { %v1621_v17 = vpop.f32.mrb[20].mxu1 }
 0xcf6   :  { %v1622_v18 = vadd.f32 %v1621_v17, %v9522_v15  ;;  %v1623_v19 = vpop.f32.mrb[21].mxu1  ;;  %v1758_v17 = vld [vmem:[#allocation20 + $0x1d0] sm:$0xff] }
 0xcf7   :  { %v1624_v20 = vadd.f32 %v1623_v19, %v9525_v16  ;;  %v1773_v19 = vld [vmem:[#allocation20 + $0x248] sm:$0xff]  ;;  %v6895_v27 = vpack.c.bf16 %v1758_v17, %v1750_v14 }
 0xcf8   :  { %v9530_v0 = vadd.f32 %v1622_v18, %v9428_v23  ;;  %v1717_v23 = vld [vmem:[#allocation20 + $0x88] sm:$0xff] }
 0xcf9   :  { %v9533_v21 = vadd.f32 %v1624_v20, %v9426_v61  ;;  %v1725_v61 = vld [vmem:[#allocation20 + $0xc8] sm:$0xff]  ;;  %v1767_v20 = vld [vmem:[#allocation20 + $0x218] sm:$0xff]  ;;  %6896 = vmatpush1.bf16.msra.mxu1 %v6895_v27  ;;  %v1828_v27 = vld [vmem:[#allocation20 + $0x400] sm:$0xff] }
 0xcfa   :  { %v6821_v42 = vpack.c.bf16 %v1725_v61, %v1717_v23  ;;  %v1765_v18 = vld [vmem:[#allocation20 + $0x208] sm:$0xff]  ;;  %v1791_v23 = vld [vmem:[#allocation20 + $0x2d8] sm:$0xff]  ;;  %v6899_v61 = vpack.c.bf16 %v1774_v4, %v1766_v2  ;;  %v1838_v2 = vld [vmem:[#allocation20 + $0x450] sm:$0xff] }
 0xcfb   :  { %v1638_v5 = vadd.f32 %v9533_v21, %v9530_v0  ;;  %v6833_v28 = vpack.c.bf16 %v1773_v19, %v1765_v18  ;;  %v6901_v46 = vpack.c.bf16 %v1791_v23, %v1783_v35  ;;  %v1829_v14 = vld [vmem:[#allocation20 + $0x408] sm:$0xff]  ;;  %v1831_v18 = vld [vmem:[#allocation20 + $0x418] sm:$0xff]  ;;  %v6915_v23 = vpack.c.bf16 %v1838_v2, %v1830_v1 }
 0xcfc   :  { %6822 = vmatprep.subr.bf16.mxu0 %v6821_v42  ;;  %v1788_v42 = vld [vmem:[#allocation20 + $0x2c0] sm:$0xff]  ;;  %v1837_v17 = vld [vmem:[#allocation20 + $0x448] sm:$0xff]  ;;  %v1839_v19 = vld [vmem:[#allocation20 + $0x458] sm:$0xff] }
 0xcfd   :  { %1639 = vadd.xlane.f32.xlu0 %v1638_v5  ;;  %6824 = vmatpush1.bf16.msra.mxu0 %v6823_v49  ;;  %v1775_v5 = vld [vmem:[#allocation20 + $0x258] sm:$0xff]  ;;  %v1805_v49 = vld [vmem:[#allocation20 + $0x348] sm:$0xff]  ;;  %v6839_v51 = vpack.c.bf16 %v1788_v42, %v1780_v41  ;;  %v6913_v29 = vpack.c.bf16 %v1839_v19, %v1831_v18  ;;  %v1846_v41 = vld [vmem:[#allocation20 + $0x490] sm:$0xff]  ;;  %v6917_v42 = vpack.c.bf16 %v1855_v32, %v1847_v31 }
 0xcfe   :  { %6826 = vmatprep.subr.bf16.mxu0 %v6825_v54  ;;  %v6897_v30 = vpack.c.bf16 %v1775_v5, %v1767_v20  ;;  %v6841_v54 = vpack.c.bf16 %v1805_v49, %v1797_v48  ;;  %v6911_v5 = vpack.c.bf16 %v1822_v8, %v1814_v13  ;;  %v1853_v4 = vld [vmem:[#allocation20 + $0x4c8] sm:$0xff]  ;;  %v1863_v48 = vld [vmem:[#allocation20 + $0x518] sm:$0xff]  ;;  %v6919_v45 = vpack.c.bf16 %v1854_v44, %v1846_v41  ;;  %v1876_v18 = vld [vmem:[#allocation20 + $0x580] sm:$0xff] }
 0xcff   :  { %v1871_v49 = vld [vmem:[#allocation20 + $0x558] sm:$0xff]  ;;  %v1885_v8 = vld [vmem:[#allocation20 + $0x5c8] sm:$0xff]  ;;  %v1900_v31 = vld [vmem:[#allocation20 + $0x640] sm:$0xff] }
 0xd00   :  { %6898 = vmatprep.subr.bf16.mxu1 %v6897_v30  ;;  %v1845_v30 = vld [vmem:[#allocation20 + $0x488] sm:$0xff]  ;;  %v6921_v55 = vpack.c.bf16 %v1871_v49, %v1863_v48  ;;  %v1916_v48 = vld [vmem:[#allocation20 + $0x6c0] sm:$0xff] }
 0xd01   :  { %6828 = vmatpush1.bf16.msra.mxu0 %v6827_v25  ;;  %6900 = vmatpush1.bf16.msra.mxu1 %v6899_v61  ;;  %v1815_v25 = vld [vmem:[#allocation20 + $0x398] sm:$0xff]  ;;  %v1844_v61 = vld [vmem:[#allocation20 + $0x480] sm:$0xff]  ;;  %v1901_v1 = vld [vmem:[#allocation20 + $0x648] sm:$0xff] }
 0xd02   :  { %6830 = vmatprep.subr.bf16.mxu0 %v6829_v11  ;;  %6902 = vmatprep.subr.bf16.mxu1 %v6901_v46  ;;  %v1812_v11 = vld [vmem:[#allocation20 + $0x380] sm:$0xff]  ;;  %v6909_v56 = vpack.c.bf16 %v1823_v7, %v1815_v25  ;;  %v1861_v46 = vld [vmem:[#allocation20 + $0x508] sm:$0xff] }
 0xd03   :  { %v6847_v20 = vpack.c.bf16 %v1820_v12, %v1812_v11  ;;  %v1917_v41 = vld [vmem:[#allocation20 + $0x6c8] sm:$0xff] }
 0xd05   :  { %6832 = vmatpush1.bf16.msra.mxu0 %v6831_v26  ;;  %6904 = vmatpush1.bf16.msra.mxu1 %v6903_v53  ;;  %v6849_v26 = vpack.c.bf16 %v1837_v17, %v1829_v14  ;;  %v1860_v53 = vld [vmem:[#allocation20 + $0x500] sm:$0xff]  ;;  %v1879_v14 = vld [vmem:[#allocation20 + $0x598] sm:$0xff] }
 0xd06   :  { %6834 = vmatprep.subr.bf16.mxu0 %v6833_v28  ;;  %6906 = vmatprep.subr.bf16.mxu1 %v6905_v60  ;;  %v1836_v28 = vld [vmem:[#allocation20 + $0x440] sm:$0xff]  ;;  %v1887_v17 = vld [vmem:[#allocation20 + $0x5d8] sm:$0xff] }
 0xd07   :  { %v6851_v35 = vpack.c.bf16 %v1836_v28, %v1828_v27  ;;  %v6925_v19 = vpack.c.bf16 %v1887_v17, %v1879_v14  ;;  %v1893_v28 = vld [vmem:[#allocation20 + $0x608] sm:$0xff]  ;;  %v1948_v14 = vld [vmem:[#allocation20 + $0x7c0] sm:$0xff] }
 0xd08   :  { %v6865_v2 = vpack.c.bf16 %v1901_v1, %v1893_v28  ;;  %v1715_v28 = vld [vmem:[#allocation20 + $0x78] sm:$0xff] }
 0xd09   :  { %6836 = vmatpush1.bf16.msra.mxu0 %v6835_v36  ;;  %6908 = vmatpush1.bf16.msra.mxu1 %v6907_v57  ;;  %v6853_v36 = vpack.c.bf16 %v1853_v4, %v1845_v30  ;;  %v1903_v30 = vld [vmem:[#allocation20 + $0x658] sm:$0xff]  ;;  %v1892_v4 = vld [vmem:[#allocation20 + $0x600] sm:$0xff] }
 0xd0a   :  { %6838 = vmatprep.subr.bf16.mxu0 %v6837_v37  ;;  %6910 = vmatprep.subr.bf16.mxu1 %v6909_v56  ;;  %v1852_v37 = vld [vmem:[#allocation20 + $0x4c0] sm:$0xff] }
 0xd0b   :  { %v6855_v50 = vpack.c.bf16 %v1852_v37, %v1844_v61  ;;  %v1909_v37 = vld [vmem:[#allocation20 + $0x688] sm:$0xff] }
 0xd0c   :  { %v6869_v44 = vpack.c.bf16 %v1917_v41, %v1909_v37  ;;  %v1636_v37 = vld [vmem:[#allocation17] sm:$0x3]  ;;  %v1637_v41 = vld [vmem:[#allocation18] sm:$0x3] }
 0xd0d   :  { %6840 = vmatpush1.bf16.msra.mxu0 %v6839_v51  ;;  %6912 = vmatpush1.bf16.msra.mxu1 %v6911_v5  ;;  %v6857_v51 = vpack.c.bf16 %v1869_v47, %v1861_v46  ;;  %v1878_v5 = vld [vmem:[#allocation20 + $0x590] sm:$0xff]  ;;  %v1919_v46 = vld [vmem:[#allocation20 + $0x6d8] sm:$0xff]  ;;  %v1908_v47 = vld [vmem:[#allocation20 + $0x680] sm:$0xff] }
 0xd0e   :  { %6842 = vmatprep.subr.bf16.mxu0 %v6841_v54  ;;  %6914 = vmatprep.subr.bf16.mxu1 %v6913_v29  ;;  %v1868_v54 = vld [vmem:[#allocation20 + $0x540] sm:$0xff]  ;;  %v1895_v29 = vld [vmem:[#allocation20 + $0x618] sm:$0xff] }
 0xd0f   :  { %v6859_v60 = vpack.c.bf16 %v1868_v54, %v1860_v53  ;;  %v6929_v32 = vpack.c.bf16 %v1903_v30, %v1895_v29  ;;  %v1925_v54 = vld [vmem:[#allocation20 + $0x708] sm:$0xff] }
 0xd11   :  { %6844 = vmatpush1.bf16.msra.mxu0 %v6843_v9  ;;  %6916 = vmatpush1.bf16.msra.mxu1 %v6915_v23  ;;  %v1894_v23 = vld [vmem:[#allocation20 + $0x610] sm:$0xff] }
 0xd12   :  { %6846 = vmatprep.subr.bf16.mxu0 %v6845_v10  ;;  %6918 = vmatprep.subr.bf16.mxu1 %v6917_v42  ;;  %v1911_v42 = vld [vmem:[#allocation20 + $0x698] sm:$0xff] }
 0xd13   :  { %v6933_v49 = vpack.c.bf16 %v1919_v46, %v1911_v42  ;;  %v9568_v42 = vrot.slane %v1636_v37, %v9413_v39 }
 0xd15   :  { %6848 = vmatpush1.bf16.msra.mxu0 %v6847_v20  ;;  %6920 = vmatpush1.bf16.msra.mxu1 %v6919_v45  ;;  %v1910_v45 = vld [vmem:[#allocation20 + $0x690] sm:$0xff] }
 0xd16   :  { %6850 = vmatprep.subr.bf16.mxu0 %v6849_v26  ;;  %6922 = vmatprep.subr.bf16.mxu1 %v6921_v55  ;;  %v1886_v26 = vld [vmem:[#allocation20 + $0x5d0] sm:$0xff]  ;;  %v1933_v55 = vld [vmem:[#allocation20 + $0x748] sm:$0xff] }
 0xd17   :  { %v6927_v27 = vpack.c.bf16 %v1886_v26, %v1878_v5  ;;  %v6873_v59 = vpack.c.bf16 %v1933_v55, %v1925_v54  ;;  %v1713_v5 = vld [vmem:[#allocation20 + $0x68] sm:$0xff]  ;;  %v1707_v26 = vld [vmem:[#allocation20 + $0x38] sm:$0xff] }
 0xd18   :  { %v7009_v1 = vpack.c.bf16 %v1715_v28, %v1707_v26  ;;  %v1761_v26 = vld [vmem:[#allocation20 + $0x1e8] sm:$0xff]  ;;  %v1763_v28 = vld [vmem:[#allocation20 + $0x1f8] sm:$0xff] }
 0xd19   :  { %6852 = vmatpush1.bf16.msra.mxu0 %v6851_v35  ;;  %6924 = vmatpush1.bf16.msra.mxu1 %v6923_v63  ;;  %v6867_v35 = vpack.c.bf16 %v1900_v31, %v1892_v4  ;;  %v1924_v63 = vld [vmem:[#allocation20 + $0x700] sm:$0xff] }
 0xd1a   :  { %6854 = vmatprep.subr.bf16.mxu0 %v6853_v36  ;;  %6926 = vmatprep.subr.bf16.mxu1 %v6925_v19  ;;  %v1902_v36 = vld [vmem:[#allocation20 + $0x650] sm:$0xff] }
 0xd1b   :  { %v6931_v61 = vpack.c.bf16 %v1902_v36, %v1894_v23 }
 0xd1d   :  { %6856 = vmatpush1.bf16.msra.mxu0 %v6855_v50  ;;  %6928 = vmatpush1.bf16.msra.mxu1 %v6927_v27  ;;  %v6871_v50 = vpack.c.bf16 %v1916_v48, %v1908_v47  ;;  %v9576_v47 = vrot.slane %v1637_v41, %v9413_v39  ;;  %v9579_v48 = vrot.slane %v1637_v41, %v9416_v40  ;;  %v1771_v41 = vld [vmem:[#allocation20 + $0x238] sm:$0xff] }
 0xd1e   :  { %6858 = vmatprep.subr.bf16.mxu0 %v6857_v51  ;;  %6930 = vmatprep.subr.bf16.mxu1 %v6929_v32  ;;  %v1918_v51 = vld [vmem:[#allocation20 + $0x6d0] sm:$0xff] }
 0xd1f   :  { %v6935_v53 = vpack.c.bf16 %v1918_v51, %v1910_v45  ;;  %v1706_v45 = vld [vmem:[#allocation20 + $0x30] sm:$0xff] }
 0xd20   :  { %v1714_v51 = vld [vmem:[#allocation20 + $0x70] sm:$0xff] }
 0xd21   :  { %6860 = vmatpush1.bf16.msra.mxu0 %v6859_v60  ;;  %6932 = vmatpush1.bf16.msra.mxu1 %v6931_v61  ;;  %v1935_v60 = vld [vmem:[#allocation20 + $0x758] sm:$0xff] }
 0xd22   :  { %6934 = vmatprep.subr.bf16.mxu1 %v6933_v49  ;;  %v1704_v49 = vld [vmem:[#allocation20 + $0x20] sm:$0xff] }
 0xd25   :  { %6936 = vmatpush1.bf16.msra.mxu1 %v6935_v53  ;;  %v1721_v53 = vld [vmem:[#allocation20 + $0xa8] sm:$0xff] }
 0xd8a   :  { %v1640_v3 = vpop.xlane.xlu0 %1639  ;;  %v1627_v24 = vpop.f32.mrb[22].mxu1 }
 0xd8b   :  { %v1644_v25 = vmul.f32 0.00390625, %v1640_v3  ;;  %v1628_v7 = vadd.f32 %v1627_v24, %v9522_v15  ;;  %v1629_v9 = vpop.f32.mrb[23].mxu1  ;;  %v1932_v3 = vld [vmem:[#allocation20 + $0x740] sm:$0xff]  ;;  %v6937_v24 = vpack.c.bf16 %v1935_v60, %v1927_v52  ;;  %v1729_v52 = vld [vmem:[#allocation20 + $0xe8] sm:$0xff] }
 0xd8c   :  { %v1630_v57 = vadd.f32 %v1629_v9, %v9525_v16  ;;  %v1934_v9 = vld [vmem:[#allocation20 + $0x750] sm:$0xff] }
 0xd8d   :  { %v9540_v10 = vsub.f32 %v9530_v0, %v1644_v25  ;;  %v9543_v11 = vsub.f32 %v9533_v21, %v1644_v25  ;;  %v9546_v12 = vadd.f32 %v1628_v7, %v9436_v6  ;;  %v1877_v21 = vld [vmem:[#allocation20 + $0x588] sm:$0xff]  ;;  %v6875_v25 = vpack.c.bf16 %v1932_v3, %v1924_v63  ;;  %v1926_v7 = vld [vmem:[#allocation20 + $0x710] sm:$0xff]  ;;  %6938 = vmatprep.subr.bf16.mxu1 %v6937_v24  ;;  %v1720_v24 = vld [vmem:[#allocation20 + $0xa0] sm:$0xff] }
 0xd8e   :  { %v9549_v13 = vadd.f32 %v1630_v57, %v9430_v22  ;;  %v6861_v6 = vpack.c.bf16 %v1885_v8, %v1877_v21  ;;  %v1884_v22 = vld [vmem:[#allocation20 + $0x5c0] sm:$0xff]  ;;  %v6939_v57 = vpack.c.bf16 %v1934_v9, %v1926_v7  ;;  %v1951_v21 = vld [vmem:[#allocation20 + $0x7d8] sm:$0xff]  ;;  %v7011_v3 = vpack.c.bf16 %v1714_v51, %v1706_v45 }
 0xd8f   :  { %v1650_v56 = vmul.f32 %v9540_v10, %v9540_v10  ;;  %v1651_v15 = vmul.f32 %v9543_v11, %v9543_v11  ;;  %v6863_v20 = vpack.c.bf16 %v1884_v22, %v1876_v18  ;;  %v1940_v8 = vld [vmem:[#allocation20 + $0x780] sm:$0xff]  ;;  %v1942_v18 = vld [vmem:[#allocation20 + $0x790] sm:$0xff]  ;;  %v6949_v7 = vpack.c.bf16 %v1729_v52, %v1721_v53  ;;  %v1793_v52 = vld [vmem:[#allocation20 + $0x2e8] sm:$0xff] }
 0xd90   :  { %v1641_v16 = vadd.f32 %v9549_v13, %v9546_v12  ;;  %6862 = vmatprep.subr.bf16.mxu0 %v6861_v6  ;;  %6940 = vmatpush1.bf16.msra.mxu1 %v6939_v57  ;;  %v6879_v17 = vpack.c.bf16 %v1948_v14, %v1940_v8  ;;  %v1950_v22 = vld [vmem:[#allocation20 + $0x7d0] sm:$0xff] }
 0xd91   :  { %v1654_v0 = vadd.f32 %v1651_v15, %v1650_v56  ;;  %6864 = vmatpush1.bf16.msra.mxu0 %v6863_v20  ;;  %v1941_v56 = vld [vmem:[#allocation20 + $0x788] sm:$0xff]  ;;  %v6943_v19 = vpack.c.bf16 %v1950_v22, %v1942_v18  ;;  %v1722_v57 = vld [vmem:[#allocation20 + $0xb0] sm:$0xff] }
 0xd92   :  { %1642 = vadd.xlane.f32.xlu1 %v1641_v16  ;;  %6866 = vmatprep.subr.bf16.mxu0 %v6865_v2  ;;  %v1949_v15 = vld [vmem:[#allocation20 + $0x7c8] sm:$0xff]  ;;  %v1943_v16 = vld [vmem:[#allocation20 + $0x798] sm:$0xff]  ;;  %v1770_v53 = vld [vmem:[#allocation20 + $0x230] sm:$0xff] }
 0xd93   :  { %1655 = vadd.xlane.f32.xlu0 %v1654_v0  ;;  %v6877_v0 = vpack.c.bf16 %v1949_v15, %v1941_v56  ;;  %v6941_v6 = vpack.c.bf16 %v1951_v21, %v1943_v16  ;;  %v1705_v20 = vld [vmem:[#allocation20 + $0x28] sm:$0xff]  ;;  %v1730_v56 = vld [vmem:[#allocation20 + $0xf0] sm:$0xff]  ;;  %v1747_v21 = vld [vmem:[#allocation20 + $0x178] sm:$0xff] }
 0xd94   :  { %v6945_v27 = vpack.c.bf16 %v1713_v5, %v1705_v20  ;;  %v1737_v15 = vld [vmem:[#allocation20 + $0x128] sm:$0xff]  ;;  %v7015_v14 = vpack.c.bf16 %v1730_v56, %v1722_v57  ;;  %v1746_v20 = vld [vmem:[#allocation20 + $0x170] sm:$0xff] }
 0xd95   :  { %6868 = vmatpush1.bf16.msra.mxu0 %v6867_v35  ;;  %6942 = vmatprep.subr.bf16.mxu1 %v6941_v6  ;;  %v1745_v16 = vld [vmem:[#allocation20 + $0x168] sm:$0xff]  ;;  %v1736_v6 = vld [vmem:[#allocation20 + $0x120] sm:$0xff]  ;;  %v1786_v57 = vld [vmem:[#allocation20 + $0x2b0] sm:$0xff] }
 0xd96   :  { %6870 = vmatprep.subr.bf16.mxu0 %v6869_v44  ;;  %6944 = vmatpush1.bf16.msra.mxu1 %v6943_v19  ;;  %v6953_v18 = vpack.c.bf16 %v1745_v16, %v1737_v15  ;;  %v1738_v19 = vld [vmem:[#allocation20 + $0x130] sm:$0xff]  ;;  %v1753_v5 = vld [vmem:[#allocation20 + $0x1a8] sm:$0xff] }
 0xd97   :  { %7010 = vmatprep.subr.bf16.mxu1 %v7009_v1  ;;  %v1794_v56 = vld [vmem:[#allocation20 + $0x2f0] sm:$0xff]  ;;  %v1801_v15 = vld [vmem:[#allocation20 + $0x328] sm:$0xff] }
 0xd98   :  { %v1809_v16 = vld [vmem:[#allocation20 + $0x368] sm:$0xff] }
 0xd99   :  { %6872 = vmatpush1.bf16.msra.mxu0 %v6871_v50  ;;  %v1712_v50 = vld [vmem:[#allocation20 + $0x60] sm:$0xff] }
 0xd9a   :  { %6874 = vmatprep.subr.bf16.mxu0 %v6873_v59  ;;  %v1723_v59 = vld [vmem:[#allocation20 + $0xb8] sm:$0xff]  ;;  %v6947_v63 = vpack.c.bf16 %v1712_v50, %v1704_v49  ;;  %v1768_v49 = vld [vmem:[#allocation20 + $0x220] sm:$0xff] }
 0xd9b   :  { %v1776_v50 = vld [vmem:[#allocation20 + $0x260] sm:$0xff] }
 0xd9d   :  { %6876 = vmatpush1.bf16.msra.mxu0 %v6875_v25  ;;  %v1728_v25 = vld [vmem:[#allocation20 + $0xe0] sm:$0xff] }
 0xd9e   :  { %6878 = vmatprep.subr.bf16.mxu0 %v6877_v0  ;;  %v1739_v0 = vld [vmem:[#allocation20 + $0x138] sm:$0xff]  ;;  %v6951_v8 = vpack.c.bf16 %v1728_v25, %v1720_v24  ;;  %v1784_v24 = vld [vmem:[#allocation20 + $0x2a0] sm:$0xff] }
 0xd9f   :  { %v7017_v22 = vpack.c.bf16 %v1747_v21, %v1739_v0  ;;  %v1792_v25 = vld [vmem:[#allocation20 + $0x2e0] sm:$0xff]  ;;  %v1803_v0 = vld [vmem:[#allocation20 + $0x338] sm:$0xff] }
 0xda0   :  { %v1811_v21 = vld [vmem:[#allocation20 + $0x378] sm:$0xff] }
 0xda1   :  { %6880 = vmatpush1.bf16.msra.mxu0 %v6879_v17  ;;  %v1744_v17 = vld [vmem:[#allocation20 + $0x160] sm:$0xff] }
 0xda2   :  { %6946 = vmatprep.subr.bf16.mxu0 %v6945_v27  ;;  %v1755_v27 = vld [vmem:[#allocation20 + $0x1b8] sm:$0xff]  ;;  %v6955_v1 = vpack.c.bf16 %v1744_v17, %v1736_v6  ;;  %v1800_v6 = vld [vmem:[#allocation20 + $0x320] sm:$0xff] }
 0xda3   :  { %v1808_v17 = vld [vmem:[#allocation20 + $0x360] sm:$0xff] }
 0xe1f   :  { %v1643_v29 = vpop.xlane.xlu1 %1642 }
 0xe20   :  { %v1645_v2 = vmul.f32 0.00390625, %v1643_v29  ;;  %v1656_v30 = vpop.xlane.xlu0 %1655  ;;  %v7019_v29 = vpack.c.bf16 %v1746_v20, %v1738_v19  ;;  %v1802_v19 = vld [vmem:[#allocation20 + $0x330] sm:$0xff] }
 0xe21   :  { %v1660_v4 = vmul.f32 0.00390625, %v1656_v30  ;;  %v1760_v30 = vld [vmem:[#allocation20 + $0x1e0] sm:$0xff]  ;;  %v1810_v20 = vld [vmem:[#allocation20 + $0x370] sm:$0xff] }
 0xe22   :  { %v9558_v31 = vsub.f32 %v9546_v12, %v1645_v2  ;;  %v9561_v32 = vsub.f32 %v9549_v13, %v1645_v2  ;;  %v9571_v12 = vrot.slane %v1636_v37, %v9416_v40  ;;  %v1752_v2 = vld [vmem:[#allocation20 + $0x1a0] sm:$0xff]  ;;  %v1777_v37 = vld [vmem:[#allocation20 + $0x268] sm:$0xff] }
 0xe23   :  { %v1662_v35 = vadd.f32 1e-12, %v1660_v4  ;;  %v6957_v4 = vpack.c.bf16 %v1761_v26, %v1753_v5  ;;  %v1817_v5 = vld [vmem:[#allocation20 + $0x3a8] sm:$0xff] }
 0xe24   :  { %v1652_v23 = vmul.f32 %v9558_v31, %v9558_v31  ;;  %v1653_v36 = vmul.f32 %v9561_v32, %v9561_v32  ;;  %v1825_v26 = vld [vmem:[#allocation20 + $0x3e8] sm:$0xff] }
 0xe25   :  { %8376 = vrsqrt.f32 %v1662_v35  ;;  %v7021_v35 = vpack.c.bf16 %v1763_v28, %v1755_v27  ;;  %v1819_v27 = vld [vmem:[#allocation20 + $0x3b8] sm:$0xff] }
 0xe26   :  { %v1657_v61 = vadd.f32 %v1653_v36, %v1652_v23  ;;  %v1754_v23 = vld [vmem:[#allocation20 + $0x1b0] sm:$0xff]  ;;  %v1827_v28 = vld [vmem:[#allocation20 + $0x3f8] sm:$0xff] }
 0xe27   :  { %v1762_v36 = vld [vmem:[#allocation20 + $0x1f0] sm:$0xff] }
 0xe28   :  { %1658 = vadd.xlane.f32.xlu1 %v1657_v61  ;;  %v1769_v61 = vld [vmem:[#allocation20 + $0x228] sm:$0xff] }
 0xe29   :  { %v6961_v45 = vpack.c.bf16 %v1777_v37, %v1769_v61  ;;  %v1833_v61 = vld [vmem:[#allocation20 + $0x428] sm:$0xff] }
 0xe2a   :  { %v1841_v37 = vld [vmem:[#allocation20 + $0x468] sm:$0xff] }
 0xe2f   :  { %v8377_v13 = vpop.eup %8376 }
 0xe30   :  { %v1666_v44 = vmul.f32 %v8377_v13, %v9540_v10  ;;  %v1667_v46 = vmul.f32 %v8377_v13, %v9543_v11  ;;  %v1731_v10 = vld [vmem:[#allocation20 + $0xf8] sm:$0xff] }
 0xe31   :  { %v7013_v9 = vpack.c.bf16 %v1731_v10, %v1723_v59  ;;  %v1779_v13 = vld [vmem:[#allocation20 + $0x278] sm:$0xff] }
 0xe32   :  { %v1682_v54 = vmul.f32 %v9568_v42, %v1667_v46  ;;  %v1681_v55 = vmul.f32 %v9571_v12, %v1666_v44  ;;  %v6959_v44 = vpack.c.bf16 %v1760_v30, %v1752_v2  ;;  %v7023_v46 = vpack.c.bf16 %v1762_v36, %v1754_v23  ;;  %v1787_v59 = vld [vmem:[#allocation20 + $0x2b8] sm:$0xff]  ;;  %v1816_v2 = vld [vmem:[#allocation20 + $0x3a0] sm:$0xff]  ;;  %v1818_v23 = vld [vmem:[#allocation20 + $0x3b0] sm:$0xff] }
 0xe33   :  { %v7025_v51 = vpack.c.bf16 %v1779_v13, %v1771_v41  ;;  %v1795_v10 = vld [vmem:[#allocation20 + $0x2f8] sm:$0xff]  ;;  %v1824_v30 = vld [vmem:[#allocation20 + $0x3e0] sm:$0xff]  ;;  %v1826_v36 = vld [vmem:[#allocation20 + $0x3f0] sm:$0xff] }
 0xe34   :  { %v9584_v11 = vadd.f32 %v9576_v47, %v1682_v54  ;;  %v9587_v60 = vadd.f32 %v9579_v48, %v1681_v55  ;;  %v1778_v54 = vld [vmem:[#allocation20 + $0x270] sm:$0xff]  ;;  %v1785_v55 = vld [vmem:[#allocation20 + $0x2a8] sm:$0xff]  ;;  %v1835_v41 = vld [vmem:[#allocation20 + $0x438] sm:$0xff] }
 0xe35   :  { %v1843_v13 = vld [vmem:[#allocation20 + $0x478] sm:$0xff] }
 0xe36   :  { %2062 = vmatprep.mubr.f32.mxu0 %v9584_v11  ;;  %2139 = vmatprep.mubr.f32.mxu1 %v9584_v11 }
 0xe37   :  { %2063 = vmatmul.mubr.f32.vlgmr.msra.gmra.mrb[8].mxu0 %v9587_v60  ;;  %2140 = vmatmul.mubr.f32.vlgmr.msra.gmra.mrb[24].mxu1 %v9587_v60 }
 0xe38   :  { %6948 = vmatpush1.bf16.msra.mxu0 %v6947_v63  ;;  %7012 = vmatpush1.bf16.msra.mxu1 %v7011_v3  ;;  %v6963_v63 = vpack.c.bf16 %v1776_v50, %v1768_v49  ;;  %v7027_v3 = vpack.c.bf16 %v1778_v54, %v1770_v53  ;;  %v1832_v49 = vld [vmem:[#allocation20 + $0x420] sm:$0xff]  ;;  %v1834_v53 = vld [vmem:[#allocation20 + $0x430] sm:$0xff] }
 0xe39   :  { %6950 = vmatprep.subr.bf16.mxu0 %v6949_v7  ;;  %7014 = vmatprep.subr.bf16.mxu1 %v7013_v9  ;;  %v6965_v7 = vpack.c.bf16 %v1793_v52, %v1785_v55  ;;  %v7029_v9 = vpack.c.bf16 %v1795_v10, %v1787_v59  ;;  %v1840_v50 = vld [vmem:[#allocation20 + $0x460] sm:$0xff]  ;;  %v1842_v54 = vld [vmem:[#allocation20 + $0x470] sm:$0xff]  ;;  %v1849_v55 = vld [vmem:[#allocation20 + $0x4a8] sm:$0xff] }
 0xe3a   :  { %v1857_v52 = vld [vmem:[#allocation20 + $0x4e8] sm:$0xff]  ;;  %v1851_v59 = vld [vmem:[#allocation20 + $0x4b8] sm:$0xff] }
 0xe3b   :  { %v1859_v10 = vld [vmem:[#allocation20 + $0x4f8] sm:$0xff] }
 0xe3c   :  { %6952 = vmatpush1.bf16.msra.mxu0 %v6951_v8  ;;  %7016 = vmatpush1.bf16.msra.mxu1 %v7015_v14  ;;  %v6967_v8 = vpack.c.bf16 %v1792_v25, %v1784_v24  ;;  %v7031_v14 = vpack.c.bf16 %v1794_v56, %v1786_v57  ;;  %v1848_v24 = vld [vmem:[#allocation20 + $0x4a0] sm:$0xff]  ;;  %v1850_v57 = vld [vmem:[#allocation20 + $0x4b0] sm:$0xff] }
 0xe3d   :  { %6954 = vmatprep.subr.bf16.mxu0 %v6953_v18  ;;  %7018 = vmatprep.subr.bf16.mxu1 %v7017_v22  ;;  %v6969_v18 = vpack.c.bf16 %v1809_v16, %v1801_v15  ;;  %v7033_v22 = vpack.c.bf16 %v1811_v21, %v1803_v0  ;;  %v1856_v25 = vld [vmem:[#allocation20 + $0x4e0] sm:$0xff]  ;;  %v1858_v56 = vld [vmem:[#allocation20 + $0x4f0] sm:$0xff]  ;;  %v1865_v15 = vld [vmem:[#allocation20 + $0x528] sm:$0xff] }
 0xe3e   :  { %v1873_v16 = vld [vmem:[#allocation20 + $0x568] sm:$0xff]  ;;  %v1867_v0 = vld [vmem:[#allocation20 + $0x538] sm:$0xff] }
 0xe3f   :  { %v1875_v21 = vld [vmem:[#allocation20 + $0x578] sm:$0xff] }
 0xe40   :  { %6956 = vmatpush1.bf16.msra.mxu0 %v6955_v1  ;;  %7020 = vmatpush1.bf16.msra.mxu1 %v7019_v29  ;;  %v6971_v1 = vpack.c.bf16 %v1808_v17, %v1800_v6  ;;  %v7035_v29 = vpack.c.bf16 %v1810_v20, %v1802_v19  ;;  %v1864_v6 = vld [vmem:[#allocation20 + $0x520] sm:$0xff]  ;;  %v1866_v19 = vld [vmem:[#allocation20 + $0x530] sm:$0xff] }
 0xe41   :  { %6958 = vmatprep.subr.bf16.mxu0 %v6957_v4  ;;  %7022 = vmatprep.subr.bf16.mxu1 %v7021_v35  ;;  %v6973_v4 = vpack.c.bf16 %v1825_v26, %v1817_v5  ;;  %v7037_v35 = vpack.c.bf16 %v1827_v28, %v1819_v27  ;;  %v1872_v17 = vld [vmem:[#allocation20 + $0x560] sm:$0xff]  ;;  %v1874_v20 = vld [vmem:[#allocation20 + $0x570] sm:$0xff]  ;;  %v1881_v5 = vld [vmem:[#allocation20 + $0x5a8] sm:$0xff] }
 0xe42   :  { %v1889_v26 = vld [vmem:[#allocation20 + $0x5e8] sm:$0xff]  ;;  %v1883_v27 = vld [vmem:[#allocation20 + $0x5b8] sm:$0xff] }
 0xe43   :  { %v1891_v28 = vld [vmem:[#allocation20 + $0x5f8] sm:$0xff] }
 0xe44   :  { %6960 = vmatpush1.bf16.msra.mxu0 %v6959_v44  ;;  %7024 = vmatpush1.bf16.msra.mxu1 %v7023_v46  ;;  %v6975_v44 = vpack.c.bf16 %v1824_v30, %v1816_v2  ;;  %v7039_v46 = vpack.c.bf16 %v1826_v36, %v1818_v23  ;;  %v1880_v2 = vld [vmem:[#allocation20 + $0x5a0] sm:$0xff]  ;;  %v1882_v23 = vld [vmem:[#allocation20 + $0x5b0] sm:$0xff] }
 0xe45   :  { %6962 = vmatprep.subr.bf16.mxu0 %v6961_v45  ;;  %7026 = vmatprep.subr.bf16.mxu1 %v7025_v51  ;;  %v6977_v45 = vpack.c.bf16 %v1841_v37, %v1833_v61  ;;  %v7041_v51 = vpack.c.bf16 %v1843_v13, %v1835_v41  ;;  %v1888_v30 = vld [vmem:[#allocation20 + $0x5e0] sm:$0xff]  ;;  %v1890_v36 = vld [vmem:[#allocation20 + $0x5f0] sm:$0xff]  ;;  %v1897_v61 = vld [vmem:[#allocation20 + $0x628] sm:$0xff] }
 0xe46   :  { %v1905_v37 = vld [vmem:[#allocation20 + $0x668] sm:$0xff]  ;;  %v1899_v41 = vld [vmem:[#allocation20 + $0x638] sm:$0xff] }
 0xe47   :  { %v1907_v13 = vld [vmem:[#allocation20 + $0x678] sm:$0xff] }
 0xe48   :  { %6964 = vmatpush1.bf16.msra.mxu0 %v6963_v63  ;;  %7028 = vmatpush1.bf16.msra.mxu1 %v7027_v3  ;;  %v6979_v63 = vpack.c.bf16 %v1840_v50, %v1832_v49  ;;  %v7043_v3 = vpack.c.bf16 %v1842_v54, %v1834_v53  ;;  %v1896_v49 = vld [vmem:[#allocation20 + $0x620] sm:$0xff]  ;;  %v1898_v53 = vld [vmem:[#allocation20 + $0x630] sm:$0xff] }
 0xe49   :  { %6966 = vmatprep.subr.bf16.mxu0 %v6965_v7  ;;  %7030 = vmatprep.subr.bf16.mxu1 %v7029_v9  ;;  %v6981_v7 = vpack.c.bf16 %v1857_v52, %v1849_v55  ;;  %v7045_v9 = vpack.c.bf16 %v1859_v10, %v1851_v59  ;;  %v1904_v50 = vld [vmem:[#allocation20 + $0x660] sm:$0xff]  ;;  %v1906_v54 = vld [vmem:[#allocation20 + $0x670] sm:$0xff]  ;;  %v1913_v55 = vld [vmem:[#allocation20 + $0x6a8] sm:$0xff] }
 0xe4a   :  { %v1921_v52 = vld [vmem:[#allocation20 + $0x6e8] sm:$0xff]  ;;  %v1915_v59 = vld [vmem:[#allocation20 + $0x6b8] sm:$0xff] }
 0xe4b   :  { %v1923_v10 = vld [vmem:[#allocation20 + $0x6f8] sm:$0xff] }
 0xe4c   :  { %6968 = vmatpush1.bf16.msra.mxu0 %v6967_v8  ;;  %7032 = vmatpush1.bf16.msra.mxu1 %v7031_v14  ;;  %v6983_v8 = vpack.c.bf16 %v1856_v25, %v1848_v24  ;;  %v7047_v14 = vpack.c.bf16 %v1858_v56, %v1850_v57  ;;  %v1912_v24 = vld [vmem:[#allocation20 + $0x6a0] sm:$0xff]  ;;  %v1914_v57 = vld [vmem:[#allocation20 + $0x6b0] sm:$0xff] }
 0xe4d   :  { %6970 = vmatprep.subr.bf16.mxu0 %v6969_v18  ;;  %7034 = vmatprep.subr.bf16.mxu1 %v7033_v22  ;;  %v6985_v18 = vpack.c.bf16 %v1873_v16, %v1865_v15  ;;  %v7049_v22 = vpack.c.bf16 %v1875_v21, %v1867_v0  ;;  %v1920_v25 = vld [vmem:[#allocation20 + $0x6e0] sm:$0xff]  ;;  %v1922_v56 = vld [vmem:[#allocation20 + $0x6f0] sm:$0xff]  ;;  %v1929_v15 = vld [vmem:[#allocation20 + $0x728] sm:$0xff] }
 0xe4e   :  { %v1937_v16 = vld [vmem:[#allocation20 + $0x768] sm:$0xff]  ;;  %v1931_v0 = vld [vmem:[#allocation20 + $0x738] sm:$0xff] }
 0xe4f   :  { %v1939_v21 = vld [vmem:[#allocation20 + $0x778] sm:$0xff] }
 0xe50   :  { %6972 = vmatpush1.bf16.msra.mxu0 %v6971_v1  ;;  %7036 = vmatpush1.bf16.msra.mxu1 %v7035_v29  ;;  %v6987_v1 = vpack.c.bf16 %v1872_v17, %v1864_v6  ;;  %v7051_v29 = vpack.c.bf16 %v1874_v20, %v1866_v19  ;;  %v1928_v6 = vld [vmem:[#allocation20 + $0x720] sm:$0xff]  ;;  %v1930_v19 = vld [vmem:[#allocation20 + $0x730] sm:$0xff] }
 0xe51   :  { %6974 = vmatprep.subr.bf16.mxu0 %v6973_v4  ;;  %7038 = vmatprep.subr.bf16.mxu1 %v7037_v35  ;;  %v6989_v4 = vpack.c.bf16 %v1889_v26, %v1881_v5  ;;  %v7053_v35 = vpack.c.bf16 %v1891_v28, %v1883_v27  ;;  %v1936_v17 = vld [vmem:[#allocation20 + $0x760] sm:$0xff]  ;;  %v1938_v20 = vld [vmem:[#allocation20 + $0x770] sm:$0xff]  ;;  %v1945_v5 = vld [vmem:[#allocation20 + $0x7a8] sm:$0xff] }
 0xe52   :  { %v1953_v26 = vld [vmem:[#allocation20 + $0x7e8] sm:$0xff]  ;;  %v1947_v27 = vld [vmem:[#allocation20 + $0x7b8] sm:$0xff] }
 0xe53   :  { %v1955_v28 = vld [vmem:[#allocation20 + $0x7f8] sm:$0xff] }
 0xe54   :  { %6976 = vmatpush1.bf16.msra.mxu0 %v6975_v44  ;;  %7040 = vmatpush1.bf16.msra.mxu1 %v7039_v46  ;;  %v6991_v44 = vpack.c.bf16 %v1888_v30, %v1880_v2  ;;  %v7055_v46 = vpack.c.bf16 %v1890_v36, %v1882_v23  ;;  %v1944_v2 = vld [vmem:[#allocation20 + $0x7a0] sm:$0xff]  ;;  %v7005_v30 = vpack.c.bf16 %v1953_v26, %v1945_v5  ;;  %v1946_v23 = vld [vmem:[#allocation20 + $0x7b0] sm:$0xff]  ;;  %v2473_v5 = vld [vmem:[#allocation23 + $0xb8] sm:$0xff] }
 0xe55   :  { %6978 = vmatprep.subr.bf16.mxu0 %v6977_v45  ;;  %7042 = vmatprep.subr.bf16.mxu1 %v7041_v51  ;;  %v6993_v45 = vpack.c.bf16 %v1905_v37, %v1897_v61  ;;  %v7057_v51 = vpack.c.bf16 %v1907_v13, %v1899_v41  ;;  %v1954_v36 = vld [vmem:[#allocation20 + $0x7f0] sm:$0xff]  ;;  %v2451_v61 = vld [vmem:[#allocation23 + $0x8] sm:$0xff]  ;;  %v2453_v37 = vld [vmem:[#allocation23 + $0x18] sm:$0xff] }
 0xe56   :  { %v7071_v13 = vpack.c.bf16 %v1954_v36, %v1946_v23  ;;  %v2476_v23 = vld [vmem:[#allocation23 + $0xd0] sm:$0xff]  ;;  %v2479_v36 = vld [vmem:[#allocation23 + $0xe8] sm:$0xff] }
 0xe58   :  { %6980 = vmatpush1.bf16.msra.mxu0 %v6979_v63  ;;  %7044 = vmatpush1.bf16.msra.mxu1 %v7043_v3  ;;  %v6995_v63 = vpack.c.bf16 %v1904_v50, %v1896_v49  ;;  %v7059_v3 = vpack.c.bf16 %v1906_v54, %v1898_v53 }
 0xe59   :  { %6982 = vmatprep.subr.bf16.mxu0 %v6981_v7  ;;  %7046 = vmatprep.subr.bf16.mxu1 %v7045_v9  ;;  %v6997_v7 = vpack.c.bf16 %v1921_v52, %v1913_v55  ;;  %v7061_v9 = vpack.c.bf16 %v1923_v10, %v1915_v59  ;;  %v2450_v10 = vld [vmem:[#allocation23] sm:$0xff] }
 0xe5c   :  { %6984 = vmatpush1.bf16.msra.mxu0 %v6983_v8  ;;  %7048 = vmatpush1.bf16.msra.mxu1 %v7047_v14  ;;  %v6999_v8 = vpack.c.bf16 %v1920_v25, %v1912_v24  ;;  %v7063_v14 = vpack.c.bf16 %v1922_v56, %v1914_v57  ;;  %v2461_v24 = vld [vmem:[#allocation23 + $0x58] sm:$0xff]  ;;  %v2460_v57 = vld [vmem:[#allocation23 + $0x50] sm:$0xff]  ;;  %v2463_v56 = vld [vmem:[#allocation23 + $0x68] sm:$0xff] }
 0xe5d   :  { %6986 = vmatprep.subr.bf16.mxu0 %v6985_v18  ;;  %7050 = vmatprep.subr.bf16.mxu1 %v7049_v22  ;;  %v7001_v18 = vpack.c.bf16 %v1937_v16, %v1929_v15  ;;  %v7065_v22 = vpack.c.bf16 %v1939_v21, %v1931_v0  ;;  %v2465_v15 = vld [vmem:[#allocation23 + $0x78] sm:$0xff]  ;;  %v2462_v21 = vld [vmem:[#allocation23 + $0x60] sm:$0xff] }
 0xe5e   :  { %v7085_v0 = vpack.c.bf16 %v2465_v15, %v2463_v56  ;;  %v2494_v56 = vld [vmem:[#allocation23 + $0x160] sm:$0xff]  ;;  %v2496_v15 = vld [vmem:[#allocation23 + $0x170] sm:$0xff] }
 0xe60   :  { %6988 = vmatpush1.bf16.msra.mxu0 %v6987_v1  ;;  %7052 = vmatpush1.bf16.msra.mxu1 %v7051_v29  ;;  %v7003_v1 = vpack.c.bf16 %v1936_v17, %v1928_v6  ;;  %v7067_v29 = vpack.c.bf16 %v1938_v20, %v1930_v19  ;;  %v2469_v6 = vld [vmem:[#allocation23 + $0x98] sm:$0xff]  ;;  %v2468_v19 = vld [vmem:[#allocation23 + $0x90] sm:$0xff]  ;;  %v2471_v20 = vld [vmem:[#allocation23 + $0xa8] sm:$0xff] }
 0xe61   :  { %6990 = vmatprep.subr.bf16.mxu0 %v6989_v4  ;;  %7054 = vmatprep.subr.bf16.mxu1 %v7053_v35  ;;  %v7069_v4 = vpack.c.bf16 %v1955_v28, %v1947_v27  ;;  %v1952_v35 = vld [vmem:[#allocation20 + $0x7e0] sm:$0xff]  ;;  %v7093_v27 = vpack.c.bf16 %v2473_v5, %v2471_v20  ;;  %v2470_v28 = vld [vmem:[#allocation23 + $0xa0] sm:$0xff] }
 0xe62   :  { %v7007_v41 = vpack.c.bf16 %v1952_v35, %v1944_v2  ;;  %v2477_v2 = vld [vmem:[#allocation23 + $0xd8] sm:$0xff]  ;;  %v2474_v35 = vld [vmem:[#allocation23 + $0xc0] sm:$0xff]  ;;  %v2504_v5 = vld [vmem:[#allocation23 + $0x1b0] sm:$0xff] }
 0xe63   :  { %v2502_v20 = vld [vmem:[#allocation23 + $0x1a0] sm:$0xff] }
 0xe64   :  { %6992 = vmatpush1.bf16.msra.mxu0 %v6991_v44  ;;  %7056 = vmatpush1.bf16.msra.mxu1 %v7055_v46  ;;  %v7073_v44 = vpack.c.bf16 %v2453_v37, %v2451_v61  ;;  %v2481_v61 = vld [vmem:[#allocation23 + $0xf8] sm:$0xff]  ;;  %v7099_v37 = vpack.c.bf16 %v2476_v23, %v2474_v35 }
 0xe65   :  { %6994 = vmatprep.subr.bf16.mxu0 %v6993_v45  ;;  %7058 = vmatprep.subr.bf16.mxu1 %v7057_v51  ;;  %v2513_v35 = vld [vmem:[#allocation23 + $0x1f8] sm:$0xff] }
 0xe68   :  { %6996 = vmatpush1.bf16.msra.mxu0 %v6995_v63  ;;  %7060 = vmatpush1.bf16.msra.mxu1 %v7059_v3  ;;  %v2452_v63 = vld [vmem:[#allocation23 + $0x10] sm:$0xff]  ;;  %v2459_v3 = vld [vmem:[#allocation23 + $0x48] sm:$0xff] }
 0xe69   :  { %6998 = vmatprep.subr.bf16.mxu0 %v6997_v7  ;;  %7062 = vmatprep.subr.bf16.mxu1 %v7061_v9  ;;  %v7081_v7 = vpack.c.bf16 %v2461_v24, %v2459_v3  ;;  %v2458_v9 = vld [vmem:[#allocation23 + $0x40] sm:$0xff]  ;;  %v2492_v24 = vld [vmem:[#allocation23 + $0x150] sm:$0xff] }
 0xe6a   :  { %v7083_v16 = vpack.c.bf16 %v2460_v57, %v2458_v9  ;;  %v2490_v3 = vld [vmem:[#allocation23 + $0x140] sm:$0xff] }
 0xe6b   :  { %v7115_v9 = vpack.c.bf16 %v2492_v24, %v2490_v3 }
 0xe6c   :  { %7000 = vmatpush1.bf16.msra.mxu0 %v6999_v8  ;;  %7064 = vmatpush1.bf16.msra.mxu1 %v7063_v14  ;;  %v2464_v8 = vld [vmem:[#allocation23 + $0x70] sm:$0xff]  ;;  %v2467_v14 = vld [vmem:[#allocation23 + $0x88] sm:$0xff] }
 0xe6d   :  { %7002 = vmatprep.subr.bf16.mxu0 %v7001_v18  ;;  %7066 = vmatprep.subr.bf16.mxu1 %v7065_v22  ;;  %v7087_v17 = vpack.c.bf16 %v2464_v8, %v2462_v21  ;;  %v7089_v18 = vpack.c.bf16 %v2469_v6, %v2467_v14  ;;  %v2466_v22 = vld [vmem:[#allocation23 + $0x80] sm:$0xff]  ;;  %v7119_v21 = vpack.c.bf16 %v2496_v15, %v2494_v56  ;;  %v2500_v6 = vld [vmem:[#allocation23 + $0x190] sm:$0xff] }
 0xe6e   :  { %v7091_v26 = vpack.c.bf16 %v2468_v19, %v2466_v22  ;;  %v2498_v14 = vld [vmem:[#allocation23 + $0x180] sm:$0xff]  ;;  %v2516_v15 = vld [vmem:[#allocation23 + $0x210] sm:$0xff] }
 0xe6f   :  { %v7123_v22 = vpack.c.bf16 %v2500_v6, %v2498_v14  ;;  %v2514_v56 = vld [vmem:[#allocation23 + $0x200] sm:$0xff] }
 0xe70   :  { %7004 = vmatpush1.bf16.msra.mxu0 %v7003_v1  ;;  %7068 = vmatpush1.bf16.msra.mxu1 %v7067_v29  ;;  %v2472_v1 = vld [vmem:[#allocation23 + $0xb0] sm:$0xff]  ;;  %v2475_v29 = vld [vmem:[#allocation23 + $0xc8] sm:$0xff] }
 0xe71   :  { %7006 = vmatprep.subr.bf16.mxu0 %v7005_v30  ;;  %7070 = vmatprep.subr.bf16.mxu1 %v7069_v4  ;;  %v7095_v30 = vpack.c.bf16 %v2472_v1, %v2470_v28  ;;  %v7097_v4 = vpack.c.bf16 %v2477_v2, %v2475_v29  ;;  %v7127_v28 = vpack.c.bf16 %v2504_v5, %v2502_v20  ;;  %v2506_v29 = vld [vmem:[#allocation23 + $0x1c0] sm:$0xff]  ;;  %v2508_v2 = vld [vmem:[#allocation23 + $0x1d0] sm:$0xff]  ;;  %v2523_v5 = vld [vmem:[#allocation23 + $0x248] sm:$0xff] }
 0xe72   :  { %v7131_v23 = vpack.c.bf16 %v2508_v2, %v2506_v29  ;;  %v2520_v20 = vld [vmem:[#allocation23 + $0x230] sm:$0xff]  ;;  %v2527_v2 = vld [vmem:[#allocation23 + $0x268] sm:$0xff] }
 0xe73   :  { %v2524_v29 = vld [vmem:[#allocation23 + $0x250] sm:$0xff] }
 0xe74   :  { %7008 = vmatpush1.bf16.msra.mxu0 %v7007_v41  ;;  %7072 = vmatpush1.bf16.msra.mxu1 %v7071_v13  ;;  %v7101_v41 = vpack.c.bf16 %v2481_v61, %v2479_v36  ;;  %v2478_v13 = vld [vmem:[#allocation23 + $0xe0] sm:$0xff] }
 0xe75   :  { %7074 = vmatprep.subr.bf16.mxu0 %v7073_v44  ;;  %v2480_v44 = vld [vmem:[#allocation23 + $0xf0] sm:$0xff] }
 0xeb5   :  { %v1659_v46 = vpop.xlane.xlu1 %1658 }
 0xeb6   :  { %v1661_v49 = vmul.f32 0.00390625, %v1659_v46  ;;  %v2483_v46 = vld [vmem:[#allocation23 + $0x108] sm:$0xff] }
 0xeb8   :  { %v1663_v50 = vadd.f32 1e-12, %v1661_v49  ;;  %v2485_v49 = vld [vmem:[#allocation23 + $0x118] sm:$0xff] }
 0xeba   :  { %8378 = vrsqrt.f32 %v1663_v50  ;;  %v7103_v50 = vpack.c.bf16 %v2480_v44, %v2478_v13  ;;  %v2515_v44 = vld [vmem:[#allocation23 + $0x208] sm:$0xff] }
 0xec4   :  { %v8379_v45 = vpop.eup %8378 }
 0xec5   :  { %v1668_v51 = vmul.f32 %v8379_v45, %v9558_v31  ;;  %v1669_v53 = vmul.f32 %v8379_v45, %v9561_v32  ;;  %v2455_v31 = vld [vmem:[#allocation23 + $0x28] sm:$0xff]  ;;  %v2457_v32 = vld [vmem:[#allocation23 + $0x38] sm:$0xff]  ;;  %v7105_v45 = vpack.c.bf16 %v2485_v49, %v2483_v46 }
 0xec6   :  { %v2517_v46 = vld [vmem:[#allocation23 + $0x218] sm:$0xff] }
 0xec7   :  { %v1684_v54 = vmul.f32 %v9568_v42, %v1669_v53  ;;  %v1683_v55 = vmul.f32 %v9571_v12, %v1668_v51  ;;  %v7075_v42 = vpack.c.bf16 %v2452_v63, %v2450_v10  ;;  %v7077_v12 = vpack.c.bf16 %v2457_v32, %v2455_v31  ;;  %v2482_v51 = vld [vmem:[#allocation23 + $0x100] sm:$0xff]  ;;  %v2484_v53 = vld [vmem:[#allocation23 + $0x110] sm:$0xff] }
 0xec8   :  { %v7107_v10 = vpack.c.bf16 %v2484_v53, %v2482_v51  ;;  %v2486_v31 = vld [vmem:[#allocation23 + $0x120] sm:$0xff]  ;;  %v2488_v32 = vld [vmem:[#allocation23 + $0x130] sm:$0xff] }
 0xec9   :  { %v9598_v52 = vadd.f32 %v9576_v47, %v1684_v54  ;;  %v9601_v59 = vadd.f32 %v9579_v48, %v1683_v55  ;;  %v2454_v47 = vld [vmem:[#allocation23 + $0x20] sm:$0xff]  ;;  %v2456_v48 = vld [vmem:[#allocation23 + $0x30] sm:$0xff]  ;;  %v2487_v54 = vld [vmem:[#allocation23 + $0x128] sm:$0xff] }
 0xeca   :  { %v7079_v25 = vpack.c.bf16 %v2456_v48, %v2454_v47  ;;  %v2489_v55 = vld [vmem:[#allocation23 + $0x138] sm:$0xff]  ;;  %v7111_v47 = vpack.c.bf16 %v2488_v32, %v2486_v31 }
 0xecb   :  { %2068 = vmatprep.mubr.f32.mxu0 %v9598_v52  ;;  %2145 = vmatprep.mubr.f32.mxu1 %v9598_v52  ;;  %v7109_v63 = vpack.c.bf16 %v2489_v55, %v2487_v54  ;;  %v7137_v55 = vpack.c.bf16 %v2517_v46, %v2515_v44  ;;  %v2533_v44 = vld [vmem:[#allocation23 + $0x298] sm:$0xff] }
 0xecc   :  { %2069 = vmatmul.mubr.f32.gmra.mrb[10].mxu0 %v9601_v59  ;;  %2146 = vmatmul.mubr.f32.gmra.mrb[26].mxu1 %v9601_v59 }
 0xecd   :  { %2216 = vmatprep.mubr.f32.mxu0 %v9584_v11  ;;  %2293 = vmatprep.mubr.f32.mxu1 %v9584_v11 }
 0xed0   :  { %2217 = vmatmul.mubr.f32.vlgmr.msra.gmra.mrb[12].mxu0 %v9587_v60  ;;  %2294 = vmatmul.mubr.f32.vlgmr.msra.gmra.mrb[28].mxu1 %v9587_v60 }
 0xed1   :  { %2222 = vmatprep.mubr.f32.mxu0 %v9598_v52  ;;  %2299 = vmatprep.mubr.f32.mxu1 %v9598_v52 }
 0xed2   :  { %7076 = vmatpush1.bf16.msra.mxu0 %v7075_v42  ;;  %v2491_v42 = vld [vmem:[#allocation23 + $0x148] sm:$0xff] }
 0xed3   :  { %7078 = vmatprep.subr.bf16.mxu0 %v7077_v12  ;;  %v2493_v12 = vld [vmem:[#allocation23 + $0x158] sm:$0xff] }
 0xed4   :  { %2223 = vmatmul.mubr.f32.gmra.mrb[14].mxu0 %v9601_v59  ;;  %2300 = vmatmul.mubr.f32.gmra.mrb[30].mxu1 %v9601_v59  ;;  %v7113_v48 = vpack.c.bf16 %v2493_v12, %v2491_v42 }
 0xed6   :  { %7080 = vmatpush1.bf16.msra.mxu0 %v7079_v25  ;;  %v2495_v25 = vld [vmem:[#allocation23 + $0x168] sm:$0xff] }
 0xed7   :  { %7082 = vmatprep.subr.bf16.mxu0 %v7081_v7  ;;  %v2497_v7 = vld [vmem:[#allocation23 + $0x178] sm:$0xff] }
 0xed8   :  { %v7117_v57 = vpack.c.bf16 %v2497_v7, %v2495_v25 }
 0xeda   :  { %7084 = vmatpush1.bf16.msra.mxu0 %v7083_v16  ;;  %v2499_v16 = vld [vmem:[#allocation23 + $0x188] sm:$0xff] }
 0xedb   :  { %7086 = vmatprep.subr.bf16.mxu0 %v7085_v0  ;;  %v2501_v0 = vld [vmem:[#allocation23 + $0x198] sm:$0xff] }
 0xedc   :  { %v7121_v8 = vpack.c.bf16 %v2501_v0, %v2499_v16 }
 0xede   :  { %7088 = vmatpush1.bf16.msra.mxu0 %v7087_v17  ;;  %v2503_v17 = vld [vmem:[#allocation23 + $0x1a8] sm:$0xff] }
 0xedf   :  { %7090 = vmatprep.subr.bf16.mxu0 %v7089_v18  ;;  %v2505_v18 = vld [vmem:[#allocation23 + $0x1b8] sm:$0xff] }
 0xee0   :  { %v7125_v19 = vpack.c.bf16 %v2505_v18, %v2503_v17  ;;  %v7139_v17 = vpack.c.bf16 %v2516_v15, %v2514_v56  ;;  %v2542_v56 = vld [vmem:[#allocation23 + $0x2e0] sm:$0xff]  ;;  %v2544_v15 = vld [vmem:[#allocation23 + $0x2f0] sm:$0xff] }
 0xee2   :  { %7092 = vmatpush1.bf16.msra.mxu0 %v7091_v26  ;;  %v2507_v26 = vld [vmem:[#allocation23 + $0x1c8] sm:$0xff] }
 0xee3   :  { %7094 = vmatprep.subr.bf16.mxu0 %v7093_v27  ;;  %v2509_v27 = vld [vmem:[#allocation23 + $0x1d8] sm:$0xff] }
 0xee4   :  { %v7129_v1 = vpack.c.bf16 %v2509_v27, %v2507_v26  ;;  %v2525_v26 = vld [vmem:[#allocation23 + $0x258] sm:$0xff] }
 0xee6   :  { %7096 = vmatpush1.bf16.msra.mxu0 %v7095_v30  ;;  %v9615_v30 = vld [vmem:[#allocation21] sm:$0xff] }
 0xee7   :  { %7098 = vmatprep.subr.bf16.mxu0 %v7097_v4  ;;  %v2511_v4 = vld [vmem:[#allocation23 + $0x1e8] sm:$0xff]  ;;  %v9619_v36 = vrot.slane %v9615_v30, %v9416_v40  ;;  %v9623_v13 = vrot.slane %v9615_v30, %v9413_v39 }
 0xee8   :  { %v7133_v61 = vpack.c.bf16 %v2513_v35, %v2511_v4  ;;  %v2529_v4 = vld [vmem:[#allocation23 + $0x278] sm:$0xff] }
 0xeea   :  { %7100 = vmatpush1.bf16.msra.mxu0 %v7099_v37  ;;  %v2510_v37 = vld [vmem:[#allocation23 + $0x1e0] sm:$0xff] }
 0xeeb   :  { %7102 = vmatprep.subr.bf16.mxu0 %v7101_v41  ;;  %v2512_v41 = vld [vmem:[#allocation23 + $0x1f0] sm:$0xff] }
 0xeee   :  { %7104 = vmatpush1.bf16.msra.mxu0 %v7103_v50 }
 0xeef   :  { %7106 = vmatprep.subr.bf16.mxu0 %v7105_v45  ;;  %v7135_v45 = vpack.c.bf16 %v2512_v41, %v2510_v37  ;;  %v2528_v37 = vld [vmem:[#allocation23 + $0x270] sm:$0xff]  ;;  %v2531_v41 = vld [vmem:[#allocation23 + $0x288] sm:$0xff] }
 0xef2   :  { %7108 = vmatpush1.bf16.msra.mxu0 %v7107_v10 }
 0xef3   :  { %7110 = vmatprep.subr.bf16.mxu0 %v7109_v63 }
 0xef6   :  { %7112 = vmatpush1.bf16.msra.mxu0 %v7111_v47 }
 0xef7   :  { %7114 = vmatprep.subr.bf16.mxu0 %v7113_v48 }
 0xefa   :  { %7116 = vmatpush1.bf16.msra.mxu0 %v7115_v9 }
 0xefb   :  { %7118 = vmatprep.subr.bf16.mxu0 %v7117_v57 }
 0xefe   :  { %7120 = vmatpush1.bf16.msra.mxu0 %v7119_v21  ;;  %v2519_v21 = vld [vmem:[#allocation23 + $0x228] sm:$0xff] }
 0xeff   :  { %7122 = vmatprep.subr.bf16.mxu0 %v7121_v8  ;;  %v2521_v8 = vld [vmem:[#allocation23 + $0x238] sm:$0xff] }
 0xf02   :  { %7124 = vmatpush1.bf16.msra.mxu0 %v7123_v22  ;;  %v7141_v22 = vpack.c.bf16 %v2521_v8, %v2519_v21  ;;  %v7167_v21 = vpack.c.bf16 %v2544_v15, %v2542_v56  ;;  %v2574_v15 = vld [vmem:[#allocation23 + $0x3e0] sm:$0xff] }
 0xf03   :  { %7126 = vmatprep.subr.bf16.mxu0 %v7125_v19  ;;  %v2518_v19 = vld [vmem:[#allocation23 + $0x220] sm:$0xff] }
 0xf04   :  { %v7143_v27 = vpack.c.bf16 %v2520_v20, %v2518_v19  ;;  %v2550_v20 = vld [vmem:[#allocation23 + $0x320] sm:$0xff] }
 0xf06   :  { %7128 = vmatpush1.bf16.msra.mxu0 %v7127_v28  ;;  %v7145_v28 = vpack.c.bf16 %v2525_v26, %v2523_v5  ;;  %v2552_v5 = vld [vmem:[#allocation23 + $0x330] sm:$0xff]  ;;  %v2555_v26 = vld [vmem:[#allocation23 + $0x348] sm:$0xff] }
 0xf07   :  { %7130 = vmatprep.subr.bf16.mxu0 %v7129_v1  ;;  %v2522_v1 = vld [vmem:[#allocation23 + $0x240] sm:$0xff] }
 0xf08   :  { %v7147_v35 = vpack.c.bf16 %v2524_v29, %v2522_v1  ;;  %v2554_v29 = vld [vmem:[#allocation23 + $0x340] sm:$0xff] }
 0xf0a   :  { %v2064_v49 = vpop.f32.mrb[8].mxu0  ;;  %v9625_v50 = vpop.f32.mrb[24].mxu1  ;;  %7132 = vmatpush1.bf16.msra.mxu0 %v7131_v23  ;;  %v7149_v23 = vpack.c.bf16 %v2529_v4, %v2527_v2  ;;  %v2556_v2 = vld [vmem:[#allocation23 + $0x350] sm:$0xff]  ;;  %v2559_v4 = vld [vmem:[#allocation23 + $0x368] sm:$0xff] }
 0xf0b   :  { %v2065_v51 = vadd.f32 %v2064_v49, %v9619_v36  ;;  %v2066_v53 = vpop.f32.mrb[9].mxu0  ;;  %v9628_v54 = vpop.f32.mrb[25].mxu1  ;;  %7134 = vmatprep.subr.bf16.mxu0 %v7133_v61  ;;  %v2526_v61 = vld [vmem:[#allocation23 + $0x260] sm:$0xff]  ;;  %v7153_v49 = vpack.c.bf16 %v2533_v44, %v2531_v41  ;;  %v2560_v41 = vld [vmem:[#allocation23 + $0x370] sm:$0xff]  ;;  %v2563_v44 = vld [vmem:[#allocation23 + $0x388] sm:$0xff] }
 0xf0c   :  { %v2067_v10 = vadd.f32 %v2066_v53, %v9623_v13  ;;  %v7151_v46 = vpack.c.bf16 %v2528_v37, %v2526_v61  ;;  %v2535_v53 = vld [vmem:[#allocation23 + $0x2a8] sm:$0xff]  ;;  %v2558_v37 = vld [vmem:[#allocation23 + $0x360] sm:$0xff] }
 0xf0d   :  { %v2322_v63 = vmul.f32 0.044715, %v2065_v51  ;;  %v2306_v14 = vmul.f32 0.5, %v2065_v51 }
 0xf0e   :  { %v2323_v31 = vmul.f32 0.044715, %v2067_v10  ;;  %7136 = vmatpush1.bf16.msra.mxu0 %v7135_v45  ;;  %v2307_v16 = vmul.f32 0.5, %v2067_v10  ;;  %v2530_v45 = vld [vmem:[#allocation23 + $0x280] sm:$0xff] }
 0xf0f   :  { %v2338_v32 = vmul.f32 %v2322_v63, %v2065_v51  ;;  %7138 = vmatprep.subr.bf16.mxu0 %v7137_v55  ;;  %v2537_v55 = vld [vmem:[#allocation23 + $0x2b8] sm:$0xff] }
 0xf10   :  { %v2339_v42 = vmul.f32 %v2323_v31, %v2067_v10  ;;  %v7157_v63 = vpack.c.bf16 %v2537_v55, %v2535_v53  ;;  %v2534_v31 = vld [vmem:[#allocation23 + $0x2a0] sm:$0xff]  ;;  %v2564_v53 = vld [vmem:[#allocation23 + $0x390] sm:$0xff]  ;;  %v2567_v55 = vld [vmem:[#allocation23 + $0x3a8] sm:$0xff] }
 0xf11   :  { %v2354_v12 = vmul.f32 %v2338_v32, %v2065_v51  ;;  %v2536_v32 = vld [vmem:[#allocation23 + $0x2b0] sm:$0xff] }
 0xf12   :  { %v2355_v47 = vmul.f32 %v2339_v42, %v2067_v10  ;;  %v2539_v42 = vld [vmem:[#allocation23 + $0x2c8] sm:$0xff] }
 0xf13   :  { %v2370_v48 = vadd.f32 %v2354_v12, %v2065_v51  ;;  %v2532_v51 = vld [vmem:[#allocation23 + $0x290] sm:$0xff]  ;;  %v2541_v12 = vld [vmem:[#allocation23 + $0x2d8] sm:$0xff] }
 0xf14   :  { %v2371_v3 = vadd.f32 %v2355_v47, %v2067_v10  ;;  %v7155_v10 = vpack.c.bf16 %v2532_v51, %v2530_v45  ;;  %v7159_v47 = vpack.c.bf16 %v2536_v32, %v2534_v31  ;;  %v2562_v51 = vld [vmem:[#allocation23 + $0x380] sm:$0xff] }
 0xf15   :  { %v2386_v24 = vmul.f32 0.7978846, %v2370_v48  ;;  %v7161_v48 = vpack.c.bf16 %v2541_v12, %v2539_v42  ;;  %v2566_v32 = vld [vmem:[#allocation23 + $0x3a0] sm:$0xff]  ;;  %v2568_v42 = vld [vmem:[#allocation23 + $0x3b0] sm:$0xff]  ;;  %v2571_v12 = vld [vmem:[#allocation23 + $0x3c8] sm:$0xff] }
 0xf16   :  { %v2387_v25 = vmul.f32 0.7978846, %v2371_v3  ;;  %v2538_v3 = vld [vmem:[#allocation23 + $0x2c0] sm:$0xff] }
 0xf17   :  { %8380 = vtanh.f32 %v2386_v24  ;;  %v2540_v24 = vld [vmem:[#allocation23 + $0x2d0] sm:$0xff] }
 0xf18   :  { %8382 = vtanh.f32 %v2387_v25  ;;  %v2543_v25 = vld [vmem:[#allocation23 + $0x2e8] sm:$0xff] }
 0xf21   :  { %v8381_v7 = vpop.eup %8380 }
 0xf22   :  { %v8383_v9 = vpop.eup %8382  ;;  %v2418_v57 = vadd.f32 1.0, %v8381_v7  ;;  %v2545_v7 = vld [vmem:[#allocation23 + $0x2f8] sm:$0xff] }
 0xf23   :  { %v2419_v0 = vadd.f32 1.0, %v8383_v9  ;;  %v7163_v9 = vpack.c.bf16 %v2540_v24, %v2538_v3  ;;  %v2570_v24 = vld [vmem:[#allocation23 + $0x3c0] sm:$0xff] }
 0xf24   :  { %v2434_v18 = vmul.f32 %v2418_v57, %v2306_v14  ;;  %v7165_v57 = vpack.c.bf16 %v2545_v7, %v2543_v25  ;;  %v2546_v14 = vld [vmem:[#allocation23 + $0x300] sm:$0xff]  ;;  %v2572_v25 = vld [vmem:[#allocation23 + $0x3d0] sm:$0xff]  ;;  %v2575_v7 = vld [vmem:[#allocation23 + $0x3e8] sm:$0xff] }
 0xf25   :  { %v2435_v6 = vmul.f32 %v2419_v0, %v2307_v16  ;;  %v2547_v16 = vld [vmem:[#allocation23 + $0x308] sm:$0xff]  ;;  %v2549_v0 = vld [vmem:[#allocation23 + $0x318] sm:$0xff] }
 0xf26   :  { %v7169_v8 = vpack.c.bf16 %v2549_v0, %v2547_v16  ;;  %v2576_v16 = vld [vmem:[#allocation23 + $0x3f0] sm:$0xff]  ;;  %v2579_v0 = vld [vmem:[#allocation23 + $0x408] sm:$0xff] }
 0xf27   :  { %2782 = vmatprep.mubr.f32.mxu0 %v2435_v6  ;;  %v2548_v6 = vld [vmem:[#allocation23 + $0x310] sm:$0xff] }
 0xf28   :  { %2783 = vmatmul.mubr.f32.vlgmr.msra.gmra.mrb[16].mxu0 %v2434_v18  ;;  %v2553_v18 = vld [vmem:[#allocation23 + $0x338] sm:$0xff] }
 0xf29   :  { %7140 = vmatpush1.bf16.msra.mxu0 %v7139_v17  ;;  %v2551_v17 = vld [vmem:[#allocation23 + $0x328] sm:$0xff] }
 0xf2a   :  { %7142 = vmatprep.subr.bf16.mxu0 %v7141_v22  ;;  %v7171_v22 = vpack.c.bf16 %v2548_v6, %v2546_v14  ;;  %v7173_v19 = vpack.c.bf16 %v2553_v18, %v2551_v17  ;;  %v1973_v6 = vrot.slane %v9615_v30, %v9455_v43  ;;  %v1969_v17 = vrot.slane %v9615_v30, %v9450_v34 }
 0xf2c   :  { %v9636_v18 = vadd.f32 %v9628_v54, %v1973_v6 }
 0xf2d   :  { %7144 = vmatpush1.bf16.msra.mxu0 %v7143_v27  ;;  %v2557_v27 = vld [vmem:[#allocation23 + $0x358] sm:$0xff] }
 0xf2e   :  { %7146 = vmatprep.subr.bf16.mxu0 %v7145_v28  ;;  %v7175_v28 = vpack.c.bf16 %v2552_v5, %v2550_v20  ;;  %v7177_v1 = vpack.c.bf16 %v2557_v27, %v2555_v26 }
 0xf31   :  { %7148 = vmatpush1.bf16.msra.mxu0 %v7147_v35  ;;  %v2561_v35 = vld [vmem:[#allocation23 + $0x378] sm:$0xff] }
 0xf32   :  { %7150 = vmatprep.subr.bf16.mxu0 %v7149_v23  ;;  %v7179_v23 = vpack.c.bf16 %v2556_v2, %v2554_v29  ;;  %v7181_v61 = vpack.c.bf16 %v2561_v35, %v2559_v4 }
 0xf35   :  { %7152 = vmatpush1.bf16.msra.mxu0 %v7151_v46  ;;  %v2565_v46 = vld [vmem:[#allocation23 + $0x398] sm:$0xff] }
 0xf36   :  { %7154 = vmatprep.subr.bf16.mxu0 %v7153_v49  ;;  %v7183_v49 = vpack.c.bf16 %v2560_v41, %v2558_v37  ;;  %v7185_v45 = vpack.c.bf16 %v2565_v46, %v2563_v44 }
 0xf39   :  { %7156 = vmatpush1.bf16.msra.mxu0 %v7155_v10  ;;  %v2569_v10 = vld [vmem:[#allocation23 + $0x3b8] sm:$0xff] }
 0xf3a   :  { %7158 = vmatprep.subr.bf16.mxu0 %v7157_v63  ;;  %v7187_v63 = vpack.c.bf16 %v2564_v53, %v2562_v51  ;;  %v7189_v31 = vpack.c.bf16 %v2569_v10, %v2567_v55 }
 0xf3d   :  { %7160 = vmatpush1.bf16.msra.mxu0 %v7159_v47  ;;  %v2573_v47 = vld [vmem:[#allocation23 + $0x3d8] sm:$0xff] }
 0xf3e   :  { %7162 = vmatprep.subr.bf16.mxu0 %v7161_v48  ;;  %v7191_v48 = vpack.c.bf16 %v2568_v42, %v2566_v32  ;;  %v7193_v3 = vpack.c.bf16 %v2573_v47, %v2571_v12 }
 0xf41   :  { %7164 = vmatpush1.bf16.msra.mxu0 %v7163_v9  ;;  %v2577_v9 = vld [vmem:[#allocation23 + $0x3f8] sm:$0xff] }
 0xf42   :  { %7166 = vmatprep.subr.bf16.mxu0 %v7165_v57  ;;  %v7195_v57 = vpack.c.bf16 %v2572_v25, %v2570_v24  ;;  %v7197_v56 = vpack.c.bf16 %v2577_v9, %v2575_v7 }
 0xf45   :  { %7168 = vmatpush1.bf16.msra.mxu0 %v7167_v21  ;;  %v2581_v21 = vld [vmem:[#allocation23 + $0x418] sm:$0xff] }
 0xf46   :  { %7170 = vmatprep.subr.bf16.mxu0 %v7169_v8  ;;  %v7199_v8 = vpack.c.bf16 %v2576_v16, %v2574_v15  ;;  %v7201_v14 = vpack.c.bf16 %v2581_v21, %v2579_v0 }
 0xf49   :  { %7172 = vmatpush1.bf16.msra.mxu0 %v7171_v22  ;;  %v9639_v22 = vadd.f32 %v9625_v50, %v1969_v17  ;;  %v9649_v50 = vrot.slane %v9615_v30, %v9475_v62 }
 0xf4a   :  { %7174 = vmatprep.subr.bf16.mxu0 %v7173_v19  ;;  %v2325_v19 = vmul.f32 0.044715, %v9636_v18 }
 0xf4b   :  { %v2324_v20 = vmul.f32 0.044715, %v9639_v22 }
 0xf4c   :  { %v2341_v5 = vmul.f32 %v2325_v19, %v9636_v18 }
 0xf4d   :  { %7176 = vmatpush1.bf16.msra.mxu0 %v7175_v28  ;;  %v2340_v2 = vmul.f32 %v2324_v20, %v9639_v22 }
 0xf4e   :  { %7178 = vmatprep.subr.bf16.mxu0 %v7177_v1 }
 0xf51   :  { %7180 = vmatpush1.bf16.msra.mxu0 %v7179_v23  ;;  %v2357_v23 = vmul.f32 %v2341_v5, %v9636_v18 }
 0xf52   :  { %7182 = vmatprep.subr.bf16.mxu0 %v7181_v61 }
 0xf53   :  { %v2373_v55 = vadd.f32 %v2357_v23, %v9636_v18 }
 0xf55   :  { %7184 = vmatpush1.bf16.msra.mxu0 %v7183_v49  ;;  %v2389_v25 = vmul.f32 0.7978846, %v2373_v55 }
 0xf56   :  { %7186 = vmatprep.subr.bf16.mxu0 %v7185_v45 }
 0xf57   :  { %8384 = vtanh.f32 %v2389_v25  ;;  %v2583_v25 = vld [vmem:[#allocation23 + $0x428] sm:$0xff] }
 0xf59   :  { %7188 = vmatpush1.bf16.msra.mxu0 %v7187_v63 }
 0xf5a   :  { %7190 = vmatprep.subr.bf16.mxu0 %v7189_v31 }
 0xf5d   :  { %7192 = vmatpush1.bf16.msra.mxu0 %v7191_v48 }
 0xf5e   :  { %7194 = vmatprep.subr.bf16.mxu0 %v7193_v3 }
 0xf61   :  { %7196 = vmatpush1.bf16.msra.mxu0 %v7195_v57 }
 0xf62   :  { %7198 = vmatprep.subr.bf16.mxu0 %v7197_v56 }
 0xf65   :  { %7200 = vmatpush1.bf16.msra.mxu0 %v7199_v8 }
 0xf66   :  { %7202 = vmatprep.subr.bf16.mxu0 %v7201_v14 }
 0xf9f   :  { %v2070_v26 = vpop.f32.mrb[10].mxu0  ;;  %v2147_v27 = vpop.f32.mrb[26].mxu1 }
 0xfa0   :  { %v2071_v28 = vadd.f32 %v2070_v26, %v9619_v36  ;;  %v2072_v1 = vpop.f32.mrb[11].mxu0  ;;  %v2149_v29 = vpop.f32.mrb[27].mxu1  ;;  %v9654_v61 = vadd.f32 %v2147_v27, %v1969_v17 }
 0xfa1   :  { %v2073_v54 = vadd.f32 %v2072_v1, %v9623_v13  ;;  %v9651_v35 = vadd.f32 %v2149_v29, %v1973_v6  ;;  %v2356_v13 = vmul.f32 %v2340_v2, %v9639_v22  ;;  %v8385_v27 = vpop.eup %8384 }
 0xfa2   :  { %v2330_v4 = vmul.f32 0.044715, %v2071_v28  ;;  %v2332_v10 = vmul.f32 0.044715, %v9654_v61 }
 0xfa3   :  { %v2331_v37 = vmul.f32 0.044715, %v2073_v54  ;;  %v9656_v41 = vpop.f32.mrb[12].mxu0  ;;  %v9658_v36 = vpop.f32.mrb[28].mxu1  ;;  %v2333_v53 = vmul.f32 0.044715, %v9651_v35  ;;  %v2372_v48 = vadd.f32 %v2356_v13, %v9639_v22 }
 0xfa4   :  { %v2220_v44 = vpop.f32.mrb[13].mxu0  ;;  %v9660_v46 = vpop.f32.mrb[29].mxu1  ;;  %v2346_v49 = vmul.f32 %v2330_v4, %v2071_v28  ;;  %v2348_v7 = vmul.f32 %v2332_v10, %v9654_v61  ;;  %v2315_v29 = vmul.f32 0.5, %v2073_v54  ;;  %v2314_v13 = vmul.f32 0.5, %v2071_v28 }
 0xfa5   :  { %v2347_v45 = vmul.f32 %v2331_v37, %v2073_v54  ;;  %v9664_v51 = vadd.f32 %v2220_v44, %v9649_v50  ;;  %v2349_v24 = vmul.f32 %v2333_v53, %v9651_v35  ;;  %v2388_v56 = vmul.f32 0.7978846, %v2372_v48 }
 0xfa6   :  { %v2362_v3 = vmul.f32 %v2346_v49, %v2071_v28  ;;  %v2364_v8 = vmul.f32 %v2348_v7, %v9654_v61  ;;  %v2421_v44 = vadd.f32 1.0, %v8385_v27  ;;  %v2309_v53 = vmul.f32 0.5, %v9636_v18 }
 0xfa7   :  { %v9669_v63 = vpop.f32.mrb[14].mxu0  ;;  %v9671_v31 = vpop.f32.mrb[30].mxu1  ;;  %v2363_v32 = vmul.f32 %v2347_v45, %v2073_v54  ;;  %v2327_v42 = vmul.f32 0.044715, %v9664_v51  ;;  %v2365_v0 = vmul.f32 %v2349_v24, %v9651_v35 }
 0xfa8   :  { %v9674_v12 = vpop.f32.mrb[15].mxu0  ;;  %v9676_v47 = vpop.f32.mrb[31].mxu1  ;;  %v2378_v16 = vadd.f32 %v2362_v3, %v2071_v28  ;;  %v2380_v17 = vadd.f32 %v2364_v8, %v9654_v61  ;;  %v2437_v3 = vmul.f32 %v2421_v44, %v2309_v53  ;;  %v2597_v44 = vld [vmem:[#allocation23 + $0x498] sm:$0xff]  ;;  %v2599_v53 = vld [vmem:[#allocation23 + $0x4a8] sm:$0xff] }
 0xfa9   :  { %v2379_v9 = vadd.f32 %v2363_v32, %v2073_v54  ;;  %v2343_v57 = vmul.f32 %v2327_v42, %v9664_v51  ;;  %v2381_v14 = vadd.f32 %v2365_v0, %v9651_v35  ;;  %v2578_v32 = vld [vmem:[#allocation23 + $0x400] sm:$0xff]  ;;  %v2580_v42 = vld [vmem:[#allocation23 + $0x410] sm:$0xff]  ;;  %v2585_v54 = vld [vmem:[#allocation23 + $0x438] sm:$0xff] }
 0xfaa   :  { %v2394_v21 = vmul.f32 0.7978846, %v2378_v16  ;;  %v2396_v5 = vmul.f32 0.7978846, %v2380_v17  ;;  %v7203_v28 = vpack.c.bf16 %v2580_v42, %v2578_v32  ;;  %v2582_v16 = vld [vmem:[#allocation23 + $0x420] sm:$0xff]  ;;  %v2584_v0 = vld [vmem:[#allocation23 + $0x430] sm:$0xff] }
 0xfab   :  { %v2395_v15 = vmul.f32 0.7978846, %v2379_v9  ;;  %v2359_v6 = vmul.f32 %v2343_v57, %v9664_v51  ;;  %v2397_v19 = vmul.f32 0.7978846, %v2381_v14  ;;  %v2308_v9 = vmul.f32 0.5, %v9639_v22  ;;  %v2587_v14 = vld [vmem:[#allocation23 + $0x448] sm:$0xff] }
 0xfac   :  { %v2317_v57 = vmul.f32 0.5, %v9651_v35  ;;  %v2316_v17 = vmul.f32 0.5, %v9654_v61  ;;  %v7207_v22 = vpack.c.bf16 %v2584_v0, %v2582_v16  ;;  %v2590_v61 = vld [vmem:[#allocation23 + $0x460] sm:$0xff] }
 0xfad   :  { %8386 = vtanh.f32 %v2395_v15  ;;  %v2375_v20 = vadd.f32 %v2359_v6, %v9664_v51  ;;  %v7205_v15 = vpack.c.bf16 %v2585_v54, %v2583_v25  ;;  %v2589_v6 = vld [vmem:[#allocation23 + $0x458] sm:$0xff]  ;;  %v2598_v42 = vld [vmem:[#allocation23 + $0x4a0] sm:$0xff]  ;;  %v1977_v25 = vrot.slane %v9615_v30, %v9471_v58 }
 0xfae   :  { %8388 = vtanh.f32 %v2388_v56  ;;  %v7209_v35 = vpack.c.bf16 %v2589_v6, %v2587_v14  ;;  %v2606_v14 = vld [vmem:[#allocation23 + $0x4e0] sm:$0xff]  ;;  %v2608_v6 = vld [vmem:[#allocation23 + $0x4f0] sm:$0xff] }
 0xfaf   :  { %8390 = vtanh.f32 %v2394_v21  ;;  %v2391_v26 = vmul.f32 0.7978846, %v2375_v20 }
 0xfb0   :  { %8392 = vtanh.f32 %v2397_v19  ;;  %v2311_v19 = vmul.f32 0.5, %v9664_v51 }
 0xfb1   :  { %8394 = vtanh.f32 %v2396_v5  ;;  %v2586_v5 = vld [vmem:[#allocation23 + $0x440] sm:$0xff] }
 0xfb2   :  { %8396 = vtanh.f32 %v2391_v26  ;;  %v2588_v26 = vld [vmem:[#allocation23 + $0x450] sm:$0xff] }
 0xfb7   :  { %v8387_v1 = vpop.eup %8386 }
 0xfb8   :  { %v2427_v2 = vadd.f32 1.0, %v8387_v1  ;;  %v8389_v4 = vpop.eup %8388  ;;  %v2591_v1 = vld [vmem:[#allocation23 + $0x468] sm:$0xff] }
 0xfb9   :  { %v8391_v23 = vpop.eup %8390  ;;  %v2420_v10 = vadd.f32 1.0, %v8389_v4 }
 0xfba   :  { %v2443_v37 = vmul.f32 %v2427_v2, %v2315_v29  ;;  %v2426_v49 = vadd.f32 1.0, %v8391_v23  ;;  %v8393_v45 = vpop.eup %8392  ;;  %v2593_v29 = vld [vmem:[#allocation23 + $0x478] sm:$0xff]  ;;  %v7211_v2 = vpack.c.bf16 %v2588_v26, %v2586_v5  ;;  %v2592_v23 = vld [vmem:[#allocation23 + $0x470] sm:$0xff]  ;;  %v2610_v5 = vld [vmem:[#allocation23 + $0x500] sm:$0xff] }
 0xfbb   :  { %v8395_v48 = vpop.eup %8394  ;;  %v2429_v24 = vadd.f32 1.0, %v8393_v45  ;;  %v2436_v56 = vmul.f32 %v2420_v10, %v2308_v9  ;;  %v7213_v4 = vpack.c.bf16 %v2593_v29, %v2591_v1  ;;  %v7215_v51 = vpack.c.bf16 %v2592_v23, %v2590_v61  ;;  %v2596_v45 = vld [vmem:[#allocation23 + $0x490] sm:$0xff]  ;;  %v2617_v1 = vld [vmem:[#allocation23 + $0x538] sm:$0xff]  ;;  %v2614_v23 = vld [vmem:[#allocation23 + $0x520] sm:$0xff] }
 0xfbc   :  { %2788 = vmatprep.mubr.f32.mxu0 %v2443_v37  ;;  %v2442_v55 = vmul.f32 %v2426_v49, %v2314_v13  ;;  %v8397_v7 = vpop.eup %8396  ;;  %v2428_v18 = vadd.f32 1.0, %v8395_v48  ;;  %v2595_v37 = vld [vmem:[#allocation23 + $0x488] sm:$0xff]  ;;  %v2594_v49 = vld [vmem:[#allocation23 + $0x480] sm:$0xff]  ;;  %v2600_v48 = vld [vmem:[#allocation23 + $0x4b0] sm:$0xff] }
 0xfbd   :  { %v2445_v21 = vmul.f32 %v2429_v24, %v2317_v57  ;;  %v2423_v8 = vadd.f32 1.0, %v8397_v7  ;;  %v7217_v13 = vpack.c.bf16 %v2597_v44, %v2595_v37  ;;  %v7219_v10 = vpack.c.bf16 %v2596_v45, %v2594_v49  ;;  %v2605_v24 = vld [vmem:[#allocation23 + $0x4d8] sm:$0xff]  ;;  %v2604_v57 = vld [vmem:[#allocation23 + $0x4d0] sm:$0xff]  ;;  %v2619_v44 = vld [vmem:[#allocation23 + $0x548] sm:$0xff] }
 0xfbe   :  { %2789 = vmatmul.mubr.f32.gmra.mrb[18].mxu0 %v2442_v55  ;;  %v2444_v20 = vmul.f32 %v2428_v18, %v2316_v17  ;;  %v2601_v55 = vld [vmem:[#allocation23 + $0x4b8] sm:$0xff]  ;;  %v7223_v54 = vpack.c.bf16 %v2600_v48, %v2598_v42  ;;  %v1988_v7 = vsub.s32 7, %v9410_v38  ;;  %v9697_v18 = vadd.f32 %v9656_v41, %v1977_v25  ;;  %v2611_v17 = vld [vmem:[#allocation23 + $0x508] sm:$0xff]  ;;  %v2612_v26 = vld [vmem:[#allocation23 + $0x510] sm:$0xff] }
 0xfbf   :  { %2859 = vmatprep.mubr.f32.mxu0 %v2437_v3  ;;  %v2439_v27 = vmul.f32 %v2423_v8, %v2311_v19  ;;  %v7221_v32 = vpack.c.bf16 %v2601_v55, %v2599_v53  ;;  %v2603_v3 = vld [vmem:[#allocation23 + $0x4c8] sm:$0xff]  ;;  %v9710_v19 = vadd.f32 %v9669_v63, %v1977_v25  ;;  %v7235_v63 = vpack.c.bf16 %v2612_v26, %v2610_v5  ;;  %v2616_v37 = vld [vmem:[#allocation23 + $0x530] sm:$0xff]  ;;  %v2633_v26 = vld [vmem:[#allocation23 + $0x5b8] sm:$0xff] }
 0xfc0   :  { %v7225_v9 = vpack.c.bf16 %v2605_v24, %v2603_v3  ;;  %v9702_v0 = vrot.slane %v9615_v30, %v1988_v7  ;;  %v2326_v41 = vmul.f32 0.044715, %v9697_v18  ;;  %v7239_v45 = vpack.c.bf16 %v2616_v37, %v2614_v23  ;;  %v2623_v48 = vld [vmem:[#allocation23 + $0x568] sm:$0xff]  ;;  %v2625_v3 = vld [vmem:[#allocation23 + $0x578] sm:$0xff] }
 0xfc1   :  { %v2631_v5 = vld [vmem:[#allocation23 + $0x5a8] sm:$0xff] }
 0xfc2   :  { %2860 = vmatmul.mubr.f32.vlgmr.msra.gmra.mrb[16].mxu0 %v2436_v56  ;;  %v2607_v56 = vld [vmem:[#allocation23 + $0x4e8] sm:$0xff]  ;;  %v2342_v29 = vmul.f32 %v2326_v41, %v9697_v18  ;;  %v2626_v41 = vld [vmem:[#allocation23 + $0x580] sm:$0xff] }
 0xfc3   :  { %7204 = vmatpush1.bf16.msra.mxu0 %v7203_v28  ;;  %2865 = vmatprep.mubr.f32.mxu0 %v2445_v21  ;;  %v2602_v28 = vld [vmem:[#allocation23 + $0x4c0] sm:$0xff]  ;;  %v9706_v21 = vadd.f32 %v9674_v12, %v9649_v50 }
 0xfc4   :  { %7206 = vmatprep.subr.bf16.mxu0 %v7205_v15  ;;  %v2609_v15 = vld [vmem:[#allocation23 + $0x4f8] sm:$0xff]  ;;  %v7227_v16 = vpack.c.bf16 %v2604_v57, %v2602_v28  ;;  %v2622_v28 = vld [vmem:[#allocation23 + $0x560] sm:$0xff]  ;;  %v2624_v57 = vld [vmem:[#allocation23 + $0x570] sm:$0xff] }
 0xfc5   :  { %v7229_v8 = vpack.c.bf16 %v2609_v15, %v2607_v56  ;;  %v2335_v50 = vmul.f32 0.044715, %v9706_v21 }
 0xfc6   :  { %2866 = vmatmul.mubr.f32.gmra.mrb[18].mxu0 %v2444_v20  ;;  %v7231_v20 = vpack.c.bf16 %v2608_v6, %v2606_v14  ;;  %v7247_v6 = vpack.c.bf16 %v2624_v57, %v2622_v28  ;;  %v2644_v28 = vld [vmem:[#allocation23 + $0x610] sm:$0xff] }
 0xfc7   :  { %7208 = vmatpush1.bf16.msra.mxu0 %v7207_v22  ;;  %2936 = vmatprep.mubr.f32.mxu0 %v2439_v27  ;;  %v2613_v22 = vld [vmem:[#allocation23 + $0x518] sm:$0xff]  ;;  %v2615_v27 = vld [vmem:[#allocation23 + $0x528] sm:$0xff]  ;;  %v2351_v61 = vmul.f32 %v2335_v50, %v9706_v21 }
 0xfc8   :  { %7210 = vmatprep.subr.bf16.mxu0 %v7209_v35  ;;  %v9714_v35 = vadd.f32 %v9660_v46, %v9702_v0  ;;  %v7233_v12 = vpack.c.bf16 %v2613_v22, %v2611_v17  ;;  %v7237_v46 = vpack.c.bf16 %v2617_v1, %v2615_v27 }
 0xfc9   :  { %v2367_v42 = vmul.f32 %v2351_v61, %v9706_v21  ;;  %v2635_v61 = vld [vmem:[#allocation23 + $0x5c8] sm:$0xff] }
 0xfcb   :  { %7212 = vmatpush1.bf16.msra.mxu0 %v7211_v2  ;;  %v2334_v2 = vmul.f32 0.044715, %v9710_v19  ;;  %v2383_v56 = vadd.f32 %v2367_v42, %v9706_v21  ;;  %v2643_v42 = vld [vmem:[#allocation23 + $0x608] sm:$0xff] }
 0xfcc   :  { %7214 = vmatprep.subr.bf16.mxu0 %v7213_v4  ;;  %v2329_v4 = vmul.f32 0.044715, %v9714_v35 }
 0xfcd   :  { %v2350_v49 = vmul.f32 %v2334_v2, %v9710_v19  ;;  %v2399_v50 = vmul.f32 0.7978846, %v2383_v56  ;;  %v2630_v2 = vld [vmem:[#allocation23 + $0x5a0] sm:$0xff] }
 0xfce   :  { %v2345_v53 = vmul.f32 %v2329_v4, %v9714_v35 }
 0xfcf   :  { %7216 = vmatpush1.bf16.msra.mxu0 %v7215_v51  ;;  %v2621_v51 = vld [vmem:[#allocation23 + $0x558] sm:$0xff] }
 0xfd0   :  { %7218 = vmatprep.subr.bf16.mxu0 %v7217_v13  ;;  %v2358_v13 = vmul.f32 %v2342_v29, %v9697_v18  ;;  %v7241_v55 = vpack.c.bf16 %v2621_v51, %v2619_v44  ;;  %v2361_v15 = vmul.f32 %v2345_v53, %v9714_v35  ;;  %v7253_v29 = vpack.c.bf16 %v2633_v26, %v2631_v5  ;;  %v2634_v44 = vld [vmem:[#allocation23 + $0x5c0] sm:$0xff]  ;;  %v2636_v51 = vld [vmem:[#allocation23 + $0x5d0] sm:$0xff] }
 0xfd2   :  { %v2374_v24 = vadd.f32 %v2358_v13, %v9697_v18  ;;  %v2639_v13 = vld [vmem:[#allocation23 + $0x5e8] sm:$0xff] }
 0xfd3   :  { %7220 = vmatpush1.bf16.msra.mxu0 %v7219_v10  ;;  %v2618_v10 = vld [vmem:[#allocation23 + $0x540] sm:$0xff] }
 0xfd4   :  { %7222 = vmatprep.subr.bf16.mxu0 %v7221_v32  ;;  %v2620_v32 = vld [vmem:[#allocation23 + $0x550] sm:$0xff]  ;;  %v2390_v14 = vmul.f32 0.7978846, %v2374_v24 }
 0xfd5   :  { %v7243_v25 = vpack.c.bf16 %v2620_v32, %v2618_v10  ;;  %v2640_v10 = vld [vmem:[#allocation23 + $0x5f0] sm:$0xff] }
 0xfd6   :  { %8398 = vtanh.f32 %v2390_v14  ;;  %v2310_v14 = vmul.f32 0.5, %v9697_v18 }
 0xfd7   :  { %7224 = vmatpush1.bf16.msra.mxu0 %v7223_v54  ;;  %v2366_v54 = vmul.f32 %v2350_v49, %v9710_v19  ;;  %8400 = vtanh.f32 %v2399_v50  ;;  %v2641_v49 = vld [vmem:[#allocation23 + $0x5f8] sm:$0xff]  ;;  %v2646_v50 = vld [vmem:[#allocation23 + $0x620] sm:$0xff] }
 0xfd8   :  { %7226 = vmatprep.subr.bf16.mxu0 %v7225_v9  ;;  %v7245_v9 = vpack.c.bf16 %v2625_v3, %v2623_v48  ;;  %v7261_v53 = vpack.c.bf16 %v2641_v49, %v2639_v13  ;;  %v2645_v48 = vld [vmem:[#allocation23 + $0x618] sm:$0xff]  ;;  %v2656_v13 = vld [vmem:[#allocation23 + $0x670] sm:$0xff]  ;;  %v2659_v49 = vld [vmem:[#allocation23 + $0x688] sm:$0xff] }
 0xfd9   :  { %v2382_v17 = vadd.f32 %v2366_v54, %v9710_v19  ;;  %v7265_v54 = vpack.c.bf16 %v2645_v48, %v2643_v42  ;;  %v2665_v42 = vld [vmem:[#allocation23 + $0x6b8] sm:$0xff]  ;;  %v1984_v48 = vsub.s32 6, %v9410_v38 }
 0xfdb   :  { %7228 = vmatpush1.bf16.msra.mxu0 %v7227_v16  ;;  %v2627_v16 = vld [vmem:[#allocation23 + $0x588] sm:$0xff]  ;;  %v2398_v1 = vmul.f32 0.7978846, %v2382_v17 }
 0xfdc   :  { %7230 = vmatprep.subr.bf16.mxu0 %v7229_v8  ;;  %v2629_v8 = vld [vmem:[#allocation23 + $0x598] sm:$0xff] }
 0xfdd   :  { %v7249_v22 = vpack.c.bf16 %v2629_v8, %v2627_v16  ;;  %8402 = vtanh.f32 %v2398_v1  ;;  %v2649_v16 = vld [vmem:[#allocation23 + $0x638] sm:$0xff] }
 0xfde   :  { %v2653_v1 = vld [vmem:[#allocation23 + $0x658] sm:$0xff] }
 0xfdf   :  { %7232 = vmatpush1.bf16.msra.mxu0 %v7231_v20  ;;  %v2628_v20 = vld [vmem:[#allocation23 + $0x590] sm:$0xff] }
 0xfe0   :  { %7234 = vmatprep.subr.bf16.mxu0 %v7233_v12  ;;  %v2377_v12 = vadd.f32 %v2361_v15, %v9714_v35  ;;  %v7251_v27 = vpack.c.bf16 %v2628_v20, %v2626_v41  ;;  %v8399_v32 = vpop.eup %8398  ;;  %v2647_v15 = vld [vmem:[#allocation23 + $0x628] sm:$0xff] }
 0xfe1   :  { %v8401_v3 = vpop.eup %8400  ;;  %v7269_v20 = vpack.c.bf16 %v2649_v16, %v2647_v15  ;;  %v2666_v16 = vld [vmem:[#allocation23 + $0x6c0] sm:$0xff] }
 0xfe2   :  { %v2393_v4 = vmul.f32 0.7978846, %v2377_v12  ;;  %v2431_v56 = vadd.f32 1.0, %v8401_v3  ;;  %v2648_v12 = vld [vmem:[#allocation23 + $0x630] sm:$0xff] }
 0xfe3   :  { %7236 = vmatpush1.bf16.msra.mxu0 %v7235_v63  ;;  %v2632_v63 = vld [vmem:[#allocation23 + $0x5b0] sm:$0xff]  ;;  %v7271_v18 = vpack.c.bf16 %v2648_v12, %v2646_v50  ;;  %v2675_v12 = vld [vmem:[#allocation23 + $0x708] sm:$0xff] }
 0xfe4   :  { %7238 = vmatprep.subr.bf16.mxu0 %v7237_v46  ;;  %v2637_v46 = vld [vmem:[#allocation23 + $0x5d8] sm:$0xff]  ;;  %v7255_v23 = vpack.c.bf16 %v2632_v63, %v2630_v2  ;;  %8404 = vtanh.f32 %v2393_v4  ;;  %v2313_v2 = vmul.f32 0.5, %v9714_v35  ;;  %v2650_v4 = vld [vmem:[#allocation23 + $0x640] sm:$0xff]  ;;  %v2672_v50 = vld [vmem:[#allocation23 + $0x6f0] sm:$0xff] }
 0xfe5   :  { %v7257_v37 = vpack.c.bf16 %v2637_v46, %v2635_v61  ;;  %v2652_v61 = vld [vmem:[#allocation23 + $0x650] sm:$0xff] }
 0xfe7   :  { %7240 = vmatpush1.bf16.msra.mxu0 %v7239_v45  ;;  %v7259_v45 = vpack.c.bf16 %v2636_v51, %v2634_v44  ;;  %v8403_v57 = vpop.eup %8402  ;;  %v7275_v44 = vpack.c.bf16 %v2652_v61, %v2650_v4 }
 0xfe8   :  { %7242 = vmatprep.subr.bf16.mxu0 %v7241_v55  ;;  %v2638_v55 = vld [vmem:[#allocation23 + $0x5e0] sm:$0xff]  ;;  %v2430_v41 = vadd.f32 1.0, %v8403_v57  ;;  %v1985_v57 = vrot.slane %v9615_v30, %v1984_v48 }
 0xfe9   :  { %v7263_v24 = vpack.c.bf16 %v2640_v10, %v2638_v55  ;;  %v2658_v55 = vld [vmem:[#allocation23 + $0x680] sm:$0xff]  ;;  %v2660_v10 = vld [vmem:[#allocation23 + $0x690] sm:$0xff] }
 0xfea   :  { %v7283_v3 = vpack.c.bf16 %v2660_v10, %v2658_v55  ;;  %v2670_v30 = vld [vmem:[#allocation23 + $0x6e0] sm:$0xff]  ;;  %v2687_v55 = vld [vmem:[#allocation23 + $0x768] sm:$0xff]  ;;  %v2689_v10 = vld [vmem:[#allocation23 + $0x778] sm:$0xff] }
 0xfeb   :  { %7244 = vmatpush1.bf16.msra.mxu0 %v7243_v25  ;;  %v2422_v25 = vadd.f32 1.0, %v8399_v32  ;;  %v2663_v32 = vld [vmem:[#allocation23 + $0x6a8] sm:$0xff] }
 0xfec   :  { %7246 = vmatprep.subr.bf16.mxu0 %v7245_v9  ;;  %v2642_v9 = vld [vmem:[#allocation23 + $0x600] sm:$0xff] }
 0xfed   :  { %v7267_v17 = vpack.c.bf16 %v2644_v28, %v2642_v9  ;;  %v2667_v9 = vld [vmem:[#allocation23 + $0x6c8] sm:$0xff]  ;;  %v2669_v28 = vld [vmem:[#allocation23 + $0x6d8] sm:$0xff] }
 0xfee   :  { %v8405_v8 = vpop.eup %8404  ;;  %v7289_v15 = vpack.c.bf16 %v2669_v28, %v2667_v9  ;;  %v2691_v28 = vld [vmem:[#allocation23 + $0x788] sm:$0xff] }
 0xfef   :  { %7248 = vmatpush1.bf16.msra.mxu0 %v7247_v6  ;;  %v2319_v6 = vmul.f32 0.5, %v9706_v21  ;;  %v2425_v26 = vadd.f32 1.0, %v8405_v8  ;;  %v2668_v8 = vld [vmem:[#allocation23 + $0x6d0] sm:$0xff] }
 0xff0   :  { %7250 = vmatprep.subr.bf16.mxu0 %v7249_v22  ;;  %v2438_v22 = vmul.f32 %v2422_v25, %v2310_v14  ;;  %v2662_v25 = vld [vmem:[#allocation23 + $0x6a0] sm:$0xff]  ;;  %v2671_v14 = vld [vmem:[#allocation23 + $0x6e8] sm:$0xff] }
 0xff1   :  { %v2447_v5 = vmul.f32 %v2431_v56, %v2319_v6  ;;  %v2441_v46 = vmul.f32 %v2425_v26, %v2313_v2  ;;  %v2673_v6 = vld [vmem:[#allocation23 + $0x6f8] sm:$0xff] }
 0xff2   :  { %v2681_v2 = vld [vmem:[#allocation23 + $0x738] sm:$0xff] }
 0xff3   :  { %7252 = vmatpush1.bf16.msra.mxu0 %v7251_v27  ;;  %v2651_v27 = vld [vmem:[#allocation23 + $0x648] sm:$0xff] }
 0xff4   :  { %7254 = vmatprep.subr.bf16.mxu0 %v7253_v29  ;;  %v2318_v29 = vmul.f32 0.5, %v9710_v19  ;;  %v7273_v63 = vpack.c.bf16 %v2653_v1, %v2651_v27  ;;  %v2654_v19 = vld [vmem:[#allocation23 + $0x660] sm:$0xff]  ;;  %v9748_v27 = vadd.f32 %v9671_v31, %v1985_v57 }
 0xff5   :  { %v7279_v35 = vpack.c.bf16 %v2656_v13, %v2654_v19 }
 0xff6   :  { %v2446_v21 = vmul.f32 %v2430_v41, %v2318_v29  ;;  %v9744_v41 = vadd.f32 %v9676_v47, %v9702_v0  ;;  %v2676_v47 = vld [vmem:[#allocation23 + $0x710] sm:$0xff]  ;;  %v2679_v0 = vld [vmem:[#allocation23 + $0x728] sm:$0xff] }
 0xff7   :  { %7256 = vmatpush1.bf16.msra.mxu0 %v7255_v23  ;;  %v2655_v23 = vld [vmem:[#allocation23 + $0x668] sm:$0xff]  ;;  %v7301_v31 = vpack.c.bf16 %v2681_v2, %v2679_v0  ;;  %v2698_v0 = vld [vmem:[#allocation23 + $0x7c0] sm:$0xff]  ;;  %v2700_v2 = vld [vmem:[#allocation23 + $0x7d0] sm:$0xff] }
 0xff8   :  { %7258 = vmatprep.subr.bf16.mxu0 %v7257_v37  ;;  %v2657_v37 = vld [vmem:[#allocation23 + $0x678] sm:$0xff]  ;;  %v2337_v1 = vmul.f32 0.044715, %v9744_v41 }
 0xff9   :  { %v7277_v51 = vpack.c.bf16 %v2657_v37, %v2655_v23  ;;  %v2680_v23 = vld [vmem:[#allocation23 + $0x730] sm:$0xff]  ;;  %v2683_v37 = vld [vmem:[#allocation23 + $0x748] sm:$0xff] }
 0xffa   :  { %v2353_v61 = vmul.f32 %v2337_v1, %v9744_v41  ;;  %v2699_v1 = vld [vmem:[#allocation23 + $0x7c8] sm:$0xff] }
 0xffb   :  { %7260 = vmatpush1.bf16.msra.mxu0 %v7259_v45  ;;  %v2661_v45 = vld [vmem:[#allocation23 + $0x698] sm:$0xff] }
 0xffc   :  { %7262 = vmatprep.subr.bf16.mxu0 %v7261_v53  ;;  %v7281_v53 = vpack.c.bf16 %v2661_v45, %v2659_v49  ;;  %v2682_v45 = vld [vmem:[#allocation23 + $0x740] sm:$0xff] }
 0xfff   :  { %7264 = vmatpush1.bf16.msra.mxu0 %v7263_v24  ;;  %v7285_v24 = vpack.c.bf16 %v2665_v42, %v2663_v32 }
0x1000   :  { %7266 = vmatprep.subr.bf16.mxu0 %v7265_v54  ;;  %v2664_v54 = vld [vmem:[#allocation23 + $0x6b0] sm:$0xff] }
0x1001   :  { %v7287_v56 = vpack.c.bf16 %v2664_v54, %v2662_v25  ;;  %v2686_v25 = vld [vmem:[#allocation23 + $0x760] sm:$0xff]  ;;  %v2688_v54 = vld [vmem:[#allocation23 + $0x770] sm:$0xff] }
0x1002   :  { %2937 = vmatmul.mubr.f32.vlgmr.msra.gmra.mrb[16].mxu0 %v2438_v22  ;;  %v7291_v22 = vpack.c.bf16 %v2668_v8, %v2666_v16 }
0x1003   :  { %2942 = vmatprep.mubr.f32.mxu0 %v2447_v5  ;;  %7268 = vmatpush1.bf16.msra.mxu0 %v7267_v17  ;;  %v9740_v17 = vadd.f32 %v9658_v36, %v1985_v57  ;;  %v2677_v5 = vld [vmem:[#allocation23 + $0x718] sm:$0xff]  ;;  %v7295_v36 = vpack.c.bf16 %v2672_v50, %v2670_v30 }
0x1004   :  { %7270 = vmatprep.subr.bf16.mxu0 %v7269_v20  ;;  %v7293_v20 = vpack.c.bf16 %v2673_v6, %v2671_v14  ;;  %v7297_v29 = vpack.c.bf16 %v2677_v5, %v2675_v12  ;;  %v2693_v57 = vld [vmem:[#allocation23 + $0x798] sm:$0xff]  ;;  %v2690_v14 = vld [vmem:[#allocation23 + $0x780] sm:$0xff]  ;;  %v2692_v6 = vld [vmem:[#allocation23 + $0x790] sm:$0xff] }
0x1005   :  { %v2328_v26 = vmul.f32 0.044715, %v9740_v17  ;;  %v7313_v8 = vpack.c.bf16 %v2693_v57, %v2691_v28  ;;  %v2697_v30 = vld [vmem:[#allocation23 + $0x7b8] sm:$0xff]  ;;  %v7315_v50 = vpack.c.bf16 %v2692_v6, %v2690_v14  ;;  %v3102_v6 = vld [vmem:[#allocation11 + $0x638] sm:$0xff] }
0x1006   :  { %2943 = vmatmul.mubr.f32.gmra.mrb[18].mxu0 %v2446_v21 }
0x1007   :  { %7272 = vmatpush1.bf16.msra.mxu0 %v7271_v18  ;;  %3013 = vmatprep.mubr.f32.mxu0 %v2441_v46  ;;  %v2674_v18 = vld [vmem:[#allocation23 + $0x700] sm:$0xff]  ;;  %v2344_v21 = vmul.f32 %v2328_v26, %v9740_v17 }
0x1008   :  { %7274 = vmatprep.subr.bf16.mxu0 %v7273_v63  ;;  %v2336_v63 = vmul.f32 0.044715, %v9748_v27  ;;  %v7299_v4 = vpack.c.bf16 %v2676_v47, %v2674_v18  ;;  %v2678_v46 = vld [vmem:[#allocation23 + $0x720] sm:$0xff] }
0x1009   :  { %v7303_v13 = vpack.c.bf16 %v2680_v23, %v2678_v46  ;;  %v2694_v26 = vld [vmem:[#allocation23 + $0x7a0] sm:$0xff]  ;;  %v2704_v46 = vld [vmem:[#allocation23 + $0x7f0] sm:$0xff] }
0x100a   :  { %v2352_v19 = vmul.f32 %v2336_v63, %v9748_v27  ;;  %v2705_v63 = vld [vmem:[#allocation23 + $0x7f8] sm:$0xff] }
0x100b   :  { %7276 = vmatpush1.bf16.msra.mxu0 %v7275_v44  ;;  %v2685_v44 = vld [vmem:[#allocation23 + $0x758] sm:$0xff] }
0x100c   :  { %7278 = vmatprep.subr.bf16.mxu0 %v7277_v51  ;;  %v2360_v51 = vmul.f32 %v2344_v21, %v9740_v17  ;;  %v7305_v49 = vpack.c.bf16 %v2685_v44, %v2683_v37  ;;  %v2703_v21 = vld [vmem:[#allocation23 + $0x7e8] sm:$0xff] }
0x100e   :  { %v2376_v32 = vadd.f32 %v2360_v51, %v9740_v17 }
0x100f   :  { %7280 = vmatpush1.bf16.msra.mxu0 %v7279_v35  ;;  %v2684_v35 = vld [vmem:[#allocation23 + $0x750] sm:$0xff] }
0x1010   :  { %7282 = vmatprep.subr.bf16.mxu0 %v7281_v53  ;;  %v2369_v53 = vmul.f32 %v2353_v61, %v9744_v41  ;;  %v7307_v42 = vpack.c.bf16 %v2684_v35, %v2682_v45  ;;  %v7325_v61 = vpack.c.bf16 %v2705_v63, %v2703_v21  ;;  %v2321_v45 = vmul.f32 0.5, %v9744_v41  ;;  %v3138_v21 = vld [vmem:[#allocation11 + $0x758] sm:$0xff] }
0x1012   :  { %v2385_v9 = vadd.f32 %v2369_v53, %v9744_v41 }
0x1013   :  { %7284 = vmatpush1.bf16.msra.mxu0 %v7283_v3  ;;  %v2368_v3 = vmul.f32 %v2352_v19, %v9748_v27 }
0x1014   :  { %7286 = vmatprep.subr.bf16.mxu0 %v7285_v24  ;;  %v7309_v24 = vpack.c.bf16 %v2689_v10, %v2687_v55  ;;  %v2320_v10 = vmul.f32 0.5, %v9748_v27 }
0x1015   :  { %v2384_v16 = vadd.f32 %v2368_v3, %v9748_v27 }
0x1017   :  { %7288 = vmatpush1.bf16.msra.mxu0 %v7287_v56  ;;  %v2392_v56 = vmul.f32 0.7978846, %v2376_v32  ;;  %v2400_v12 = vmul.f32 0.7978846, %v2384_v16 }
0x1018   :  { %7290 = vmatprep.subr.bf16.mxu0 %v7289_v15  ;;  %v7311_v15 = vpack.c.bf16 %v2688_v54, %v2686_v25 }
0x1019   :  { %8406 = vtanh.f32 %v2392_v56 }
0x101b   :  { %7292 = vmatpush1.bf16.msra.mxu0 %v7291_v22  ;;  %v2401_v22 = vmul.f32 0.7978846, %v2385_v9 }
0x101c   :  { %7294 = vmatprep.subr.bf16.mxu0 %v7293_v20  ;;  %v2695_v20 = vld [vmem:[#allocation23 + $0x7a8] sm:$0xff] }
0x101d   :  { %v7317_v5 = vpack.c.bf16 %v2697_v30, %v2695_v20  ;;  %8408 = vtanh.f32 %v2401_v22  ;;  %v3095_v22 = vld [vmem:[#allocation11 + $0x600] sm:$0xff]  ;;  %v3101_v30 = vld [vmem:[#allocation11 + $0x630] sm:$0xff] }
0x101e   :  { %8410 = vtanh.f32 %v2400_v12  ;;  %v3114_v12 = vld [vmem:[#allocation11 + $0x698] sm:$0xff] }
0x101f   :  { %7296 = vmatpush1.bf16.msra.mxu0 %v7295_v36  ;;  %v2696_v36 = vld [vmem:[#allocation23 + $0x7b0] sm:$0xff] }
0x1020   :  { %7298 = vmatprep.subr.bf16.mxu0 %v7297_v29  ;;  %v2701_v29 = vld [vmem:[#allocation23 + $0x7d8] sm:$0xff]  ;;  %v7319_v18 = vpack.c.bf16 %v2696_v36, %v2694_v26 }
0x1021   :  { %v7321_v47 = vpack.c.bf16 %v2701_v29, %v2699_v1  ;;  %v3107_v36 = vld [vmem:[#allocation11 + $0x660] sm:$0xff]  ;;  %v3120_v1 = vld [vmem:[#allocation11 + $0x6c8] sm:$0xff] }
0x1023   :  { %7300 = vmatpush1.bf16.msra.mxu0 %v7299_v4  ;;  %v7323_v4 = vpack.c.bf16 %v2700_v2, %v2698_v0  ;;  %v8407_v23 = vpop.eup %8406  ;;  %v3125_v0 = vld [vmem:[#allocation11 + $0x6f0] sm:$0xff]  ;;  %v3132_v2 = vld [vmem:[#allocation11 + $0x728] sm:$0xff] }
0x1024   :  { %7302 = vmatprep.subr.bf16.mxu0 %v7301_v31  ;;  %v2702_v31 = vld [vmem:[#allocation23 + $0x7e0] sm:$0xff]  ;;  %v2424_v51 = vadd.f32 1.0, %v8407_v23  ;;  %v3150_v23 = vld [vmem:[#allocation11 + $0x7b8] sm:$0xff] }
0x1025   :  { %v7327_v44 = vpack.c.bf16 %v2704_v46, %v2702_v31  ;;  %v3137_v31 = vld [vmem:[#allocation11 + $0x750] sm:$0xff]  ;;  %v3144_v46 = vld [vmem:[#allocation11 + $0x788] sm:$0xff] }
0x1027   :  { %7304 = vmatpush1.bf16.msra.mxu0 %v7303_v13  ;;  %v8409_v37 = vpop.eup %8408 }
0x1028   :  { %7306 = vmatprep.subr.bf16.mxu0 %v7305_v49  ;;  %v8411_v19 = vpop.eup %8410  ;;  %v2433_v13 = vadd.f32 1.0, %v8409_v37  ;;  %v2312_v49 = vmul.f32 0.5, %v9740_v17 }
0x1029   :  { %v2432_v53 = vadd.f32 1.0, %v8411_v19  ;;  %v3149_v19 = vld [vmem:[#allocation11 + $0x7b0] sm:$0xff] }
0x102a   :  { %v2440_v35 = vmul.f32 %v2424_v51, %v2312_v49  ;;  %v2449_v55 = vmul.f32 %v2433_v13, %v2321_v45  ;;  %v3143_v51 = vld [vmem:[#allocation11 + $0x780] sm:$0xff]  ;;  %v3156_v13 = vld [vmem:[#allocation11 + $0x7e8] sm:$0xff]  ;;  %v3162_v49 = vld [vmem:[#allocation11 + $0x818] sm:$0xff] }
0x102b   :  { %7308 = vmatpush1.bf16.msra.mxu0 %v7307_v42  ;;  %v2448_v32 = vmul.f32 %v2432_v53, %v2320_v10  ;;  %v2706_v42 = vld [vmem:[#allocation24] sm:$0x3]  ;;  %v7347_v45 = vpack.c.bf16 %v3149_v19, %v3143_v51  ;;  %v3155_v53 = vld [vmem:[#allocation11 + $0x7e0] sm:$0xff] }
0x102c   :  { %7310 = vmatprep.subr.bf16.mxu0 %v7309_v24  ;;  %v2711_v3 = vrot.slane %v2706_v42, %v9416_v40  ;;  %v2715_v24 = vrot.slane %v2706_v42, %v9413_v39  ;;  %v3168_v10 = vld [vmem:[#allocation11 + $0x848] sm:$0xff] }
0x102d   :  { %v3228_v19 = vld [vmem:[#allocation11 + $0xa28] sm:$0xff] }
0x102f   :  { %7312 = vmatpush1.bf16.msra.mxu0 %v7311_v15 }
0x1030   :  { %7314 = vmatprep.subr.bf16.mxu0 %v7313_v8 }
0x1033   :  { %7316 = vmatpush1.bf16.msra.mxu0 %v7315_v50  ;;  %v3108_v50 = vld [vmem:[#allocation11 + $0x668] sm:$0xff] }
0x1034   :  { %7318 = vmatprep.subr.bf16.mxu0 %v7317_v5  ;;  %v7331_v5 = vpack.c.bf16 %v3101_v30, %v3095_v22  ;;  %v7333_v26 = vpack.c.bf16 %v3114_v12, %v3108_v50  ;;  %v3197_v22 = vld [vmem:[#allocation11 + $0x930] sm:$0xff]  ;;  %v3210_v30 = vld [vmem:[#allocation11 + $0x998] sm:$0xff] }
0x1037   :  { %7320 = vmatpush1.bf16.msra.mxu0 %v7319_v18 }
0x1038   :  { %7322 = vmatprep.subr.bf16.mxu0 %v7321_v47  ;;  %v3119_v47 = vld [vmem:[#allocation11 + $0x6c0] sm:$0xff] }
0x1039   :  { %v7339_v63 = vpack.c.bf16 %v3125_v0, %v3119_v47 }
0x103b   :  { %7324 = vmatpush1.bf16.msra.mxu0 %v7323_v4  ;;  %v7341_v4 = vpack.c.bf16 %v3138_v21, %v3132_v2 }
0x103c   :  { %7326 = vmatprep.subr.bf16.mxu0 %v7325_v61  ;;  %v3131_v61 = vld [vmem:[#allocation11 + $0x720] sm:$0xff] }
0x103d   :  { %v7343_v37 = vpack.c.bf16 %v3137_v31, %v3131_v61 }
0x103f   :  { %7328 = vmatpush1.bf16.msra.mxu0 %v7327_v44  ;;  %v7345_v44 = vpack.c.bf16 %v3150_v23, %v3144_v46 }
0x1042   :  { %3014 = vmatmul.mubr.f32.vlgmr.msra.gmra.mrb[16].mxu0 %v2440_v35  ;;  %v7349_v35 = vpack.c.bf16 %v3162_v49, %v3156_v13  ;;  %v3234_v13 = vld [vmem:[#allocation11 + $0xa58] sm:$0xff] }
0x1043   :  { %3019 = vmatprep.mubr.f32.mxu0 %v2449_v55  ;;  %v3161_v55 = vld [vmem:[#allocation11 + $0x810] sm:$0xff]  ;;  %v7373_v49 = vpack.c.bf16 %v3234_v13, %v3228_v19 }
0x1044   :  { %v7351_v42 = vpack.c.bf16 %v3161_v55, %v3155_v53  ;;  %v3246_v53 = vld [vmem:[#allocation11 + $0xab8] sm:$0xff] }
0x1046   :  { %3020 = vmatmul.mubr.f32.gmra.mrb[18].mxu0 %v2448_v32  ;;  %v3174_v32 = vld [vmem:[#allocation11 + $0x878] sm:$0xff] }
0x1115   :  { %v3015_v25 = vpop.f32.mrb[16].mxu0 }
0x1116   :  { %v8289_v54 = vadd.f32 %v3015_v25, %v2711_v3  ;;  %v3017_v17 = vpop.f32.mrb[17].mxu0  ;;  %v3173_v25 = vld [vmem:[#allocation11 + $0x870] sm:$0xff] }
0x1117   :  { %v8290_v9 = vadd.f32 %v3017_v17, %v2715_v24  ;;  %v3186_v17 = vld [vmem:[#allocation11 + $0x8d8] sm:$0xff] }
0x1118   :  { %v9767_v41 = vadd.f32 %v8289_v54, %v9587_v60  ;;  %v3180_v54 = vld [vmem:[#allocation11 + $0x8a8] sm:$0xff] }
0x1119   :  { %v9770_v28 = vadd.f32 %v8290_v9, %v9584_v11  ;;  %v3021_v57 = vpop.f32.mrb[18].mxu0  ;;  %v3096_v11 = vld [vmem:[#allocation11 + $0x608] sm:$0xff] }
0x111a   :  { %v8291_v27 = vadd.f32 %v3021_v57, %v2711_v3  ;;  %v3023_v56 = vpop.f32.mrb[19].mxu0  ;;  %v7329_v20 = vpack.c.bf16 %v3102_v6, %v3096_v11  ;;  %v7353_v3 = vpack.c.bf16 %v3174_v32, %v3168_v10  ;;  %v7357_v57 = vpack.c.bf16 %v3186_v17, %v3180_v54  ;;  %v3191_v6 = vld [vmem:[#allocation11 + $0x900] sm:$0xff]  ;;  %v3245_v32 = vld [vmem:[#allocation11 + $0xab0] sm:$0xff] }
0x111b   :  { %v8292_v15 = vadd.f32 %v3023_v56, %v2715_v24  ;;  %v3032_v16 = vadd.f32 %v9770_v28, %v9767_v41  ;;  %v3167_v24 = vld [vmem:[#allocation11 + $0x840] sm:$0xff]  ;;  %v3185_v56 = vld [vmem:[#allocation11 + $0x8d0] sm:$0xff]  ;;  %v7363_v50 = vpack.c.bf16 %v3197_v22, %v3191_v6 }
0x111c   :  { %v9775_v8 = vadd.f32 %v8291_v27, %v9601_v59  ;;  %v3113_v59 = vld [vmem:[#allocation11 + $0x690] sm:$0xff]  ;;  %7330 = vmatprep.subr.bf16.mxu1 %v7329_v20  ;;  %v7355_v9 = vpack.c.bf16 %v3173_v25, %v3167_v24  ;;  %v3179_v27 = vld [vmem:[#allocation11 + $0x8a0] sm:$0xff]  ;;  %v3204_v20 = vld [vmem:[#allocation11 + $0x968] sm:$0xff] }
0x111d   :  { %v9778_v14 = vadd.f32 %v8292_v15, %v9598_v52  ;;  %3033 = vadd.xlane.f32.xlu0 %v3032_v16  ;;  %v3126_v52 = vld [vmem:[#allocation11 + $0x6f8] sm:$0xff]  ;;  %7332 = vmatpush1.bf16.msra.mxu1 %v7331_v5  ;;  %v7335_v29 = vpack.c.bf16 %v3113_v59, %v3107_v36  ;;  %v3192_v15 = vld [vmem:[#allocation11 + $0x908] sm:$0xff]  ;;  %v7365_v12 = vpack.c.bf16 %v3210_v30, %v3204_v20  ;;  %v3203_v5 = vld [vmem:[#allocation11 + $0x960] sm:$0xff] }
0x111e   :  { %7334 = vmatprep.subr.bf16.mxu1 %v7333_v26  ;;  %v7337_v18 = vpack.c.bf16 %v3126_v52, %v3120_v1  ;;  %v3198_v16 = vld [vmem:[#allocation11 + $0x938] sm:$0xff]  ;;  %v3209_v26 = vld [vmem:[#allocation11 + $0x990] sm:$0xff]  ;;  %v3216_v36 = vld [vmem:[#allocation11 + $0x9c8] sm:$0xff] }
0x111f   :  { %v3035_v60 = vadd.f32 %v9778_v14, %v9775_v8  ;;  %v7361_v11 = vpack.c.bf16 %v3198_v16, %v3192_v15  ;;  %v3222_v59 = vld [vmem:[#allocation11 + $0x9f8] sm:$0xff]  ;;  %v7367_v1 = vpack.c.bf16 %v3209_v26, %v3203_v5  ;;  %v3239_v10 = vld [vmem:[#allocation11 + $0xa80] sm:$0xff]  ;;  %v3257_v17 = vld [vmem:[#allocation11 + $0xb10] sm:$0xff] }
0x1120   :  { %v7369_v52 = vpack.c.bf16 %v3222_v59, %v3216_v36  ;;  %v3258_v24 = vld [vmem:[#allocation11 + $0xb18] sm:$0xff]  ;;  %v3251_v25 = vld [vmem:[#allocation11 + $0xae0] sm:$0xff]  ;;  %v3269_v16 = vld [vmem:[#allocation11 + $0xb70] sm:$0xff] }
0x1121   :  { %3036 = vadd.xlane.f32.xlu1 %v3035_v60  ;;  %7336 = vmatpush1.bf16.msra.mxu1 %v7335_v29  ;;  %v7359_v60 = vpack.c.bf16 %v3185_v56, %v3179_v27  ;;  %v3215_v29 = vld [vmem:[#allocation11 + $0x9c0] sm:$0xff]  ;;  %v7383_v27 = vpack.c.bf16 %v3257_v17, %v3251_v25  ;;  %v3281_v30 = vld [vmem:[#allocation11 + $0xbd0] sm:$0xff]  ;;  %v3128_v25 = vld [vmem:[#allocation11 + $0x708] sm:$0xff] }
0x1122   :  { %7338 = vmatprep.subr.bf16.mxu1 %v7337_v18  ;;  %v3221_v18 = vld [vmem:[#allocation11 + $0x9f0] sm:$0xff]  ;;  %v3263_v15 = vld [vmem:[#allocation11 + $0xb40] sm:$0xff] }
0x1123   :  { %v7371_v47 = vpack.c.bf16 %v3221_v18, %v3215_v29  ;;  %v7387_v6 = vpack.c.bf16 %v3269_v16, %v3263_v15  ;;  %v3275_v20 = vld [vmem:[#allocation11 + $0xba0] sm:$0xff] }
0x1124   :  { %v7391_v5 = vpack.c.bf16 %v3281_v30, %v3275_v20 }
0x1125   :  { %7340 = vmatpush1.bf16.msra.mxu1 %v7339_v63 }
0x1126   :  { %7342 = vmatprep.subr.bf16.mxu1 %v7341_v4 }
0x1129   :  { %7344 = vmatpush1.bf16.msra.mxu1 %v7343_v37 }
0x112a   :  { %7346 = vmatprep.subr.bf16.mxu1 %v7345_v44 }
0x112d   :  { %7348 = vmatpush1.bf16.msra.mxu1 %v7347_v45  ;;  %v3227_v45 = vld [vmem:[#allocation11 + $0xa20] sm:$0xff] }
0x112e   :  { %7350 = vmatprep.subr.bf16.mxu1 %v7349_v35  ;;  %v3233_v35 = vld [vmem:[#allocation11 + $0xa50] sm:$0xff] }
0x1131   :  { %7352 = vmatpush1.bf16.msra.mxu1 %v7351_v42  ;;  %v7379_v42 = vpack.c.bf16 %v3245_v32, %v3239_v10  ;;  %v3109_v10 = vld [vmem:[#allocation11 + $0x670] sm:$0xff]  ;;  %v3115_v32 = vld [vmem:[#allocation11 + $0x6a0] sm:$0xff] }
0x1132   :  { %7354 = vmatprep.subr.bf16.mxu1 %v7353_v3  ;;  %v3252_v3 = vld [vmem:[#allocation11 + $0xae8] sm:$0xff] }
0x1133   :  { %v7381_v54 = vpack.c.bf16 %v3258_v24, %v3252_v3  ;;  %v3122_v24 = vld [vmem:[#allocation11 + $0x6d8] sm:$0xff] }
0x1135   :  { %7356 = vmatpush1.bf16.msra.mxu1 %v7355_v9  ;;  %v3264_v9 = vld [vmem:[#allocation11 + $0xb48] sm:$0xff] }
0x1136   :  { %7358 = vmatprep.subr.bf16.mxu1 %v7357_v57  ;;  %v3270_v57 = vld [vmem:[#allocation11 + $0xb78] sm:$0xff] }
0x1137   :  { %v7385_v56 = vpack.c.bf16 %v3270_v57, %v3264_v9  ;;  %v7399_v9 = vpack.c.bf16 %v3115_v32, %v3109_v10  ;;  %v3127_v57 = vld [vmem:[#allocation11 + $0x700] sm:$0xff]  ;;  %v3205_v10 = vld [vmem:[#allocation11 + $0x970] sm:$0xff] }
0x1138   :  { %v3211_v32 = vld [vmem:[#allocation11 + $0x9a0] sm:$0xff] }
0x1139   :  { %7360 = vmatpush1.bf16.msra.mxu1 %v7359_v60  ;;  %v3276_v60 = vld [vmem:[#allocation11 + $0xba8] sm:$0xff] }
0x113a   :  { %7362 = vmatprep.subr.bf16.mxu1 %v7361_v11  ;;  %v3282_v11 = vld [vmem:[#allocation11 + $0xbd8] sm:$0xff] }
0x113b   :  { %v7389_v22 = vpack.c.bf16 %v3282_v11, %v3276_v60  ;;  %v3133_v60 = vld [vmem:[#allocation11 + $0x730] sm:$0xff]  ;;  %v3139_v11 = vld [vmem:[#allocation11 + $0x760] sm:$0xff] }
0x113c   :  { %v7407_v20 = vpack.c.bf16 %v3139_v11, %v3133_v60  ;;  %v3242_v60 = vld [vmem:[#allocation11 + $0xa98] sm:$0xff]  ;;  %v3248_v11 = vld [vmem:[#allocation11 + $0xac8] sm:$0xff] }
0x113d   :  { %7364 = vmatpush1.bf16.msra.mxu1 %v7363_v50  ;;  %v3098_v50 = vld [vmem:[#allocation11 + $0x618] sm:$0xff] }
0x113e   :  { %7366 = vmatprep.subr.bf16.mxu1 %v7365_v12  ;;  %v3104_v12 = vld [vmem:[#allocation11 + $0x648] sm:$0xff] }
0x113f   :  { %v7393_v26 = vpack.c.bf16 %v3104_v12, %v3098_v50  ;;  %v3145_v50 = vld [vmem:[#allocation11 + $0x790] sm:$0xff]  ;;  %v3151_v12 = vld [vmem:[#allocation11 + $0x7c0] sm:$0xff] }
0x1141   :  { %7368 = vmatpush1.bf16.msra.mxu1 %v7367_v1 }
0x1142   :  { %7370 = vmatprep.subr.bf16.mxu1 %v7369_v52 }
0x1145   :  { %7372 = vmatpush1.bf16.msra.mxu1 %v7371_v47  ;;  %v3030_v47 = vld [vmem:[#allocation26] sm:$0x3] }
0x1146   :  { %7374 = vmatprep.subr.bf16.mxu1 %v7373_v49  ;;  %v3110_v49 = vld [vmem:[#allocation11 + $0x678] sm:$0xff] }
0x11aa   :  { %v3034_v0 = vpop.xlane.xlu0 %3033 }
0x11ab   :  { %v3038_v2 = vmul.f32 0.00390625, %v3034_v0  ;;  %v3031_v0 = vld [vmem:[#allocation27] sm:$0x3] }
0x11ad   :  { %v9783_v21 = vsub.f32 %v9767_v41, %v3038_v2  ;;  %v9786_v63 = vsub.f32 %v9770_v28, %v3038_v2  ;;  %v3068_v2 = vrot.slane %v3030_v47, %v9416_v40 }
0x11ae   :  { %v3037_v4 = vpop.xlane.xlu1 %3036 }
0x11af   :  { %v3039_v61 = vmul.f32 0.00390625, %v3037_v4  ;;  %v3044_v31 = vmul.f32 %v9783_v21, %v9783_v21  ;;  %v3045_v46 = vmul.f32 %v9786_v63, %v9786_v63  ;;  %v3072_v4 = vrot.slane %v3030_v47, %v9413_v39 }
0x11b1   :  { %v9793_v23 = vsub.f32 %v9775_v8, %v3039_v61  ;;  %v9796_v37 = vsub.f32 %v9778_v14, %v3039_v61  ;;  %v3048_v44 = vadd.f32 %v3045_v46, %v3044_v31  ;;  %v7375_v8 = vpack.c.bf16 %v3233_v35, %v3227_v45  ;;  %v3240_v14 = vld [vmem:[#allocation11 + $0xa88] sm:$0xff] }
0x11b2   :  { %v7377_v55 = vpack.c.bf16 %v3246_v53, %v3240_v14  ;;  %v3116_v45 = vld [vmem:[#allocation11 + $0x6a8] sm:$0xff] }
0x11b3   :  { %3049 = vadd.xlane.f32.xlu0 %v3048_v44  ;;  %v3046_v41 = vmul.f32 %v9793_v23, %v9793_v23  ;;  %v3047_v28 = vmul.f32 %v9796_v37, %v9796_v37  ;;  %7376 = vmatpush1.bf16.msra.mxu1 %v7375_v8  ;;  %v3083_v44 = vrot.slane %v3031_v0, %v9416_v40 }
0x11b4   :  { %7378 = vmatprep.subr.bf16.mxu1 %v7377_v55  ;;  %v7397_v55 = vpack.c.bf16 %v3116_v45, %v3110_v49  ;;  %v3193_v45 = vld [vmem:[#allocation11 + $0x910] sm:$0xff] }
0x11b5   :  { %v3051_v51 = vadd.f32 %v3047_v28, %v3046_v41  ;;  %v3087_v41 = vrot.slane %v3031_v0, %v9413_v39  ;;  %v3097_v28 = vld [vmem:[#allocation11 + $0x610] sm:$0xff] }
0x11b7   :  { %3052 = vadd.xlane.f32.xlu1 %v3051_v51  ;;  %7380 = vmatpush1.bf16.msra.mxu1 %v7379_v42  ;;  %v3103_v51 = vld [vmem:[#allocation11 + $0x640] sm:$0xff] }
0x11b8   :  { %7382 = vmatprep.subr.bf16.mxu1 %v7381_v54  ;;  %v7395_v8 = vpack.c.bf16 %v3103_v51, %v3097_v28  ;;  %v3187_v28 = vld [vmem:[#allocation11 + $0x8e0] sm:$0xff]  ;;  %v3194_v51 = vld [vmem:[#allocation11 + $0x918] sm:$0xff] }
0x11bb   :  { %7384 = vmatpush1.bf16.msra.mxu1 %v7383_v27  ;;  %v3134_v27 = vld [vmem:[#allocation11 + $0x738] sm:$0xff] }
0x11bc   :  { %7386 = vmatprep.subr.bf16.mxu1 %v7385_v56  ;;  %v3140_v56 = vld [vmem:[#allocation11 + $0x768] sm:$0xff] }
0x11bd   :  { %v7405_v16 = vpack.c.bf16 %v3140_v56, %v3134_v27 }
0x11bf   :  { %7388 = vmatpush1.bf16.msra.mxu1 %v7387_v6  ;;  %v3146_v6 = vld [vmem:[#allocation11 + $0x798] sm:$0xff] }
0x11c0   :  { %7390 = vmatprep.subr.bf16.mxu1 %v7389_v22  ;;  %v3152_v22 = vld [vmem:[#allocation11 + $0x7c8] sm:$0xff] }
0x11c1   :  { %v7409_v30 = vpack.c.bf16 %v3152_v22, %v3146_v6  ;;  %v7441_v22 = vpack.c.bf16 %v3248_v11, %v3242_v60 }
0x11c3   :  { %7392 = vmatpush1.bf16.msra.mxu1 %v7391_v5  ;;  %v3158_v5 = vld [vmem:[#allocation11 + $0x7f8] sm:$0xff] }
0x11c4   :  { %7394 = vmatprep.subr.bf16.mxu1 %v7393_v26  ;;  %v3164_v26 = vld [vmem:[#allocation11 + $0x828] sm:$0xff] }
0x1240   :  { %v3050_v36 = vpop.xlane.xlu0 %3049 }
0x1241   :  { %v3054_v59 = vmul.f32 0.00390625, %v3050_v36  ;;  %v7411_v36 = vpack.c.bf16 %v3151_v12, %v3145_v50  ;;  %v3254_v50 = vld [vmem:[#allocation11 + $0xaf8] sm:$0xff]  ;;  %v3260_v12 = vld [vmem:[#allocation11 + $0xb28] sm:$0xff] }
0x1243   :  { %v3056_v1 = vadd.f32 1e-12, %v3054_v59  ;;  %v7413_v59 = vpack.c.bf16 %v3164_v26, %v3158_v5  ;;  %v7445_v26 = vpack.c.bf16 %v3260_v12, %v3254_v50 }
0x1244   :  { %v3053_v52 = vpop.xlane.xlu1 %3052 }
0x1245   :  { %8412 = vrsqrt.f32 %v3056_v1  ;;  %v3055_v29 = vmul.f32 0.00390625, %v3053_v52  ;;  %v3157_v1 = vld [vmem:[#allocation11 + $0x7f0] sm:$0xff]  ;;  %v3163_v52 = vld [vmem:[#allocation11 + $0x820] sm:$0xff] }
0x1246   :  { %v7415_v47 = vpack.c.bf16 %v3163_v52, %v3157_v1  ;;  %v3266_v1 = vld [vmem:[#allocation11 + $0xb58] sm:$0xff]  ;;  %v3272_v52 = vld [vmem:[#allocation11 + $0xb88] sm:$0xff] }
0x1247   :  { %v3057_v18 = vadd.f32 1e-12, %v3055_v29  ;;  %v3170_v29 = vld [vmem:[#allocation11 + $0x858] sm:$0xff] }
0x1249   :  { %8414 = vrsqrt.f32 %v3057_v18  ;;  %v3176_v18 = vld [vmem:[#allocation11 + $0x888] sm:$0xff] }
0x124a   :  { %v7417_v0 = vpack.c.bf16 %v3176_v18, %v3170_v29  ;;  %v7449_v18 = vpack.c.bf16 %v3272_v52, %v3266_v1 }
0x124f   :  { %v8413_v61 = vpop.eup %8412 }
0x1250   :  { %v3060_v31 = vmul.f32 %v8413_v61, %v9783_v21  ;;  %v3061_v46 = vmul.f32 %v8413_v61, %v9786_v63  ;;  %v3182_v61 = vld [vmem:[#allocation11 + $0x8b8] sm:$0xff] }
0x1252   :  { %v3076_v19 = vmul.f32 %v3072_v4, %v3061_v46  ;;  %v3075_v13 = vmul.f32 %v3068_v2, %v3060_v31  ;;  %v3188_v31 = vld [vmem:[#allocation11 + $0x8e8] sm:$0xff] }
0x1253   :  { %v8415_v35 = vpop.eup %8414 }
0x1254   :  { %v9808_v14 = vadd.f32 %v3087_v41, %v3076_v19  ;;  %v9810_v53 = vadd.f32 %v3083_v44, %v3075_v13  ;;  %v3063_v21 = vmul.f32 %v8415_v35, %v9796_v37  ;;  %v3062_v63 = vmul.f32 %v8415_v35, %v9793_v23  ;;  %v3121_v23 = vld [vmem:[#allocation11 + $0x6d0] sm:$0xff]  ;;  %v3200_v19 = vld [vmem:[#allocation11 + $0x948] sm:$0xff]  ;;  %v3199_v35 = vld [vmem:[#allocation11 + $0x940] sm:$0xff] }
0x1255   :  { %v7401_v37 = vpack.c.bf16 %v3128_v25, %v3122_v24  ;;  %v7403_v15 = vpack.c.bf16 %v3127_v57, %v3121_v23  ;;  %v7425_v49 = vpack.c.bf16 %v3200_v19, %v3194_v51  ;;  %v7431_v24 = vpack.c.bf16 %v3211_v32, %v3205_v10  ;;  %v3230_v23 = vld [vmem:[#allocation11 + $0xa38] sm:$0xff]  ;;  %v3236_v57 = vld [vmem:[#allocation11 + $0xa68] sm:$0xff] }
0x1256   :  { %3384 = vmatprep.mubr.f32.mxu1 %v9808_v14  ;;  %v3078_v42 = vmul.f32 %v3072_v4, %v3063_v21  ;;  %v3077_v3 = vmul.f32 %v3068_v2, %v3062_v63  ;;  %v3169_v2 = vld [vmem:[#allocation11 + $0x850] sm:$0xff]  ;;  %v3175_v4 = vld [vmem:[#allocation11 + $0x880] sm:$0xff]  ;;  %v3212_v21 = vld [vmem:[#allocation11 + $0x9a8] sm:$0xff]  ;;  %v7427_v63 = vpack.c.bf16 %v3199_v35, %v3193_v45  ;;  %v7437_v56 = vpack.c.bf16 %v3236_v57, %v3230_v23 }
0x1257   :  { %3385 = vmatmul.mubr.f32.vlgmr.msra.gmra.mrb[32].mxu1 %v9810_v53  ;;  %v7419_v46 = vpack.c.bf16 %v3175_v4, %v3169_v2  ;;  %v3278_v2 = vld [vmem:[#allocation11 + $0xbb8] sm:$0xff]  ;;  %v3284_v4 = vld [vmem:[#allocation11 + $0xbe8] sm:$0xff] }
0x1258   :  { %7396 = vmatpush1.bf16.msra.mxu1 %v7395_v8  ;;  %v9816_v54 = vadd.f32 %v3087_v41, %v3078_v42  ;;  %v9818_v17 = vadd.f32 %v3083_v44, %v3077_v3  ;;  %v7421_v44 = vpack.c.bf16 %v3188_v31, %v3182_v61  ;;  %v3181_v41 = vld [vmem:[#allocation11 + $0x8b0] sm:$0xff]  ;;  %v3206_v8 = vld [vmem:[#allocation11 + $0x978] sm:$0xff]  ;;  %v3224_v3 = vld [vmem:[#allocation11 + $0xa08] sm:$0xff]  ;;  %v7453_v31 = vpack.c.bf16 %v3284_v4, %v3278_v2 }
0x1259   :  { %7398 = vmatprep.subr.bf16.mxu1 %v7397_v55  ;;  %v7423_v13 = vpack.c.bf16 %v3187_v28, %v3181_v41  ;;  %v7429_v55 = vpack.c.bf16 %v3212_v21, %v3206_v8  ;;  %v3218_v42 = vld [vmem:[#allocation11 + $0x9d8] sm:$0xff]  ;;  %v3100_v41 = vld [vmem:[#allocation11 + $0x628] sm:$0xff] }
0x125a   :  { %3390 = vmatprep.mubr.f32.mxu1 %v9816_v54  ;;  %v7433_v25 = vpack.c.bf16 %v3224_v3, %v3218_v42  ;;  %v3106_v28 = vld [vmem:[#allocation11 + $0x658] sm:$0xff]  ;;  %v3112_v45 = vld [vmem:[#allocation11 + $0x688] sm:$0xff] }
0x125b   :  { %3391 = vmatmul.mubr.f32.gmra.mrb[34].mxu1 %v9818_v17  ;;  %v7457_v19 = vpack.c.bf16 %v3106_v28, %v3100_v41  ;;  %v3118_v35 = vld [vmem:[#allocation11 + $0x6b8] sm:$0xff]  ;;  %v3124_v10 = vld [vmem:[#allocation11 + $0x6e8] sm:$0xff] }
0x125c   :  { %7400 = vmatpush1.bf16.msra.mxu1 %v7399_v9  ;;  %3461 = vmatprep.mubr.f32.mxu1 %v9808_v14  ;;  %v3217_v9 = vld [vmem:[#allocation11 + $0x9d0] sm:$0xff]  ;;  %v7461_v21 = vpack.c.bf16 %v3118_v35, %v3112_v45  ;;  %v3130_v32 = vld [vmem:[#allocation11 + $0x718] sm:$0xff] }
0x125d   :  { %7402 = vmatprep.subr.bf16.mxu1 %v7401_v37  ;;  %v3223_v37 = vld [vmem:[#allocation11 + $0xa00] sm:$0xff]  ;;  %v7465_v3 = vpack.c.bf16 %v3130_v32, %v3124_v10 }
0x125e   :  { %v7435_v27 = vpack.c.bf16 %v3223_v37, %v3217_v9  ;;  %v3136_v9 = vld [vmem:[#allocation11 + $0x748] sm:$0xff]  ;;  %v3142_v37 = vld [vmem:[#allocation11 + $0x778] sm:$0xff] }
0x125f   :  { %v7469_v57 = vpack.c.bf16 %v3142_v37, %v3136_v9 }
0x1260   :  { %7404 = vmatpush1.bf16.msra.mxu1 %v7403_v15  ;;  %v3229_v15 = vld [vmem:[#allocation11 + $0xa30] sm:$0xff] }
0x1261   :  { %7406 = vmatprep.subr.bf16.mxu1 %v7405_v16  ;;  %v3235_v16 = vld [vmem:[#allocation11 + $0xa60] sm:$0xff] }
0x1262   :  { %v7439_v6 = vpack.c.bf16 %v3235_v16, %v3229_v15  ;;  %v3148_v15 = vld [vmem:[#allocation11 + $0x7a8] sm:$0xff]  ;;  %v3154_v16 = vld [vmem:[#allocation11 + $0x7d8] sm:$0xff] }
0x1263   :  { %v7473_v11 = vpack.c.bf16 %v3154_v16, %v3148_v15 }
0x1264   :  { %7408 = vmatpush1.bf16.msra.mxu1 %v7407_v20  ;;  %v3241_v20 = vld [vmem:[#allocation11 + $0xa90] sm:$0xff] }
0x1265   :  { %7410 = vmatprep.subr.bf16.mxu1 %v7409_v30  ;;  %v3247_v30 = vld [vmem:[#allocation11 + $0xac0] sm:$0xff] }
0x1266   :  { %v7443_v5 = vpack.c.bf16 %v3247_v30, %v3241_v20  ;;  %v3160_v20 = vld [vmem:[#allocation11 + $0x808] sm:$0xff]  ;;  %v3166_v30 = vld [vmem:[#allocation11 + $0x838] sm:$0xff] }
0x1267   :  { %v7477_v12 = vpack.c.bf16 %v3166_v30, %v3160_v20 }
0x1268   :  { %7412 = vmatpush1.bf16.msra.mxu1 %v7411_v36  ;;  %v3253_v36 = vld [vmem:[#allocation11 + $0xaf0] sm:$0xff] }
0x1269   :  { %7414 = vmatprep.subr.bf16.mxu1 %v7413_v59  ;;  %v3259_v59 = vld [vmem:[#allocation11 + $0xb20] sm:$0xff] }
0x126a   :  { %v7447_v29 = vpack.c.bf16 %v3259_v59, %v3253_v36  ;;  %v3172_v36 = vld [vmem:[#allocation11 + $0x868] sm:$0xff]  ;;  %v3178_v59 = vld [vmem:[#allocation11 + $0x898] sm:$0xff] }
0x126b   :  { %v7481_v52 = vpack.c.bf16 %v3178_v59, %v3172_v36 }
0x126c   :  { %7416 = vmatpush1.bf16.msra.mxu1 %v7415_v47  ;;  %v3265_v47 = vld [vmem:[#allocation11 + $0xb50] sm:$0xff] }
0x126d   :  { %7418 = vmatprep.subr.bf16.mxu1 %v7417_v0  ;;  %v3271_v0 = vld [vmem:[#allocation11 + $0xb80] sm:$0xff] }
0x126e   :  { %v7451_v61 = vpack.c.bf16 %v3271_v0, %v3265_v47  ;;  %v3184_v47 = vld [vmem:[#allocation11 + $0x8c8] sm:$0xff]  ;;  %v3190_v0 = vld [vmem:[#allocation11 + $0x8f8] sm:$0xff] }
0x126f   :  { %v7485_v4 = vpack.c.bf16 %v3190_v0, %v3184_v47 }
0x1270   :  { %7420 = vmatpush1.bf16.msra.mxu1 %v7419_v46  ;;  %v3277_v46 = vld [vmem:[#allocation11 + $0xbb0] sm:$0xff] }
0x1271   :  { %7422 = vmatprep.subr.bf16.mxu1 %v7421_v44  ;;  %v3283_v44 = vld [vmem:[#allocation11 + $0xbe0] sm:$0xff] }
0x1272   :  { %v7455_v51 = vpack.c.bf16 %v3283_v44, %v3277_v46  ;;  %v3196_v46 = vld [vmem:[#allocation11 + $0x928] sm:$0xff]  ;;  %v3202_v44 = vld [vmem:[#allocation11 + $0x958] sm:$0xff] }
0x1273   :  { %v7489_v28 = vpack.c.bf16 %v3202_v44, %v3196_v46 }
0x1274   :  { %7424 = vmatpush1.bf16.msra.mxu1 %v7423_v13  ;;  %v3099_v13 = vld [vmem:[#allocation11 + $0x620] sm:$0xff] }
0x1275   :  { %7426 = vmatprep.subr.bf16.mxu1 %v7425_v49  ;;  %v3105_v49 = vld [vmem:[#allocation11 + $0x650] sm:$0xff] }
0x1276   :  { %v7459_v8 = vpack.c.bf16 %v3105_v49, %v3099_v13  ;;  %v3208_v13 = vld [vmem:[#allocation11 + $0x988] sm:$0xff]  ;;  %v3214_v49 = vld [vmem:[#allocation11 + $0x9b8] sm:$0xff] }
0x1277   :  { %v7493_v35 = vpack.c.bf16 %v3214_v49, %v3208_v13 }
0x1278   :  { %7428 = vmatpush1.bf16.msra.mxu1 %v7427_v63  ;;  %v3111_v63 = vld [vmem:[#allocation11 + $0x680] sm:$0xff] }
0x1279   :  { %7430 = vmatprep.subr.bf16.mxu1 %v7429_v55  ;;  %v3117_v55 = vld [vmem:[#allocation11 + $0x6b0] sm:$0xff] }
0x127a   :  { %v7463_v42 = vpack.c.bf16 %v3117_v55, %v3111_v63  ;;  %v3220_v63 = vld [vmem:[#allocation11 + $0x9e8] sm:$0xff]  ;;  %v3226_v55 = vld [vmem:[#allocation11 + $0xa18] sm:$0xff] }
0x127b   :  { %v7497_v32 = vpack.c.bf16 %v3226_v55, %v3220_v63 }
0x127c   :  { %7432 = vmatpush1.bf16.msra.mxu1 %v7431_v24  ;;  %v3123_v24 = vld [vmem:[#allocation11 + $0x6e0] sm:$0xff] }
0x127d   :  { %7434 = vmatprep.subr.bf16.mxu1 %v7433_v25  ;;  %v3129_v25 = vld [vmem:[#allocation11 + $0x710] sm:$0xff] }
0x127e   :  { %v7467_v23 = vpack.c.bf16 %v3129_v25, %v3123_v24  ;;  %v3232_v24 = vld [vmem:[#allocation11 + $0xa48] sm:$0xff]  ;;  %v3238_v25 = vld [vmem:[#allocation11 + $0xa78] sm:$0xff] }
0x127f   :  { %v7501_v37 = vpack.c.bf16 %v3238_v25, %v3232_v24 }
0x1280   :  { %7436 = vmatpush1.bf16.msra.mxu1 %v7435_v27  ;;  %v3135_v27 = vld [vmem:[#allocation11 + $0x740] sm:$0xff] }
0x1281   :  { %7438 = vmatprep.subr.bf16.mxu1 %v7437_v56  ;;  %v3141_v56 = vld [vmem:[#allocation11 + $0x770] sm:$0xff] }
0x1282   :  { %v7471_v60 = vpack.c.bf16 %v3141_v56, %v3135_v27  ;;  %v3244_v27 = vld [vmem:[#allocation11 + $0xaa8] sm:$0xff]  ;;  %v3250_v56 = vld [vmem:[#allocation11 + $0xad8] sm:$0xff] }
0x1283   :  { %v7505_v16 = vpack.c.bf16 %v3250_v56, %v3244_v27 }
0x1284   :  { %7440 = vmatpush1.bf16.msra.mxu1 %v7439_v6  ;;  %v3147_v6 = vld [vmem:[#allocation11 + $0x7a0] sm:$0xff] }
0x1285   :  { %7442 = vmatprep.subr.bf16.mxu1 %v7441_v22  ;;  %v3153_v22 = vld [vmem:[#allocation11 + $0x7d0] sm:$0xff] }
0x1286   :  { %v7475_v50 = vpack.c.bf16 %v3153_v22, %v3147_v6  ;;  %v3256_v6 = vld [vmem:[#allocation11 + $0xb08] sm:$0xff]  ;;  %v3262_v22 = vld [vmem:[#allocation11 + $0xb38] sm:$0xff] }
0x1287   :  { %v7509_v30 = vpack.c.bf16 %v3262_v22, %v3256_v6 }
0x1288   :  { %7444 = vmatpush1.bf16.msra.mxu1 %v7443_v5  ;;  %v3159_v5 = vld [vmem:[#allocation11 + $0x800] sm:$0xff] }
0x1289   :  { %7446 = vmatprep.subr.bf16.mxu1 %v7445_v26  ;;  %v3165_v26 = vld [vmem:[#allocation11 + $0x830] sm:$0xff] }
0x128a   :  { %v7479_v1 = vpack.c.bf16 %v3165_v26, %v3159_v5  ;;  %v3268_v5 = vld [vmem:[#allocation11 + $0xb68] sm:$0xff]  ;;  %v3274_v26 = vld [vmem:[#allocation11 + $0xb98] sm:$0xff] }
0x128b   :  { %v7513_v59 = vpack.c.bf16 %v3274_v26, %v3268_v5 }
0x128c   :  { %7448 = vmatpush1.bf16.msra.mxu1 %v7447_v29  ;;  %v3171_v29 = vld [vmem:[#allocation11 + $0x860] sm:$0xff] }
0x128d   :  { %7450 = vmatprep.subr.bf16.mxu1 %v7449_v18  ;;  %v3177_v18 = vld [vmem:[#allocation11 + $0x890] sm:$0xff] }
0x128e   :  { %v7483_v2 = vpack.c.bf16 %v3177_v18, %v3171_v29  ;;  %v3280_v29 = vld [vmem:[#allocation11 + $0xbc8] sm:$0xff]  ;;  %v3286_v18 = vld [vmem:[#allocation11 + $0xbf8] sm:$0xff] }
0x128f   :  { %v7517_v0 = vpack.c.bf16 %v3286_v18, %v3280_v29 }
0x1290   :  { %7452 = vmatpush1.bf16.msra.mxu1 %v7451_v61  ;;  %v3183_v61 = vld [vmem:[#allocation11 + $0x8c0] sm:$0xff] }
0x1291   :  { %7454 = vmatprep.subr.bf16.mxu1 %v7453_v31  ;;  %v3189_v31 = vld [vmem:[#allocation11 + $0x8f0] sm:$0xff] }
0x1292   :  { %v7487_v41 = vpack.c.bf16 %v3189_v31, %v3183_v61  ;;  %v3288_v31 = vld [vmem:[#allocation12 + $0x6] sm:$0x3f] }
0x1293   :  { %v3305_v55 = vrot.slane %v3288_v31, %v9455_v43  ;;  %v3309_v24 = vrot.slane %v3288_v31, %v9471_v58 }
0x1294   :  { %7456 = vmatpush1.bf16.msra.mxu1 %v7455_v51  ;;  %v3195_v51 = vld [vmem:[#allocation11 + $0x920] sm:$0xff] }
0x1295   :  { %7458 = vmatprep.subr.bf16.mxu1 %v7457_v19  ;;  %v3201_v19 = vld [vmem:[#allocation11 + $0x950] sm:$0xff] }
0x1296   :  { %v7491_v45 = vpack.c.bf16 %v3201_v19, %v3195_v51 }
0x1297   :  { %3462 = vmatmul.mubr.f32.vlgmr.msra.gmra.mrb[36].mxu1 %v9810_v53 }
0x1298   :  { %3467 = vmatprep.mubr.f32.mxu1 %v9816_v54  ;;  %7460 = vmatpush1.bf16.msra.mxu1 %v7459_v8  ;;  %v3207_v8 = vld [vmem:[#allocation11 + $0x980] sm:$0xff] }
0x1299   :  { %7462 = vmatprep.subr.bf16.mxu1 %v7461_v21  ;;  %v3213_v21 = vld [vmem:[#allocation11 + $0x9b0] sm:$0xff] }
0x129a   :  { %v7495_v10 = vpack.c.bf16 %v3213_v21, %v3207_v8 }
0x129b   :  { %3468 = vmatmul.mubr.f32.gmra.mrb[38].mxu1 %v9818_v17 }
0x129c   :  { %7464 = vmatpush1.bf16.msra.mxu1 %v7463_v42  ;;  %3538 = vmatprep.mubr.f32.mxu1 %v9808_v14  ;;  %v3219_v42 = vld [vmem:[#allocation11 + $0x9e0] sm:$0xff] }
0x129d   :  { %7466 = vmatprep.subr.bf16.mxu1 %v7465_v3  ;;  %v3225_v3 = vld [vmem:[#allocation11 + $0xa10] sm:$0xff] }
0x129e   :  { %v7499_v9 = vpack.c.bf16 %v3225_v3, %v3219_v42 }
0x12a0   :  { %7468 = vmatpush1.bf16.msra.mxu1 %v7467_v23  ;;  %v3231_v23 = vld [vmem:[#allocation11 + $0xa40] sm:$0xff] }
0x12a1   :  { %7470 = vmatprep.subr.bf16.mxu1 %v7469_v57  ;;  %v3237_v57 = vld [vmem:[#allocation11 + $0xa70] sm:$0xff] }
0x12a2   :  { %v7503_v15 = vpack.c.bf16 %v3237_v57, %v3231_v23  ;;  %v3313_v23 = vrot.slane %v3288_v31, %v9475_v62 }
0x12a4   :  { %7472 = vmatpush1.bf16.msra.mxu1 %v7471_v60  ;;  %v3243_v60 = vld [vmem:[#allocation11 + $0xaa0] sm:$0xff] }
0x12a5   :  { %7474 = vmatprep.subr.bf16.mxu1 %v7473_v11  ;;  %v3249_v11 = vld [vmem:[#allocation11 + $0xad0] sm:$0xff] }
0x12a6   :  { %v7507_v20 = vpack.c.bf16 %v3249_v11, %v3243_v60 }
0x12a8   :  { %7476 = vmatpush1.bf16.msra.mxu1 %v7475_v50  ;;  %v3255_v50 = vld [vmem:[#allocation11 + $0xb00] sm:$0xff] }
0x12a9   :  { %7478 = vmatprep.subr.bf16.mxu1 %v7477_v12  ;;  %v3261_v12 = vld [vmem:[#allocation11 + $0xb30] sm:$0xff] }
0x12aa   :  { %v7511_v36 = vpack.c.bf16 %v3261_v12, %v3255_v50 }
0x12ac   :  { %7480 = vmatpush1.bf16.msra.mxu1 %v7479_v1  ;;  %v3267_v1 = vld [vmem:[#allocation11 + $0xb60] sm:$0xff] }
0x12ad   :  { %7482 = vmatprep.subr.bf16.mxu1 %v7481_v52  ;;  %v3273_v52 = vld [vmem:[#allocation11 + $0xb90] sm:$0xff] }
0x12ae   :  { %v7515_v47 = vpack.c.bf16 %v3273_v52, %v3267_v1 }
0x12b0   :  { %7484 = vmatpush1.bf16.msra.mxu1 %v7483_v2  ;;  %v3279_v2 = vld [vmem:[#allocation11 + $0xbc0] sm:$0xff] }
0x12b1   :  { %7486 = vmatprep.subr.bf16.mxu1 %v7485_v4  ;;  %v3285_v4 = vld [vmem:[#allocation11 + $0xbf0] sm:$0xff] }
0x12b2   :  { %v7519_v61 = vpack.c.bf16 %v3285_v4, %v3279_v2 }
0x12b4   :  { %7488 = vmatpush1.bf16.msra.mxu1 %v7487_v41  ;;  %v3293_v41 = vrot.slane %v3288_v31, %v9416_v40 }
0x12b5   :  { %7490 = vmatprep.subr.bf16.mxu1 %v7489_v28  ;;  %v3297_v28 = vrot.slane %v3288_v31, %v9413_v39 }
0x12b8   :  { %7492 = vmatpush1.bf16.msra.mxu1 %v7491_v45  ;;  %v3301_v45 = vrot.slane %v3288_v31, %v9450_v34 }
0x12b9   :  { %7494 = vmatprep.subr.bf16.mxu1 %v7493_v35 }
0x12bc   :  { %7496 = vmatpush1.bf16.msra.mxu1 %v7495_v10 }
0x12bd   :  { %7498 = vmatprep.subr.bf16.mxu1 %v7497_v32 }
0x12c0   :  { %7500 = vmatpush1.bf16.msra.mxu1 %v7499_v9 }
0x12c1   :  { %7502 = vmatprep.subr.bf16.mxu1 %v7501_v37 }
0x12c4   :  { %7504 = vmatpush1.bf16.msra.mxu1 %v7503_v15 }
0x12c5   :  { %7506 = vmatprep.subr.bf16.mxu1 %v7505_v16  ;;  %v6373_v16 = vld [vmem:[#allocation6] ss:$0 sm:$0xff] }
0x12c8   :  { %7508 = vmatpush1.bf16.msra.mxu1 %v7507_v20 }
0x12c9   :  { %7510 = vmatprep.subr.bf16.mxu1 %v7509_v30 }
0x12cc   :  { %7512 = vmatpush1.bf16.msra.mxu1 %v7511_v36 }
0x12cd   :  { %7514 = vmatprep.subr.bf16.mxu1 %v7513_v59 }
0x12d0   :  { %7516 = vmatpush1.bf16.msra.mxu1 %v7515_v47 }
0x12d1   :  { %7518 = vmatprep.subr.bf16.mxu1 %v7517_v0 }
0x12d4   :  { %7520 = vmatpush1.bf16.msra.mxu1 %v7519_v61 }
0x12d5   :  { %6521 = vmatprep.subr.mxu1 %v8982_v33 }
0x12d7   :  { %3539 = vmatmul.mubr.f32.vlgmr.msra.gmra.mrb[40].mxu1 %v9810_v53 }
0x12d8   :  { %3544 = vmatprep.mubr.f32.mxu1 %v9816_v54 }
0x12db   :  { %3545 = vmatmul.mubr.f32.gmra.mrb[42].mxu1 %v9818_v17 }
0x12dc   :  { %6523 = vmatprep.mubr.msk.f32.mxu1 %vm8983_vm0, %v8982_v33 }
0x132a   :  { %v3386_v46 = vpop.f32.mrb[32].mxu1 }
0x132b   :  { %v3388_v44 = vpop.f32.mrb[33].mxu1  ;;  %v3387_v63 = vadd.f32 %v3386_v46, %v3293_v41 }
0x132c   :  { %v3389_v52 = vadd.f32 %v3388_v44, %v3297_v28 }
0x132e   :  { %v3392_v51 = vpop.f32.mrb[34].mxu1 }
0x132f   :  { %v9835_v19 = vadd.f32 %v3392_v51, %v3293_v41  ;;  %v3394_v13 = vpop.f32.mrb[35].mxu1 }
0x1330   :  { %v9837_v49 = vadd.f32 %v3394_v13, %v3297_v28 }
0x136a   :  { %v3463_v35 = vpop.f32.mrb[36].mxu1 }
0x136b   :  { %v3464_v8 = vadd.f32 %v3463_v35, %v3301_v45  ;;  %v3465_v21 = vpop.f32.mrb[37].mxu1 }
0x136c   :  { %v3466_v1 = vadd.f32 %v3465_v21, %v3305_v55  ;;  %v6376_v21 = vld [vmem:[#allocation6 + $0x1] ss:$0 sm:$0xff] }
0x136d   :  { %6522 = vmatpush3.xpose.msra.mxu1 %v3464_v8 }
0x136e   :  { %v3469_v10 = vpop.f32.mrb[38].mxu1  ;;  %6526 = vmatprep.subr.mxu1 %v8982_v33 }
0x136f   :  { %v9842_v32 = vadd.f32 %v3469_v10, %v3301_v45  ;;  %v3471_v42 = vpop.f32.mrb[39].mxu1 }
0x1370   :  { %v9844_v3 = vadd.f32 %v3471_v42, %v3305_v55  ;;  %6524 = vmatmul.mubr.f32.vlgmr.msra.gmra.mrb[44].mxu1 %v3387_v63 }
0x1371   :  { %6528 = vmatprep.mubr.msk.f32.mxu1 %vm8983_vm0, %v8982_v33 }
0x13aa   :  { %v3540_v25 = vpop.f32.mrb[40].mxu1 }
0x13ab   :  { %v3541_v9 = vadd.f32 %v3540_v25, %v3309_v24  ;;  %v3542_v37 = vpop.f32.mrb[41].mxu1 }
0x13ac   :  { %v3543_v29 = vadd.f32 %v3542_v37, %v3313_v23 }
0x13ad   :  { %6527 = vmatpush3.msra.mxu1 %v3541_v9 }
0x13ae   :  { %v3546_v57 = vpop.f32.mrb[42].mxu1  ;;  %6531 = vmatprep.subr.mxu1 %v8982_v33 }
0x13af   :  { %v3547_v27 = vadd.f32 %v3546_v57, %v3309_v24  ;;  %v3548_v56 = vpop.f32.mrb[43].mxu1 }
0x13b0   :  { %v9851_v15 = vadd.f32 %v3548_v56, %v3313_v23 }
0x1443   :  { %v3624_v60 = vpop.f32.mrb[44].mxu1 }
0x1444   :  { %v3625_v11 = vadd.f32 %v6373_v16, %v3624_v60  ;;  %v6525_v6 = vpop.f32.mrb[45].mxu1 }
0x1446   :  { %v3628_v22 = vsel %vm916_vm1, %v3625_v11, -inf }
0x1447   :  { %3629 = vmax.xlane.f32.xlu0 %v3628_v22 }
0x14d4   :  { %v3630_v20 = vpop.xlane.xlu0 %3629 }
0x14d5   :  { %v3631_v30 = vsub.f32 %v3625_v11, %v3630_v20 }
0x14d7   :  { %v3632_v50 = vmul.f32 1.442695, %v3631_v30 }
0x14d9   :  { %8416 = vpow2.f32 %v3632_v50  ;;  %v4193_v50 = vld [vmem:[#allocation14 + $0x218] sm:$0xff] }
0x14e3   :  { %v8417_v12 = vpop.eup %8416 }
0x14e4   :  { %v3634_v5 = vsel %vm916_vm1, %v8417_v12, 0.0 }
0x14e5   :  { %3635 = vadd.xlane.f32.xlu1 %v3634_v5  ;;  %v4190_v5 = vld [vmem:[#allocation14 + $0x200] sm:$0xff] }
0x1572   :  { %v3636_v26 = vpop.xlane.xlu1 %3635 }
0x1573   :  { %8418 = vrcp.f32 %v3636_v26  ;;  %v4192_v26 = vld [vmem:[#allocation14 + $0x210] sm:$0xff] }
0x157d   :  { %v8419_v36 = vpop.eup %8418 }
0x157e   :  { %v3638_v59 = vmul.f32 %v8419_v36, %v8417_v12  ;;  %v4195_v36 = vld [vmem:[#allocation14 + $0x228] sm:$0xff] }
0x1580   :  { %6529 = vmatmul.mubr.msk.f32.vlgmr.msra.gmra.mrb[46].mxu1 %vm916_vm1, %v3638_v59  ;;  %v4197_v59 = vld [vmem:[#allocation14 + $0x238] sm:$0xff] }
0x1581   :  { %6532 = vmatpush3.xpose.msra.mxu1 %v3466_v1  ;;  %6533 = vmatprep.mubr.msk.f32.mxu1 %vm8983_vm0, %v8982_v33 }
0x1582   :  { %6536 = vmatprep.subr.mxu1 %v8982_v33 }
0x1584   :  { %6534 = vmatmul.mubr.f32.vlgmr.msra.gmra.mrb[48].mxu1 %v3389_v52  ;;  %v7523_v52 = vpack.c.bf16 %v4192_v26, %v4190_v5  ;;  %v4222_v26 = vld [vmem:[#allocation14 + $0x300] sm:$0xff] }
0x1585   :  { %6537 = vmatpush3.msra.mxu1 %v3543_v29  ;;  %6538 = vmatprep.mubr.msk.f32.mxu1 %vm8983_vm0, %v8982_v33 }
0x1586   :  { %6541 = vmatprep.subr.mxu1 %v8982_v33 }
0x1653   :  { %v9862_v18 = vpop.f32.mrb[46].mxu1 }
0x1654   :  { %v6530_v47 = vpop.f32.mrb[47].mxu1 }
0x1655   :  { %v7525_v47 = vpack.c.bf16 %v4197_v59, %v4195_v36  ;;  %v4224_v36 = vld [vmem:[#allocation14 + $0x310] sm:$0xff]  ;;  %v4227_v59 = vld [vmem:[#allocation14 + $0x328] sm:$0xff] }
0x1657   :  { %v3779_v0 = vpop.f32.mrb[48].mxu1 }
0x1658   :  { %v3780_v2 = vadd.f32 %v6373_v16, %v3779_v0  ;;  %v6535_v4 = vpop.f32.mrb[49].mxu1  ;;  %v4194_v0 = vld [vmem:[#allocation14 + $0x220] sm:$0xff] }
0x1659   :  { %v4199_v4 = vld [vmem:[#allocation14 + $0x248] sm:$0xff] }
0x165a   :  { %v3783_v61 = vsel %vm916_vm1, %v3780_v2, -inf }
0x165b   :  { %3784 = vmax.xlane.f32.xlu0 %v3783_v61  ;;  %v4201_v61 = vld [vmem:[#allocation14 + $0x258] sm:$0xff] }
0x16e8   :  { %v3785_v31 = vpop.xlane.xlu0 %3784 }
0x16e9   :  { %v3786_v46 = vsub.f32 %v3780_v2, %v3785_v31  ;;  %v4196_v2 = vld [vmem:[#allocation14 + $0x230] sm:$0xff] }
0x16ea   :  { %v7527_v31 = vpack.c.bf16 %v4196_v2, %v4194_v0  ;;  %v4228_v0 = vld [vmem:[#allocation14 + $0x330] sm:$0xff]  ;;  %v4231_v2 = vld [vmem:[#allocation14 + $0x348] sm:$0xff] }
0x16eb   :  { %v3787_v44 = vmul.f32 1.442695, %v3786_v46  ;;  %v7529_v46 = vpack.c.bf16 %v4201_v61, %v4199_v4  ;;  %v4233_v4 = vld [vmem:[#allocation14 + $0x358] sm:$0xff] }
0x16ed   :  { %8420 = vpow2.f32 %v3787_v44  ;;  %v4198_v44 = vld [vmem:[#allocation14 + $0x240] sm:$0xff] }
0x16f7   :  { %v8421_v41 = vpop.eup %8420 }
0x16f8   :  { %v3789_v28 = vsel %vm916_vm1, %v8421_v41, 0.0 }
0x16f9   :  { %3790 = vadd.xlane.f32.xlu1 %v3789_v28  ;;  %v4203_v28 = vld [vmem:[#allocation14 + $0x268] sm:$0xff] }
0x1786   :  { %v3791_v51 = vpop.xlane.xlu1 %3790 }
0x1787   :  { %8422 = vrcp.f32 %v3791_v51  ;;  %v4205_v51 = vld [vmem:[#allocation14 + $0x278] sm:$0xff] }
0x1791   :  { %v8423_v13 = vpop.eup %8422 }
0x1792   :  { %v3793_v45 = vmul.f32 %v8423_v13, %v8421_v41  ;;  %v4200_v41 = vld [vmem:[#allocation14 + $0x250] sm:$0xff] }
0x1793   :  { %v7531_v13 = vpack.c.bf16 %v4200_v41, %v4198_v44  ;;  %v4232_v44 = vld [vmem:[#allocation14 + $0x350] sm:$0xff]  ;;  %v4235_v41 = vld [vmem:[#allocation14 + $0x368] sm:$0xff] }
0x1794   :  { %6539 = vmatmul.mubr.msk.f32.vlgmr.msra.gmra.mrb[50].mxu1 %vm916_vm1, %v3793_v45  ;;  %v7533_v45 = vpack.c.bf16 %v4205_v51, %v4203_v28  ;;  %v4237_v28 = vld [vmem:[#allocation14 + $0x378] sm:$0xff] }
0x1795   :  { %6542 = vmatpush3.xpose.msra.mxu1 %v9842_v32  ;;  %6543 = vmatprep.mubr.msk.f32.mxu1 %vm8983_vm0, %v8982_v33 }
0x1796   :  { %6546 = vmatprep.subr.mxu1 %v8982_v33 }
0x1798   :  { %6544 = vmatmul.mubr.f32.vlgmr.msra.gmra.mrb[52].mxu1 %v9835_v19 }
0x1799   :  { %6547 = vmatpush3.msra.mxu1 %v3547_v27  ;;  %6548 = vmatprep.mubr.msk.f32.mxu1 %vm8983_vm0, %v8982_v33 }
0x179a   :  { %6551 = vmatprep.subr.mxu1 %v8982_v33 }
0x1867   :  { %v3863_v35 = vpop.f32.mrb[50].mxu1 }
0x1868   :  { %v6540_v8 = vpop.f32.mrb[51].mxu1 }
0x1869   :  { %v4202_v8 = vld [vmem:[#allocation14 + $0x260] sm:$0xff] }
0x186b   :  { %v3941_v63 = vpop.f32.mrb[52].mxu1 }
0x186c   :  { %v3942_v55 = vadd.f32 %v6376_v21, %v3941_v63  ;;  %v6545_v10 = vpop.f32.mrb[53].mxu1  ;;  %v4207_v63 = vld [vmem:[#allocation14 + $0x288] sm:$0xff] }
0x186e   :  { %v3945_v32 = vsel %vm916_vm1, %v3942_v55, -inf }
0x186f   :  { %3946 = vmax.xlane.f32.xlu0 %v3945_v32 }
0x18fc   :  { %v3947_v42 = vpop.xlane.xlu0 %3946 }
0x18fd   :  { %v3948_v24 = vsub.f32 %v3942_v55, %v3947_v42  ;;  %v4209_v55 = vld [vmem:[#allocation14 + $0x298] sm:$0xff]  ;;  %v4208_v42 = vld [vmem:[#allocation14 + $0x290] sm:$0xff] }
0x18fe   :  { %v7537_v32 = vpack.c.bf16 %v4209_v55, %v4207_v63  ;;  %v4241_v63 = vld [vmem:[#allocation14 + $0x398] sm:$0xff] }
0x18ff   :  { %v3949_v25 = vmul.f32 1.442695, %v3948_v24  ;;  %v4211_v24 = vld [vmem:[#allocation14 + $0x2a8] sm:$0xff] }
0x1901   :  { %8424 = vpow2.f32 %v3949_v25  ;;  %v4213_v25 = vld [vmem:[#allocation14 + $0x2b8] sm:$0xff] }
0x190b   :  { %v8425_v19 = vpop.eup %8424 }
0x190c   :  { %v3951_v9 = vsel %vm916_vm1, %v8425_v19, 0.0 }
0x190d   :  { %3952 = vadd.xlane.f32.xlu1 %v3951_v9  ;;  %v7541_v9 = vpack.c.bf16 %v4213_v25, %v4211_v24  ;;  %v4245_v24 = vld [vmem:[#allocation14 + $0x3b8] sm:$0xff] }
0x199a   :  { %v3953_v37 = vpop.xlane.xlu1 %3952 }
0x199b   :  { %8426 = vrcp.f32 %v3953_v37  ;;  %v4210_v37 = vld [vmem:[#allocation14 + $0x2a0] sm:$0xff] }
0x19a5   :  { %v8427_v23 = vpop.eup %8426 }
0x19a6   :  { %v3955_v57 = vmul.f32 %v8427_v23, %v8425_v19  ;;  %v4212_v23 = vld [vmem:[#allocation14 + $0x2b0] sm:$0xff] }
0x19a8   :  { %6549 = vmatmul.mubr.msk.f32.vlgmr.msra.gmra.mrb[54].mxu1 %vm916_vm1, %v3955_v57  ;;  %v4215_v57 = vld [vmem:[#allocation14 + $0x2c8] sm:$0xff] }
0x19a9   :  { %6552 = vmatpush3.xpose.msra.mxu1 %v9844_v3  ;;  %6553 = vmatprep.mubr.msk.f32.mxu1 %vm8983_vm0, %v8982_v33 }
0x19aa   :  { %6556 = vmatprep.subr.mxu1 %v8982_v33 }
0x19ac   :  { %6554 = vmatmul.mubr.f32.vlgmr.msra.gmra.mrb[56].mxu1 %v9837_v49 }
0x19ad   :  { %6557 = vmatpush3.msra.mxu1 %v9851_v15  ;;  %6558 = vmatprep.mubr.msk.f32.mxu1 %vm8983_vm0, %v8982_v33  ;;  %v4191_v15 = vld [vmem:[#allocation14 + $0x208] sm:$0xff] }
0x19ae   :  { %v7521_v33 = vpack.c.bf16 %v4193_v50, %v4191_v15  ;;  %v4220_v15 = vld [vmem:[#allocation14 + $0x2f0] sm:$0xff]  ;;  %v4223_v50 = vld [vmem:[#allocation14 + $0x308] sm:$0xff] }
0x19b0   :  { %7522 = vmatprep.subr.bf16.mxu1 %v7521_v33  ;;  %v4225_v33 = vld [vmem:[#allocation14 + $0x318] sm:$0xff] }
0x19b1   :  { %v7553_v5 = vpack.c.bf16 %v4225_v33, %v4223_v50 }
0x1a7b   :  { %v9886_v27 = vpop.f32.mrb[54].mxu1 }
0x1a7c   :  { %v6550_v56 = vpop.f32.mrb[55].mxu1 }
0x1a7d   :  { %v4217_v56 = vld [vmem:[#allocation14 + $0x2d8] sm:$0xff] }
0x1a7f   :  { %v4096_v16 = vpop.f32.mrb[56].mxu1 }
0x1a80   :  { %v4097_v60 = vadd.f32 %v6376_v21, %v4096_v16  ;;  %v6555_v11 = vpop.f32.mrb[57].mxu1  ;;  %v4204_v21 = vld [vmem:[#allocation14 + $0x270] sm:$0xff]  ;;  %v7543_v16 = vpack.c.bf16 %v4212_v23, %v4210_v37  ;;  %v4247_v23 = vld [vmem:[#allocation14 + $0x3c8] sm:$0xff] }
0x1a81   :  { %v7535_v10 = vpack.c.bf16 %v4204_v21, %v4202_v8  ;;  %v4214_v11 = vld [vmem:[#allocation14 + $0x2c0] sm:$0xff]  ;;  %v4236_v8 = vld [vmem:[#allocation14 + $0x370] sm:$0xff]  ;;  %v4239_v21 = vld [vmem:[#allocation14 + $0x388] sm:$0xff] }
0x1a82   :  { %v4100_v3 = vsel %vm916_vm1, %v4097_v60, -inf  ;;  %v4244_v37 = vld [vmem:[#allocation14 + $0x3b0] sm:$0xff] }
0x1a83   :  { %4101 = vmax.xlane.f32.xlu0 %v4100_v3  ;;  %v4216_v3 = vld [vmem:[#allocation14 + $0x2d0] sm:$0xff] }
0x1b10   :  { %v4102_v6 = vpop.xlane.xlu0 %4101 }
0x1b11   :  { %v4103_v22 = vsub.f32 %v4097_v60, %v4102_v6  ;;  %v7545_v60 = vpack.c.bf16 %v4217_v56, %v4215_v57  ;;  %v4219_v6 = vld [vmem:[#allocation14 + $0x2e8] sm:$0xff]  ;;  %v4249_v57 = vld [vmem:[#allocation14 + $0x3d8] sm:$0xff] }
0x1b13   :  { %v4104_v20 = vmul.f32 1.442695, %v4103_v22  ;;  %v4221_v22 = vld [vmem:[#allocation14 + $0x2f8] sm:$0xff] }
0x1b15   :  { %8428 = vpow2.f32 %v4104_v20  ;;  %v7547_v20 = vpack.c.bf16 %v4216_v3, %v4214_v11  ;;  %v4248_v11 = vld [vmem:[#allocation14 + $0x3d0] sm:$0xff]  ;;  %v4251_v3 = vld [vmem:[#allocation14 + $0x3e8] sm:$0xff] }
0x1b1f   :  { %v8429_v30 = vpop.eup %8428 }
0x1b20   :  { %v4106_v49 = vsel %vm916_vm1, %v8429_v30, 0.0 }
0x1b21   :  { %4107 = vadd.xlane.f32.xlu1 %v4106_v49  ;;  %v4218_v49 = vld [vmem:[#allocation14 + $0x2e0] sm:$0xff] }
0x1bae   :  { %v4108_v12 = vpop.xlane.xlu1 %4107 }
0x1baf   :  { %8430 = vrcp.f32 %v4108_v12  ;;  %v7551_v12 = vpack.c.bf16 %v4220_v15, %v4218_v49  ;;  %v4252_v49 = vld [vmem:[#allocation14 + $0x3f0] sm:$0xff] }
0x1bb9   :  { %v8431_v1 = vpop.eup %8430 }
0x1bba   :  { %v4110_v29 = vmul.f32 %v8431_v1, %v8429_v30  ;;  %v7549_v30 = vpack.c.bf16 %v4221_v22, %v4219_v6  ;;  %v4229_v1 = vld [vmem:[#allocation14 + $0x338] sm:$0xff] }
0x1bbb   :  { %v4253_v6 = vld [vmem:[#allocation14 + $0x3f8] sm:$0xff] }
0x1bbc   :  { %6559 = vmatmul.mubr.msk.f32.vlgmr.msra.gmra.mrb[58].mxu1 %vm916_vm1, %v4110_v29  ;;  %v7557_v29 = vpack.c.bf16 %v4229_v1, %v4227_v59 }
0x1bbd   :  { %7524 = vmatpush1.bf16.msra.mxu1 %v7523_v52  ;;  %4331 = vmatprep.mubr.f32.mxu1 %v3863_v35  ;;  %v4206_v35 = vld [vmem:[#allocation14 + $0x280] sm:$0xff]  ;;  %v7555_v52 = vpack.c.bf16 %v4224_v36, %v4222_v26 }
0x1bbe   :  { %7526 = vmatprep.subr.bf16.mxu1 %v7525_v47  ;;  %v7539_v19 = vpack.c.bf16 %v4208_v42, %v4206_v35  ;;  %v4226_v47 = vld [vmem:[#allocation14 + $0x320] sm:$0xff]  ;;  %v4240_v35 = vld [vmem:[#allocation14 + $0x390] sm:$0xff]  ;;  %v4243_v42 = vld [vmem:[#allocation14 + $0x3a8] sm:$0xff] }
0x1bbf   :  { %v7559_v61 = vpack.c.bf16 %v4228_v0, %v4226_v47  ;;  %v4416_v47 = vld [vmem:[#allocation20 + $0x808] sm:$0xff] }
0x1bc0   :  { %v4424_v0 = vld [vmem:[#allocation20 + $0x848] sm:$0xff] }
0x1bc1   :  { %7528 = vmatpush1.bf16.msra.mxu1 %v7527_v31  ;;  %v7561_v31 = vpack.c.bf16 %v4233_v4, %v4231_v2  ;;  %v4418_v2 = vld [vmem:[#allocation20 + $0x818] sm:$0xff]  ;;  %v7585_v4 = vpack.c.bf16 %v4424_v0, %v4416_v47 }
0x1bc2   :  { %7530 = vmatprep.subr.bf16.mxu1 %v7529_v46  ;;  %v4230_v46 = vld [vmem:[#allocation14 + $0x340] sm:$0xff] }
0x1bc3   :  { %v7563_v51 = vpack.c.bf16 %v4232_v44, %v4230_v46  ;;  %v4423_v46 = vld [vmem:[#allocation20 + $0x840] sm:$0xff]  ;;  %7586 = vmatprep.subr.bf16.mxu0 %v7585_v4  ;;  %v4490_v47 = vld [vmem:[#allocation20 + $0xa58] sm:$0xff] }
0x1bc5   :  { %7532 = vmatpush1.bf16.msra.mxu1 %v7531_v13  ;;  %v7565_v13 = vpack.c.bf16 %v4237_v28, %v4235_v41  ;;  %v4417_v28 = vld [vmem:[#allocation20 + $0x810] sm:$0xff] }
0x1bc6   :  { %7534 = vmatprep.subr.bf16.mxu1 %v7533_v45  ;;  %v4234_v45 = vld [vmem:[#allocation14 + $0x360] sm:$0xff] }
0x1bc7   :  { %v7567_v55 = vpack.c.bf16 %v4236_v8, %v4234_v45  ;;  %v4434_v45 = vld [vmem:[#allocation20 + $0x898] sm:$0xff] }
0x1bc8   :  { %v4442_v8 = vld [vmem:[#allocation20 + $0x8d8] sm:$0xff] }
0x1bc9   :  { %7536 = vmatpush1.bf16.msra.mxu1 %v7535_v10  ;;  %v7569_v10 = vpack.c.bf16 %v4241_v63, %v4239_v21  ;;  %v7653_v63 = vpack.c.bf16 %v4442_v8, %v4434_v45 }
0x1bca   :  { %7538 = vmatprep.subr.bf16.mxu1 %v7537_v32  ;;  %v4238_v32 = vld [vmem:[#allocation14 + $0x380] sm:$0xff] }
0x1bcb   :  { %v7571_v25 = vpack.c.bf16 %v4240_v35, %v4238_v32  ;;  %v4433_v32 = vld [vmem:[#allocation20 + $0x890] sm:$0xff] }
0x1bcd   :  { %7540 = vmatpush1.bf16.msra.mxu1 %v7539_v19  ;;  %v7573_v19 = vpack.c.bf16 %v4245_v24, %v4243_v42  ;;  %v4441_v42 = vld [vmem:[#allocation20 + $0x8d0] sm:$0xff]  ;;  %v4448_v24 = vld [vmem:[#allocation20 + $0x908] sm:$0xff] }
0x1bce   :  { %7542 = vmatprep.subr.bf16.mxu1 %v7541_v9  ;;  %v4242_v9 = vld [vmem:[#allocation14 + $0x3a0] sm:$0xff] }
0x1bcf   :  { %v7575_v56 = vpack.c.bf16 %v4244_v37, %v4242_v9  ;;  %v4450_v37 = vld [vmem:[#allocation20 + $0x918] sm:$0xff] }
0x1bd1   :  { %7544 = vmatpush1.bf16.msra.mxu1 %v7543_v16  ;;  %v7577_v16 = vpack.c.bf16 %v4249_v57, %v4247_v23  ;;  %v4458_v23 = vld [vmem:[#allocation20 + $0x958] sm:$0xff]  ;;  %v4447_v57 = vld [vmem:[#allocation20 + $0x900] sm:$0xff] }
0x1bd2   :  { %7546 = vmatprep.subr.bf16.mxu1 %v7545_v60  ;;  %v4246_v60 = vld [vmem:[#allocation14 + $0x3c0] sm:$0xff] }
0x1bd3   :  { %v7579_v22 = vpack.c.bf16 %v4248_v11, %v4246_v60  ;;  %v4449_v60 = vld [vmem:[#allocation20 + $0x910] sm:$0xff] }
0x1bd4   :  { %v4457_v11 = vld [vmem:[#allocation20 + $0x950] sm:$0xff] }
0x1bd5   :  { %7548 = vmatpush1.bf16.msra.mxu1 %v7547_v20  ;;  %v7581_v20 = vpack.c.bf16 %v4253_v6, %v4251_v3  ;;  %v4464_v6 = vld [vmem:[#allocation20 + $0x988] sm:$0xff] }
0x1bd6   :  { %7550 = vmatprep.subr.bf16.mxu1 %v7549_v30  ;;  %v4250_v30 = vld [vmem:[#allocation14 + $0x3e0] sm:$0xff] }
0x1bd7   :  { %v7583_v15 = vpack.c.bf16 %v4252_v49, %v4250_v30  ;;  %v7659_v30 = vpack.c.bf16 %v4457_v11, %v4449_v60  ;;  %v4521_v60 = vld [vmem:[#allocation20 + $0xb50] sm:$0xff]  ;;  %v4528_v11 = vld [vmem:[#allocation20 + $0xb88] sm:$0xff] }
0x1bd9   :  { %7552 = vmatpush1.bf16.msra.mxu1 %v7551_v12  ;;  %v4255_v12 = vld [vmem:[#allocation15 + $0x2] sm:$0x3] }
0x1bda   :  { %7554 = vmatprep.subr.bf16.mxu1 %v7553_v5  ;;  %v9894_v5 = vrot.slane %v4255_v12, %v9416_v40  ;;  %v9897_v26 = vrot.slane %v4255_v12, %v9413_v39 }
0x1bdd   :  { %7556 = vmatpush1.bf16.msra.mxu1 %v7555_v52 }
0x1bde   :  { %7558 = vmatprep.subr.bf16.mxu1 %v7557_v29 }
0x1be1   :  { %7560 = vmatpush1.bf16.msra.mxu1 %v7559_v61  ;;  %v4426_v61 = vld [vmem:[#allocation20 + $0x858] sm:$0xff] }
0x1be2   :  { %7562 = vmatprep.subr.bf16.mxu1 %v7561_v31  ;;  %v4415_v31 = vld [vmem:[#allocation20 + $0x800] sm:$0xff]  ;;  %v7649_v44 = vpack.c.bf16 %v4426_v61, %v4418_v2 }
0x1be3   :  { %v7587_v41 = vpack.c.bf16 %v4423_v46, %v4415_v31  ;;  %v4479_v61 = vld [vmem:[#allocation20 + $0xa00] sm:$0xff]  ;;  %v4481_v46 = vld [vmem:[#allocation20 + $0xa10] sm:$0xff] }
0x1be4   :  { %v4487_v31 = vld [vmem:[#allocation20 + $0xa40] sm:$0xff] }
0x1be5   :  { %7564 = vmatpush1.bf16.msra.mxu1 %v7563_v51  ;;  %v4425_v51 = vld [vmem:[#allocation20 + $0x850] sm:$0xff]  ;;  %7588 = vmatpush1.bf16.msra.mxu0 %v7587_v41 }
0x1be6   :  { %7566 = vmatprep.subr.bf16.mxu1 %v7565_v13  ;;  %v7651_v13 = vpack.c.bf16 %v4425_v51, %v4417_v28  ;;  %v4489_v41 = vld [vmem:[#allocation20 + $0xa50] sm:$0xff]  ;;  %v4496_v28 = vld [vmem:[#allocation20 + $0xa88] sm:$0xff] }
0x1be7   :  { %v4504_v51 = vld [vmem:[#allocation20 + $0xac8] sm:$0xff]  ;;  %v7667_v45 = vpack.c.bf16 %v4489_v41, %v4481_v46 }
0x1be8   :  { %v7605_v8 = vpack.c.bf16 %v4504_v51, %v4496_v28  ;;  %v4560_v41 = vld [vmem:[#allocation20 + $0xc88] sm:$0xff]  ;;  %v4562_v51 = vld [vmem:[#allocation20 + $0xc98] sm:$0xff] }
0x1be9   :  { %7568 = vmatpush1.bf16.msra.mxu1 %v7567_v55  ;;  %v4431_v55 = vld [vmem:[#allocation20 + $0x880] sm:$0xff]  ;;  %v4568_v28 = vld [vmem:[#allocation20 + $0xcc8] sm:$0xff] }
0x1bea   :  { %7570 = vmatprep.subr.bf16.mxu1 %v7569_v10  ;;  %v4439_v10 = vld [vmem:[#allocation20 + $0x8c0] sm:$0xff] }
0x1beb   :  { %v7591_v35 = vpack.c.bf16 %v4439_v10, %v4431_v55  ;;  %v4497_v55 = vld [vmem:[#allocation20 + $0xa90] sm:$0xff] }
0x1bed   :  { %7572 = vmatpush1.bf16.msra.mxu1 %v7571_v25  ;;  %v4456_v25 = vld [vmem:[#allocation20 + $0x948] sm:$0xff] }
0x1bee   :  { %7574 = vmatprep.subr.bf16.mxu1 %v7573_v19  ;;  %v7655_v19 = vpack.c.bf16 %v4441_v42, %v4433_v32  ;;  %v7593_v9 = vpack.c.bf16 %v4456_v25, %v4448_v24  ;;  %v4505_v32 = vld [vmem:[#allocation20 + $0xad0] sm:$0xff]  ;;  %v4520_v42 = vld [vmem:[#allocation20 + $0xb48] sm:$0xff]  ;;  %v4514_v24 = vld [vmem:[#allocation20 + $0xb18] sm:$0xff] }
0x1bef   :  { %v4522_v25 = vld [vmem:[#allocation20 + $0xb58] sm:$0xff] }
0x1bf1   :  { %7576 = vmatpush1.bf16.msra.mxu1 %v7575_v56  ;;  %v7657_v56 = vpack.c.bf16 %v4458_v23, %v4450_v37  ;;  %v4511_v23 = vld [vmem:[#allocation20 + $0xb00] sm:$0xff] }
0x1bf2   :  { %7578 = vmatprep.subr.bf16.mxu1 %v7577_v16  ;;  %v4455_v16 = vld [vmem:[#allocation20 + $0x940] sm:$0xff] }
0x1bf3   :  { %v7595_v3 = vpack.c.bf16 %v4455_v16, %v4447_v57  ;;  %v4519_v57 = vld [vmem:[#allocation20 + $0xb40] sm:$0xff]  ;;  %v7673_v16 = vpack.c.bf16 %v4522_v25, %v4514_v24  ;;  %v4586_v24 = vld [vmem:[#allocation20 + $0xd58] sm:$0xff] }
0x1bf5   :  { %7580 = vmatpush1.bf16.msra.mxu1 %v7579_v22  ;;  %v4472_v22 = vld [vmem:[#allocation20 + $0x9c8] sm:$0xff] }
0x1bf6   :  { %7582 = vmatprep.subr.bf16.mxu1 %v7581_v20  ;;  %v4466_v20 = vld [vmem:[#allocation20 + $0x998] sm:$0xff]  ;;  %v7597_v49 = vpack.c.bf16 %v4472_v22, %v4464_v6 }
0x1bf7   :  { %v4530_v6 = vld [vmem:[#allocation20 + $0xb98] sm:$0xff] }
0x1bf8   :  { %v4538_v22 = vld [vmem:[#allocation20 + $0xbd8] sm:$0xff] }
0x1bf9   :  { %7584 = vmatpush1.bf16.msra.mxu1 %v7583_v15  ;;  %v4474_v15 = vld [vmem:[#allocation20 + $0x9d8] sm:$0xff] }
0x1bfa   :  { %7650 = vmatprep.subr.bf16.mxu1 %v7649_v44  ;;  %v7661_v12 = vpack.c.bf16 %v4474_v15, %v4466_v20  ;;  %v7611_v20 = vpack.c.bf16 %v4519_v57, %v4511_v23  ;;  %v4527_v15 = vld [vmem:[#allocation20 + $0xb80] sm:$0xff] }
0x1bfb   :  { %v4583_v23 = vld [vmem:[#allocation20 + $0xd40] sm:$0xff] }
0x1bfc   :  { %4332 = vmatmul.mubr.f32.vlgmr.msra.gmra.mrb[60].mxu1 %v9862_v18 }
0x1bfd   :  { %7652 = vmatpush1.bf16.msra.mxu1 %v7651_v13  ;;  %v4506_v13 = vld [vmem:[#allocation20 + $0xad8] sm:$0xff] }
0x1bfe   :  { %7654 = vmatprep.subr.bf16.mxu1 %v7653_v63  ;;  %v4503_v63 = vld [vmem:[#allocation20 + $0xac0] sm:$0xff] }
0x1c01   :  { %7656 = vmatpush1.bf16.msra.mxu1 %v7655_v19 }
0x1c02   :  { %7658 = vmatprep.subr.bf16.mxu1 %v7657_v56  ;;  %v4513_v56 = vld [vmem:[#allocation20 + $0xb10] sm:$0xff] }
0x1c05   :  { %7660 = vmatpush1.bf16.msra.mxu1 %v7659_v30  ;;  %v7675_v30 = vpack.c.bf16 %v4521_v60, %v4513_v56  ;;  %v4577_v56 = vld [vmem:[#allocation20 + $0xd10] sm:$0xff] }
0x1c06   :  { %7662 = vmatprep.subr.bf16.mxu1 %v7661_v12  ;;  %v7677_v12 = vpack.c.bf16 %v4538_v22, %v4530_v6 }
0x1c8f   :  { %v4180_v50 = vpop.f32.mrb[58].mxu1 }
0x1c90   :  { %v6560_v33 = vpop.f32.mrb[59].mxu1  ;;  %4337 = vmatprep.mubr.f32.mxu1 %v4180_v50  ;;  %v4463_v50 = vld [vmem:[#allocation20 + $0x980] sm:$0xff] }
0x1c91   :  { %4338 = vmatmul.mubr.f32.gmra.mrb[62].mxu1 %v9886_v27  ;;  %v4471_v33 = vld [vmem:[#allocation20 + $0x9c0] sm:$0xff] }
0x1c92   :  { %v7599_v0 = vpack.c.bf16 %v4471_v33, %v4463_v50  ;;  %v4535_v50 = vld [vmem:[#allocation20 + $0xbc0] sm:$0xff]  ;;  %v4529_v33 = vld [vmem:[#allocation20 + $0xb90] sm:$0xff] }
0x1ccf   :  { %v4333_v36 = vpop.f32.mrb[60].mxu1 }
0x1cd0   :  { %v4334_v59 = vadd.f32 %v4333_v36, %v9894_v5  ;;  %v4335_v1 = vpop.f32.mrb[61].mxu1  ;;  %v4465_v36 = vld [vmem:[#allocation20 + $0x990] sm:$0xff] }
0x1cd1   :  { %v4336_v52 = vadd.f32 %v4335_v1, %v9897_v26  ;;  %v4480_v1 = vld [vmem:[#allocation20 + $0xa08] sm:$0xff] }
0x1cd2   :  { %v9902_v18 = vadd.f32 %v4334_v59, %v9810_v53  ;;  %v4432_v53 = vld [vmem:[#allocation20 + $0x888] sm:$0xff]  ;;  %v4473_v59 = vld [vmem:[#allocation20 + $0x9d0] sm:$0xff] }
0x1cd3   :  { %v9905_v29 = vadd.f32 %v4336_v52, %v9808_v14  ;;  %v4440_v14 = vld [vmem:[#allocation20 + $0x8c8] sm:$0xff]  ;;  %v7663_v2 = vpack.c.bf16 %v4473_v59, %v4465_v36  ;;  %v4537_v36 = vld [vmem:[#allocation20 + $0xbd0] sm:$0xff] }
0x1cd4   :  { %v7589_v21 = vpack.c.bf16 %v4440_v14, %v4432_v53  ;;  %v4488_v52 = vld [vmem:[#allocation20 + $0xa48] sm:$0xff]  ;;  %v4498_v53 = vld [vmem:[#allocation20 + $0xa98] sm:$0xff]  ;;  %v7603_v14 = vpack.c.bf16 %v4487_v31, %v4479_v61  ;;  %v4551_v61 = vld [vmem:[#allocation20 + $0xc40] sm:$0xff] }
0x1cd5   :  { %v4352_v27 = vadd.f32 %v9905_v29, %v9902_v18  ;;  %v7601_v4 = vpack.c.bf16 %v4488_v52, %v4480_v1  ;;  %7664 = vmatpush1.bf16.msra.mxu1 %v7663_v2  ;;  %v7669_v10 = vpack.c.bf16 %v4506_v13, %v4498_v53  ;;  %v4544_v59 = vld [vmem:[#allocation20 + $0xc08] sm:$0xff]  ;;  %v4546_v52 = vld [vmem:[#allocation20 + $0xc18] sm:$0xff]  ;;  %v4545_v31 = vld [vmem:[#allocation20 + $0xc10] sm:$0xff] }
0x1cd6   :  { %7590 = vmatprep.subr.bf16.mxu0 %v7589_v21  ;;  %v4495_v21 = vld [vmem:[#allocation20 + $0xa80] sm:$0xff]  ;;  %v4552_v1 = vld [vmem:[#allocation20 + $0xc48] sm:$0xff]  ;;  %v4570_v53 = vld [vmem:[#allocation20 + $0xcd8] sm:$0xff] }
0x1cd7   :  { %4353 = vadd.xlane.f32.xlu0 %v4352_v27  ;;  %7592 = vmatpush1.bf16.msra.mxu0 %v7591_v35  ;;  %v4482_v27 = vld [vmem:[#allocation20 + $0xa18] sm:$0xff]  ;;  %v4512_v35 = vld [vmem:[#allocation20 + $0xb08] sm:$0xff]  ;;  %v7607_v19 = vpack.c.bf16 %v4503_v63, %v4495_v21  ;;  %v7617_v2 = vpack.c.bf16 %v4552_v1, %v4544_v59  ;;  %v4567_v21 = vld [vmem:[#allocation20 + $0xcc0] sm:$0xff] }
0x1cd8   :  { %7594 = vmatprep.subr.bf16.mxu0 %v7593_v9  ;;  %v7665_v44 = vpack.c.bf16 %v4490_v47, %v4482_v27  ;;  %v7671_v9 = vpack.c.bf16 %v4505_v32, %v4497_v55  ;;  %v7609_v37 = vpack.c.bf16 %v4520_v42, %v4512_v35  ;;  %v4554_v27 = vld [vmem:[#allocation20 + $0xc58] sm:$0xff]  ;;  %v7615_v47 = vpack.c.bf16 %v4535_v50, %v4527_v15  ;;  %v4561_v63 = vld [vmem:[#allocation20 + $0xc90] sm:$0xff]  ;;  %v4576_v32 = vld [vmem:[#allocation20 + $0xd08] sm:$0xff] }
0x1cd9   :  { %v7681_v46 = vpack.c.bf16 %v4554_v27, %v4546_v52  ;;  %v7685_v55 = vpack.c.bf16 %v4570_v53, %v4562_v51  ;;  %v4584_v35 = vld [vmem:[#allocation20 + $0xd48] sm:$0xff]  ;;  %v4578_v42 = vld [vmem:[#allocation20 + $0xd18] sm:$0xff]  ;;  %v4591_v27 = vld [vmem:[#allocation20 + $0xd80] sm:$0xff] }
0x1cda   :  { %7666 = vmatprep.subr.bf16.mxu1 %v7665_v44  ;;  %v4553_v44 = vld [vmem:[#allocation20 + $0xc50] sm:$0xff]  ;;  %v7689_v57 = vpack.c.bf16 %v4586_v24, %v4578_v42  ;;  %v4600_v59 = vld [vmem:[#allocation20 + $0xdc8] sm:$0xff]  ;;  %v4594_v1 = vld [vmem:[#allocation20 + $0xd98] sm:$0xff] }
0x1cdb   :  { %7596 = vmatpush1.bf16.msra.mxu0 %v7595_v3  ;;  %7668 = vmatpush1.bf16.msra.mxu1 %v7667_v45  ;;  %v4536_v3 = vld [vmem:[#allocation20 + $0xbc8] sm:$0xff]  ;;  %v7621_v45 = vpack.c.bf16 %v4568_v28, %v4560_v41  ;;  %v4602_v52 = vld [vmem:[#allocation20 + $0xdd8] sm:$0xff]  ;;  %v4607_v51 = vld [vmem:[#allocation20 + $0xe00] sm:$0xff] }
0x1cdc   :  { %7598 = vmatprep.subr.bf16.mxu0 %v7597_v49  ;;  %7670 = vmatprep.subr.bf16.mxu1 %v7669_v10  ;;  %v7613_v49 = vpack.c.bf16 %v4536_v3, %v4528_v11  ;;  %v4569_v10 = vld [vmem:[#allocation20 + $0xcd0] sm:$0xff]  ;;  %v4618_v28 = vld [vmem:[#allocation20 + $0xe58] sm:$0xff]  ;;  %v4615_v53 = vld [vmem:[#allocation20 + $0xe40] sm:$0xff] }
0x1cdd   :  { %v4623_v42 = vld [vmem:[#allocation20 + $0xe80] sm:$0xff] }
0x1cde   :  { %v4631_v24 = vld [vmem:[#allocation20 + $0xec0] sm:$0xff] }
0x1cdf   :  { %7600 = vmatpush1.bf16.msra.mxu0 %v7599_v0  ;;  %7672 = vmatpush1.bf16.msra.mxu1 %v7671_v9  ;;  %v7679_v0 = vpack.c.bf16 %v4537_v36, %v4529_v33  ;;  %v7625_v9 = vpack.c.bf16 %v4584_v35, %v4576_v32  ;;  %v4634_v35 = vld [vmem:[#allocation20 + $0xed8] sm:$0xff] }
0x1ce0   :  { %7602 = vmatprep.subr.bf16.mxu0 %v7601_v4  ;;  %7674 = vmatprep.subr.bf16.mxu1 %v7673_v16  ;;  %v4543_v4 = vld [vmem:[#allocation20 + $0xc00] sm:$0xff]  ;;  %v4585_v16 = vld [vmem:[#allocation20 + $0xd50] sm:$0xff] }
0x1ce1   :  { %v7619_v13 = vpack.c.bf16 %v4551_v61, %v4543_v4  ;;  %v7691_v11 = vpack.c.bf16 %v4585_v16, %v4577_v56  ;;  %v4601_v4 = vld [vmem:[#allocation20 + $0xdd0] sm:$0xff]  ;;  %v4648_v56 = vld [vmem:[#allocation20 + $0xf48] sm:$0xff]  ;;  %v4642_v16 = vld [vmem:[#allocation20 + $0xf18] sm:$0xff] }
0x1ce3   :  { %7604 = vmatpush1.bf16.msra.mxu0 %v7603_v14  ;;  %7676 = vmatpush1.bf16.msra.mxu1 %v7675_v30  ;;  %v7683_v14 = vpack.c.bf16 %v4553_v44, %v4545_v31  ;;  %v4608_v31 = vld [vmem:[#allocation20 + $0xe08] sm:$0xff]  ;;  %v4610_v44 = vld [vmem:[#allocation20 + $0xe18] sm:$0xff] }
0x1ce4   :  { %7606 = vmatprep.subr.bf16.mxu0 %v7605_v8  ;;  %7678 = vmatprep.subr.bf16.mxu1 %v7677_v12  ;;  %v4559_v8 = vld [vmem:[#allocation20 + $0xc80] sm:$0xff] }
0x1ce5   :  { %v7623_v25 = vpack.c.bf16 %v4567_v21, %v4559_v8  ;;  %v4617_v8 = vld [vmem:[#allocation20 + $0xe50] sm:$0xff] }
0x1ce7   :  { %7608 = vmatpush1.bf16.msra.mxu0 %v7607_v19  ;;  %7680 = vmatpush1.bf16.msra.mxu1 %v7679_v0  ;;  %v7687_v19 = vpack.c.bf16 %v4569_v10, %v4561_v63  ;;  %v4624_v63 = vld [vmem:[#allocation20 + $0xe88] sm:$0xff]  ;;  %v4626_v10 = vld [vmem:[#allocation20 + $0xe98] sm:$0xff] }
0x1ce8   :  { %7610 = vmatprep.subr.bf16.mxu0 %v7609_v37  ;;  %7682 = vmatprep.subr.bf16.mxu1 %v7681_v46  ;;  %v4575_v37 = vld [vmem:[#allocation20 + $0xd00] sm:$0xff]  ;;  %v4616_v46 = vld [vmem:[#allocation20 + $0xe48] sm:$0xff] }
0x1ce9   :  { %v7627_v60 = vpack.c.bf16 %v4583_v23, %v4575_v37  ;;  %v7633_v41 = vpack.c.bf16 %v4616_v46, %v4608_v31  ;;  %v4633_v37 = vld [vmem:[#allocation20 + $0xed0] sm:$0xff]  ;;  %v4640_v23 = vld [vmem:[#allocation20 + $0xf08] sm:$0xff] }
0x1ceb   :  { %7612 = vmatpush1.bf16.msra.mxu0 %v7611_v20  ;;  %7684 = vmatpush1.bf16.msra.mxu1 %v7683_v14  ;;  %v7635_v14 = vpack.c.bf16 %v4615_v53, %v4607_v51 }
0x1cec   :  { %7614 = vmatprep.subr.bf16.mxu0 %v7613_v49  ;;  %7686 = vmatprep.subr.bf16.mxu1 %v7685_v55  ;;  %v4632_v55 = vld [vmem:[#allocation20 + $0xec8] sm:$0xff] }
0x1ced   :  { %v7637_v32 = vpack.c.bf16 %v4632_v55, %v4624_v63  ;;  %v4349_v55 = vld [vmem:[#allocation17 + $0x2] sm:$0x3] }
0x1cef   :  { %7616 = vmatpush1.bf16.msra.mxu0 %v7615_v47  ;;  %7688 = vmatpush1.bf16.msra.mxu1 %v7687_v19  ;;  %v7693_v47 = vpack.c.bf16 %v4602_v52, %v4594_v1  ;;  %v7639_v19 = vpack.c.bf16 %v4631_v24, %v4623_v42  ;;  %v4655_v1 = vld [vmem:[#allocation20 + $0xf80] sm:$0xff] }
0x1cf0   :  { %7618 = vmatprep.subr.bf16.mxu0 %v7617_v2  ;;  %7690 = vmatprep.subr.bf16.mxu1 %v7689_v57  ;;  %v4593_v2 = vld [vmem:[#allocation20 + $0xd90] sm:$0xff]  ;;  %v4663_v52 = vld [vmem:[#allocation20 + $0xfc0] sm:$0xff] }
0x1cf1   :  { %v7695_v61 = vpack.c.bf16 %v4601_v4, %v4593_v2  ;;  %v4428_v2 = vld [vmem:[#allocation20 + $0x868] sm:$0xff]  ;;  %v4422_v4 = vld [vmem:[#allocation20 + $0x838] sm:$0xff] }
0x1cf3   :  { %7620 = vmatpush1.bf16.msra.mxu0 %v7619_v13  ;;  %7692 = vmatpush1.bf16.msra.mxu1 %v7691_v11  ;;  %v7697_v13 = vpack.c.bf16 %v4618_v28, %v4610_v44  ;;  %v7641_v11 = vpack.c.bf16 %v4648_v56, %v4640_v23  ;;  %v4429_v23 = vld [vmem:[#allocation20 + $0x870] sm:$0xff] }
0x1cf4   :  { %7622 = vmatprep.subr.bf16.mxu0 %v7621_v45  ;;  %7694 = vmatprep.subr.bf16.mxu1 %v7693_v47  ;;  %v4609_v45 = vld [vmem:[#allocation20 + $0xe10] sm:$0xff]  ;;  %v4420_v47 = vld [vmem:[#allocation20 + $0x828] sm:$0xff] }
0x1cf5   :  { %v7699_v21 = vpack.c.bf16 %v4617_v8, %v4609_v45  ;;  %v7713_v46 = vpack.c.bf16 %v4428_v2, %v4420_v47  ;;  %v4453_v2 = vld [vmem:[#allocation20 + $0x930] sm:$0xff] }
0x1cf7   :  { %7624 = vmatpush1.bf16.msra.mxu0 %v7623_v25  ;;  %7696 = vmatpush1.bf16.msra.mxu1 %v7695_v61  ;;  %v7701_v25 = vpack.c.bf16 %v4634_v35, %v4626_v10  ;;  %v4430_v61 = vld [vmem:[#allocation20 + $0x878] sm:$0xff] }
0x1cf8   :  { %7626 = vmatprep.subr.bf16.mxu0 %v7625_v9  ;;  %7698 = vmatprep.subr.bf16.mxu1 %v7697_v13  ;;  %v4625_v9 = vld [vmem:[#allocation20 + $0xe90] sm:$0xff]  ;;  %v7777_v44 = vpack.c.bf16 %v4430_v61, %v4422_v4  ;;  %v4351_v10 = vld [vmem:[#allocation18 + $0x2] sm:$0x3]  ;;  %v4468_v61 = vld [vmem:[#allocation20 + $0x9a8] sm:$0xff] }
0x1cf9   :  { %v7703_v57 = vpack.c.bf16 %v4633_v37, %v4625_v9  ;;  %v9948_v24 = vrot.slane %v4351_v10, %v9413_v39  ;;  %v4427_v9 = vld [vmem:[#allocation20 + $0x860] sm:$0xff]  ;;  %v4421_v37 = vld [vmem:[#allocation20 + $0x830] sm:$0xff] }
0x1cfa   :  { %v4461_v4 = vld [vmem:[#allocation20 + $0x970] sm:$0xff] }
0x1cfb   :  { %7628 = vmatpush1.bf16.msra.mxu0 %v7627_v60  ;;  %7700 = vmatpush1.bf16.msra.mxu1 %v7699_v21  ;;  %v4650_v60 = vld [vmem:[#allocation20 + $0xf58] sm:$0xff] }
0x1cfc   :  { %7702 = vmatprep.subr.bf16.mxu1 %v7701_v25  ;;  %v9951_v25 = vrot.slane %v4351_v10, %v9416_v40  ;;  %v4492_v10 = vld [vmem:[#allocation20 + $0xa68] sm:$0xff] }
0x1cff   :  { %7704 = vmatpush1.bf16.msra.mxu1 %v7703_v57  ;;  %v4436_v57 = vld [vmem:[#allocation20 + $0x8a8] sm:$0xff] }
0x1d64   :  { %v4354_v3 = vpop.xlane.xlu0 %4353  ;;  %v4339_v6 = vpop.f32.mrb[62].mxu1 }
0x1d65   :  { %v4358_v22 = vmul.f32 0.00390625, %v4354_v3  ;;  %v4340_v20 = vadd.f32 %v4339_v6, %v9894_v5  ;;  %v4341_v30 = vpop.f32.mrb[63].mxu1  ;;  %v7705_v3 = vpack.c.bf16 %v4650_v60, %v4642_v16  ;;  %v4639_v6 = vld [vmem:[#allocation20 + $0xf00] sm:$0xff]  ;;  %v4444_v60 = vld [vmem:[#allocation20 + $0x8e8] sm:$0xff] }
0x1d66   :  { %v4342_v49 = vadd.f32 %v4341_v30, %v9897_v26 }
0x1d67   :  { %v9912_v15 = vsub.f32 %v9902_v18, %v4358_v22  ;;  %v9915_v50 = vsub.f32 %v9905_v29, %v4358_v22  ;;  %v9918_v33 = vadd.f32 %v4340_v20, %v9818_v17  ;;  %v4592_v29 = vld [vmem:[#allocation20 + $0xd88] sm:$0xff]  ;;  %v4647_v22 = vld [vmem:[#allocation20 + $0xf40] sm:$0xff]  ;;  %v4641_v20 = vld [vmem:[#allocation20 + $0xf10] sm:$0xff]  ;;  %7706 = vmatprep.subr.bf16.mxu1 %v7705_v3 }
0x1d68   :  { %v9921_v12 = vadd.f32 %v4342_v49, %v9816_v54  ;;  %v7629_v17 = vpack.c.bf16 %v4600_v59, %v4592_v29  ;;  %v4599_v54 = vld [vmem:[#allocation20 + $0xdc0] sm:$0xff]  ;;  %v7643_v30 = vpack.c.bf16 %v4647_v22, %v4639_v6  ;;  %v4649_v49 = vld [vmem:[#allocation20 + $0xf50] sm:$0xff]  ;;  %v4658_v29 = vld [vmem:[#allocation20 + $0xf98] sm:$0xff]  ;;  %v7779_v22 = vpack.c.bf16 %v4429_v23, %v4421_v37 }
0x1d69   :  { %v4364_v36 = vmul.f32 %v9912_v15, %v9912_v15  ;;  %v4365_v5 = vmul.f32 %v9915_v50, %v9915_v50  ;;  %v7631_v0 = vpack.c.bf16 %v4599_v54, %v4591_v27  ;;  %v4666_v59 = vld [vmem:[#allocation20 + $0xfd8] sm:$0xff]  ;;  %v4657_v27 = vld [vmem:[#allocation20 + $0xf90] sm:$0xff]  ;;  %v4491_v37 = vld [vmem:[#allocation20 + $0xa60] sm:$0xff] }
0x1d6a   :  { %v4355_v26 = vadd.f32 %v9921_v12, %v9918_v33  ;;  %7630 = vmatprep.subr.bf16.mxu0 %v7629_v17  ;;  %v7709_v17 = vpack.c.bf16 %v4666_v59, %v4658_v29  ;;  %v4665_v54 = vld [vmem:[#allocation20 + $0xfd0] sm:$0xff]  ;;  %v4460_v29 = vld [vmem:[#allocation20 + $0x968] sm:$0xff]  ;;  %v4454_v59 = vld [vmem:[#allocation20 + $0x938] sm:$0xff] }
0x1d6b   :  { %v4368_v18 = vadd.f32 %v4365_v5, %v4364_v36  ;;  %7632 = vmatpush1.bf16.msra.mxu0 %v7631_v0  ;;  %v4656_v36 = vld [vmem:[#allocation20 + $0xf88] sm:$0xff]  ;;  %v7647_v0 = vpack.c.bf16 %v4663_v52, %v4655_v1  ;;  %v7711_v31 = vpack.c.bf16 %v4665_v54, %v4657_v27  ;;  %v4462_v1 = vld [vmem:[#allocation20 + $0x978] sm:$0xff]  ;;  %v4451_v27 = vld [vmem:[#allocation20 + $0x920] sm:$0xff] }
0x1d6c   :  { %4356 = vadd.xlane.f32.xlu1 %v4355_v26  ;;  %7634 = vmatprep.subr.bf16.mxu0 %v7633_v41  ;;  %v4664_v5 = vld [vmem:[#allocation20 + $0xfc8] sm:$0xff]  ;;  %v7707_v26 = vpack.c.bf16 %v4649_v49, %v4641_v20  ;;  %v4435_v20 = vld [vmem:[#allocation20 + $0x8a0] sm:$0xff]  ;;  %v7717_v49 = vpack.c.bf16 %v4444_v60, %v4436_v57 }
0x1d6d   :  { %4369 = vadd.xlane.f32.xlu0 %v4368_v18  ;;  %v7645_v18 = vpack.c.bf16 %v4664_v5, %v4656_v36  ;;  %v4437_v5 = vld [vmem:[#allocation20 + $0x8b0] sm:$0xff]  ;;  %v4459_v54 = vld [vmem:[#allocation20 + $0x960] sm:$0xff]  ;;  %v4500_v60 = vld [vmem:[#allocation20 + $0xaa8] sm:$0xff] }
0x1d6e   :  { %7708 = vmatpush1.bf16.msra.mxu1 %v7707_v26  ;;  %v4445_v26 = vld [vmem:[#allocation20 + $0x8f0] sm:$0xff] }
0x1d6f   :  { %7636 = vmatpush1.bf16.msra.mxu0 %v7635_v14  ;;  %7710 = vmatprep.subr.bf16.mxu1 %v7709_v17  ;;  %v7783_v52 = vpack.c.bf16 %v4445_v26, %v4437_v5  ;;  %v4501_v26 = vld [vmem:[#allocation20 + $0xab0] sm:$0xff] }
0x1d70   :  { %7638 = vmatprep.subr.bf16.mxu0 %v7637_v32  ;;  %v9940_v32 = vrot.slane %v4349_v55, %v9413_v39 }
0x1d72   :  { %7712 = vmatpush1.bf16.msra.mxu1 %v7711_v31  ;;  %v4476_v31 = vld [vmem:[#allocation20 + $0x9e8] sm:$0xff] }
0x1d73   :  { %7640 = vmatpush1.bf16.msra.mxu0 %v7639_v19  ;;  %7778 = vmatprep.subr.bf16.mxu1 %v7777_v44  ;;  %v4419_v19 = vld [vmem:[#allocation20 + $0x820] sm:$0xff]  ;;  %v4478_v44 = vld [vmem:[#allocation20 + $0x9f8] sm:$0xff] }
0x1d74   :  { %7642 = vmatprep.subr.bf16.mxu0 %v7641_v11  ;;  %v4438_v11 = vld [vmem:[#allocation20 + $0x8b8] sm:$0xff]  ;;  %v7715_v6 = vpack.c.bf16 %v4427_v9, %v4419_v19  ;;  %v4483_v9 = vld [vmem:[#allocation20 + $0xa20] sm:$0xff] }
0x1d77   :  { %7644 = vmatpush1.bf16.msra.mxu0 %v7643_v30  ;;  %v4443_v30 = vld [vmem:[#allocation20 + $0x8e0] sm:$0xff] }
0x1d78   :  { %7646 = vmatprep.subr.bf16.mxu0 %v7645_v18  ;;  %v4452_v18 = vld [vmem:[#allocation20 + $0x928] sm:$0xff]  ;;  %v7719_v17 = vpack.c.bf16 %v4443_v30, %v4435_v20  ;;  %v4499_v30 = vld [vmem:[#allocation20 + $0xaa0] sm:$0xff] }
0x1d79   :  { %v7721_v47 = vpack.c.bf16 %v4460_v29, %v4452_v18  ;;  %v4509_v18 = vld [vmem:[#allocation20 + $0xaf0] sm:$0xff]  ;;  %v4516_v29 = vld [vmem:[#allocation20 + $0xb28] sm:$0xff] }
0x1d7b   :  { %7648 = vmatpush1.bf16.msra.mxu0 %v7647_v0  ;;  %v7785_v0 = vpack.c.bf16 %v4462_v1, %v4454_v59  ;;  %v4524_v59 = vld [vmem:[#allocation20 + $0xb68] sm:$0xff]  ;;  %v4518_v1 = vld [vmem:[#allocation20 + $0xb38] sm:$0xff] }
0x1d7c   :  { %7714 = vmatprep.subr.bf16.mxu0 %v7713_v46  ;;  %v4470_v46 = vld [vmem:[#allocation20 + $0x9b8] sm:$0xff] }
0x1df9   :  { %v4357_v41 = vpop.xlane.xlu1 %4356 }
0x1dfa   :  { %v4359_v28 = vmul.f32 0.00390625, %v4357_v41  ;;  %v4370_v51 = vpop.xlane.xlu0 %4369  ;;  %v7723_v41 = vpack.c.bf16 %v4459_v54, %v4451_v27  ;;  %v7799_v27 = vpack.c.bf16 %v4509_v18, %v4501_v26  ;;  %v4515_v54 = vld [vmem:[#allocation20 + $0xb20] sm:$0xff]  ;;  %v4565_v18 = vld [vmem:[#allocation20 + $0xcb0] sm:$0xff] }
0x1dfb   :  { %v4374_v53 = vmul.f32 0.00390625, %v4370_v51  ;;  %v4467_v51 = vld [vmem:[#allocation20 + $0x9a0] sm:$0xff] }
0x1dfc   :  { %v9930_v13 = vsub.f32 %v9918_v33, %v4359_v28  ;;  %v9933_v14 = vsub.f32 %v9921_v12, %v4359_v28  ;;  %v9943_v33 = vrot.slane %v4349_v55, %v9416_v40  ;;  %v7787_v28 = vpack.c.bf16 %v4461_v4, %v4453_v2  ;;  %v4484_v55 = vld [vmem:[#allocation20 + $0xa28] sm:$0xff]  ;;  %v4517_v4 = vld [vmem:[#allocation20 + $0xb30] sm:$0xff] }
0x1dfd   :  { %v4376_v45 = vadd.f32 1e-12, %v4374_v53  ;;  %v4475_v53 = vld [vmem:[#allocation20 + $0x9e0] sm:$0xff]  ;;  %v7729_v23 = vpack.c.bf16 %v4492_v10, %v4484_v55  ;;  %v4541_v55 = vld [vmem:[#allocation20 + $0xbf0] sm:$0xff]  ;;  %v4548_v10 = vld [vmem:[#allocation20 + $0xc28] sm:$0xff] }
0x1dfe   :  { %v4366_v8 = vmul.f32 %v9930_v13, %v9930_v13  ;;  %v4367_v21 = vmul.f32 %v9933_v14, %v9933_v14 }
0x1dff   :  { %8432 = vrsqrt.f32 %v4376_v45  ;;  %v7725_v45 = vpack.c.bf16 %v4476_v31, %v4468_v61  ;;  %v4525_v61 = vld [vmem:[#allocation20 + $0xb70] sm:$0xff]  ;;  %v4532_v31 = vld [vmem:[#allocation20 + $0xba8] sm:$0xff] }
0x1e00   :  { %v4371_v63 = vadd.f32 %v4367_v21, %v4366_v8  ;;  %v7789_v8 = vpack.c.bf16 %v4478_v44, %v4470_v46  ;;  %v4469_v21 = vld [vmem:[#allocation20 + $0x9b0] sm:$0xff]  ;;  %v4540_v46 = vld [vmem:[#allocation20 + $0xbe8] sm:$0xff]  ;;  %v4534_v44 = vld [vmem:[#allocation20 + $0xbb8] sm:$0xff] }
0x1e02   :  { %4372 = vadd.xlane.f32.xlu1 %v4371_v63  ;;  %v4477_v63 = vld [vmem:[#allocation20 + $0x9f0] sm:$0xff] }
0x1e03   :  { %v7791_v19 = vpack.c.bf16 %v4477_v63, %v4469_v21  ;;  %v4533_v63 = vld [vmem:[#allocation20 + $0xbb0] sm:$0xff] }
0x1e09   :  { %v8433_v12 = vpop.eup %8432 }
0x1e0a   :  { %v4380_v35 = vmul.f32 %v8433_v12, %v9912_v15  ;;  %v4381_v42 = vmul.f32 %v8433_v12, %v9915_v50  ;;  %v4446_v15 = vld [vmem:[#allocation20 + $0x8f8] sm:$0xff] }
0x1e0b   :  { %v7781_v36 = vpack.c.bf16 %v4446_v15, %v4438_v11  ;;  %v4486_v12 = vld [vmem:[#allocation20 + $0xa38] sm:$0xff]  ;;  %v4508_v11 = vld [vmem:[#allocation20 + $0xae8] sm:$0xff] }
0x1e0c   :  { %v4396_v56 = vmul.f32 %v9940_v32, %v4381_v42  ;;  %v4395_v16 = vmul.f32 %v9943_v33, %v4380_v35  ;;  %v4494_v35 = vld [vmem:[#allocation20 + $0xa78] sm:$0xff]  ;;  %v7727_v42 = vpack.c.bf16 %v4475_v53, %v4467_v51  ;;  %v7803_v51 = vpack.c.bf16 %v4525_v61, %v4517_v4  ;;  %v4531_v53 = vld [vmem:[#allocation20 + $0xba0] sm:$0xff]  ;;  %v4581_v61 = vld [vmem:[#allocation20 + $0xd30] sm:$0xff] }
0x1e0d   :  { %v7793_v57 = vpack.c.bf16 %v4494_v35, %v4486_v12  ;;  %v4502_v15 = vld [vmem:[#allocation20 + $0xab8] sm:$0xff]  ;;  %v4556_v12 = vld [vmem:[#allocation20 + $0xc68] sm:$0xff] }
0x1e0e   :  { %v9956_v50 = vadd.f32 %v9948_v24, %v4396_v56  ;;  %v9959_v3 = vadd.f32 %v9951_v25, %v4395_v16  ;;  %v4485_v56 = vld [vmem:[#allocation20 + $0xa30] sm:$0xff]  ;;  %v4550_v35 = vld [vmem:[#allocation20 + $0xc38] sm:$0xff] }
0x1e0f   :  { %v4493_v16 = vld [vmem:[#allocation20 + $0xa70] sm:$0xff] }
0x1e10   :  { %4778 = vmatprep.mubr.f32.mxu0 %v9956_v50  ;;  %4855 = vmatprep.mubr.f32.mxu1 %v9956_v50  ;;  %v7795_v20 = vpack.c.bf16 %v4493_v16, %v4485_v56  ;;  %v4549_v16 = vld [vmem:[#allocation20 + $0xc30] sm:$0xff] }
0x1e11   :  { %4779 = vmatmul.mubr.f32.vlgmr.msra.gmra.mrb[20].mxu0 %v9959_v3  ;;  %4856 = vmatmul.mubr.f32.vlgmr.msra.gmra.mrb[64].mxu1 %v9959_v3 }
0x1e12   :  { %7716 = vmatpush1.bf16.msra.mxu0 %v7715_v6  ;;  %7780 = vmatpush1.bf16.msra.mxu1 %v7779_v22  ;;  %v4510_v6 = vld [vmem:[#allocation20 + $0xaf8] sm:$0xff]  ;;  %v7731_v22 = vpack.c.bf16 %v4491_v37, %v4483_v9  ;;  %v7807_v9 = vpack.c.bf16 %v4541_v55, %v4533_v63  ;;  %v4547_v37 = vld [vmem:[#allocation20 + $0xc20] sm:$0xff]  ;;  %v4597_v55 = vld [vmem:[#allocation20 + $0xdb0] sm:$0xff] }
0x1e13   :  { %7718 = vmatprep.subr.bf16.mxu0 %v7717_v49  ;;  %7782 = vmatprep.subr.bf16.mxu1 %v7781_v36  ;;  %v4507_v49 = vld [vmem:[#allocation20 + $0xae0] sm:$0xff]  ;;  %v7733_v36 = vpack.c.bf16 %v4508_v11, %v4500_v60  ;;  %v7797_v5 = vpack.c.bf16 %v4510_v6, %v4502_v15  ;;  %v4557_v60 = vld [vmem:[#allocation20 + $0xc70] sm:$0xff]  ;;  %v4564_v11 = vld [vmem:[#allocation20 + $0xca8] sm:$0xff] }
0x1e14   :  { %v4572_v15 = vld [vmem:[#allocation20 + $0xce8] sm:$0xff]  ;;  %v4566_v6 = vld [vmem:[#allocation20 + $0xcb8] sm:$0xff] }
0x1e16   :  { %7720 = vmatpush1.bf16.msra.mxu0 %v7719_v17  ;;  %7784 = vmatpush1.bf16.msra.mxu1 %v7783_v52  ;;  %v4526_v17 = vld [vmem:[#allocation20 + $0xb78] sm:$0xff]  ;;  %v7735_v52 = vpack.c.bf16 %v4507_v49, %v4499_v30  ;;  %v7811_v30 = vpack.c.bf16 %v4557_v60, %v4549_v16  ;;  %v4563_v49 = vld [vmem:[#allocation20 + $0xca0] sm:$0xff]  ;;  %v4613_v60 = vld [vmem:[#allocation20 + $0xe30] sm:$0xff] }
0x1e17   :  { %7722 = vmatprep.subr.bf16.mxu0 %v7721_v47  ;;  %7786 = vmatprep.subr.bf16.mxu1 %v7785_v0  ;;  %v4523_v47 = vld [vmem:[#allocation20 + $0xb60] sm:$0xff]  ;;  %v7737_v0 = vpack.c.bf16 %v4524_v59, %v4516_v29  ;;  %v7801_v2 = vpack.c.bf16 %v4526_v17, %v4518_v1  ;;  %v4573_v29 = vld [vmem:[#allocation20 + $0xcf0] sm:$0xff]  ;;  %v4580_v59 = vld [vmem:[#allocation20 + $0xd28] sm:$0xff] }
0x1e18   :  { %v4588_v1 = vld [vmem:[#allocation20 + $0xd68] sm:$0xff]  ;;  %v4582_v17 = vld [vmem:[#allocation20 + $0xd38] sm:$0xff] }
0x1e1a   :  { %7724 = vmatpush1.bf16.msra.mxu0 %v7723_v41  ;;  %7788 = vmatpush1.bf16.msra.mxu1 %v7787_v28  ;;  %v4542_v41 = vld [vmem:[#allocation20 + $0xbf8] sm:$0xff]  ;;  %v7739_v28 = vpack.c.bf16 %v4523_v47, %v4515_v54  ;;  %v7815_v54 = vpack.c.bf16 %v4573_v29, %v4565_v18  ;;  %v4579_v47 = vld [vmem:[#allocation20 + $0xd20] sm:$0xff]  ;;  %v4629_v29 = vld [vmem:[#allocation20 + $0xeb0] sm:$0xff] }
0x1e1b   :  { %7726 = vmatprep.subr.bf16.mxu0 %v7725_v45  ;;  %7790 = vmatprep.subr.bf16.mxu1 %v7789_v8  ;;  %v4539_v45 = vld [vmem:[#allocation20 + $0xbe0] sm:$0xff]  ;;  %v7741_v8 = vpack.c.bf16 %v4540_v46, %v4532_v31  ;;  %v7805_v21 = vpack.c.bf16 %v4542_v41, %v4534_v44  ;;  %v4589_v31 = vld [vmem:[#allocation20 + $0xd70] sm:$0xff]  ;;  %v4596_v46 = vld [vmem:[#allocation20 + $0xda8] sm:$0xff] }
0x1e1c   :  { %v4604_v44 = vld [vmem:[#allocation20 + $0xde8] sm:$0xff]  ;;  %v4598_v41 = vld [vmem:[#allocation20 + $0xdb8] sm:$0xff] }
0x1e1e   :  { %7728 = vmatpush1.bf16.msra.mxu0 %v7727_v42  ;;  %7792 = vmatpush1.bf16.msra.mxu1 %v7791_v19  ;;  %v4558_v42 = vld [vmem:[#allocation20 + $0xc78] sm:$0xff]  ;;  %v7743_v19 = vpack.c.bf16 %v4539_v45, %v4531_v53  ;;  %v7819_v53 = vpack.c.bf16 %v4589_v31, %v4581_v61  ;;  %v4595_v45 = vld [vmem:[#allocation20 + $0xda0] sm:$0xff]  ;;  %v4645_v31 = vld [vmem:[#allocation20 + $0xf30] sm:$0xff] }
0x1e1f   :  { %7730 = vmatprep.subr.bf16.mxu0 %v7729_v23  ;;  %7794 = vmatprep.subr.bf16.mxu1 %v7793_v57  ;;  %v4555_v23 = vld [vmem:[#allocation20 + $0xc60] sm:$0xff]  ;;  %v7745_v57 = vpack.c.bf16 %v4556_v12, %v4548_v10  ;;  %v7809_v56 = vpack.c.bf16 %v4558_v42, %v4550_v35  ;;  %v4605_v10 = vld [vmem:[#allocation20 + $0xdf0] sm:$0xff]  ;;  %v4612_v12 = vld [vmem:[#allocation20 + $0xe28] sm:$0xff] }
0x1e20   :  { %v4620_v35 = vld [vmem:[#allocation20 + $0xe68] sm:$0xff]  ;;  %v4614_v42 = vld [vmem:[#allocation20 + $0xe38] sm:$0xff] }
0x1e22   :  { %7732 = vmatpush1.bf16.msra.mxu0 %v7731_v22  ;;  %7796 = vmatpush1.bf16.msra.mxu1 %v7795_v20  ;;  %v4574_v22 = vld [vmem:[#allocation20 + $0xcf8] sm:$0xff]  ;;  %v7747_v20 = vpack.c.bf16 %v4555_v23, %v4547_v37  ;;  %v7823_v37 = vpack.c.bf16 %v4605_v10, %v4597_v55  ;;  %v4611_v23 = vld [vmem:[#allocation20 + $0xe20] sm:$0xff]  ;;  %v4661_v10 = vld [vmem:[#allocation20 + $0xfb0] sm:$0xff] }
0x1e23   :  { %7734 = vmatprep.subr.bf16.mxu0 %v7733_v36  ;;  %7798 = vmatprep.subr.bf16.mxu1 %v7797_v5  ;;  %v4571_v36 = vld [vmem:[#allocation20 + $0xce0] sm:$0xff]  ;;  %v7749_v5 = vpack.c.bf16 %v4572_v15, %v4564_v11  ;;  %v7813_v26 = vpack.c.bf16 %v4574_v22, %v4566_v6  ;;  %v4621_v11 = vld [vmem:[#allocation20 + $0xe70] sm:$0xff]  ;;  %v4628_v15 = vld [vmem:[#allocation20 + $0xea8] sm:$0xff] }
0x1e24   :  { %v4636_v6 = vld [vmem:[#allocation20 + $0xee8] sm:$0xff]  ;;  %v4630_v22 = vld [vmem:[#allocation20 + $0xeb8] sm:$0xff]  ;;  %v4667_v55 = vld [vmem:[#allocation20 + $0xfe0] sm:$0xff] }
0x1e26   :  { %7736 = vmatpush1.bf16.msra.mxu0 %v7735_v52  ;;  %7800 = vmatpush1.bf16.msra.mxu1 %v7799_v27  ;;  %v4590_v52 = vld [vmem:[#allocation20 + $0xd78] sm:$0xff]  ;;  %v7751_v27 = vpack.c.bf16 %v4571_v36, %v4563_v49  ;;  %v7827_v49 = vpack.c.bf16 %v4621_v11, %v4613_v60  ;;  %v4627_v36 = vld [vmem:[#allocation20 + $0xea0] sm:$0xff] }
0x1e27   :  { %7738 = vmatprep.subr.bf16.mxu0 %v7737_v0  ;;  %7802 = vmatprep.subr.bf16.mxu1 %v7801_v2  ;;  %v4587_v0 = vld [vmem:[#allocation20 + $0xd60] sm:$0xff]  ;;  %v7753_v2 = vpack.c.bf16 %v4588_v1, %v4580_v59  ;;  %v7817_v4 = vpack.c.bf16 %v4590_v52, %v4582_v17  ;;  %v4637_v59 = vld [vmem:[#allocation20 + $0xef0] sm:$0xff]  ;;  %v4644_v1 = vld [vmem:[#allocation20 + $0xf28] sm:$0xff] }
0x1e28   :  { %v4652_v17 = vld [vmem:[#allocation20 + $0xf68] sm:$0xff]  ;;  %v4646_v52 = vld [vmem:[#allocation20 + $0xf38] sm:$0xff] }
0x1e2a   :  { %7740 = vmatpush1.bf16.msra.mxu0 %v7739_v28  ;;  %7804 = vmatpush1.bf16.msra.mxu1 %v7803_v51  ;;  %v4606_v28 = vld [vmem:[#allocation20 + $0xdf8] sm:$0xff]  ;;  %v7755_v51 = vpack.c.bf16 %v4587_v0, %v4579_v47  ;;  %v7831_v47 = vpack.c.bf16 %v4637_v59, %v4629_v29  ;;  %v4643_v0 = vld [vmem:[#allocation20 + $0xf20] sm:$0xff]  ;;  %v5175_v29 = vld [vmem:[#allocation23 + $0x840] sm:$0xff] }
0x1e2b   :  { %7742 = vmatprep.subr.bf16.mxu0 %v7741_v8  ;;  %7806 = vmatprep.subr.bf16.mxu1 %v7805_v21  ;;  %v4603_v8 = vld [vmem:[#allocation20 + $0xde0] sm:$0xff]  ;;  %v7757_v21 = vpack.c.bf16 %v4604_v44, %v4596_v46  ;;  %v7821_v63 = vpack.c.bf16 %v4606_v28, %v4598_v41  ;;  %v4653_v46 = vld [vmem:[#allocation20 + $0xf70] sm:$0xff]  ;;  %v4660_v44 = vld [vmem:[#allocation20 + $0xfa8] sm:$0xff] }
0x1e2c   :  { %v4668_v41 = vld [vmem:[#allocation20 + $0xfe8] sm:$0xff]  ;;  %v4662_v28 = vld [vmem:[#allocation20 + $0xfb8] sm:$0xff]  ;;  %v5177_v59 = vld [vmem:[#allocation23 + $0x850] sm:$0xff] }
0x1e2e   :  { %7744 = vmatpush1.bf16.msra.mxu0 %v7743_v19  ;;  %7808 = vmatpush1.bf16.msra.mxu1 %v7807_v9  ;;  %v4622_v19 = vld [vmem:[#allocation20 + $0xe78] sm:$0xff]  ;;  %v7759_v9 = vpack.c.bf16 %v4603_v8, %v4595_v45  ;;  %v7835_v45 = vpack.c.bf16 %v4653_v46, %v4645_v31  ;;  %v4659_v8 = vld [vmem:[#allocation20 + $0xfa0] sm:$0xff]  ;;  %v5183_v31 = vld [vmem:[#allocation23 + $0x880] sm:$0xff] }
0x1e2f   :  { %7746 = vmatprep.subr.bf16.mxu0 %v7745_v57  ;;  %7810 = vmatprep.subr.bf16.mxu1 %v7809_v56  ;;  %v4619_v57 = vld [vmem:[#allocation20 + $0xe60] sm:$0xff]  ;;  %v7761_v56 = vpack.c.bf16 %v4620_v35, %v4612_v12  ;;  %v7825_v16 = vpack.c.bf16 %v4622_v19, %v4614_v42  ;;  %v4669_v12 = vld [vmem:[#allocation20 + $0xff0] sm:$0xff]  ;;  %v5168_v35 = vld [vmem:[#allocation23 + $0x808] sm:$0xff]  ;;  %v7775_v19 = vpack.c.bf16 %v4667_v55, %v4659_v8 }
0x1e30   :  { %v5170_v42 = vld [vmem:[#allocation23 + $0x818] sm:$0xff]  ;;  %v5185_v46 = vld [vmem:[#allocation23 + $0x890] sm:$0xff]  ;;  %v5192_v8 = vld [vmem:[#allocation23 + $0x8c8] sm:$0xff] }
0x1e32   :  { %7748 = vmatpush1.bf16.msra.mxu0 %v7747_v20  ;;  %7812 = vmatpush1.bf16.msra.mxu1 %v7811_v30  ;;  %v4638_v20 = vld [vmem:[#allocation20 + $0xef8] sm:$0xff]  ;;  %v7763_v30 = vpack.c.bf16 %v4619_v57, %v4611_v23 }
0x1e33   :  { %7750 = vmatprep.subr.bf16.mxu0 %v7749_v5  ;;  %7814 = vmatprep.subr.bf16.mxu1 %v7813_v26  ;;  %v4635_v5 = vld [vmem:[#allocation20 + $0xee0] sm:$0xff]  ;;  %v7765_v26 = vpack.c.bf16 %v4636_v6, %v4628_v15  ;;  %v7829_v18 = vpack.c.bf16 %v4638_v20, %v4630_v22 }
0x1e36   :  { %7752 = vmatpush1.bf16.msra.mxu0 %v7751_v27  ;;  %7816 = vmatpush1.bf16.msra.mxu1 %v7815_v54  ;;  %v4654_v27 = vld [vmem:[#allocation20 + $0xf78] sm:$0xff]  ;;  %v7767_v54 = vpack.c.bf16 %v4635_v5, %v4627_v36  ;;  %v5178_v5 = vld [vmem:[#allocation23 + $0x858] sm:$0xff] }
0x1e37   :  { %7754 = vmatprep.subr.bf16.mxu0 %v7753_v2  ;;  %7818 = vmatprep.subr.bf16.mxu1 %v7817_v4  ;;  %v4651_v2 = vld [vmem:[#allocation20 + $0xf60] sm:$0xff]  ;;  %v7769_v4 = vpack.c.bf16 %v4652_v17, %v4644_v1  ;;  %v7833_v61 = vpack.c.bf16 %v4654_v27, %v4646_v52  ;;  %v5176_v36 = vld [vmem:[#allocation23 + $0x848] sm:$0xff]  ;;  %v5182_v17 = vld [vmem:[#allocation23 + $0x878] sm:$0xff]  ;;  %v7851_v52 = vpack.c.bf16 %v5177_v59, %v5175_v29 }
0x1e38   :  { %v5180_v1 = vld [vmem:[#allocation23 + $0x868] sm:$0xff]  ;;  %v5214_v29 = vld [vmem:[#allocation23 + $0x978] sm:$0xff] }
0x1e39   :  { %v7853_v27 = vpack.c.bf16 %v5182_v17, %v5180_v1  ;;  %v5211_v17 = vld [vmem:[#allocation23 + $0x960] sm:$0xff] }
0x1e3a   :  { %7756 = vmatpush1.bf16.msra.mxu0 %v7755_v51  ;;  %7820 = vmatpush1.bf16.msra.mxu1 %v7819_v53  ;;  %v4670_v51 = vld [vmem:[#allocation20 + $0xff8] sm:$0xff]  ;;  %v7771_v53 = vpack.c.bf16 %v4651_v2, %v4643_v0  ;;  %v5186_v2 = vld [vmem:[#allocation23 + $0x898] sm:$0xff] }
0x1e3b   :  { %7758 = vmatprep.subr.bf16.mxu0 %v7757_v21  ;;  %7822 = vmatprep.subr.bf16.mxu1 %v7821_v63  ;;  %v7773_v21 = vpack.c.bf16 %v4668_v41, %v4660_v44  ;;  %v7837_v63 = vpack.c.bf16 %v4670_v51, %v4662_v28  ;;  %v5184_v0 = vld [vmem:[#allocation23 + $0x888] sm:$0xff]  ;;  %v5190_v41 = vld [vmem:[#allocation23 + $0x8b8] sm:$0xff]  ;;  %v7859_v28 = vpack.c.bf16 %v5185_v46, %v5183_v31 }
0x1e3c   :  { %v5188_v44 = vld [vmem:[#allocation23 + $0x8a8] sm:$0xff]  ;;  %v5222_v31 = vld [vmem:[#allocation23 + $0x9b8] sm:$0xff] }
0x1e3d   :  { %v7861_v51 = vpack.c.bf16 %v5190_v41, %v5188_v44  ;;  %v5219_v41 = vld [vmem:[#allocation23 + $0x9a0] sm:$0xff] }
0x1e3e   :  { %7760 = vmatpush1.bf16.msra.mxu0 %v7759_v9  ;;  %7824 = vmatpush1.bf16.msra.mxu1 %v7823_v37  ;;  %v7839_v9 = vpack.c.bf16 %v4669_v12, %v4661_v10  ;;  %v7841_v37 = vpack.c.bf16 %v5170_v42, %v5168_v35  ;;  %v5191_v10 = vld [vmem:[#allocation23 + $0x8c0] sm:$0xff]  ;;  %v5193_v12 = vld [vmem:[#allocation23 + $0x8d0] sm:$0xff]  ;;  %v5196_v35 = vld [vmem:[#allocation23 + $0x8e8] sm:$0xff] }
0x1e3f   :  { %7762 = vmatprep.subr.bf16.mxu0 %v7761_v56  ;;  %7826 = vmatprep.subr.bf16.mxu1 %v7825_v16  ;;  %v5198_v42 = vld [vmem:[#allocation23 + $0x8f8] sm:$0xff] }
0x1e42   :  { %7764 = vmatpush1.bf16.msra.mxu0 %v7763_v30  ;;  %7828 = vmatpush1.bf16.msra.mxu1 %v7827_v49  ;;  %v5167_v30 = vld [vmem:[#allocation23 + $0x800] sm:$0xff]  ;;  %v5169_v49 = vld [vmem:[#allocation23 + $0x810] sm:$0xff] }
0x1e43   :  { %7766 = vmatprep.subr.bf16.mxu0 %v7765_v26  ;;  %7830 = vmatprep.subr.bf16.mxu1 %v7829_v18  ;;  %v7849_v18 = vpack.c.bf16 %v5178_v5, %v5176_v36  ;;  %v5207_v5 = vld [vmem:[#allocation23 + $0x940] sm:$0xff] }
0x1e46   :  { %7768 = vmatpush1.bf16.msra.mxu0 %v7767_v54  ;;  %7832 = vmatpush1.bf16.msra.mxu1 %v7831_v47  ;;  %v5179_v54 = vld [vmem:[#allocation23 + $0x860] sm:$0xff]  ;;  %v5181_v47 = vld [vmem:[#allocation23 + $0x870] sm:$0xff] }
0x1e47   :  { %7770 = vmatprep.subr.bf16.mxu0 %v7769_v4  ;;  %7834 = vmatprep.subr.bf16.mxu1 %v7833_v61  ;;  %v7855_v4 = vpack.c.bf16 %v5181_v47, %v5179_v54  ;;  %v7857_v61 = vpack.c.bf16 %v5186_v2, %v5184_v0  ;;  %v5218_v54 = vld [vmem:[#allocation23 + $0x998] sm:$0xff]  ;;  %v5215_v2 = vld [vmem:[#allocation23 + $0x980] sm:$0xff] }
0x1e4a   :  { %7772 = vmatpush1.bf16.msra.mxu0 %v7771_v53  ;;  %7836 = vmatpush1.bf16.msra.mxu1 %v7835_v45  ;;  %v5187_v53 = vld [vmem:[#allocation23 + $0x8a0] sm:$0xff]  ;;  %v5189_v45 = vld [vmem:[#allocation23 + $0x8b0] sm:$0xff] }
0x1e4b   :  { %7774 = vmatprep.subr.bf16.mxu0 %v7773_v21  ;;  %7838 = vmatprep.subr.bf16.mxu1 %v7837_v63  ;;  %v5194_v21 = vld [vmem:[#allocation23 + $0x8d8] sm:$0xff]  ;;  %v7863_v63 = vpack.c.bf16 %v5189_v45, %v5187_v53 }
0x1e4c   :  { %v7865_v55 = vpack.c.bf16 %v5194_v21, %v5192_v8  ;;  %v5226_v53 = vld [vmem:[#allocation23 + $0x9d8] sm:$0xff]  ;;  %v5223_v21 = vld [vmem:[#allocation23 + $0x9c0] sm:$0xff] }
0x1e4e   :  { %7776 = vmatpush1.bf16.msra.mxu0 %v7775_v19  ;;  %7840 = vmatpush1.bf16.msra.mxu1 %v7839_v9  ;;  %v7867_v19 = vpack.c.bf16 %v5193_v12, %v5191_v10  ;;  %v7869_v9 = vpack.c.bf16 %v5198_v42, %v5196_v35  ;;  %v5228_v10 = vld [vmem:[#allocation23 + $0x9e8] sm:$0xff]  ;;  %v5230_v12 = vld [vmem:[#allocation23 + $0x9f8] sm:$0xff] }
0x1e4f   :  { %7842 = vmatprep.subr.bf16.mxu0 %v7841_v37  ;;  %v5195_v37 = vld [vmem:[#allocation23 + $0x8e0] sm:$0xff] }
0x1e8f   :  { %v4373_v23 = vpop.xlane.xlu1 %4372 }
0x1e90   :  { %v4375_v57 = vmul.f32 0.00390625, %v4373_v23  ;;  %v5197_v23 = vld [vmem:[#allocation23 + $0x8f0] sm:$0xff] }
0x1e92   :  { %v4377_v56 = vadd.f32 1e-12, %v4375_v57  ;;  %v5200_v57 = vld [vmem:[#allocation23 + $0x908] sm:$0xff] }
0x1e94   :  { %8434 = vrsqrt.f32 %v4377_v56  ;;  %v5202_v56 = vld [vmem:[#allocation23 + $0x918] sm:$0xff] }
0x1e9e   :  { %v8435_v16 = vpop.eup %8434 }
0x1e9f   :  { %v4382_v60 = vmul.f32 %v8435_v16, %v9930_v13  ;;  %v4383_v11 = vmul.f32 %v8435_v16, %v9933_v14  ;;  %v5172_v13 = vld [vmem:[#allocation23 + $0x828] sm:$0xff]  ;;  %v5174_v14 = vld [vmem:[#allocation23 + $0x838] sm:$0xff]  ;;  %v7871_v16 = vpack.c.bf16 %v5197_v23, %v5195_v37  ;;  %v5229_v37 = vld [vmem:[#allocation23 + $0x9f0] sm:$0xff] }
0x1ea1   :  { %v4398_v15 = vmul.f32 %v9940_v32, %v4383_v11  ;;  %v4397_v6 = vmul.f32 %v9943_v33, %v4382_v60  ;;  %v7843_v32 = vpack.c.bf16 %v5169_v49, %v5167_v30  ;;  %v7845_v33 = vpack.c.bf16 %v5174_v14, %v5172_v13  ;;  %v5199_v11 = vld [vmem:[#allocation23 + $0x900] sm:$0xff]  ;;  %v5206_v30 = vld [vmem:[#allocation23 + $0x938] sm:$0xff] }
0x1ea2   :  { %v7873_v60 = vpack.c.bf16 %v5202_v56, %v5200_v57  ;;  %v5203_v14 = vld [vmem:[#allocation23 + $0x920] sm:$0xff]  ;;  %v5232_v57 = vld [vmem:[#allocation23 + $0xa08] sm:$0xff]  ;;  %v5234_v56 = vld [vmem:[#allocation23 + $0xa18] sm:$0xff] }
0x1ea3   :  { %v9970_v22 = vadd.f32 %v9948_v24, %v4398_v15  ;;  %v9973_v20 = vadd.f32 %v9951_v25, %v4397_v6  ;;  %v5171_v24 = vld [vmem:[#allocation23 + $0x820] sm:$0xff]  ;;  %v5173_v25 = vld [vmem:[#allocation23 + $0x830] sm:$0xff]  ;;  %v5204_v6 = vld [vmem:[#allocation23 + $0x928] sm:$0xff] }
0x1ea4   :  { %v7847_v26 = vpack.c.bf16 %v5173_v25, %v5171_v24  ;;  %v5201_v15 = vld [vmem:[#allocation23 + $0x910] sm:$0xff]  ;;  %v7877_v13 = vpack.c.bf16 %v5206_v30, %v5204_v6  ;;  %v5210_v24 = vld [vmem:[#allocation23 + $0x958] sm:$0xff] }
0x1ea5   :  { %4784 = vmatprep.mubr.f32.mxu0 %v9970_v22  ;;  %4861 = vmatprep.mubr.f32.mxu1 %v9970_v22  ;;  %v7875_v49 = vpack.c.bf16 %v5201_v15, %v5199_v11 }
0x1ea6   :  { %4785 = vmatmul.mubr.f32.gmra.mrb[22].mxu0 %v9973_v20  ;;  %4862 = vmatmul.mubr.f32.gmra.mrb[66].mxu1 %v9973_v20 }
0x1ea7   :  { %4932 = vmatprep.mubr.f32.mxu0 %v9956_v50  ;;  %5009 = vmatprep.mubr.f32.mxu1 %v9956_v50 }
0x1eaa   :  { %4933 = vmatmul.mubr.f32.vlgmr.msra.gmra.mrb[24].mxu0 %v9959_v3  ;;  %5010 = vmatmul.mubr.f32.vlgmr.msra.gmra.mrb[68].mxu1 %v9959_v3 }
0x1eab   :  { %4938 = vmatprep.mubr.f32.mxu0 %v9970_v22  ;;  %5015 = vmatprep.mubr.f32.mxu1 %v9970_v22 }
0x1eac   :  { %7844 = vmatpush1.bf16.msra.mxu0 %v7843_v32  ;;  %v5205_v32 = vld [vmem:[#allocation23 + $0x930] sm:$0xff] }
0x1ead   :  { %7846 = vmatprep.subr.bf16.mxu0 %v7845_v33  ;;  %v5208_v33 = vld [vmem:[#allocation23 + $0x948] sm:$0xff]  ;;  %v7879_v25 = vpack.c.bf16 %v5205_v32, %v5203_v14 }
0x1eae   :  { %4939 = vmatmul.mubr.f32.gmra.mrb[26].mxu0 %v9973_v20  ;;  %5016 = vmatmul.mubr.f32.gmra.mrb[70].mxu1 %v9973_v20  ;;  %v7881_v36 = vpack.c.bf16 %v5210_v24, %v5208_v33 }
0x1eb0   :  { %7848 = vmatpush1.bf16.msra.mxu0 %v7847_v26  ;;  %v5209_v26 = vld [vmem:[#allocation23 + $0x950] sm:$0xff] }
0x1eb1   :  { %7850 = vmatprep.subr.bf16.mxu0 %v7849_v18  ;;  %v5212_v18 = vld [vmem:[#allocation23 + $0x968] sm:$0xff]  ;;  %v7883_v59 = vpack.c.bf16 %v5209_v26, %v5207_v5 }
0x1eb2   :  { %v7885_v1 = vpack.c.bf16 %v5214_v29, %v5212_v18 }
0x1eb4   :  { %7852 = vmatpush1.bf16.msra.mxu0 %v7851_v52  ;;  %v5213_v52 = vld [vmem:[#allocation23 + $0x970] sm:$0xff] }
0x1eb5   :  { %7854 = vmatprep.subr.bf16.mxu0 %v7853_v27  ;;  %v5216_v27 = vld [vmem:[#allocation23 + $0x988] sm:$0xff]  ;;  %v7887_v47 = vpack.c.bf16 %v5213_v52, %v5211_v17  ;;  %v5231_v52 = vld [vmem:[#allocation23 + $0xa00] sm:$0xff] }
0x1eb6   :  { %v7889_v0 = vpack.c.bf16 %v5218_v54, %v5216_v27  ;;  %v5233_v27 = vld [vmem:[#allocation23 + $0xa10] sm:$0xff] }
0x1eb8   :  { %7856 = vmatpush1.bf16.msra.mxu0 %v7855_v4  ;;  %v5217_v4 = vld [vmem:[#allocation23 + $0x990] sm:$0xff] }
0x1eb9   :  { %7858 = vmatprep.subr.bf16.mxu0 %v7857_v61  ;;  %v5220_v61 = vld [vmem:[#allocation23 + $0x9a8] sm:$0xff]  ;;  %v7891_v46 = vpack.c.bf16 %v5217_v4, %v5215_v2  ;;  %v5238_v2 = vld [vmem:[#allocation23 + $0xa38] sm:$0xff] }
0x1eba   :  { %v7893_v44 = vpack.c.bf16 %v5222_v31, %v5220_v61  ;;  %v7907_v31 = vpack.c.bf16 %v5233_v27, %v5231_v52  ;;  %v5259_v27 = vld [vmem:[#allocation23 + $0xae0] sm:$0xff] }
0x1ebc   :  { %7860 = vmatpush1.bf16.msra.mxu0 %v7859_v28  ;;  %v5221_v28 = vld [vmem:[#allocation23 + $0x9b0] sm:$0xff] }
0x1ebd   :  { %7862 = vmatprep.subr.bf16.mxu0 %v7861_v51  ;;  %v5224_v51 = vld [vmem:[#allocation23 + $0x9c8] sm:$0xff]  ;;  %v7895_v45 = vpack.c.bf16 %v5221_v28, %v5219_v41  ;;  %v5235_v41 = vld [vmem:[#allocation23 + $0xa20] sm:$0xff]  ;;  %v5237_v28 = vld [vmem:[#allocation23 + $0xa30] sm:$0xff] }
0x1ebe   :  { %v7897_v8 = vpack.c.bf16 %v5226_v53, %v5224_v51  ;;  %v5240_v51 = vld [vmem:[#allocation23 + $0xa48] sm:$0xff]  ;;  %v5242_v53 = vld [vmem:[#allocation23 + $0xa58] sm:$0xff] }
0x1ec0   :  { %7864 = vmatpush1.bf16.msra.mxu0 %v7863_v63  ;;  %v5225_v63 = vld [vmem:[#allocation23 + $0x9d0] sm:$0xff] }
0x1ec1   :  { %7866 = vmatprep.subr.bf16.mxu0 %v7865_v55  ;;  %v9987_v55 = vld [vmem:[#allocation21 + $0x8] sm:$0xff]  ;;  %v7899_v35 = vpack.c.bf16 %v5225_v63, %v5223_v21  ;;  %v5239_v21 = vld [vmem:[#allocation23 + $0xa40] sm:$0xff]  ;;  %v5241_v63 = vld [vmem:[#allocation23 + $0xa50] sm:$0xff] }
0x1ec2   :  { %v9991_v42 = vrot.slane %v9987_v55, %v9416_v40  ;;  %v9995_v23 = vrot.slane %v9987_v55, %v9413_v39 }
0x1ec4   :  { %7868 = vmatpush1.bf16.msra.mxu0 %v7867_v19  ;;  %v7901_v19 = vpack.c.bf16 %v5230_v12, %v5228_v10  ;;  %v5244_v10 = vld [vmem:[#allocation23 + $0xa68] sm:$0xff]  ;;  %v5246_v12 = vld [vmem:[#allocation23 + $0xa78] sm:$0xff] }
0x1ec5   :  { %7870 = vmatprep.subr.bf16.mxu0 %v7869_v9  ;;  %v5227_v9 = vld [vmem:[#allocation23 + $0x9e0] sm:$0xff] }
0x1ec6   :  { %v7903_v11 = vpack.c.bf16 %v5229_v37, %v5227_v9  ;;  %v5243_v9 = vld [vmem:[#allocation23 + $0xa60] sm:$0xff]  ;;  %v5245_v37 = vld [vmem:[#allocation23 + $0xa70] sm:$0xff] }
0x1ec8   :  { %7872 = vmatpush1.bf16.msra.mxu0 %v7871_v16 }
0x1ec9   :  { %7874 = vmatprep.subr.bf16.mxu0 %v7873_v60 }
0x1ecc   :  { %7876 = vmatpush1.bf16.msra.mxu0 %v7875_v49  ;;  %v7905_v49 = vpack.c.bf16 %v5234_v56, %v5232_v57  ;;  %v5248_v57 = vld [vmem:[#allocation23 + $0xa88] sm:$0xff]  ;;  %v5250_v56 = vld [vmem:[#allocation23 + $0xa98] sm:$0xff] }
0x1ecd   :  { %7878 = vmatprep.subr.bf16.mxu0 %v7877_v13 }
0x1ed0   :  { %7880 = vmatpush1.bf16.msra.mxu0 %v7879_v25 }
0x1ed1   :  { %7882 = vmatprep.subr.bf16.mxu0 %v7881_v36 }
0x1ed4   :  { %7884 = vmatpush1.bf16.msra.mxu0 %v7883_v59 }
0x1ed5   :  { %7886 = vmatprep.subr.bf16.mxu0 %v7885_v1 }
0x1ed8   :  { %7888 = vmatpush1.bf16.msra.mxu0 %v7887_v47 }
0x1ed9   :  { %7890 = vmatprep.subr.bf16.mxu0 %v7889_v0  ;;  %v5236_v0 = vld [vmem:[#allocation23 + $0xa28] sm:$0xff] }
0x1edc   :  { %7892 = vmatpush1.bf16.msra.mxu0 %v7891_v46 }
0x1edd   :  { %7894 = vmatprep.subr.bf16.mxu0 %v7893_v44  ;;  %v7909_v44 = vpack.c.bf16 %v5238_v2, %v5236_v0  ;;  %v5266_v0 = vld [vmem:[#allocation23 + $0xb18] sm:$0xff] }
0x1ee0   :  { %7896 = vmatpush1.bf16.msra.mxu0 %v7895_v45  ;;  %v7911_v45 = vpack.c.bf16 %v5237_v28, %v5235_v41 }
0x1ee1   :  { %7898 = vmatprep.subr.bf16.mxu0 %v7897_v8  ;;  %v7913_v8 = vpack.c.bf16 %v5242_v53, %v5240_v51  ;;  %v5267_v51 = vld [vmem:[#allocation23 + $0xb20] sm:$0xff]  ;;  %v5269_v53 = vld [vmem:[#allocation23 + $0xb30] sm:$0xff] }
0x1ee4   :  { %v4780_v16 = vpop.f32.mrb[20].mxu0  ;;  %v9997_v60 = vpop.f32.mrb[64].mxu1  ;;  %7900 = vmatpush1.bf16.msra.mxu0 %v7899_v35  ;;  %v7915_v35 = vpack.c.bf16 %v5241_v63, %v5239_v21  ;;  %v7943_v21 = vpack.c.bf16 %v5269_v53, %v5267_v51 }
0x1ee5   :  { %v4781_v15 = vadd.f32 %v4780_v16, %v9991_v42  ;;  %v4782_v6 = vpop.f32.mrb[21].mxu0  ;;  %v10000_v30 = vpop.f32.mrb[65].mxu1  ;;  %7902 = vmatprep.subr.bf16.mxu0 %v7901_v19  ;;  %v7917_v19 = vpack.c.bf16 %v5246_v12, %v5244_v10  ;;  %v7919_v16 = vpack.c.bf16 %v5245_v37, %v5243_v9  ;;  %v5271_v10 = vld [vmem:[#allocation23 + $0xb40] sm:$0xff]  ;;  %v5273_v12 = vld [vmem:[#allocation23 + $0xb50] sm:$0xff] }
0x1ee6   :  { %v4783_v13 = vadd.f32 %v4782_v6, %v9995_v23  ;;  %v5249_v6 = vld [vmem:[#allocation23 + $0xa90] sm:$0xff]  ;;  %v7947_v9 = vpack.c.bf16 %v5273_v12, %v5271_v10 }
0x1ee7   :  { %v5038_v14 = vmul.f32 0.044715, %v4781_v15  ;;  %v5022_v4 = vmul.f32 0.5, %v4781_v15 }
0x1ee8   :  { %v5039_v32 = vmul.f32 0.044715, %v4783_v13  ;;  %7904 = vmatpush1.bf16.msra.mxu0 %v7903_v11  ;;  %v5023_v54 = vmul.f32 0.5, %v4783_v13  ;;  %v7921_v11 = vpack.c.bf16 %v5250_v56, %v5248_v57  ;;  %v5275_v57 = vld [vmem:[#allocation23 + $0xb60] sm:$0xff]  ;;  %v5277_v56 = vld [vmem:[#allocation23 + $0xb70] sm:$0xff] }
0x1ee9   :  { %v5054_v33 = vmul.f32 %v5038_v14, %v4781_v15  ;;  %7906 = vmatprep.subr.bf16.mxu0 %v7905_v49  ;;  %v5252_v49 = vld [vmem:[#allocation23 + $0xaa8] sm:$0xff] }
0x1eea   :  { %v5055_v24 = vmul.f32 %v5039_v32, %v4783_v13 }
0x1eeb   :  { %v5070_v25 = vmul.f32 %v5054_v33, %v4781_v15  ;;  %v5251_v33 = vld [vmem:[#allocation23 + $0xaa0] sm:$0xff] }
0x1eec   :  { %v5071_v36 = vmul.f32 %v5055_v24, %v4783_v13  ;;  %v5253_v24 = vld [vmem:[#allocation23 + $0xab0] sm:$0xff] }
0x1eed   :  { %v5086_v5 = vadd.f32 %v5070_v25, %v4781_v15  ;;  %v5247_v15 = vld [vmem:[#allocation23 + $0xa80] sm:$0xff]  ;;  %v5256_v25 = vld [vmem:[#allocation23 + $0xac8] sm:$0xff] }
0x1eee   :  { %v5087_v26 = vadd.f32 %v5071_v36, %v4783_v13  ;;  %v5254_v13 = vld [vmem:[#allocation23 + $0xab8] sm:$0xff]  ;;  %v7923_v14 = vpack.c.bf16 %v5249_v6, %v5247_v15  ;;  %v7951_v15 = vpack.c.bf16 %v5277_v56, %v5275_v57 }
0x1eef   :  { %v5102_v18 = vmul.f32 0.7978846, %v5086_v5  ;;  %v7925_v32 = vpack.c.bf16 %v5254_v13, %v5252_v49  ;;  %v5258_v36 = vld [vmem:[#allocation23 + $0xad8] sm:$0xff]  ;;  %v7927_v5 = vpack.c.bf16 %v5253_v24, %v5251_v33  ;;  %v5279_v49 = vld [vmem:[#allocation23 + $0xb80] sm:$0xff]  ;;  %v5281_v13 = vld [vmem:[#allocation23 + $0xb90] sm:$0xff] }
0x1ef0   :  { %v5103_v29 = vmul.f32 0.7978846, %v5087_v26  ;;  %v7929_v26 = vpack.c.bf16 %v5258_v36, %v5256_v25  ;;  %v7955_v33 = vpack.c.bf16 %v5281_v13, %v5279_v49  ;;  %v5283_v25 = vld [vmem:[#allocation23 + $0xba0] sm:$0xff]  ;;  %v5285_v36 = vld [vmem:[#allocation23 + $0xbb0] sm:$0xff] }
0x1ef1   :  { %8436 = vtanh.f32 %v5102_v18  ;;  %v5255_v18 = vld [vmem:[#allocation23 + $0xac0] sm:$0xff] }
0x1ef2   :  { %8438 = vtanh.f32 %v5103_v29  ;;  %v5257_v29 = vld [vmem:[#allocation23 + $0xad0] sm:$0xff] }
0x1efb   :  { %v8437_v59 = vpop.eup %8436 }
0x1efc   :  { %v8439_v1 = vpop.eup %8438  ;;  %v5134_v17 = vadd.f32 1.0, %v8437_v59  ;;  %v5260_v59 = vld [vmem:[#allocation23 + $0xae8] sm:$0xff] }
0x1efd   :  { %v5135_v47 = vadd.f32 1.0, %v8439_v1  ;;  %v5262_v1 = vld [vmem:[#allocation23 + $0xaf8] sm:$0xff] }
0x1efe   :  { %v5150_v46 = vmul.f32 %v5134_v17, %v5022_v4  ;;  %v7931_v17 = vpack.c.bf16 %v5257_v29, %v5255_v18  ;;  %v7933_v52 = vpack.c.bf16 %v5262_v1, %v5260_v59  ;;  %v7959_v18 = vpack.c.bf16 %v5285_v36, %v5283_v25  ;;  %v5287_v59 = vld [vmem:[#allocation23 + $0xbc0] sm:$0xff]  ;;  %v5289_v1 = vld [vmem:[#allocation23 + $0xbd0] sm:$0xff] }
0x1eff   :  { %v5151_v61 = vmul.f32 %v5135_v47, %v5023_v54  ;;  %v5261_v54 = vld [vmem:[#allocation23 + $0xaf0] sm:$0xff]  ;;  %v5264_v47 = vld [vmem:[#allocation23 + $0xb08] sm:$0xff] }
0x1f00   :  { %v7935_v2 = vpack.c.bf16 %v5261_v54, %v5259_v27  ;;  %v7937_v4 = vpack.c.bf16 %v5266_v0, %v5264_v47  ;;  %v7963_v27 = vpack.c.bf16 %v5289_v1, %v5287_v59  ;;  %v5291_v47 = vld [vmem:[#allocation23 + $0xbe0] sm:$0xff]  ;;  %v5293_v0 = vld [vmem:[#allocation23 + $0xbf0] sm:$0xff] }
0x1f01   :  { %5500 = vmatprep.mubr.f32.mxu0 %v5151_v61  ;;  %v5263_v61 = vld [vmem:[#allocation23 + $0xb00] sm:$0xff] }
0x1f02   :  { %5501 = vmatmul.mubr.f32.vlgmr.msra.gmra.mrb[28].mxu0 %v5150_v46  ;;  %v5268_v46 = vld [vmem:[#allocation23 + $0xb28] sm:$0xff] }
0x1f03   :  { %7908 = vmatpush1.bf16.msra.mxu0 %v7907_v31  ;;  %v5265_v31 = vld [vmem:[#allocation23 + $0xb10] sm:$0xff] }
0x1f04   :  { %7910 = vmatprep.subr.bf16.mxu0 %v7909_v44  ;;  %v5270_v44 = vld [vmem:[#allocation23 + $0xb38] sm:$0xff]  ;;  %v7939_v41 = vpack.c.bf16 %v5265_v31, %v5263_v61  ;;  %v7967_v61 = vpack.c.bf16 %v5293_v0, %v5291_v47 }
0x1f05   :  { %v7941_v28 = vpack.c.bf16 %v5270_v44, %v5268_v46  ;;  %v4689_v46 = vrot.slane %v9987_v55, %v9455_v43  ;;  %v4685_v44 = vrot.slane %v9987_v55, %v9450_v34 }
0x1f07   :  { %7912 = vmatpush1.bf16.msra.mxu0 %v7911_v45  ;;  %v5272_v45 = vld [vmem:[#allocation23 + $0xb48] sm:$0xff] }
0x1f08   :  { %7914 = vmatprep.subr.bf16.mxu0 %v7913_v8  ;;  %v5274_v8 = vld [vmem:[#allocation23 + $0xb58] sm:$0xff] }
0x1f09   :  { %v7945_v63 = vpack.c.bf16 %v5274_v8, %v5272_v45 }
0x1f0b   :  { %7916 = vmatpush1.bf16.msra.mxu0 %v7915_v35  ;;  %v5276_v35 = vld [vmem:[#allocation23 + $0xb68] sm:$0xff] }
0x1f0c   :  { %7918 = vmatprep.subr.bf16.mxu0 %v7917_v19  ;;  %v5278_v19 = vld [vmem:[#allocation23 + $0xb78] sm:$0xff] }
0x1f0d   :  { %v7949_v37 = vpack.c.bf16 %v5278_v19, %v5276_v35 }
0x1f0f   :  { %7920 = vmatpush1.bf16.msra.mxu0 %v7919_v16  ;;  %v5280_v16 = vld [vmem:[#allocation23 + $0xb88] sm:$0xff] }
0x1f10   :  { %7922 = vmatprep.subr.bf16.mxu0 %v7921_v11  ;;  %v5282_v11 = vld [vmem:[#allocation23 + $0xb98] sm:$0xff] }
0x1f11   :  { %v7953_v6 = vpack.c.bf16 %v5282_v11, %v5280_v16 }
0x1f13   :  { %7924 = vmatpush1.bf16.msra.mxu0 %v7923_v14  ;;  %v5284_v14 = vld [vmem:[#allocation23 + $0xba8] sm:$0xff] }
0x1f14   :  { %7926 = vmatprep.subr.bf16.mxu0 %v7925_v32  ;;  %v5286_v32 = vld [vmem:[#allocation23 + $0xbb8] sm:$0xff] }
0x1f15   :  { %v7957_v24 = vpack.c.bf16 %v5286_v32, %v5284_v14 }
0x1f17   :  { %7928 = vmatpush1.bf16.msra.mxu0 %v7927_v5  ;;  %v5288_v5 = vld [vmem:[#allocation23 + $0xbc8] sm:$0xff] }
0x1f18   :  { %7930 = vmatprep.subr.bf16.mxu0 %v7929_v26  ;;  %v5290_v26 = vld [vmem:[#allocation23 + $0xbd8] sm:$0xff] }
0x1f19   :  { %v7961_v29 = vpack.c.bf16 %v5290_v26, %v5288_v5 }
0x1f1b   :  { %7932 = vmatpush1.bf16.msra.mxu0 %v7931_v17  ;;  %v5292_v17 = vld [vmem:[#allocation23 + $0xbe8] sm:$0xff] }
0x1f1c   :  { %7934 = vmatprep.subr.bf16.mxu0 %v7933_v52  ;;  %v5294_v52 = vld [vmem:[#allocation23 + $0xbf8] sm:$0xff] }
0x1f1d   :  { %v7965_v54 = vpack.c.bf16 %v5294_v52, %v5292_v17 }
0x1f1f   :  { %7936 = vmatpush1.bf16.msra.mxu0 %v7935_v2  ;;  %v5296_v2 = vld [vmem:[#allocation23 + $0xc08] sm:$0xff] }
0x1f20   :  { %7938 = vmatprep.subr.bf16.mxu0 %v7937_v4  ;;  %v5298_v4 = vld [vmem:[#allocation23 + $0xc18] sm:$0xff] }
0x1f21   :  { %v7969_v31 = vpack.c.bf16 %v5298_v4, %v5296_v2 }
0x1f23   :  { %7940 = vmatpush1.bf16.msra.mxu0 %v7939_v41  ;;  %v10008_v41 = vadd.f32 %v10000_v30, %v4689_v46 }
0x1f24   :  { %7942 = vmatprep.subr.bf16.mxu0 %v7941_v28  ;;  %v10011_v28 = vadd.f32 %v9997_v60, %v4685_v44  ;;  %v10021_v60 = vrot.slane %v9987_v55, %v9475_v62 }
0x1f25   :  { %v5041_v51 = vmul.f32 0.044715, %v10008_v41 }
0x1f26   :  { %v5040_v53 = vmul.f32 0.044715, %v10011_v28 }
0x1f27   :  { %7944 = vmatpush1.bf16.msra.mxu0 %v7943_v21  ;;  %v5057_v45 = vmul.f32 %v5041_v51, %v10008_v41 }
0x1f28   :  { %7946 = vmatprep.subr.bf16.mxu0 %v7945_v63  ;;  %v5056_v34 = vmul.f32 %v5040_v53, %v10011_v28 }
0x1f29   :  { %v5073_v19 = vmul.f32 %v5057_v45, %v10008_v41 }
0x1f2b   :  { %7948 = vmatpush1.bf16.msra.mxu0 %v7947_v9  ;;  %v5089_v49 = vadd.f32 %v5073_v19, %v10008_v41 }
0x1f2c   :  { %7950 = vmatprep.subr.bf16.mxu0 %v7949_v37 }
0x1f2f   :  { %7952 = vmatpush1.bf16.msra.mxu0 %v7951_v15 }
0x1f30   :  { %7954 = vmatprep.subr.bf16.mxu0 %v7953_v6 }
0x1f33   :  { %7956 = vmatpush1.bf16.msra.mxu0 %v7955_v33 }
0x1f34   :  { %7958 = vmatprep.subr.bf16.mxu0 %v7957_v24 }
0x1f37   :  { %7960 = vmatpush1.bf16.msra.mxu0 %v7959_v18 }
0x1f38   :  { %7962 = vmatprep.subr.bf16.mxu0 %v7961_v29  ;;  %v5105_v29 = vmul.f32 0.7978846, %v5089_v49  ;;  %v5295_v49 = vld [vmem:[#allocation23 + $0xc00] sm:$0xff] }
0x1f3a   :  { %8440 = vtanh.f32 %v5105_v29  ;;  %v5024_v29 = vmul.f32 0.5, %v10011_v28 }
0x1f3b   :  { %7964 = vmatpush1.bf16.msra.mxu0 %v7963_v27 }
0x1f3c   :  { %7966 = vmatprep.subr.bf16.mxu0 %v7965_v54 }
0x1f3f   :  { %7968 = vmatpush1.bf16.msra.mxu0 %v7967_v61 }
0x1f40   :  { %7970 = vmatprep.subr.bf16.mxu0 %v7969_v31 }
0x1f44   :  { %v8441_v45 = vpop.eup %8440 }
0x1f45   :  { %v5137_v19 = vadd.f32 1.0, %v8441_v45  ;;  %v5310_v45 = vld [vmem:[#allocation23 + $0xc78] sm:$0xff] }
0x1f79   :  { %v4786_v8 = vpop.f32.mrb[22].mxu0  ;;  %v4863_v21 = vpop.f32.mrb[66].mxu1 }
0x1f7a   :  { %v4787_v63 = vadd.f32 %v4786_v8, %v9991_v42  ;;  %v4788_v43 = vpop.f32.mrb[23].mxu0  ;;  %v4865_v10 = vpop.f32.mrb[67].mxu1  ;;  %v10026_v9 = vadd.f32 %v4863_v21, %v4685_v44 }
0x1f7b   :  { %v4789_v30 = vadd.f32 %v4788_v43, %v9995_v23  ;;  %v10023_v35 = vadd.f32 %v4865_v10, %v4689_v46  ;;  %v5072_v23 = vmul.f32 %v5056_v34, %v10011_v28 }
0x1f7c   :  { %v5046_v12 = vmul.f32 0.044715, %v4787_v63  ;;  %v5048_v13 = vmul.f32 0.044715, %v10026_v9 }
0x1f7d   :  { %v5047_v37 = vmul.f32 0.044715, %v4789_v30  ;;  %v10028_v57 = vpop.f32.mrb[24].mxu0  ;;  %v10030_v42 = vpop.f32.mrb[68].mxu1  ;;  %v5049_v6 = vmul.f32 0.044715, %v10023_v35  ;;  %v5088_v5 = vadd.f32 %v5072_v23, %v10011_v28 }
0x1f7e   :  { %v4936_v56 = vpop.f32.mrb[25].mxu0  ;;  %v10032_v16 = vpop.f32.mrb[69].mxu1  ;;  %v5062_v11 = vmul.f32 %v5046_v12, %v4787_v63  ;;  %v5064_v59 = vmul.f32 %v5048_v13, %v10026_v9  ;;  %v5031_v21 = vmul.f32 0.5, %v4789_v30  ;;  %v5297_v13 = vld [vmem:[#allocation23 + $0xc10] sm:$0xff] }
0x1f7f   :  { %v5063_v62 = vmul.f32 %v5047_v37, %v4789_v30  ;;  %v10036_v15 = vadd.f32 %v4936_v56, %v10021_v60  ;;  %v5065_v18 = vmul.f32 %v5049_v6, %v10023_v35  ;;  %v5104_v52 = vmul.f32 0.7978846, %v5088_v5 }
0x1f80   :  { %v5078_v26 = vmul.f32 %v5062_v11, %v4787_v63  ;;  %v5080_v2 = vmul.f32 %v5064_v59, %v10026_v9  ;;  %v5030_v37 = vmul.f32 0.5, %v4787_v63  ;;  %v5025_v11 = vmul.f32 0.5, %v10008_v41 }
0x1f81   :  { %v10041_v14 = vpop.f32.mrb[26].mxu0  ;;  %v10043_v32 = vpop.f32.mrb[70].mxu1  ;;  %v5079_v33 = vmul.f32 %v5063_v62, %v4789_v30  ;;  %v5043_v24 = vmul.f32 0.044715, %v10036_v15  ;;  %v5081_v47 = vmul.f32 %v5065_v18, %v10023_v35  ;;  %v5033_v59 = vmul.f32 0.5, %v10023_v35 }
0x1f82   :  { %v10046_v25 = vpop.f32.mrb[27].mxu0  ;;  %v10048_v36 = vpop.f32.mrb[71].mxu1  ;;  %v5094_v54 = vadd.f32 %v5078_v26, %v4787_v63  ;;  %v5096_v31 = vadd.f32 %v5080_v2, %v10026_v9  ;;  %v5300_v26 = vld [vmem:[#allocation23 + $0xc28] sm:$0xff]  ;;  %v7971_v63 = vpack.c.bf16 %v5297_v13, %v5295_v49  ;;  %v5306_v2 = vld [vmem:[#allocation23 + $0xc58] sm:$0xff]  ;;  %v5317_v49 = vld [vmem:[#allocation23 + $0xcb0] sm:$0xff] }
0x1f83   :  { %v5095_v1 = vadd.f32 %v5079_v33, %v4789_v30  ;;  %v5059_v17 = vmul.f32 %v5043_v24, %v10036_v15  ;;  %v5097_v4 = vadd.f32 %v5081_v47, %v10023_v35  ;;  %v5153_v24 = vmul.f32 %v5137_v19, %v5025_v11  ;;  %v5302_v30 = vld [vmem:[#allocation23 + $0xc38] sm:$0xff]  ;;  %v5311_v19 = vld [vmem:[#allocation23 + $0xc80] sm:$0xff]  ;;  %v5320_v13 = vld [vmem:[#allocation23 + $0xcc8] sm:$0xff] }
0x1f84   :  { %v5110_v0 = vmul.f32 0.7978846, %v5094_v54  ;;  %v5112_v51 = vmul.f32 0.7978846, %v5096_v31 }
0x1f85   :  { %v5111_v27 = vmul.f32 0.7978846, %v5095_v1  ;;  %v5075_v61 = vmul.f32 %v5059_v17, %v10036_v15  ;;  %v5113_v46 = vmul.f32 0.7978846, %v5097_v4  ;;  %v7973_v17 = vpack.c.bf16 %v5302_v30, %v5300_v26  ;;  %v5319_v30 = vld [vmem:[#allocation23 + $0xcc0] sm:$0xff] }
0x1f86   :  { %v5032_v4 = vmul.f32 0.5, %v10026_v9  ;;  %v5307_v9 = vld [vmem:[#allocation23 + $0xc60] sm:$0xff] }
0x1f87   :  { %8442 = vtanh.f32 %v5111_v27  ;;  %v5091_v44 = vadd.f32 %v5075_v61, %v10036_v15  ;;  %v5301_v27 = vld [vmem:[#allocation23 + $0xc30] sm:$0xff]  ;;  %v5027_v61 = vmul.f32 0.5, %v10036_v15 }
0x1f88   :  { %8444 = vtanh.f32 %v5104_v52  ;;  %v5299_v52 = vld [vmem:[#allocation23 + $0xc20] sm:$0xff] }
0x1f89   :  { %8446 = vtanh.f32 %v5110_v0  ;;  %v5107_v53 = vmul.f32 0.7978846, %v5091_v44  ;;  %v5304_v0 = vld [vmem:[#allocation23 + $0xc48] sm:$0xff]  ;;  %v7975_v28 = vpack.c.bf16 %v5301_v27, %v5299_v52  ;;  %v5305_v44 = vld [vmem:[#allocation23 + $0xc50] sm:$0xff]  ;;  %v5323_v52 = vld [vmem:[#allocation23 + $0xce0] sm:$0xff] }
0x1f8a   :  { %8448 = vtanh.f32 %v5113_v46  ;;  %v7977_v35 = vpack.c.bf16 %v5306_v2, %v5304_v0  ;;  %v5303_v46 = vld [vmem:[#allocation23 + $0xc40] sm:$0xff]  ;;  %v5325_v27 = vld [vmem:[#allocation23 + $0xcf0] sm:$0xff] }
0x1f8b   :  { %8450 = vtanh.f32 %v5112_v51  ;;  %v7999_v2 = vpack.c.bf16 %v5325_v27, %v5323_v52  ;;  %v5345_v52 = vld [vmem:[#allocation23 + $0xd90] sm:$0xff] }
0x1f8c   :  { %8452 = vtanh.f32 %v5107_v53  ;;  %v5308_v53 = vld [vmem:[#allocation23 + $0xc68] sm:$0xff] }
0x1f91   :  { %v8443_v8 = vpop.eup %8442 }
0x1f92   :  { %v5143_v43 = vadd.f32 1.0, %v8443_v8  ;;  %v8445_v10 = vpop.eup %8444  ;;  %v7979_v8 = vpack.c.bf16 %v5305_v44, %v5303_v46 }
0x1f93   :  { %v8447_v34 = vpop.eup %8446  ;;  %v5136_v6 = vadd.f32 1.0, %v8445_v10  ;;  %v5312_v10 = vld [vmem:[#allocation23 + $0xc88] sm:$0xff] }
0x1f94   :  { %v5159_v12 = vmul.f32 %v5143_v43, %v5031_v21  ;;  %v5142_v56 = vadd.f32 1.0, %v8447_v34  ;;  %v8449_v23 = vpop.eup %8448  ;;  %v7981_v21 = vpack.c.bf16 %v5310_v45, %v5308_v53  ;;  %v5309_v43 = vld [vmem:[#allocation23 + $0xc70] sm:$0xff]  ;;  %v5314_v34 = vld [vmem:[#allocation23 + $0xc98] sm:$0xff]  ;;  %v5331_v53 = vld [vmem:[#allocation23 + $0xd20] sm:$0xff] }
0x1f95   :  { %v8451_v33 = vpop.eup %8450  ;;  %v5145_v5 = vadd.f32 1.0, %v8449_v23  ;;  %v5152_v1 = vmul.f32 %v5136_v6, %v5024_v29  ;;  %v7983_v15 = vpack.c.bf16 %v5309_v43, %v5307_v9  ;;  %v5318_v23 = vld [vmem:[#allocation23 + $0xcb8] sm:$0xff]  ;;  %v5315_v6 = vld [vmem:[#allocation23 + $0xca0] sm:$0xff]  ;;  %v5324_v29 = vld [vmem:[#allocation23 + $0xce8] sm:$0xff] }
0x1f96   :  { %5506 = vmatprep.mubr.f32.mxu0 %v5159_v12  ;;  %v5158_v62 = vmul.f32 %v5142_v56, %v5030_v37  ;;  %v8453_v18 = vpop.eup %8452  ;;  %v5144_v41 = vadd.f32 1.0, %v8451_v33  ;;  %v7985_v12 = vpack.c.bf16 %v5314_v34, %v5312_v10  ;;  %v5313_v37 = vld [vmem:[#allocation23 + $0xc90] sm:$0xff]  ;;  %v5316_v56 = vld [vmem:[#allocation23 + $0xca8] sm:$0xff]  ;;  %v5322_v33 = vld [vmem:[#allocation23 + $0xcd8] sm:$0xff] }
0x1f97   :  { %v5161_v54 = vmul.f32 %v5145_v5, %v5033_v59  ;;  %v5139_v47 = vadd.f32 1.0, %v8453_v18  ;;  %v7987_v11 = vpack.c.bf16 %v5313_v37, %v5311_v19  ;;  %v7991_v5 = vpack.c.bf16 %v5317_v49, %v5315_v6  ;;  %v5321_v18 = vld [vmem:[#allocation23 + $0xcd0] sm:$0xff] }
0x1f98   :  { %5507 = vmatmul.mubr.f32.gmra.mrb[30].mxu0 %v5158_v62  ;;  %v5160_v31 = vmul.f32 %v5144_v41, %v5032_v4  ;;  %v7989_v62 = vpack.c.bf16 %v5318_v23, %v5316_v56  ;;  %v7993_v26 = vpack.c.bf16 %v5322_v33, %v5320_v13  ;;  %v5327_v4 = vld [vmem:[#allocation23 + $0xd00] sm:$0xff]  ;;  %v5333_v45 = vld [vmem:[#allocation23 + $0xd30] sm:$0xff]  ;;  %v5340_v56 = vld [vmem:[#allocation23 + $0xd68] sm:$0xff] }
0x1f99   :  { %5577 = vmatprep.mubr.f32.mxu0 %v5153_v24  ;;  %v5155_v51 = vmul.f32 %v5139_v47, %v5027_v61  ;;  %v4693_v24 = vrot.slane %v9987_v55, %v9471_v58  ;;  %v10077_v58 = vadd.f32 %v10046_v25, %v10021_v60  ;;  %v5330_v47 = vld [vmem:[#allocation23 + $0xd18] sm:$0xff]  ;;  %v5332_v61 = vld [vmem:[#allocation23 + $0xd28] sm:$0xff]  ;;  %v8007_v10 = vpack.c.bf16 %v5333_v45, %v5331_v53  ;;  %v5337_v19 = vld [vmem:[#allocation23 + $0xd50] sm:$0xff] }
0x1f9a   :  { %v5342_v23 = vld [vmem:[#allocation23 + $0xd78] sm:$0xff]  ;;  %v5339_v13 = vld [vmem:[#allocation23 + $0xd60] sm:$0xff]  ;;  %v5341_v33 = vld [vmem:[#allocation23 + $0xd70] sm:$0xff] }
0x1f9b   :  { %v10068_v59 = vadd.f32 %v10028_v57, %v4693_v24  ;;  %v10081_v0 = vadd.f32 %v10041_v14, %v4693_v24  ;;  %v5051_v60 = vmul.f32 0.044715, %v10077_v58  ;;  %v8013_v49 = vpack.c.bf16 %v5342_v23, %v5340_v56  ;;  %v5358_v53 = vld [vmem:[#allocation23 + $0xdf8] sm:$0xff]  ;;  %v5359_v56 = vld [vmem:[#allocation23 + $0xe00] sm:$0xff]  ;;  %v5361_v23 = vld [vmem:[#allocation23 + $0xe10] sm:$0xff] }
0x1f9c   :  { %5578 = vmatmul.mubr.f32.vlgmr.msra.gmra.mrb[28].mxu0 %v5152_v1  ;;  %v7995_v1 = vpack.c.bf16 %v5321_v18, %v5319_v30  ;;  %v5346_v30 = vld [vmem:[#allocation23 + $0xd98] sm:$0xff] }
0x1f9d   :  { %7972 = vmatpush1.bf16.msra.mxu0 %v7971_v63  ;;  %5583 = vmatprep.mubr.f32.mxu0 %v5161_v54  ;;  %v5326_v63 = vld [vmem:[#allocation23 + $0xcf8] sm:$0xff]  ;;  %v5328_v54 = vld [vmem:[#allocation23 + $0xd08] sm:$0xff]  ;;  %v5042_v57 = vmul.f32 0.044715, %v10068_v59  ;;  %v5050_v46 = vmul.f32 0.044715, %v10081_v0 }
0x1f9e   :  { %7974 = vmatprep.subr.bf16.mxu0 %v7973_v17  ;;  %v10073_v17 = vrot.slane %v9987_v55, %v1988_v7  ;;  %v7997_v41 = vpack.c.bf16 %v5326_v63, %v5324_v29  ;;  %v8001_v25 = vpack.c.bf16 %v5330_v47, %v5328_v54  ;;  %v8015_v29 = vpack.c.bf16 %v5341_v33, %v5339_v13  ;;  %v5348_v47 = vld [vmem:[#allocation23 + $0xda8] sm:$0xff] }
0x1f9f   :  { %v5066_v43 = vmul.f32 %v5050_v46, %v10081_v0  ;;  %v5026_v33 = vmul.f32 0.5, %v10068_v59 }
0x1fa0   :  { %5584 = vmatmul.mubr.f32.gmra.mrb[30].mxu0 %v5160_v31  ;;  %v10085_v7 = vadd.f32 %v10032_v16, %v10073_v17  ;;  %v5334_v31 = vld [vmem:[#allocation23 + $0xd38] sm:$0xff] }
0x1fa1   :  { %7976 = vmatpush1.bf16.msra.mxu0 %v7975_v28  ;;  %5654 = vmatprep.mubr.f32.mxu0 %v5155_v51  ;;  %v5329_v28 = vld [vmem:[#allocation23 + $0xd10] sm:$0xff]  ;;  %v5067_v51 = vmul.f32 %v5051_v60, %v10077_v58  ;;  %v8005_v16 = vpack.c.bf16 %v5334_v31, %v5332_v61  ;;  %v5082_v6 = vmul.f32 %v5066_v43, %v10081_v0  ;;  %v5352_v31 = vld [vmem:[#allocation23 + $0xdc8] sm:$0xff] }
0x1fa2   :  { %7978 = vmatprep.subr.bf16.mxu0 %v7977_v35  ;;  %v5058_v35 = vmul.f32 %v5042_v57, %v10068_v59  ;;  %v8003_v14 = vpack.c.bf16 %v5329_v28, %v5327_v4  ;;  %v5045_v44 = vmul.f32 0.044715, %v10085_v7  ;;  %v5350_v57 = vld [vmem:[#allocation23 + $0xdb8] sm:$0xff]  ;;  %v5347_v4 = vld [vmem:[#allocation23 + $0xda0] sm:$0xff]  ;;  %v5349_v28 = vld [vmem:[#allocation23 + $0xdb0] sm:$0xff] }
0x1fa3   :  { %v5083_v37 = vmul.f32 %v5067_v51, %v10077_v58  ;;  %v5098_v63 = vadd.f32 %v5082_v6, %v10081_v0  ;;  %v8023_v46 = vpack.c.bf16 %v5349_v28, %v5347_v4  ;;  %v5353_v51 = vld [vmem:[#allocation23 + $0xdd0] sm:$0xff]  ;;  %v5364_v6 = vld [vmem:[#allocation23 + $0xe28] sm:$0xff]  ;;  %v5374_v28 = vld [vmem:[#allocation23 + $0xe78] sm:$0xff] }
0x1fa4   :  { %v5074_v9 = vmul.f32 %v5058_v35, %v10068_v59  ;;  %v5061_v34 = vmul.f32 %v5045_v44, %v10085_v7  ;;  %v5354_v35 = vld [vmem:[#allocation23 + $0xdd8] sm:$0xff]  ;;  %v5351_v44 = vld [vmem:[#allocation23 + $0xdc0] sm:$0xff]  ;;  %v5372_v4 = vld [vmem:[#allocation23 + $0xe68] sm:$0xff] }
0x1fa5   :  { %7980 = vmatpush1.bf16.msra.mxu0 %v7979_v8  ;;  %v5336_v8 = vld [vmem:[#allocation23 + $0xd48] sm:$0xff]  ;;  %v5099_v24 = vadd.f32 %v5083_v37, %v10077_v58  ;;  %v5114_v60 = vmul.f32 0.7978846, %v5098_v63  ;;  %v8027_v45 = vpack.c.bf16 %v5353_v51, %v5351_v44  ;;  %v5365_v63 = vld [vmem:[#allocation23 + $0xe30] sm:$0xff]  ;;  %v5375_v51 = vld [vmem:[#allocation23 + $0xe80] sm:$0xff] }
0x1fa6   :  { %7982 = vmatprep.subr.bf16.mxu0 %v7981_v21  ;;  %v5338_v21 = vld [vmem:[#allocation23 + $0xd58] sm:$0xff] }
0x1fa7   :  { %v5115_v27 = vmul.f32 0.7978846, %v5099_v24  ;;  %v5035_v24 = vmul.f32 0.5, %v10077_v58 }
0x1fa9   :  { %7984 = vmatpush1.bf16.msra.mxu0 %v7983_v15  ;;  %v8009_v15 = vpack.c.bf16 %v5338_v21, %v5336_v8  ;;  %v5355_v21 = vld [vmem:[#allocation23 + $0xde0] sm:$0xff] }
0x1faa   :  { %7986 = vmatprep.subr.bf16.mxu0 %v7985_v12  ;;  %v5335_v12 = vld [vmem:[#allocation23 + $0xd40] sm:$0xff] }
0x1fad   :  { %7988 = vmatpush1.bf16.msra.mxu0 %v7987_v11  ;;  %v5090_v11 = vadd.f32 %v5074_v9, %v10068_v59  ;;  %v5357_v9 = vld [vmem:[#allocation23 + $0xdf0] sm:$0xff] }
0x1fae   :  { %7990 = vmatprep.subr.bf16.mxu0 %v7989_v62  ;;  %v8011_v62 = vpack.c.bf16 %v5337_v19, %v5335_v12  ;;  %v8031_v12 = vpack.c.bf16 %v5357_v9, %v5355_v21  ;;  %v5379_v9 = vld [vmem:[#allocation23 + $0xea0] sm:$0xff] }
0x1faf   :  { %v5106_v18 = vmul.f32 0.7978846, %v5090_v11 }
0x1fb1   :  { %7992 = vmatpush1.bf16.msra.mxu0 %v7991_v5  ;;  %v5077_v5 = vmul.f32 %v5061_v34, %v10085_v7  ;;  %8454 = vtanh.f32 %v5106_v18  ;;  %v5362_v34 = vld [vmem:[#allocation23 + $0xe18] sm:$0xff] }
0x1fb2   :  { %7994 = vmatprep.subr.bf16.mxu0 %v7993_v26  ;;  %v5344_v26 = vld [vmem:[#allocation23 + $0xd88] sm:$0xff]  ;;  %8456 = vtanh.f32 %v5115_v27  ;;  %v5370_v27 = vld [vmem:[#allocation23 + $0xe58] sm:$0xff] }
0x1fb3   :  { %v5093_v54 = vadd.f32 %v5077_v5, %v10085_v7  ;;  %8458 = vtanh.f32 %v5114_v60  ;;  %v8035_v5 = vpack.c.bf16 %v5361_v23, %v5359_v56  ;;  %v5369_v60 = vld [vmem:[#allocation23 + $0xe50] sm:$0xff]  ;;  %v5388_v23 = vld [vmem:[#allocation23 + $0xee8] sm:$0xff] }
0x1fb4   :  { %v5385_v56 = vld [vmem:[#allocation23 + $0xed0] sm:$0xff] }
0x1fb5   :  { %7996 = vmatpush1.bf16.msra.mxu0 %v7995_v1  ;;  %v8017_v1 = vpack.c.bf16 %v5346_v30, %v5344_v26  ;;  %v5109_v61 = vmul.f32 0.7978846, %v5093_v54  ;;  %v5034_v54 = vmul.f32 0.5, %v10081_v0  ;;  %v5371_v0 = vld [vmem:[#allocation23 + $0xe60] sm:$0xff] }
0x1fb6   :  { %7998 = vmatprep.subr.bf16.mxu0 %v7997_v41  ;;  %v5343_v41 = vld [vmem:[#allocation23 + $0xd80] sm:$0xff] }
0x1fb7   :  { %8460 = vtanh.f32 %v5109_v61 }
0x1fb9   :  { %8000 = vmatpush1.bf16.msra.mxu0 %v7999_v2  ;;  %v8019_v2 = vpack.c.bf16 %v5345_v52, %v5343_v41  ;;  %v5368_v52 = vld [vmem:[#allocation23 + $0xe48] sm:$0xff] }
0x1fba   :  { %8002 = vmatprep.subr.bf16.mxu0 %v8001_v25  ;;  %v8021_v25 = vpack.c.bf16 %v5350_v57, %v5348_v47  ;;  %v5029_v47 = vmul.f32 0.5, %v10085_v7  ;;  %v8041_v57 = vpack.c.bf16 %v5370_v27, %v5368_v52  ;;  %v5395_v27 = vld [vmem:[#allocation23 + $0xf20] sm:$0xff] }
0x1fbb   :  { %v8455_v43 = vpop.eup %8454 }
0x1fbc   :  { %v5138_v19 = vadd.f32 1.0, %v8455_v43  ;;  %v5381_v43 = vld [vmem:[#allocation23 + $0xeb0] sm:$0xff] }
0x1fbd   :  { %8004 = vmatpush1.bf16.msra.mxu0 %v8003_v14  ;;  %v8025_v14 = vpack.c.bf16 %v5354_v35, %v5352_v31  ;;  %v8045_v31 = vpack.c.bf16 %v5374_v28, %v5372_v4  ;;  %v5373_v35 = vld [vmem:[#allocation23 + $0xe70] sm:$0xff] }
0x1fbe   :  { %8006 = vmatprep.subr.bf16.mxu0 %v8005_v16  ;;  %v5356_v16 = vld [vmem:[#allocation23 + $0xde8] sm:$0xff]  ;;  %v5154_v26 = vmul.f32 %v5138_v19, %v5026_v33  ;;  %v8047_v7 = vpack.c.bf16 %v5373_v35, %v5371_v0  ;;  %v5394_v33 = vld [vmem:[#allocation23 + $0xf18] sm:$0xff]  ;;  %v5401_v4 = vld [vmem:[#allocation23 + $0xf50] sm:$0xff] }
0x1fbf   :  { %v8029_v8 = vpack.c.bf16 %v5358_v53, %v5356_v16  ;;  %v5377_v16 = vld [vmem:[#allocation23 + $0xe90] sm:$0xff]  ;;  %v5380_v53 = vld [vmem:[#allocation23 + $0xea8] sm:$0xff] }
0x1fc1   :  { %8008 = vmatpush1.bf16.msra.mxu0 %v8007_v10  ;;  %v5360_v10 = vld [vmem:[#allocation23 + $0xe08] sm:$0xff] }
0x1fc2   :  { %8010 = vmatprep.subr.bf16.mxu0 %v8009_v15  ;;  %v8457_v15 = vpop.eup %8456  ;;  %v8033_v37 = vpack.c.bf16 %v5362_v34, %v5360_v10  ;;  %v5384_v10 = vld [vmem:[#allocation23 + $0xec8] sm:$0xff]  ;;  %v5386_v34 = vld [vmem:[#allocation23 + $0xed8] sm:$0xff] }
0x1fc3   :  { %v8459_v11 = vpop.eup %8458  ;;  %v8057_v19 = vpack.c.bf16 %v5386_v34, %v5384_v10  ;;  %v5409_v10 = vld [vmem:[#allocation23 + $0xf90] sm:$0xff] }
0x1fc4   :  { %v8461_v13 = vpop.eup %8460  ;;  %v5146_v30 = vadd.f32 1.0, %v8459_v11  ;;  %v5390_v11 = vld [vmem:[#allocation23 + $0xef8] sm:$0xff] }
0x1fc5   :  { %8012 = vmatpush1.bf16.msra.mxu0 %v8011_v62  ;;  %v5147_v62 = vadd.f32 1.0, %v8457_v15  ;;  %v5141_v41 = vadd.f32 1.0, %v8461_v13  ;;  %v4701_v15 = vrot.slane %v9987_v55, %v1984_v48  ;;  %v8061_v38 = vpack.c.bf16 %v5390_v11, %v5388_v23  ;;  %v5387_v48 = vld [vmem:[#allocation23 + $0xee0] sm:$0xff]  ;;  %v5389_v55 = vld [vmem:[#allocation23 + $0xef0] sm:$0xff]  ;;  %v5392_v13 = vld [vmem:[#allocation23 + $0xf08] sm:$0xff] }
0x1fc6   :  { %8014 = vmatprep.subr.bf16.mxu0 %v8013_v49  ;;  %v5366_v49 = vld [vmem:[#allocation23 + $0xe38] sm:$0xff]  ;;  %v5162_v58 = vmul.f32 %v5146_v30, %v5034_v54  ;;  %v8065_v30 = vpack.c.bf16 %v5394_v33, %v5392_v13  ;;  %v5397_v54 = vld [vmem:[#allocation23 + $0xf30] sm:$0xff]  ;;  %v5411_v23 = vld [vmem:[#allocation23 + $0xfa0] sm:$0xff] }
0x1fc7   :  { %v8037_v18 = vpack.c.bf16 %v5366_v49, %v5364_v6  ;;  %v10114_v49 = vadd.f32 %v10048_v36, %v10073_v17  ;;  %v5393_v36 = vld [vmem:[#allocation23 + $0xf10] sm:$0xff]  ;;  %v5396_v17 = vld [vmem:[#allocation23 + $0xf28] sm:$0xff]  ;;  %v5415_v13 = vld [vmem:[#allocation23 + $0xfc0] sm:$0xff] }
0x1fc8   :  { %v5413_v11 = vld [vmem:[#allocation23 + $0xfb0] sm:$0xff] }
0x1fc9   :  { %8016 = vmatpush1.bf16.msra.mxu0 %v8015_v29  ;;  %v5363_v29 = vld [vmem:[#allocation23 + $0xe20] sm:$0xff]  ;;  %v5417_v33 = vld [vmem:[#allocation23 + $0xfd0] sm:$0xff] }
0x1fca   :  { %8018 = vmatprep.subr.bf16.mxu0 %v8017_v1  ;;  %v5163_v1 = vmul.f32 %v5147_v62, %v5035_v24  ;;  %v8039_v59 = vpack.c.bf16 %v5365_v63, %v5363_v29  ;;  %v10110_v62 = vadd.f32 %v10030_v42, %v4701_v15  ;;  %v8063_v42 = vpack.c.bf16 %v5389_v55, %v5387_v48  ;;  %v5398_v29 = vld [vmem:[#allocation23 + $0xf38] sm:$0xff] }
0x1fcb   :  { %v8087_v48 = vpack.c.bf16 %v5413_v11, %v5411_v23  ;;  %v5829_v23 = vld [vmem:[#allocation29 + $0x78] sm:$0xff] }
0x1fcc   :  { %v5044_v24 = vmul.f32 0.044715, %v10110_v62 }
0x1fcd   :  { %8020 = vmatpush1.bf16.msra.mxu0 %v8019_v2  ;;  %v5367_v2 = vld [vmem:[#allocation23 + $0xe40] sm:$0xff] }
0x1fce   :  { %8022 = vmatprep.subr.bf16.mxu0 %v8021_v25  ;;  %v5157_v25 = vmul.f32 %v5141_v41, %v5029_v47  ;;  %v8043_v61 = vpack.c.bf16 %v5369_v60, %v5367_v2  ;;  %v5060_v63 = vmul.f32 %v5044_v24, %v10110_v62  ;;  %v5402_v47 = vld [vmem:[#allocation23 + $0xf58] sm:$0xff]  ;;  %v8071_v2 = vpack.c.bf16 %v5397_v54, %v5395_v27  ;;  %v5420_v24 = vld [vmem:[#allocation23 + $0xfe8] sm:$0xff] }
0x1fcf   :  { %v5037_v27 = vmul.f32 0.5, %v10114_v49 }
0x1fd1   :  { %8024 = vmatpush1.bf16.msra.mxu0 %v8023_v46  ;;  %v5376_v46 = vld [vmem:[#allocation23 + $0xe88] sm:$0xff] }
0x1fd2   :  { %8026 = vmatprep.subr.bf16.mxu0 %v8025_v14  ;;  %v5378_v14 = vld [vmem:[#allocation23 + $0xe98] sm:$0xff] }
0x1fd3   :  { %v8049_v44 = vpack.c.bf16 %v5378_v14, %v5376_v46 }
0x1fd5   :  { %8028 = vmatpush1.bf16.msra.mxu0 %v8027_v45  ;;  %v5382_v45 = vld [vmem:[#allocation23 + $0xeb8] sm:$0xff] }
0x1fd6   :  { %8030 = vmatprep.subr.bf16.mxu0 %v8029_v8  ;;  %v8051_v8 = vpack.c.bf16 %v5377_v16, %v5375_v51  ;;  %v8053_v21 = vpack.c.bf16 %v5382_v45, %v5380_v53  ;;  %v5408_v16 = vld [vmem:[#allocation23 + $0xf88] sm:$0xff]  ;;  %v5410_v53 = vld [vmem:[#allocation23 + $0xf98] sm:$0xff] }
0x1fd9   :  { %8032 = vmatpush1.bf16.msra.mxu0 %v8031_v12  ;;  %v8055_v12 = vpack.c.bf16 %v5381_v43, %v5379_v9  ;;  %v8081_v9 = vpack.c.bf16 %v5410_v53, %v5408_v16  ;;  %v5407_v43 = vld [vmem:[#allocation23 + $0xf80] sm:$0xff]  ;;  %v5814_v16 = vld [vmem:[#allocation29] sm:$0xff] }
0x1fda   :  { %8034 = vmatprep.subr.bf16.mxu0 %v8033_v37  ;;  %v5383_v37 = vld [vmem:[#allocation23 + $0xec0] sm:$0xff] }
0x1fdb   :  { %v8059_v6 = vpack.c.bf16 %v5385_v56, %v5383_v37 }
0x1fdc   :  { %5655 = vmatmul.mubr.f32.vlgmr.msra.gmra.mrb[28].mxu0 %v5154_v26  ;;  %v5053_v26 = vmul.f32 0.044715, %v10114_v49 }
0x1fdd   :  { %5660 = vmatprep.mubr.f32.mxu0 %v5163_v1  ;;  %8036 = vmatpush1.bf16.msra.mxu0 %v8035_v5  ;;  %v10118_v5 = vadd.f32 %v10043_v32, %v4701_v15  ;;  %v8069_v32 = vpack.c.bf16 %v5398_v29, %v5396_v17  ;;  %v5412_v15 = vld [vmem:[#allocation23 + $0xfa8] sm:$0xff] }
0x1fde   :  { %8038 = vmatprep.subr.bf16.mxu0 %v8037_v18  ;;  %v5391_v18 = vld [vmem:[#allocation23 + $0xf00] sm:$0xff]  ;;  %v5069_v52 = vmul.f32 %v5053_v26, %v10114_v49  ;;  %v8091_v26 = vpack.c.bf16 %v5417_v33, %v5415_v13 }
0x1fdf   :  { %v5052_v1 = vmul.f32 0.044715, %v10118_v5  ;;  %v8067_v41 = vpack.c.bf16 %v5393_v36, %v5391_v18  ;;  %v5419_v18 = vld [vmem:[#allocation23 + $0xfe0] sm:$0xff]  ;;  %v5421_v36 = vld [vmem:[#allocation23 + $0xff0] sm:$0xff] }
0x1fe0   :  { %5661 = vmatmul.mubr.f32.gmra.mrb[30].mxu0 %v5162_v58  ;;  %v5076_v58 = vmul.f32 %v5060_v63, %v10110_v62  ;;  %v5085_v28 = vmul.f32 %v5069_v52, %v10114_v49  ;;  %v8095_v63 = vpack.c.bf16 %v5421_v36, %v5419_v18  ;;  %v5833_v13 = vld [vmem:[#allocation29 + $0x98] sm:$0xff] }
0x1fe1   :  { %8040 = vmatpush1.bf16.msra.mxu0 %v8039_v59  ;;  %5731 = vmatprep.mubr.f32.mxu0 %v5157_v25  ;;  %v5400_v59 = vld [vmem:[#allocation23 + $0xf48] sm:$0xff]  ;;  %v5399_v25 = vld [vmem:[#allocation23 + $0xf40] sm:$0xff] }
0x1fe2   :  { %8042 = vmatprep.subr.bf16.mxu0 %v8041_v57  ;;  %v5068_v57 = vmul.f32 %v5052_v1, %v10118_v5  ;;  %v8073_v60 = vpack.c.bf16 %v5402_v47, %v5400_v59  ;;  %v5092_v0 = vadd.f32 %v5076_v58, %v10110_v62  ;;  %v8075_v35 = vpack.c.bf16 %v5401_v4, %v5399_v25  ;;  %v5837_v18 = vld [vmem:[#allocation29 + $0xb8] sm:$0xff] }
0x1fe3   :  { %v5101_v51 = vadd.f32 %v5085_v28, %v10114_v49  ;;  %v5036_v58 = vmul.f32 0.5, %v10118_v5 }
0x1fe4   :  { %v5084_v46 = vmul.f32 %v5068_v57, %v10118_v5  ;;  %v5108_v45 = vmul.f32 0.7978846, %v5092_v0 }
0x1fe5   :  { %8044 = vmatpush1.bf16.msra.mxu0 %v8043_v61  ;;  %v5404_v61 = vld [vmem:[#allocation23 + $0xf68] sm:$0xff]  ;;  %v5117_v34 = vmul.f32 0.7978846, %v5101_v51 }
0x1fe6   :  { %8046 = vmatprep.subr.bf16.mxu0 %v8045_v31  ;;  %v5406_v31 = vld [vmem:[#allocation23 + $0xf78] sm:$0xff]  ;;  %8462 = vtanh.f32 %v5108_v45  ;;  %v5817_v51 = vld [vmem:[#allocation29 + $0x18] sm:$0xff] }
0x1fe7   :  { %v8077_v14 = vpack.c.bf16 %v5406_v31, %v5404_v61  ;;  %8464 = vtanh.f32 %v5117_v34  ;;  %v5816_v45 = vld [vmem:[#allocation29 + $0x10] sm:$0xff]  ;;  %v5825_v34 = vld [vmem:[#allocation29 + $0x58] sm:$0xff] }
0x1fe9   :  { %8048 = vmatpush1.bf16.msra.mxu0 %v8047_v7  ;;  %v5403_v7 = vld [vmem:[#allocation23 + $0xf60] sm:$0xff] }
0x1fea   :  { %8050 = vmatprep.subr.bf16.mxu0 %v8049_v44  ;;  %v5405_v44 = vld [vmem:[#allocation23 + $0xf70] sm:$0xff] }
0x1fed   :  { %8052 = vmatpush1.bf16.msra.mxu0 %v8051_v8  ;;  %v8079_v8 = vpack.c.bf16 %v5405_v44, %v5403_v7 }
0x1fee   :  { %8054 = vmatprep.subr.bf16.mxu0 %v8053_v21  ;;  %v5100_v21 = vadd.f32 %v5084_v46, %v10118_v5 }
0x1ff0   :  { %v5116_v37 = vmul.f32 0.7978846, %v5100_v21  ;;  %v8463_v17 = vpop.eup %8462  ;;  %v5821_v21 = vld [vmem:[#allocation29 + $0x38] sm:$0xff] }
0x1ff1   :  { %8056 = vmatpush1.bf16.msra.mxu0 %v8055_v12  ;;  %v5414_v12 = vld [vmem:[#allocation23 + $0xfb8] sm:$0xff]  ;;  %v8465_v29 = vpop.eup %8464  ;;  %v5140_v1 = vadd.f32 1.0, %v8463_v17 }
0x1ff2   :  { %8058 = vmatprep.subr.bf16.mxu0 %v8057_v19  ;;  %v8083_v19 = vpack.c.bf16 %v5409_v10, %v5407_v43  ;;  %v8085_v56 = vpack.c.bf16 %v5414_v12, %v5412_v15  ;;  %8466 = vtanh.f32 %v5116_v37  ;;  %v5149_v52 = vadd.f32 1.0, %v8465_v29  ;;  %v5818_v43 = vld [vmem:[#allocation29 + $0x20] sm:$0xff]  ;;  %v5823_v10 = vld [vmem:[#allocation29 + $0x48] sm:$0xff]  ;;  %v5824_v37 = vld [vmem:[#allocation29 + $0x50] sm:$0xff] }
0x1ff3   :  { %v10163_v12 = vpack.c.bf16 %v5825_v34, %v5823_v10  ;;  %v5834_v29 = vld [vmem:[#allocation29 + $0xa0] sm:$0xff] }
0x1ff4   :  { %v5165_v47 = vmul.f32 %v5149_v52, %v5037_v27  ;;  %v5838_v27 = vld [vmem:[#allocation29 + $0xc0] sm:$0xff] }
0x1ff5   :  { %8060 = vmatpush1.bf16.msra.mxu0 %v8059_v6  ;;  %v5416_v6 = vld [vmem:[#allocation23 + $0xfc8] sm:$0xff] }
0x1ff6   :  { %8062 = vmatprep.subr.bf16.mxu0 %v8061_v38  ;;  %v5418_v38 = vld [vmem:[#allocation23 + $0xfd8] sm:$0xff] }
0x1ff7   :  { %v8089_v55 = vpack.c.bf16 %v5418_v38, %v5416_v6  ;;  %v5826_v38 = vld [vmem:[#allocation29 + $0x60] sm:$0xff] }
0x1ff9   :  { %8064 = vmatpush1.bf16.msra.mxu0 %v8063_v42  ;;  %v5422_v42 = vld [vmem:[#allocation23 + $0xff8] sm:$0xff] }
0x1ffa   :  { %8066 = vmatprep.subr.bf16.mxu0 %v8065_v30  ;;  %v8093_v30 = vpack.c.bf16 %v5422_v42, %v5420_v24  ;;  %v5830_v42 = vld [vmem:[#allocation29 + $0x80] sm:$0xff] }
0x1ffd   :  { %8068 = vmatpush1.bf16.msra.mxu0 %v8067_v41  ;;  %v8467_v41 = vpop.eup %8466 }
0x1ffe   :  { %8070 = vmatprep.subr.bf16.mxu0 %v8069_v32  ;;  %v5028_v32 = vmul.f32 0.5, %v10110_v62  ;;  %v5148_v59 = vadd.f32 1.0, %v8467_v41  ;;  %v5841_v41 = vld [vmem:[#allocation29 + $0xd8] sm:$0xff] }
0x2000   :  { %v5156_v54 = vmul.f32 %v5140_v1, %v5028_v32  ;;  %v5164_v57 = vmul.f32 %v5148_v59, %v5036_v58  ;;  %v5839_v1 = vld [vmem:[#allocation29 + $0xc8] sm:$0xff] }
0x2001   :  { %8072 = vmatpush1.bf16.msra.mxu0 %v8071_v2  ;;  %v5424_v2 = vld [vmem:[#allocation24 + $0x2] sm:$0x3]  ;;  %v10187_v32 = vpack.c.bf16 %v5841_v41, %v5839_v1  ;;  %v5843_v59 = vld [vmem:[#allocation29 + $0xe8] sm:$0xff]  ;;  %v5865_v41 = vld [vmem:[#allocation29 + $0x198] sm:$0xff] }
0x2002   :  { %8074 = vmatprep.subr.bf16.mxu0 %v8073_v60  ;;  %v5429_v60 = vrot.slane %v5424_v2, %v9416_v40  ;;  %v5433_v25 = vrot.slane %v5424_v2, %v9413_v39  ;;  %v5842_v2 = vld [vmem:[#allocation29 + $0xe0] sm:$0xff] }
0x2005   :  { %8076 = vmatpush1.bf16.msra.mxu0 %v8075_v35 }
0x2006   :  { %8078 = vmatprep.subr.bf16.mxu0 %v8077_v14 }
0x2009   :  { %8080 = vmatpush1.bf16.msra.mxu0 %v8079_v8  ;;  %v5819_v8 = vld [vmem:[#allocation29 + $0x28] sm:$0xff] }
0x200a   :  { %8082 = vmatprep.subr.bf16.mxu0 %v8081_v9  ;;  %v10154_v9 = vpack.c.bf16 %v5816_v45, %v5814_v16  ;;  %v5857_v16 = vld [vmem:[#allocation29 + $0x158] sm:$0xff] }
0x200d   :  { %8084 = vmatpush1.bf16.msra.mxu0 %v8083_v19  ;;  %v5822_v19 = vld [vmem:[#allocation29 + $0x40] sm:$0xff] }
0x200e   :  { %8086 = vmatprep.subr.bf16.mxu0 %v8085_v56  ;;  %v5827_v56 = vld [vmem:[#allocation29 + $0x68] sm:$0xff]  ;;  %v10166_v11 = vpack.c.bf16 %v5824_v37, %v5822_v19 }
0x200f   :  { %v10169_v6 = vpack.c.bf16 %v5829_v23, %v5827_v56 }
0x2011   :  { %8088 = vmatpush1.bf16.msra.mxu0 %v8087_v48  ;;  %v5828_v48 = vld [vmem:[#allocation29 + $0x70] sm:$0xff] }
0x2012   :  { %8090 = vmatprep.subr.bf16.mxu0 %v8089_v55  ;;  %v5831_v55 = vld [vmem:[#allocation29 + $0x88] sm:$0xff]  ;;  %v10172_v33 = vpack.c.bf16 %v5828_v48, %v5826_v38 }
0x2013   :  { %v10175_v24 = vpack.c.bf16 %v5833_v13, %v5831_v55 }
0x2015   :  { %8092 = vmatpush1.bf16.msra.mxu0 %v8091_v26  ;;  %v5832_v26 = vld [vmem:[#allocation29 + $0x90] sm:$0xff] }
0x2016   :  { %8094 = vmatprep.subr.bf16.mxu0 %v8093_v30  ;;  %v5835_v30 = vld [vmem:[#allocation29 + $0xa8] sm:$0xff]  ;;  %v10178_v36 = vpack.c.bf16 %v5832_v26, %v5830_v42 }
0x2017   :  { %v10181_v17 = vpack.c.bf16 %v5837_v18, %v5835_v30  ;;  %v5859_v30 = vld [vmem:[#allocation29 + $0x168] sm:$0xff]  ;;  %v5861_v18 = vld [vmem:[#allocation29 + $0x178] sm:$0xff] }
0x2019   :  { %8096 = vmatpush1.bf16.msra.mxu0 %v8095_v63  ;;  %v5836_v63 = vld [vmem:[#allocation29 + $0xb0] sm:$0xff] }
0x201a   :  { %v10184_v52 = vpack.c.bf16 %v5836_v63, %v5834_v29  ;;  %v10238_v29 = vpack.c.bf16 %v5861_v18, %v5859_v30  ;;  %v5858_v63 = vld [vmem:[#allocation29 + $0x160] sm:$0xff] }
0x201c   :  { %5732 = vmatmul.mubr.f32.vlgmr.msra.gmra.mrb[28].mxu0 %v5156_v54  ;;  %v5840_v54 = vld [vmem:[#allocation29 + $0xd0] sm:$0xff] }
0x201d   :  { %5737 = vmatprep.mubr.f32.mxu0 %v5165_v47  ;;  %v5845_v47 = vld [vmem:[#allocation29 + $0xf8] sm:$0xff]  ;;  %v10190_v58 = vpack.c.bf16 %v5840_v54, %v5838_v27  ;;  %v5862_v54 = vld [vmem:[#allocation29 + $0x180] sm:$0xff] }
0x2020   :  { %5738 = vmatmul.mubr.f32.gmra.mrb[30].mxu0 %v5164_v57  ;;  %v10193_v57 = vpack.c.bf16 %v5845_v47, %v5843_v59  ;;  %v5864_v59 = vld [vmem:[#allocation29 + $0x190] sm:$0xff]  ;;  %v5867_v47 = vld [vmem:[#allocation29 + $0x1a8] sm:$0xff] }
0x20ef   :  { %v5733_v4 = vpop.f32.mrb[28].mxu0 }
0x20f0   :  { %v8293_v28 = vadd.f32 %v5733_v4, %v5429_v60  ;;  %v5735_v62 = vpop.f32.mrb[29].mxu0  ;;  %v5849_v4 = vld [vmem:[#allocation29 + $0x118] sm:$0xff] }
0x20f1   :  { %v8294_v61 = vadd.f32 %v5735_v62, %v5433_v25 }
0x20f2   :  { %v10137_v49 = vadd.f32 %v8293_v28, %v9959_v3 }
0x20f3   :  { %v10140_v31 = vadd.f32 %v8294_v61, %v9956_v50  ;;  %v5739_v0 = vpop.f32.mrb[30].mxu0  ;;  %v5815_v50 = vld [vmem:[#allocation29 + $0x8] sm:$0xff]  ;;  %v5846_v61 = vld [vmem:[#allocation29 + $0x100] sm:$0xff] }
0x20f4   :  { %v8295_v5 = vadd.f32 %v5739_v0, %v5429_v60  ;;  %v5741_v35 = vpop.f32.mrb[31].mxu0  ;;  %v10152_v53 = vpack.c.bf16 %v5817_v51, %v5815_v50  ;;  %v5844_v60 = vld [vmem:[#allocation29 + $0xf0] sm:$0xff]  ;;  %v5855_v51 = vld [vmem:[#allocation29 + $0x148] sm:$0xff] }
0x20f5   :  { %v8296_v46 = vadd.f32 %v5741_v35, %v5433_v25  ;;  %v5752_v14 = vadd.f32 %v10140_v31, %v10137_v49  ;;  %v5847_v25 = vld [vmem:[#allocation29 + $0x108] sm:$0xff]  ;;  %v10196_v28 = vpack.c.bf16 %v5844_v60, %v5842_v2  ;;  %v5848_v0 = vld [vmem:[#allocation29 + $0x110] sm:$0xff]  ;;  %v5853_v35 = vld [vmem:[#allocation29 + $0x138] sm:$0xff]  ;;  %v10246_v2 = vpack.c.bf16 %v5864_v59, %v5862_v54 }
0x20f6   :  { %v10145_v7 = vadd.f32 %v8295_v5, %v9973_v20  ;;  %v10156_v20 = vpack.c.bf16 %v5821_v21, %v5819_v8  ;;  %8098 = vmatprep.subr.bf16.mxu1 %v10152_v53  ;;  %v10199_v62 = vpack.c.bf16 %v5849_v4, %v5847_v25  ;;  %v5851_v5 = vld [vmem:[#allocation29 + $0x128] sm:$0xff]  ;;  %v5852_v50 = vld [vmem:[#allocation29 + $0x130] sm:$0xff]  ;;  %v10211_v8 = vpack.c.bf16 %v5857_v16, %v5855_v51  ;;  %v5854_v21 = vld [vmem:[#allocation29 + $0x140] sm:$0xff] }
0x20f7   :  { %v10148_v44 = vadd.f32 %v8296_v46, %v9970_v22  ;;  %5753 = vadd.xlane.f32.xlu0 %v5752_v14  ;;  %v5820_v22 = vld [vmem:[#allocation29 + $0x30] sm:$0xff]  ;;  %8100 = vmatpush1.bf16.msra.mxu1 %v10154_v9  ;;  %v10202_v46 = vpack.c.bf16 %v5848_v0, %v5846_v61  ;;  %v10205_v14 = vpack.c.bf16 %v5853_v35, %v5851_v5  ;;  %v5869_v60 = vld [vmem:[#allocation29 + $0x1b8] sm:$0xff]  ;;  %v5866_v25 = vld [vmem:[#allocation29 + $0x1a0] sm:$0xff] }
0x20f8   :  { %v10160_v15 = vpack.c.bf16 %v5820_v22, %v5818_v43  ;;  %8102 = vmatprep.subr.bf16.mxu1 %v10156_v20  ;;  %v5856_v43 = vld [vmem:[#allocation29 + $0x150] sm:$0xff]  ;;  %v10249_v61 = vpack.c.bf16 %v5869_v60, %v5867_v47  ;;  %v5871_v0 = vld [vmem:[#allocation29 + $0x1c8] sm:$0xff]  ;;  %v5873_v5 = vld [vmem:[#allocation29 + $0x1d8] sm:$0xff] }
0x20f9   :  { %v5755_v3 = vadd.f32 %v10148_v44, %v10145_v7  ;;  %v10214_v22 = vpack.c.bf16 %v5856_v43, %v5854_v21  ;;  %v5868_v4 = vld [vmem:[#allocation29 + $0x1b0] sm:$0xff]  ;;  %v5875_v16 = vld [vmem:[#allocation29 + $0x1e8] sm:$0xff]  ;;  %v5877_v21 = vld [vmem:[#allocation29 + $0x1f8] sm:$0xff] }
0x20fa   :  { %v10252_v35 = vpack.c.bf16 %v5868_v4, %v5866_v25  ;;  %v5872_v51 = vld [vmem:[#allocation29 + $0x1d0] sm:$0xff] }
0x20fb   :  { %5756 = vadd.xlane.f32.xlu0 %v5755_v3  ;;  %8104 = vmatpush1.bf16.msra.mxu1 %v10160_v15  ;;  %v5850_v3 = vld [vmem:[#allocation29 + $0x120] sm:$0xff] }
0x20fc   :  { %8106 = vmatprep.subr.bf16.mxu1 %v10163_v12  ;;  %v10208_v45 = vpack.c.bf16 %v5852_v50, %v5850_v3  ;;  %v10255_v3 = vpack.c.bf16 %v5873_v5, %v5871_v0  ;;  %v5870_v50 = vld [vmem:[#allocation29 + $0x1c0] sm:$0xff]  ;;  %v5964_v5 = vld [vmem:[%s10539_s7 + $0x8] sm:$0xff] }
0x20fd   :  { %v10258_v43 = vpack.c.bf16 %v5872_v51, %v5870_v50  ;;  %v5963_v0 = vld [vmem:[%s10539_s7] sm:$0xff] }
0x20ff   :  { %8108 = vmatpush1.bf16.msra.mxu1 %v10166_v11 }
0x2100   :  { %8110 = vmatprep.subr.bf16.mxu1 %v10169_v6 }
0x2103   :  { %8112 = vmatpush1.bf16.msra.mxu1 %v10172_v33 }
0x2104   :  { %8114 = vmatprep.subr.bf16.mxu1 %v10175_v24 }
0x2107   :  { %8116 = vmatpush1.bf16.msra.mxu1 %v10178_v36 }
0x2108   :  { %8118 = vmatprep.subr.bf16.mxu1 %v10181_v17 }
0x210b   :  { %8120 = vmatpush1.bf16.msra.mxu1 %v10184_v52 }
0x210c   :  { %8122 = vmatprep.subr.bf16.mxu1 %v10187_v32 }
0x210f   :  { %8124 = vmatpush1.bf16.msra.mxu1 %v10190_v58 }
0x2110   :  { %8126 = vmatprep.subr.bf16.mxu1 %v10193_v57 }
0x2113   :  { %8128 = vmatpush1.bf16.msra.mxu1 %v10196_v28 }
0x2114   :  { %8130 = vmatprep.subr.bf16.mxu1 %v10199_v62 }
0x2117   :  { %8132 = vmatpush1.bf16.msra.mxu1 %v10202_v46 }
0x2118   :  { %8134 = vmatprep.subr.bf16.mxu1 %v10205_v14 }
0x211b   :  { %8136 = vmatpush1.bf16.msra.mxu1 %v10208_v45 }
0x211c   :  { %8138 = vmatprep.subr.bf16.mxu1 %v10211_v8 }
0x211f   :  { %8140 = vmatpush1.bf16.msra.mxu1 %v10214_v22 }
0x2120   :  { %8142 = vmatprep.subr.bf16.mxu1 %v10238_v29 }
0x2184   :  { %v5754_v10 = vpop.xlane.xlu0 %5753 }
0x2185   :  { %v5758_v34 = vmul.f32 0.00390625, %v5754_v10  ;;  %v10261_v10 = vpack.c.bf16 %v5877_v21, %v5875_v16  ;;  %v10295_v21 = vpack.c.bf16 %v5964_v5, %v5963_v0  ;;  %v5969_v0 = vld [vmem:[%s10539_s7 + $0x30] sm:$0xff]  ;;  %v5970_v5 = vld [vmem:[%s10539_s7 + $0x38] sm:$0xff] }
0x2187   :  { %v10219_v19 = vsub.f32 %v10137_v49, %v5758_v34  ;;  %v10222_v37 = vsub.f32 %v10140_v31, %v5758_v34  ;;  %v5874_v34 = vld [vmem:[#allocation29 + $0x1e0] sm:$0xff] }
0x2188   :  { %v5757_v56 = vpop.xlane.xlu0 %5756 }
0x2189   :  { %v5759_v23 = vmul.f32 0.00390625, %v5757_v56  ;;  %v5764_v38 = vmul.f32 %v10219_v19, %v10219_v19  ;;  %v5765_v48 = vmul.f32 %v10222_v37, %v10222_v37  ;;  %v5876_v56 = vld [vmem:[#allocation29 + $0x1f0] sm:$0xff] }
0x218b   :  { %v10229_v55 = vsub.f32 %v10145_v7, %v5759_v23  ;;  %v10232_v13 = vsub.f32 %v10148_v44, %v5759_v23  ;;  %v5768_v42 = vadd.f32 %v5765_v48, %v5764_v38  ;;  %v5860_v7 = vld [vmem:[#allocation29 + $0x170] sm:$0xff]  ;;  %v5863_v44 = vld [vmem:[#allocation29 + $0x188] sm:$0xff]  ;;  %v10270_v48 = vpack.c.bf16 %v5876_v56, %v5874_v34 }
0x218c   :  { %v10240_v1 = vpack.c.bf16 %v5860_v7, %v5858_v63  ;;  %v10244_v27 = vpack.c.bf16 %v5865_v41, %v5863_v44  ;;  %v5979_v23 = vld [vmem:[%s10539_s7 + $0x80] sm:$0xff]  ;;  %v5980_v38 = vld [vmem:[%s10539_s7 + $0x88] sm:$0xff]  ;;  %v5749_v7 = vld [vmem:[#allocation26 + $0x2] sm:$0x3] }
0x218d   :  { %5769 = vadd.xlane.f32.xlu1 %v5768_v42  ;;  %v5766_v49 = vmul.f32 %v10229_v55, %v10229_v55  ;;  %v5767_v31 = vmul.f32 %v10232_v13, %v10232_v13  ;;  %v10273_v42 = vpack.c.bf16 %v5980_v38, %v5979_v23  ;;  %v5751_v44 = vld [vmem:[#allocation27 + $0x2] sm:$0x3]  ;;  %v5788_v41 = vrot.slane %v5749_v7, %v9416_v40 }
0x218e   :  { %8144 = vmatpush1.bf16.msra.mxu1 %v10240_v1  ;;  %v5792_v54 = vrot.slane %v5749_v7, %v9413_v39  ;;  %v5803_v25 = vrot.slane %v5751_v44, %v9416_v40  ;;  %v5807_v4 = vrot.slane %v5751_v44, %v9413_v39 }
0x218f   :  { %v5771_v26 = vadd.f32 %v5767_v31, %v5766_v49  ;;  %8146 = vmatprep.subr.bf16.mxu1 %v10244_v27 }
0x2191   :  { %5772 = vadd.xlane.f32.xlu1 %v5771_v26 }
0x2192   :  { %8148 = vmatpush1.bf16.msra.mxu1 %v10246_v2 }
0x2193   :  { %8150 = vmatprep.subr.bf16.mxu1 %v10249_v61 }
0x2196   :  { %8152 = vmatpush1.bf16.msra.mxu1 %v10252_v35 }
0x2197   :  { %8154 = vmatprep.subr.bf16.mxu1 %v10255_v3 }
0x219a   :  { %8156 = vmatpush1.bf16.msra.mxu1 %v10258_v43 }
0x219b   :  { %8158 = vmatprep.subr.bf16.mxu1 %v10261_v10 }
0x219e   :  { %8160 = vmatpush1.bf16.msra.mxu1 %v10270_v48 }
0x219f   :  { %8162 = vmatprep.subr.bf16.mxu1 %v10273_v42 }
0x221a   :  { %v5770_v49 = vpop.xlane.xlu1 %5769 }
0x221b   :  { %v5774_v31 = vmul.f32 0.00390625, %v5770_v49 }
0x221d   :  { %v5776_v26 = vadd.f32 1e-12, %v5774_v31  ;;  %v5965_v31 = vld [vmem:[%s10539_s7 + $0x10] sm:$0xff] }
0x221e   :  { %v5773_v30 = vpop.xlane.xlu1 %5772 }
0x221f   :  { %8468 = vrsqrt.f32 %v5776_v26  ;;  %v5775_v18 = vmul.f32 0.00390625, %v5773_v30  ;;  %v5966_v26 = vld [vmem:[%s10539_s7 + $0x18] sm:$0xff]  ;;  %v5983_v30 = vld [vmem:[%s10539_s7 + $0xa0] sm:$0xff] }
0x2221   :  { %v5777_v63 = vadd.f32 1e-12, %v5775_v18 }
0x2223   :  { %8470 = vrsqrt.f32 %v5777_v63  ;;  %v10314_v63 = vpack.c.bf16 %v5966_v26, %v5965_v31  ;;  %v5973_v31 = vld [vmem:[%s10539_s7 + $0x50] sm:$0xff] }
0x2229   :  { %v8469_v59 = vpop.eup %8468 }
0x222a   :  { %v5780_v47 = vmul.f32 %v8469_v59, %v10219_v19  ;;  %v5781_v60 = vmul.f32 %v8469_v59, %v10222_v37  ;;  %v5981_v19 = vld [vmem:[%s10539_s7 + $0x90] sm:$0xff]  ;;  %v5982_v37 = vld [vmem:[%s10539_s7 + $0x98] sm:$0xff] }
0x222b   :  { %v10299_v49 = vpack.c.bf16 %v5982_v37, %v5981_v19  ;;  %v10354_v19 = vpack.c.bf16 %v5970_v5, %v5969_v0  ;;  %v5994_v0 = vld [vmem:[%s10539_s7 + $0xf8] sm:$0xff] }
0x222c   :  { %v5795_v50 = vmul.f32 %v5788_v41, %v5780_v47  ;;  %v5796_v51 = vmul.f32 %v5792_v54, %v5781_v60  ;;  %v5967_v47 = vld [vmem:[%s10539_s7 + $0x20] sm:$0xff]  ;;  %v5986_v60 = vld [vmem:[%s10539_s7 + $0xb8] sm:$0xff] }
0x222d   :  { %v8471_v16 = vpop.eup %8470 }
0x222e   :  { %v5810_v34 = vadd.f32 %v5803_v25, %v5795_v50  ;;  %v5811_v56 = vadd.f32 %v5807_v4, %v5796_v51  ;;  %v5783_v23 = vmul.f32 %v8471_v16, %v10232_v13  ;;  %v5782_v38 = vmul.f32 %v8471_v16, %v10229_v55  ;;  %v5984_v13 = vld [vmem:[%s10539_s7 + $0xa8] sm:$0xff]  ;;  %v5987_v50 = vld [vmem:[%s10539_s7 + $0xc0] sm:$0xff] }
0x222f   :  { %v10321_v59 = vpack.c.bf16 %v5984_v13, %v5983_v30  ;;  %v5988_v51 = vld [vmem:[%s10539_s7 + $0xc8] sm:$0xff]  ;;  %v5971_v16 = vld [vmem:[%s10539_s7 + $0x40] sm:$0xff]  ;;  %v5974_v30 = vld [vmem:[%s10539_s7 + $0x58] sm:$0xff] }
0x2230   :  { %5954 = vmatprep.mubr.f32.mxu1 %v5811_v56  ;;  %v5798_v55 = vmul.f32 %v5792_v54, %v5783_v23  ;;  %v5797_v18 = vmul.f32 %v5788_v41, %v5782_v38  ;;  %v5968_v41 = vld [vmem:[%s10539_s7 + $0x28] sm:$0xff]  ;;  %v5985_v54 = vld [vmem:[%s10539_s7 + $0xb0] sm:$0xff]  ;;  %v10357_v37 = vpack.c.bf16 %v5988_v51, %v5987_v50  ;;  %v5990_v38 = vld [vmem:[%s10539_s7 + $0xd8] sm:$0xff] }
0x2231   :  { %5955 = vmatmul.mubr.f32.vlgmr.msra.gmra.mrb[72].mxu1 %v5810_v34  ;;  %v5972_v34 = vld [vmem:[%s10539_s7 + $0x48] sm:$0xff]  ;;  %v5989_v23 = vld [vmem:[%s10539_s7 + $0xd0] sm:$0xff]  ;;  %v5991_v13 = vld [vmem:[%s10539_s7 + $0xe0] sm:$0xff] }
0x2232   :  { %8164 = vmatpush3.bf16.msra.mxu1 %v10295_v21  ;;  %v10316_v7 = vadd.f32 %v5807_v4, %v5798_v55  ;;  %v10318_v44 = vadd.f32 %v5803_v25, %v5797_v18  ;;  %v10336_v25 = vpack.c.bf16 %v5968_v41, %v5967_v47  ;;  %v10339_v4 = vpack.c.bf16 %v5986_v60, %v5985_v54  ;;  %v5992_v55 = vld [vmem:[%s10539_s7 + $0xe8] sm:$0xff]  ;;  %v5975_v41 = vld [vmem:[%s10539_s7 + $0x60] sm:$0xff]  ;;  %v5993_v60 = vld [vmem:[%s10539_s7 + $0xf0] sm:$0xff] }
0x2233   :  { %8166 = vmatprep.subr.bf16.mxu1 %v10299_v49  ;;  %v10367_v56 = vpack.c.bf16 %v5972_v34, %v5971_v16  ;;  %v10378_v26 = vpack.c.bf16 %v5990_v38, %v5989_v23  ;;  %v10390_v18 = vpack.c.bf16 %v5974_v30, %v5973_v31  ;;  %v10393_v47 = vpack.c.bf16 %v5992_v55, %v5991_v13  ;;  %v5976_v54 = vld [vmem:[%s10539_s7 + $0x68] sm:$0xff]  ;;  %v5977_v51 = vld [vmem:[%s10539_s7 + $0x70] sm:$0xff]  ;;  %v5978_v16 = vld [vmem:[%s10539_s7 + $0x78] sm:$0xff]  ;;  %s8984_s7 = smov [#allocation33]  }
0x2234   :  { %v10408_v5 = vpack.c.bf16 %v5976_v54, %v5975_v41  ;;  %v10411_v50 = vpack.c.bf16 %v5994_v0, %v5993_v60  ;;  %v10420_v34 = vpack.c.bf16 %v5978_v16, %v5977_v51  ;;  %v5878_v23 = vld [vmem:[#allocation30] sm:$0x3]  ;;  %s6349_s4 = sshll.u32 %s8984_s7, 4  ;;  %s6350_s4 = int_to_ptr.vmem [resolvable:$true] %s6349_s4 }
0x2235   :  { %v5883_v38 = vrot.slane %v5878_v23, %v9416_v40  ;;  %v5887_v31 = vrot.slane %v5878_v23, %v9413_v39  ;;  %s8906_s28 = scalar_lea.vmem %s6350_s4, 32  ;;  %p8911_p13 = scmp.lt.s32.totalorder %s6350_s4, %s6350_s4 }
0x2236   :  { %8168 = vmatpush3.bf16.msra.mxu1 %v10314_v63  ;;  %p8907_p12 = scmp.ne.s32.totalorder %s6350_s4, %s8906_s28  ;;  %p8912_p0 = scmp.lt.s32.totalorder %s8906_s28, %s8906_s28 }
0x2237   :  { %8170 = vmatprep.subr.bf16.mxu1 %v10321_v59 }
0x2238   :  { %p8913_p1 = por %p8912_p0, %p8911_p13 }
0x223a   :  { %8172 = vmatpush3.bf16.msra.mxu1 %v10336_v25  ;;  %p8914_p2 = pnand %p8913_p1, %p8907_p12 }
0x223b   :  { %8174 = vmatprep.subr.bf16.mxu1 %v10339_v4 }
0x223e   :  { %8176 = vmatpush3.bf16.msra.mxu1 %v10354_v19 }
0x223f   :  { %8178 = vmatprep.subr.bf16.mxu1 %v10357_v37 }
0x2242   :  { %8180 = vmatpush3.bf16.msra.mxu1 %v10367_v56 }
0x2243   :  { %8182 = vmatprep.subr.bf16.mxu1 %v10378_v26 }
0x2246   :  { %8184 = vmatpush3.bf16.msra.mxu1 %v10390_v18 }
0x2247   :  { %8186 = vmatprep.subr.bf16.mxu1 %v10393_v47 }
0x224a   :  { %8188 = vmatpush3.bf16.msra.mxu1 %v10408_v5 }
0x224b   :  { %8190 = vmatprep.subr.bf16.mxu1 %v10411_v50 }
0x224e   :  { %8192 = vmatpush3.bf16.msra.mxu1 %v10420_v34 }
0x224f   :  { %8194 = vmatprep.subr.bf16.mxu1 %v10152_v53 }
0x2304   :  { %v5956_v30 = vpop.f32.mrb[72].mxu1 }
0x2305   :  { %v5957_v13 = vadd.f32 %v5956_v30, %v5883_v38  ;;  %v5958_v55 = vpop.f32.mrb[73].mxu1 }
0x2306   :  { %v5959_v41 = vadd.f32 %v5958_v55, %v5887_v31 }
0x2308   :  { %8472 = vtanh.f32 %v5959_v41 }
0x2309   :  { %8474 = vtanh.f32 %v5957_v13 }
0x2312   :  { %v8473_v54 = vpop.eup %8472 }
0x2313   :  { %v8475_v60 = vpop.eup %8474  ;;  %6060 = vmatprep.mubr.f32.mxu1 %v8473_v54 }
0x2314   :  { %6061 = vmatmul.mubr.f32.vlgmr.msra.gmra.mrb[74].mxu1 %v8475_v60 }
0x2315   :  { %8196 = vmatpush1.bf16.msra.mxu1 %v10154_v9  ;;  %6219 = vmatprep.mubr.f32.mxu1 %v10316_v7 }
0x2316   :  { %8198 = vmatprep.subr.bf16.mxu1 %v10156_v20  ;;  %v5995_v20 = vld [vmem:[#allocation32] sm:$0x1] }
0x2319   :  { %8200 = vmatpush1.bf16.msra.mxu1 %v10160_v15 }
0x231a   :  { %8202 = vmatprep.subr.bf16.mxu1 %v10163_v12 }
0x231d   :  { %8204 = vmatpush1.bf16.msra.mxu1 %v10166_v11 }
0x231e   :  { %8206 = vmatprep.subr.bf16.mxu1 %v10169_v6  ;;  %v6143_v6 = vld [vmem:[#allocation30] sm:$0x3] }
0x2321   :  { %8208 = vmatpush1.bf16.msra.mxu1 %v10172_v33  ;;  %v6148_v33 = vrot.slane %v6143_v6, %v9416_v40 }
0x2322   :  { %8210 = vmatprep.subr.bf16.mxu1 %v10175_v24  ;;  %v6152_v24 = vrot.slane %v6143_v6, %v9413_v39 }
0x2325   :  { %8212 = vmatpush1.bf16.msra.mxu1 %v10178_v36 }
0x2326   :  { %8214 = vmatprep.subr.bf16.mxu1 %v10181_v17 }
0x2329   :  { %8216 = vmatpush1.bf16.msra.mxu1 %v10184_v52 }
0x232a   :  { %8218 = vmatprep.subr.bf16.mxu1 %v10187_v32 }
0x232d   :  { %8220 = vmatpush1.bf16.msra.mxu1 %v10190_v58 }
0x232e   :  { %8222 = vmatprep.subr.bf16.mxu1 %v10193_v57 }
0x2331   :  { %8224 = vmatpush1.bf16.msra.mxu1 %v10196_v28 }
0x2332   :  { %8226 = vmatprep.subr.bf16.mxu1 %v10199_v62 }
0x2335   :  { %8228 = vmatpush1.bf16.msra.mxu1 %v10202_v46 }
0x2336   :  { %8230 = vmatprep.subr.bf16.mxu1 %v10205_v14 }
0x2339   :  { %8232 = vmatpush1.bf16.msra.mxu1 %v10208_v45 }
0x233a   :  { %8234 = vmatprep.subr.bf16.mxu1 %v10211_v8  ;;  %v6260_v8 = vld [vmem:[#allocation32] sm:$0x1] }
0x233d   :  { %8236 = vmatpush1.bf16.msra.mxu1 %v10214_v22 }
0x233e   :  { %8238 = vmatprep.subr.bf16.mxu1 %v10238_v29 }
0x2341   :  { %8240 = vmatpush1.bf16.msra.mxu1 %v10240_v1 }
0x2342   :  { %8242 = vmatprep.subr.bf16.mxu1 %v10244_v27 }
0x2345   :  { %8244 = vmatpush1.bf16.msra.mxu1 %v10246_v2 }
0x2346   :  { %8246 = vmatprep.subr.bf16.mxu1 %v10249_v61 }
0x2349   :  { %8248 = vmatpush1.bf16.msra.mxu1 %v10252_v35 }
0x234a   :  { %8250 = vmatprep.subr.bf16.mxu1 %v10255_v3 }
0x234d   :  { %8252 = vmatpush1.bf16.msra.mxu1 %v10258_v43 }
0x234e   :  { %8254 = vmatprep.subr.bf16.mxu1 %v10261_v10 }
0x2351   :  { %8256 = vmatpush1.bf16.msra.mxu1 %v10270_v48 }
0x2352   :  { %8258 = vmatprep.subr.bf16.mxu1 %v10273_v42 }
0x2354   :  { %6220 = vmatmul.mubr.f32.vlgmr.msra.gmra.mrb[76].mxu1 %v10318_v44 }
0x2355   :  { %8260 = vmatpush3.bf16.msra.mxu1 %v10295_v21 }
0x2356   :  { %8262 = vmatprep.subr.bf16.mxu1 %v10299_v49 }
0x2359   :  { %8264 = vmatpush3.bf16.msra.mxu1 %v10314_v63 }
0x235a   :  { %8266 = vmatprep.subr.bf16.mxu1 %v10321_v59 }
0x235d   :  { %8268 = vmatpush3.bf16.msra.mxu1 %v10336_v25 }
0x235e   :  { %8270 = vmatprep.subr.bf16.mxu1 %v10339_v4 }
0x2361   :  { %8272 = vmatpush3.bf16.msra.mxu1 %v10354_v19 }
0x2362   :  { %8274 = vmatprep.subr.bf16.mxu1 %v10357_v37 }
0x2365   :  { %8276 = vmatpush3.bf16.msra.mxu1 %v10367_v56 }
0x2366   :  { %8278 = vmatprep.subr.bf16.mxu1 %v10378_v26 }
0x2369   :  { %8280 = vmatpush3.bf16.msra.mxu1 %v10390_v18 }
0x236a   :  { %8282 = vmatprep.subr.bf16.mxu1 %v10393_v47 }
0x236d   :  { %8284 = vmatpush3.bf16.msra.mxu1 %v10408_v5 }
0x236e   :  { %8286 = vmatprep.subr.bf16.mxu1 %v10411_v50 }
0x2371   :  { %8288 = vmatpush3.bf16.msra.mxu1 %v10420_v34 }
0x23e7   :  { %v6443_v53 = vpop.f32.mrb[74].mxu1 }
0x23e8   :  { %v6444_v9 = vpop.f32.mrb[75].mxu1 }
0x23e9   :  { %v6445_v15 = vadd.f32 %v6444_v9, %v6443_v53 }
0x23eb   :  { %v6063_v12 = vadd.f32 %v6445_v15, %v5995_v20 }
0x23ed   :  { %v6067_v11 = vsel %vm6066_vm2, %v6063_v12, -inf }
0x23ee   :  { %6068 = vmax.xlane.f32.xlu0 %v6067_v11 }
0x2427   :  { %v6221_v36 = vpop.f32.mrb[76].mxu1 }
0x2428   :  { %v6222_v17 = vadd.f32 %v6221_v36, %v6148_v33  ;;  %v6223_v52 = vpop.f32.mrb[77].mxu1 }
0x2429   :  { %v6224_v32 = vadd.f32 %v6223_v52, %v6152_v24 }
0x242b   :  { %8476 = vtanh.f32 %v6224_v32 }
0x242c   :  { %8478 = vtanh.f32 %v6222_v17 }
0x2435   :  { %v8477_v58 = vpop.eup %8476 }
0x2436   :  { %v8479_v57 = vpop.eup %8478  ;;  %6325 = vmatprep.mubr.f32.mxu1 %v8477_v58 }
0x2437   :  { %6326 = vmatmul.mubr.f32.vlgmr.msra.gmra.mrb[78].mxu1 %v8479_v57 }
0x247b   :  { %v6069_v28 = vpop.xlane.xlu0 %6068 }
0x247c   :  { %v6070_v62 = vsub.f32 %v6063_v12, %v6069_v28 }
0x247e   :  { %v6071_v46 = vmul.f32 1.442695, %v6070_v62 }
0x2480   :  { %8480 = vpow2.f32 %v6071_v46 }
0x248a   :  { %v8481_v14 = vpop.eup %8480 }
0x248b   :  { %v6073_v45 = vsel %vm6066_vm2, %v8481_v14, 0.0 }
0x248c   :  { %6074 = vadd.xlane.f32.xlu0 %v6073_v45 }
0x250a   :  { %v6478_v40 = vpop.f32.mrb[78].mxu1 }
0x250b   :  { %v6479_v39 = vpop.f32.mrb[79].mxu1 }
0x250c   :  { %v6480_v22 = vadd.f32 %v6479_v39, %v6478_v40 }
0x250e   :  { %v6328_v29 = vadd.f32 %v6480_v22, %v6260_v8 }
0x2510   :  { %v6331_v1 = vsel %vm6066_vm2, %v6328_v29, -inf }
0x2511   :  { %6332 = vmax.xlane.f32.xlu1 %v6331_v1 }
0x2519   :  { %v6075_v27 = vpop.xlane.xlu0 %6074 }
0x251a   :  { %8482 = vrcp.f32 %v6075_v27 }
0x2524   :  { %v8483_v2 = vpop.eup %8482 }
0x2525   :  { %v6077_v61 = vmul.f32 %v8483_v2, %v8481_v14 }
0x2527   :  { %6078 = vst.msk [vmem:[#allocation33] sm:$0x1] %vm6066_vm2, %v6077_v61 }
0x259e   :  { %v6333_v35 = vpop.xlane.xlu1 %6332 }
0x259f   :  { %v6334_v3 = vsub.f32 %v6328_v29, %v6333_v35 }
0x25a1   :  { %v6335_v43 = vmul.f32 1.442695, %v6334_v3 }
0x25a3   :  { %8484 = vpow2.f32 %v6335_v43 }
0x25ad   :  { %v8485_v10 = vpop.eup %8484 }
0x25ae   :  { %v6337_v48 = vsel %vm6066_vm2, %v8485_v10, 0.0 }
0x25af   :  { %6338 = vadd.xlane.f32.xlu1 %v6337_v48 }
0x263c   :  { %v6339_v42 = vpop.xlane.xlu1 %6338 }
0x263d   :  { %8486 = vrcp.f32 %v6339_v42 }
0x2647   :  { %v8487_v21 = vpop.eup %8486 }
0x2648   :  { %v6341_v49 = vmul.f32 %v8487_v21, %v8485_v10 }
0x264a   :  { %6342 = vst.msk [vmem:[#allocation33 + $0x1] sm:$0x1] %vm6066_vm2, %v6341_v49 }
0x264b   :  { %8917 = shalt.err (!%p8914_p2)
}
0x264c   :  { %s10540_s15 = sld [smem:[#allocation52_spill]] }
0x2652   :  { %s8918_s22 = scalar_lea.hbm %s10540_s15, 32 }
0x2653   :  { %p8919_p3 = scmp.ne.s32.totalorder %s10540_s15, %s8918_s22  ;;  %p8922_p4 = scmp.lt.u32.totalorder %s8918_s22, %s10540_s15 }
0x2655   :  { %p8924_p5 = pnand %p8922_p4, %p8919_p3 }
0x2657   :  { %8927 = shalt.err (!%p8924_p5)
}
0x2658   :  { %6352 = dma.vmem_to_hbm [thread:$0]  %s6350_s4, 32, %s10540_s15, [#allocation5]  }
0x2659   :  { %8948 = dma.done.wait [#allocation5], 32  }
0x265a   :  { %8949 = vsyncadd [#allocation5], 4294967264 }
0x265b   :  { %6356 = vsyncpa [#allocation4], 1 }
0x265c   :  { %6357 = vsyncpa [#allocation7], 1 }
0x265d   :  { %6358 = vsyncpa [#allocation10], 1 }
0x265e   :  { %6359 = vsyncpa [#allocation13], 1 }
0x265f   :  { %6360 = vsyncpa [#allocation16], 1 }
0x2660   :  { %6361 = vsyncpa [#allocation19], 1 }
0x2661   :  { %6362 = vsyncpa [#allocation22], 1 }
0x2662   :  { %6363 = vsyncpa [#allocation25], 1 }
0x2663   :  { %6364 = vsyncpa [#allocation28], 1 }
0x2664   :  { %6365 = vsyncpa [#allocation31], 1 }
0x2665   :  { %6366 = vsyncpa [#allocation5], 1 }

</bundles_post_ra>
